<compile_context>
chip_gen: v7x
topology: tpu7x:2x2x1
jax: 0.10.0
libtpu: 0.0.40
codegen_flags: <defaults>
</compile_context>

<pallas_src>
import functools

import jax
import jax.numpy as jnp
from jax.experimental import pallas as pl
from jax.experimental.pallas import tpu as pltpu

_H0, _W0, _C0 = 16, 16, 3
_NUM_CLASSES = 5
_FC_PAD = 128   # pad classes 5 -> 128 lanes (lane-dense store), slice back in the wrapper
_PAD = 16       # per-image halo rows in the conv staging buffers (>= W+1, multiple of 16 for bf16)


# ----------------------------------------------------------------------------
# In-kernel building blocks (activations are flattened (N*H*W, C); rows = (n, h, w)).
# ----------------------------------------------------------------------------
def _stage_bf16(y, stage_ref, *, N, HW):
    """Write a compact (N*HW, C) activation into a per-image zero-haloed bf16 buffer.

    Layout per image: [_PAD zero rows][HW body rows][_PAD zero rows]; only the halo rows are
    zeroed; the single f32->bf16 cast for the next conv happens here.
    """
    C = y.shape[-1]
    S = HW + 2 * _PAD
    zpad = jnp.zeros((_PAD, C), jnp.bfloat16)
    for n in range(N):
        stage_ref[pl.ds(n * S, _PAD), :] = zpad
        stage_ref[pl.ds(n * S + _PAD, HW), :] = y[n * HW:(n + 1) * HW, :].astype(jnp.bfloat16)
        stage_ref[pl.ds(n * S + _PAD + HW, _PAD), :] = zpad


def _conv3x3_relu(stage_ref, w_ref, b_ref, *, N, H, W):
    """3x3 stride-1 pad-1 conv + bias + ReLU as ONE fused im2col matmul.

    stage_ref: (N*(HW+2*_PAD), Cin) bf16 zero-haloed staging buffer.
    w_ref:     (9*Cin, Cout) bf16, rows ordered (kh, kw, cin).
    b_ref:     (1, Cout) f32.
    Returns (N*H*W, Cout) f32.
    """
    HW = H * W
    S = HW + 2 * _PAD
    Cin = stage_ref.shape[-1]
    # Only the w-edges still need masks (h / image boundaries read the zero halo rows).
    wcol = jax.lax.broadcasted_iota(jnp.int32, (HW, Cin), 0) & (W - 1)   # w index per row
    not_left = wcol > 0          # valid mask for dw = -1 taps
    not_right = wcol < (W - 1)   # valid mask for dw = +1 taps

    taps = []
    for kh in range(3):
        for kw in range(3):
            d = (kh - 1) * W + (kw - 1)
            per_img = []
            for n in range(N):
                t = stage_ref[pl.ds(n * S + _PAD + d, HW), :]   # (HW, Cin) bf16 shifted tap
                if kw == 0:
                    t = jnp.where(not_left, t, jnp.zeros_like(t))
                elif kw == 2:
                    t = jnp.where(not_right, t, jnp.zeros_like(t))
                per_img.append(t)
            taps.append(per_img[0] if N == 1 else jnp.concatenate(per_img, axis=0))
    slab = jnp.concatenate(taps, axis=1)                          # (N*HW, 9*Cin) bf16
    acc = jnp.dot(slab, w_ref[...], preferred_element_type=jnp.float32)
    return jnp.maximum(acc + b_ref[...], 0.0)


def _maxpool2x2(v, g_ref, r_ref, *, N, H, W):
    """MaxPool2d(2, 2) on a flattened (N*H*W, C) activation.

    Shifted neighbours are built by value slicing + zero fill (no staging buffer / no masks:
    out-of-range taps only feed anchor rows that are discarded by the stride-2 compaction).
    """
    M, C = v.shape

    def shifted(d):
        return jnp.concatenate([v[d:, :], jnp.zeros((d, C), v.dtype)], axis=0)

    m = jnp.maximum(jnp.maximum(v, shifted(1)),
                    jnp.maximum(shifted(W), shifted(W + 1)))
    # Drop odd h: view as (N*H, W, C) and take every other leading index.
    g_ref[...] = m.reshape(N * H, W, C)
    kept = g_ref[pl.ds(0, (N * H) // 2, 2), :, :]                 # (N*H/2, W, C)
    # Drop odd w: stride-2 sublane rows of the flattened survivor.
    r_ref[...] = kept.reshape((N * H // 2) * W, C)
    return r_ref[pl.ds(0, M // 4, 2), :]                          # (N*(H/2)*(W/2), C)


# ----------------------------------------------------------------------------
# Fused network kernel.
# ----------------------------------------------------------------------------
def _vgg_kernel(xcol_ref, w1_ref, b1_ref, w2_ref, b2_ref, w3_ref, b3_ref,
                w4_ref, b4_ref, wfc_ref, bfc_ref,
                logits_ref, feat_ref,
                stage2, stage3, stage4, g1, r1, g2, r2, *, N):
    # conv1 + ReLU : (N*256, 27) @ (27, 64)  -> (N,16,16,64)   (im2col built in the wrapper)
    y = jnp.dot(xcol_ref[...], w1_ref[...], preferred_element_type=jnp.float32)
    y = jnp.maximum(y + b1_ref[...], 0.0)
    # maxpool 2x2  : -> (N,8,8,64)
    y = _maxpool2x2(y, g1, r1, N=N, H=16, W=16)
    # conv2 + ReLU : -> (N,8,8,128)
    _stage_bf16(y, stage2, N=N, HW=64)
    y = _conv3x3_relu(stage2, w2_ref, b2_ref, N=N, H=8, W=8)
    # maxpool 2x2  : -> (N,4,4,128)
    y = _maxpool2x2(y, g2, r2, N=N, H=8, W=8)
    # conv3 + ReLU : -> (N,4,4,256)
    _stage_bf16(y, stage3, N=N, HW=16)
    y = _conv3x3_relu(stage3, w3_ref, b3_ref, N=N, H=4, W=4)
    # conv4 + ReLU : -> (N,4,4,256)
    _stage_bf16(y, stage4, N=N, HW=16)
    y = _conv3x3_relu(stage4, w4_ref, b4_ref, N=N, H=4, W=4)     # (N*16, 256) f32

    # AdaptiveAvgPool2d((1,1)) + Flatten: sublane-sum over the 16 spatial positions (XLU).
    feat = jnp.sum(y.reshape(N, 16, 256), axis=1) * (1.0 / 16.0)
    feat_ref[...] = feat

    # TODO(synk): nn.Dropout(0.5) is identity in eval mode; training-mode masking not implemented.
    logits_ref[...] = (jnp.dot(feat, wfc_ref[...], preferred_element_type=jnp.float32)
                       + bfc_ref[...])


def _whole(shape):
    zeros = (0,) * len(shape)
    return pl.BlockSpec(shape, lambda *_: zeros)


def _vgg_pallas(N):
    M0 = N * _H0 * _W0           # rows into conv1 (N*256)
    S2 = 8 * 8 + 2 * _PAD        # 96  rows / image in conv2 staging
    S3 = 4 * 4 + 2 * _PAD        # 48  rows / image in conv3/conv4 staging

    in_shapes = [
        (M0, 27),                       # conv1 im2col (wrapper-built, bf16)
        (27, 64), (1, 64),              # conv1
        (576, 128), (1, 128),           # conv2   (9*Cin, Cout)
        (1152, 256), (1, 256),          # conv3
        (2304, 256), (1, 256),          # conv4
        (256, _FC_PAD), (1, _FC_PAD),   # fc (class dim zero-padded to 128 lanes)
    ]

    flops = 2 * (M0 * 27 * 64 + (M0 // 4) * 576 * 128
                 + (M0 // 16) * 1152 * 256 + (M0 // 16) * 2304 * 256
                 + N * 256 * _FC_PAD)
    bytes_accessed = (M0 * 27 * 2
                      + (27 * 64 + 576 * 128 + 1152 * 256 + 2304 * 256) * 2
                      + (256 * _FC_PAD + _FC_PAD + 64 + 128 + 256 + 256) * 4
                      + N * (_FC_PAD + 256) * 4)

    return pl.pallas_call(
        functools.partial(_vgg_kernel, N=N),
        out_shape=(jax.ShapeDtypeStruct((N, _FC_PAD), jnp.float32),
                   jax.ShapeDtypeStruct((N, 256), jnp.float32)),
        in_specs=[_whole(s) for s in in_shapes],
        out_specs=(_whole((N, _FC_PAD)), _whole((N, 256))),
        scratch_shapes=[
            pltpu.VMEM((N * S2, 64), jnp.bfloat16),      # stage2: conv2 haloed input (bf16)
            pltpu.VMEM((N * S3, 128), jnp.bfloat16),     # stage3: conv3 haloed input
            pltpu.VMEM((N * S3, 256), jnp.bfloat16),     # stage4: conv4 haloed input
            pltpu.VMEM((N * 16, 16, 64), jnp.float32),   # g1: pool1 (N*H, W, C) view
            pltpu.VMEM((N * 8 * 16, 64), jnp.float32),   # r1: pool1 row compaction
            pltpu.VMEM((N * 8, 8, 128), jnp.float32),    # g2
            pltpu.VMEM((N * 4 * 8, 128), jnp.float32),   # r2
        ],
        cost_estimate=pl.CostEstimate(flops=flops, transcendentals=0,
                                      bytes_accessed=bytes_accessed),
    )


# ----------------------------------------------------------------------------
# Parameters (synthetic, deterministic — pretrained torchvision weights are not loadable here).
# ----------------------------------------------------------------------------
def init_params(key, num_classes=_NUM_CLASSES):
    def conv_init(k, cin, cout):
        kw_, kb_ = jax.random.split(k)
        std = (2.0 / (9 * cin)) ** 0.5
        w = jax.random.normal(kw_, (3, 3, cin, cout), jnp.float32) * std  # HWIO
        b = jax.random.normal(kb_, (cout,), jnp.float32) * 0.01
        return w, b

    ks = jax.random.split(key, 5)
    params = {
        "conv1": conv_init(ks[0], 3, 64),
        "conv2": conv_init(ks[1], 64, 128),
        "conv3": conv_init(ks[2], 128, 256),
        "conv4": conv_init(ks[3], 256, 256),
    }
    kw_, kb_ = jax.random.split(ks[4])
    params["fc"] = (
        jax.random.normal(kw_, (256, num_classes), jnp.float32) * (1.0 / 16.0),
        jax.random.normal(kb_, (num_classes,), jnp.float32) * 0.01,
    )
    return params


def _prep_params(params, num_classes):
    packed = []
    for name in ("conv1", "conv2", "conv3", "conv4"):
        w, b = params[name]                       # (3,3,Cin,Cout) HWIO
        cin, cout = w.shape[2], w.shape[3]
        packed.append(w.reshape(9 * cin, cout).astype(jnp.bfloat16))   # (9*Cin, Cout) bf16
        packed.append(b.reshape(1, cout).astype(jnp.float32))          # f32 epilogue
    wfc, bfc = params["fc"]
    wfc_p = jnp.zeros((256, _FC_PAD), jnp.float32).at[:, :num_classes].set(wfc)
    bfc_p = jnp.zeros((1, _FC_PAD), jnp.float32).at[0, :num_classes].set(bfc)
    packed += [wfc_p, bfc_p]
    return packed


def _im2col_conv1(x_nchw):
    """Wrapper-side im2col for conv1 only (Cin=3 -> 27 lanes, ~27 KiB): avoids 3/128-lane
    waste and K=3 matmuls in the kernel."""
    N = x_nchw.shape[0]
    x = jnp.transpose(x_nchw, (0, 2, 3, 1)).astype(jnp.float32)          # NHWC
    xp = jnp.pad(x, ((0, 0), (1, 1), (1, 1), (0, 0)))                    # (N, 18, 18, 3)
    cols = [xp[:, kh:kh + _H0, kw:kw + _W0, :] for kh in range(3) for kw in range(3)]
    return (jnp.concatenate(cols, axis=-1)
            .reshape(N * _H0 * _W0, 9 * _C0).astype(jnp.bfloat16))        # (N*256, 27)


# ----------------------------------------------------------------------------
# Forward pass (matches VGG.forward; features=True returns the (N,256,1,1) pooled feature map).
# Conv matmuls run in bf16 on the MXU -> expect ~1e-2 relative divergence vs f32 PyTorch.
# ----------------------------------------------------------------------------
def vgg_forward(params, x_nchw, features=False, num_classes=_NUM_CLASSES):
    N, C, H, W = x_nchw.shape
    if (C, H, W) != (_C0, _H0, _W0):
        raise ValueError("fused kernel is specialized to 3x16x16 inputs")
    x_col = _im2col_conv1(x_nchw)
    logits_pad, feat = _vgg_pallas(N)(x_col, *_prep_params(params, num_classes))
    if features:
        return feat[:, :, None, None]            # (N, 256, 1, 1)
    return logits_pad[:, :num_classes]           # (N, num_classes)


if __name__ == "__main__":
    key = jax.random.PRNGKey(0)
    k_param, k_x = jax.random.split(key)
    params = init_params(k_param, num_classes=_NUM_CLASSES)

    # Small NCHW input consistent with the module: (batch=2, channels=3, 16, 16)
    x = jax.random.normal(k_x, (2, 3, 16, 16), jnp.float32)

    fwd = jax.jit(functools.partial(vgg_forward, features=False))
    logits = fwd(params, x)
    jax.block_until_ready(logits)

    assert logits.shape == (2, _NUM_CLASSES), logits.shape
    assert logits.dtype == jnp.float32
    print("KERNEL_OK")
</pallas_src>

<mosaic_0001>
module attributes {stable_mosaic.version = 11 : i64} {
  func.func @_vgg_kernel(%arg0: memref<512x27xbf16, #tpu.memory_space<vmem>>, %arg1: memref<27x64xbf16, #tpu.memory_space<vmem>>, %arg2: memref<1x64xf32, #tpu.memory_space<vmem>>, %arg3: memref<576x128xbf16, #tpu.memory_space<vmem>>, %arg4: memref<1x128xf32, #tpu.memory_space<vmem>>, %arg5: memref<1152x256xbf16, #tpu.memory_space<vmem>>, %arg6: memref<1x256xf32, #tpu.memory_space<vmem>>, %arg7: memref<2304x256xbf16, #tpu.memory_space<vmem>>, %arg8: memref<1x256xf32, #tpu.memory_space<vmem>>, %arg9: memref<256x128xf32, #tpu.memory_space<vmem>>, %arg10: memref<1x128xf32, #tpu.memory_space<vmem>>, %arg11: memref<2x128xf32, #tpu.memory_space<vmem>>, %arg12: memref<2x256xf32, #tpu.memory_space<vmem>>, %arg13: memref<192x64xbf16, #tpu.memory_space<vmem>>, %arg14: memref<96x128xbf16, #tpu.memory_space<vmem>>, %arg15: memref<96x256xbf16, #tpu.memory_space<vmem>>, %arg16: memref<32x16x64xf32, #tpu.memory_space<vmem>>, %arg17: memref<256x64xf32, #tpu.memory_space<vmem>>, %arg18: memref<16x8x128xf32, #tpu.memory_space<vmem>>, %arg19: memref<64x128xf32, #tpu.memory_space<vmem>>) attributes {dimension_semantics = [], scalar_prefetch = 0 : i64, scratch_operands = 7 : i64, tpu.core_type = #tpu.core_type<tc>} {
    %c0 = arith.constant 0 : index
    %c0_0 = arith.constant 0 : index
    %0 = vector.load %arg0[%c0, %c0_0] : memref<512x27xbf16, #tpu.memory_space<vmem>>, vector<512x27xbf16>
    %c0_1 = arith.constant 0 : index
    %c0_2 = arith.constant 0 : index
    %1 = vector.load %arg1[%c0_1, %c0_2] : memref<27x64xbf16, #tpu.memory_space<vmem>>, vector<27x64xbf16>
    %cst = arith.constant dense<0.000000e+00> : vector<512x64xf32>
    %2 = tpu.matmul %0, %1, %cst {dimension_numbers = #tpu.dot_dimension_numbers<[1], [0], [0], [1], [0, 0, 1, 1], [], []>} : vector<512x27xbf16>, vector<27x64xbf16>, vector<512x64xf32> -> vector<512x64xf32>
    %c0_3 = arith.constant 0 : index
    %c0_4 = arith.constant 0 : index
    %3 = vector.load %arg2[%c0_3, %c0_4] : memref<1x64xf32, #tpu.memory_space<vmem>>, vector<1x64xf32>
    %4 = vector.broadcast %3 : vector<1x64xf32> to vector<512x64xf32>
    %5 = arith.addf %2, %4 : vector<512x64xf32>
    %cst_5 = arith.constant 0.000000e+00 : f32
    %6 = vector.broadcast %cst_5 : f32 to vector<512x64xf32>
    %7 = arith.maximumf %5, %6 : vector<512x64xf32>
    %8 = vector.extract_strided_slice %7 {offsets = [1, 0], sizes = [511, 64], strides = [1, 1]} : vector<512x64xf32> to vector<511x64xf32>
    %cst_6 = arith.constant 0.000000e+00 : f32
    %9 = vector.broadcast %cst_6 : f32 to vector<1x64xf32>
    %10 = tpu.concatenate %8, %9 in 0 : vector<511x64xf32>, vector<1x64xf32> -> vector<512x64xf32>
    %11 = arith.maximumf %7, %10 : vector<512x64xf32>
    %12 = vector.extract_strided_slice %7 {offsets = [16, 0], sizes = [496, 64], strides = [1, 1]} : vector<512x64xf32> to vector<496x64xf32>
    %cst_7 = arith.constant 0.000000e+00 : f32
    %13 = vector.broadcast %cst_7 : f32 to vector<16x64xf32>
    %14 = tpu.concatenate %12, %13 in 0 : vector<496x64xf32>, vector<16x64xf32> -> vector<512x64xf32>
    %15 = vector.extract_strided_slice %7 {offsets = [17, 0], sizes = [495, 64], strides = [1, 1]} : vector<512x64xf32> to vector<495x64xf32>
    %cst_8 = arith.constant 0.000000e+00 : f32
    %16 = vector.broadcast %cst_8 : f32 to vector<17x64xf32>
    %17 = tpu.concatenate %15, %16 in 0 : vector<495x64xf32>, vector<17x64xf32> -> vector<512x64xf32>
    %18 = arith.maximumf %14, %17 : vector<512x64xf32>
    %19 = arith.maximumf %11, %18 : vector<512x64xf32>
    %20 = vector.shape_cast %19 : vector<512x64xf32> to vector<32x16x64xf32>
    %c0_9 = arith.constant 0 : index
    %c0_10 = arith.constant 0 : index
    %c0_11 = arith.constant 0 : index
    %21 = vector.load %arg16[%c0_9, %c0_10, %c0_11] : memref<32x16x64xf32, #tpu.memory_space<vmem>>, vector<32x16x64xf32>
    tpu.vector_store %arg16[%c0_9, %c0_10, %c0_11], %20 {strides = array<i32>} : memref<32x16x64xf32, #tpu.memory_space<vmem>>, vector<32x16x64xf32>,
    %c0_12 = arith.constant 0 : index
    %c0_13 = arith.constant 0 : index
    %c0_14 = arith.constant 0 : index
    %22 = tpu.strided_load %arg16[%c0_12, %c0_13, %c0_14] {strides = array<i32: 2, 1, 1>} : memref<32x16x64xf32, #tpu.memory_space<vmem>>, vector<16x16x64xf32>
    %23 = vector.shape_cast %22 : vector<16x16x64xf32> to vector<256x64xf32>
    %c0_15 = arith.constant 0 : index
    %c0_16 = arith.constant 0 : index
    %24 = vector.load %arg17[%c0_15, %c0_16] : memref<256x64xf32, #tpu.memory_space<vmem>>, vector<256x64xf32>
    tpu.vector_store %arg17[%c0_15, %c0_16], %23 {strides = array<i32>} : memref<256x64xf32, #tpu.memory_space<vmem>>, vector<256x64xf32>,
    %c0_17 = arith.constant 0 : index
    %c0_18 = arith.constant 0 : index
    %25 = tpu.strided_load %arg17[%c0_17, %c0_18] {strides = array<i32: 2, 1>} : memref<256x64xf32, #tpu.memory_space<vmem>>, vector<128x64xf32>
    %cst_19 = arith.constant 0.000000e+00 : bf16
    %26 = vector.broadcast %cst_19 : bf16 to vector<16x64xbf16>
    %c0_20 = arith.constant 0 : index
    %c0_21 = arith.constant 0 : index
    %27 = vector.load %arg13[%c0_20, %c0_21] : memref<192x64xbf16, #tpu.memory_space<vmem>>, vector<16x64xbf16>
    tpu.vector_store %arg13[%c0_20, %c0_21], %26 {strides = array<i32>} : memref<192x64xbf16, #tpu.memory_space<vmem>>, vector<16x64xbf16>,
    %28 = vector.extract_strided_slice %25 {offsets = [0, 0], sizes = [64, 64], strides = [1, 1]} : vector<128x64xf32> to vector<64x64xf32>
    %29 = arith.truncf %28 : vector<64x64xf32> to vector<64x64xbf16>
    %c16 = arith.constant 16 : index
    %c0_22 = arith.constant 0 : index
    %30 = vector.load %arg13[%c16, %c0_22] : memref<192x64xbf16, #tpu.memory_space<vmem>>, vector<64x64xbf16>
    tpu.vector_store %arg13[%c16, %c0_22], %29 {strides = array<i32>} : memref<192x64xbf16, #tpu.memory_space<vmem>>, vector<64x64xbf16>,
    %c80 = arith.constant 80 : index
    %c0_23 = arith.constant 0 : index
    %31 = vector.load %arg13[%c80, %c0_23] : memref<192x64xbf16, #tpu.memory_space<vmem>>, vector<16x64xbf16>
    tpu.vector_store %arg13[%c80, %c0_23], %26 {strides = array<i32>} : memref<192x64xbf16, #tpu.memory_space<vmem>>, vector<16x64xbf16>,
    %c96 = arith.constant 96 : index
    %c0_24 = arith.constant 0 : index
    %32 = vector.load %arg13[%c96, %c0_24] : memref<192x64xbf16, #tpu.memory_space<vmem>>, vector<16x64xbf16>
    tpu.vector_store %arg13[%c96, %c0_24], %26 {strides = array<i32>} : memref<192x64xbf16, #tpu.memory_space<vmem>>, vector<16x64xbf16>,
    %33 = vector.extract_strided_slice %25 {offsets = [64, 0], sizes = [64, 64], strides = [1, 1]} : vector<128x64xf32> to vector<64x64xf32>
    %34 = arith.truncf %33 : vector<64x64xf32> to vector<64x64xbf16>
    %c112 = arith.constant 112 : index
    %c0_25 = arith.constant 0 : index
    %35 = vector.load %arg13[%c112, %c0_25] : memref<192x64xbf16, #tpu.memory_space<vmem>>, vector<64x64xbf16>
    tpu.vector_store %arg13[%c112, %c0_25], %34 {strides = array<i32>} : memref<192x64xbf16, #tpu.memory_space<vmem>>, vector<64x64xbf16>,
    %c176 = arith.constant 176 : index
    %c0_26 = arith.constant 0 : index
    %36 = vector.load %arg13[%c176, %c0_26] : memref<192x64xbf16, #tpu.memory_space<vmem>>, vector<16x64xbf16>
    tpu.vector_store %arg13[%c176, %c0_26], %26 {strides = array<i32>} : memref<192x64xbf16, #tpu.memory_space<vmem>>, vector<16x64xbf16>,
    %37 = tpu.iota {dimensions = array<i32: 0>} : vector<64x64xi32>
    %c7_i32 = arith.constant 7 : i32
    %38 = vector.broadcast %c7_i32 : i32 to vector<64x64xi32>
    %39 = arith.andi %37, %38 : vector<64x64xi32>
    %c0_i32 = arith.constant 0 : i32
    %40 = vector.broadcast %c0_i32 : i32 to vector<64x64xi32>
    %41 = arith.cmpi sgt, %39, %40 : vector<64x64xi32>
    %c7_i32_27 = arith.constant 7 : i32
    %42 = vector.broadcast %c7_i32_27 : i32 to vector<64x64xi32>
    %43 = arith.cmpi slt, %39, %42 : vector<64x64xi32>
    %c7 = arith.constant 7 : index
    %c0_28 = arith.constant 0 : index
    %44 = vector.load %arg13[%c7, %c0_28] : memref<192x64xbf16, #tpu.memory_space<vmem>>, vector<64x64xbf16>
    %cst_29 = arith.constant 0.000000e+00 : bf16
    %45 = vector.broadcast %cst_29 : bf16 to vector<64x64xbf16>
    %46 = arith.select %41, %44, %45 : vector<64x64xi1>, vector<64x64xbf16>
    %c103 = arith.constant 103 : index
    %c0_30 = arith.constant 0 : index
    %47 = vector.load %arg13[%c103, %c0_30] : memref<192x64xbf16, #tpu.memory_space<vmem>>, vector<64x64xbf16>
    %cst_31 = arith.constant 0.000000e+00 : bf16
    %48 = vector.broadcast %cst_31 : bf16 to vector<64x64xbf16>
    %49 = arith.select %41, %47, %48 : vector<64x64xi1>, vector<64x64xbf16>
    %50 = tpu.concatenate %46, %49 in 0 : vector<64x64xbf16>, vector<64x64xbf16> -> vector<128x64xbf16>
    %c8 = arith.constant 8 : index
    %c0_32 = arith.constant 0 : index
    %51 = vector.load %arg13[%c8, %c0_32] : memref<192x64xbf16, #tpu.memory_space<vmem>>, vector<64x64xbf16>
    %c104 = arith.constant 104 : index
    %c0_33 = arith.constant 0 : index
    %52 = vector.load %arg13[%c104, %c0_33] : memref<192x64xbf16, #tpu.memory_space<vmem>>, vector<64x64xbf16>
    %53 = tpu.concatenate %51, %52 in 0 : vector<64x64xbf16>, vector<64x64xbf16> -> vector<128x64xbf16>
    %c9 = arith.constant 9 : index
    %c0_34 = arith.constant 0 : index
    %54 = vector.load %arg13[%c9, %c0_34] : memref<192x64xbf16, #tpu.memory_space<vmem>>, vector<64x64xbf16>
    %cst_35 = arith.constant 0.000000e+00 : bf16
    %55 = vector.broadcast %cst_35 : bf16 to vector<64x64xbf16>
    %56 = arith.select %43, %54, %55 : vector<64x64xi1>, vector<64x64xbf16>
    %c105 = arith.constant 105 : index
    %c0_36 = arith.constant 0 : index
    %57 = vector.load %arg13[%c105, %c0_36] : memref<192x64xbf16, #tpu.memory_space<vmem>>, vector<64x64xbf16>
    %cst_37 = arith.constant 0.000000e+00 : bf16
    %58 = vector.broadcast %cst_37 : bf16 to vector<64x64xbf16>
    %59 = arith.select %43, %57, %58 : vector<64x64xi1>, vector<64x64xbf16>
    %60 = tpu.concatenate %56, %59 in 0 : vector<64x64xbf16>, vector<64x64xbf16> -> vector<128x64xbf16>
    %c15 = arith.constant 15 : index
    %c0_38 = arith.constant 0 : index
    %61 = vector.load %arg13[%c15, %c0_38] : memref<192x64xbf16, #tpu.memory_space<vmem>>, vector<64x64xbf16>
    %cst_39 = arith.constant 0.000000e+00 : bf16
    %62 = vector.broadcast %cst_39 : bf16 to vector<64x64xbf16>
    %63 = arith.select %41, %61, %62 : vector<64x64xi1>, vector<64x64xbf16>
    %c111 = arith.constant 111 : index
    %c0_40 = arith.constant 0 : index
    %64 = vector.load %arg13[%c111, %c0_40] : memref<192x64xbf16, #tpu.memory_space<vmem>>, vector<64x64xbf16>
    %cst_41 = arith.constant 0.000000e+00 : bf16
    %65 = vector.broadcast %cst_41 : bf16 to vector<64x64xbf16>
    %66 = arith.select %41, %64, %65 : vector<64x64xi1>, vector<64x64xbf16>
    %67 = tpu.concatenate %63, %66 in 0 : vector<64x64xbf16>, vector<64x64xbf16> -> vector<128x64xbf16>
    %c16_42 = arith.constant 16 : index
    %c0_43 = arith.constant 0 : index
    %68 = vector.load %arg13[%c16_42, %c0_43] : memref<192x64xbf16, #tpu.memory_space<vmem>>, vector<64x64xbf16>
    %c112_44 = arith.constant 112 : index
    %c0_45 = arith.constant 0 : index
    %69 = vector.load %arg13[%c112_44, %c0_45] : memref<192x64xbf16, #tpu.memory_space<vmem>>, vector<64x64xbf16>
    %70 = tpu.concatenate %68, %69 in 0 : vector<64x64xbf16>, vector<64x64xbf16> -> vector<128x64xbf16>
    %c17 = arith.constant 17 : index
    %c0_46 = arith.constant 0 : index
    %71 = vector.load %arg13[%c17, %c0_46] : memref<192x64xbf16, #tpu.memory_space<vmem>>, vector<64x64xbf16>
    %cst_47 = arith.constant 0.000000e+00 : bf16
    %72 = vector.broadcast %cst_47 : bf16 to vector<64x64xbf16>
    %73 = arith.select %43, %71, %72 : vector<64x64xi1>, vector<64x64xbf16>
    %c113 = arith.constant 113 : index
    %c0_48 = arith.constant 0 : index
    %74 = vector.load %arg13[%c113, %c0_48] : memref<192x64xbf16, #tpu.memory_space<vmem>>, vector<64x64xbf16>
    %cst_49 = arith.constant 0.000000e+00 : bf16
    %75 = vector.broadcast %cst_49 : bf16 to vector<64x64xbf16>
    %76 = arith.select %43, %74, %75 : vector<64x64xi1>, vector<64x64xbf16>
    %77 = tpu.concatenate %73, %76 in 0 : vector<64x64xbf16>, vector<64x64xbf16> -> vector<128x64xbf16>
    %c23 = arith.constant 23 : index
    %c0_50 = arith.constant 0 : index
    %78 = vector.load %arg13[%c23, %c0_50] : memref<192x64xbf16, #tpu.memory_space<vmem>>, vector<64x64xbf16>
    %cst_51 = arith.constant 0.000000e+00 : bf16
    %79 = vector.broadcast %cst_51 : bf16 to vector<64x64xbf16>
    %80 = arith.select %41, %78, %79 : vector<64x64xi1>, vector<64x64xbf16>
    %c119 = arith.constant 119 : index
    %c0_52 = arith.constant 0 : index
    %81 = vector.load %arg13[%c119, %c0_52] : memref<192x64xbf16, #tpu.memory_space<vmem>>, vector<64x64xbf16>
    %cst_53 = arith.constant 0.000000e+00 : bf16
    %82 = vector.broadcast %cst_53 : bf16 to vector<64x64xbf16>
    %83 = arith.select %41, %81, %82 : vector<64x64xi1>, vector<64x64xbf16>
    %84 = tpu.concatenate %80, %83 in 0 : vector<64x64xbf16>, vector<64x64xbf16> -> vector<128x64xbf16>
    %c24 = arith.constant 24 : index
    %c0_54 = arith.constant 0 : index
    %85 = vector.load %arg13[%c24, %c0_54] : memref<192x64xbf16, #tpu.memory_space<vmem>>, vector<64x64xbf16>
    %c120 = arith.constant 120 : index
    %c0_55 = arith.constant 0 : index
    %86 = vector.load %arg13[%c120, %c0_55] : memref<192x64xbf16, #tpu.memory_space<vmem>>, vector<64x64xbf16>
    %87 = tpu.concatenate %85, %86 in 0 : vector<64x64xbf16>, vector<64x64xbf16> -> vector<128x64xbf16>
    %c25 = arith.constant 25 : index
    %c0_56 = arith.constant 0 : index
    %88 = vector.load %arg13[%c25, %c0_56] : memref<192x64xbf16, #tpu.memory_space<vmem>>, vector<64x64xbf16>
    %cst_57 = arith.constant 0.000000e+00 : bf16
    %89 = vector.broadcast %cst_57 : bf16 to vector<64x64xbf16>
    %90 = arith.select %43, %88, %89 : vector<64x64xi1>, vector<64x64xbf16>
    %c121 = arith.constant 121 : index
    %c0_58 = arith.constant 0 : index
    %91 = vector.load %arg13[%c121, %c0_58] : memref<192x64xbf16, #tpu.memory_space<vmem>>, vector<64x64xbf16>
    %cst_59 = arith.constant 0.000000e+00 : bf16
    %92 = vector.broadcast %cst_59 : bf16 to vector<64x64xbf16>
    %93 = arith.select %43, %91, %92 : vector<64x64xi1>, vector<64x64xbf16>
    %94 = tpu.concatenate %90, %93 in 0 : vector<64x64xbf16>, vector<64x64xbf16> -> vector<128x64xbf16>
    %95 = tpu.concatenate %50, %53, %60, %67, %70, %77, %84, %87, %94 in 1 : vector<128x64xbf16>, vector<128x64xbf16>, vector<128x64xbf16>, vector<128x64xbf16>, vector<128x64xbf16>, vector<128x64xbf16>, vector<128x64xbf16>, vector<128x64xbf16>, vector<128x64xbf16> -> vector<128x576xbf16>
    %c0_60 = arith.constant 0 : index
    %c0_61 = arith.constant 0 : index
    %96 = vector.load %arg3[%c0_60, %c0_61] : memref<576x128xbf16, #tpu.memory_space<vmem>>, vector<576x128xbf16>
    %cst_62 = arith.constant dense<0.000000e+00> : vector<128x128xf32>
    %97 = tpu.matmul %95, %96, %cst_62 {dimension_numbers = #tpu.dot_dimension_numbers<[1], [0], [0], [1], [0, 0, 1, 1], [], []>} : vector<128x576xbf16>, vector<576x128xbf16>, vector<128x128xf32> -> vector<128x128xf32>
    %c0_63 = arith.constant 0 : index
    %c0_64 = arith.constant 0 : index
    %98 = vector.load %arg4[%c0_63, %c0_64] : memref<1x128xf32, #tpu.memory_space<vmem>>, vector<1x128xf32>
    %99 = vector.broadcast %98 : vector<1x128xf32> to vector<128x128xf32>
    %100 = arith.addf %97, %99 : vector<128x128xf32>
    %cst_65 = arith.constant 0.000000e+00 : f32
    %101 = vector.broadcast %cst_65 : f32 to vector<128x128xf32>
    %102 = arith.maximumf %100, %101 : vector<128x128xf32>
    %103 = vector.extract_strided_slice %102 {offsets = [1, 0], sizes = [127, 128], strides = [1, 1]} : vector<128x128xf32> to vector<127x128xf32>
    %cst_66 = arith.constant 0.000000e+00 : f32
    %104 = vector.broadcast %cst_66 : f32 to vector<1x128xf32>
    %105 = tpu.concatenate %103, %104 in 0 : vector<127x128xf32>, vector<1x128xf32> -> vector<128x128xf32>
    %106 = arith.maximumf %102, %105 : vector<128x128xf32>
    %107 = vector.extract_strided_slice %102 {offsets = [8, 0], sizes = [120, 128], strides = [1, 1]} : vector<128x128xf32> to vector<120x128xf32>
    %cst_67 = arith.constant 0.000000e+00 : f32
    %108 = vector.broadcast %cst_67 : f32 to vector<8x128xf32>
    %109 = tpu.concatenate %107, %108 in 0 : vector<120x128xf32>, vector<8x128xf32> -> vector<128x128xf32>
    %110 = vector.extract_strided_slice %102 {offsets = [9, 0], sizes = [119, 128], strides = [1, 1]} : vector<128x128xf32> to vector<119x128xf32>
    %cst_68 = arith.constant 0.000000e+00 : f32
    %111 = vector.broadcast %cst_68 : f32 to vector<9x128xf32>
    %112 = tpu.concatenate %110, %111 in 0 : vector<119x128xf32>, vector<9x128xf32> -> vector<128x128xf32>
    %113 = arith.maximumf %109, %112 : vector<128x128xf32>
    %114 = arith.maximumf %106, %113 : vector<128x128xf32>
    %115 = vector.shape_cast %114 : vector<128x128xf32> to vector<16x8x128xf32>
    %c0_69 = arith.constant 0 : index
    %c0_70 = arith.constant 0 : index
    %c0_71 = arith.constant 0 : index
    %116 = vector.load %arg18[%c0_69, %c0_70, %c0_71] : memref<16x8x128xf32, #tpu.memory_space<vmem>>, vector<16x8x128xf32>
    tpu.vector_store %arg18[%c0_69, %c0_70, %c0_71], %115 {strides = array<i32>} : memref<16x8x128xf32, #tpu.memory_space<vmem>>, vector<16x8x128xf32>,
    %c0_72 = arith.constant 0 : index
    %c0_73 = arith.constant 0 : index
    %c0_74 = arith.constant 0 : index
    %117 = tpu.strided_load %arg18[%c0_72, %c0_73, %c0_74] {strides = array<i32: 2, 1, 1>} : memref<16x8x128xf32, #tpu.memory_space<vmem>>, vector<8x8x128xf32>
    %118 = vector.shape_cast %117 : vector<8x8x128xf32> to vector<64x128xf32>
    %c0_75 = arith.constant 0 : index
    %c0_76 = arith.constant 0 : index
    %119 = vector.load %arg19[%c0_75, %c0_76] : memref<64x128xf32, #tpu.memory_space<vmem>>, vector<64x128xf32>
    tpu.vector_store %arg19[%c0_75, %c0_76], %118 {strides = array<i32>} : memref<64x128xf32, #tpu.memory_space<vmem>>, vector<64x128xf32>,
    %c0_77 = arith.constant 0 : index
    %c0_78 = arith.constant 0 : index
    %120 = tpu.strided_load %arg19[%c0_77, %c0_78] {strides = array<i32: 2, 1>} : memref<64x128xf32, #tpu.memory_space<vmem>>, vector<32x128xf32>
    %cst_79 = arith.constant 0.000000e+00 : bf16
    %121 = vector.broadcast %cst_79 : bf16 to vector<16x128xbf16>
    %c0_80 = arith.constant 0 : index
    %c0_81 = arith.constant 0 : index
    %122 = vector.load %arg14[%c0_80, %c0_81] : memref<96x128xbf16, #tpu.memory_space<vmem>>, vector<16x128xbf16>
    tpu.vector_store %arg14[%c0_80, %c0_81], %121 {strides = array<i32>} : memref<96x128xbf16, #tpu.memory_space<vmem>>, vector<16x128xbf16>,
    %123 = vector.extract_strided_slice %120 {offsets = [0, 0], sizes = [16, 128], strides = [1, 1]} : vector<32x128xf32> to vector<16x128xf32>
    %124 = arith.truncf %123 : vector<16x128xf32> to vector<16x128xbf16>
    %c16_82 = arith.constant 16 : index
    %c0_83 = arith.constant 0 : index
    %125 = vector.load %arg14[%c16_82, %c0_83] : memref<96x128xbf16, #tpu.memory_space<vmem>>, vector<16x128xbf16>
    tpu.vector_store %arg14[%c16_82, %c0_83], %124 {strides = array<i32>} : memref<96x128xbf16, #tpu.memory_space<vmem>>, vector<16x128xbf16>,
    %c32 = arith.constant 32 : index
    %c0_84 = arith.constant 0 : index
    %126 = vector.load %arg14[%c32, %c0_84] : memref<96x128xbf16, #tpu.memory_space<vmem>>, vector<16x128xbf16>
    tpu.vector_store %arg14[%c32, %c0_84], %121 {strides = array<i32>} : memref<96x128xbf16, #tpu.memory_space<vmem>>, vector<16x128xbf16>,
    %c48 = arith.constant 48 : index
    %c0_85 = arith.constant 0 : index
    %127 = vector.load %arg14[%c48, %c0_85] : memref<96x128xbf16, #tpu.memory_space<vmem>>, vector<16x128xbf16>
    tpu.vector_store %arg14[%c48, %c0_85], %121 {strides = array<i32>} : memref<96x128xbf16, #tpu.memory_space<vmem>>, vector<16x128xbf16>,
    %128 = vector.extract_strided_slice %120 {offsets = [16, 0], sizes = [16, 128], strides = [1, 1]} : vector<32x128xf32> to vector<16x128xf32>
    %129 = arith.truncf %128 : vector<16x128xf32> to vector<16x128xbf16>
    %c64 = arith.constant 64 : index
    %c0_86 = arith.constant 0 : index
    %130 = vector.load %arg14[%c64, %c0_86] : memref<96x128xbf16, #tpu.memory_space<vmem>>, vector<16x128xbf16>
    tpu.vector_store %arg14[%c64, %c0_86], %129 {strides = array<i32>} : memref<96x128xbf16, #tpu.memory_space<vmem>>, vector<16x128xbf16>,
    %c80_87 = arith.constant 80 : index
    %c0_88 = arith.constant 0 : index
    %131 = vector.load %arg14[%c80_87, %c0_88] : memref<96x128xbf16, #tpu.memory_space<vmem>>, vector<16x128xbf16>
    tpu.vector_store %arg14[%c80_87, %c0_88], %121 {strides = array<i32>} : memref<96x128xbf16, #tpu.memory_space<vmem>>, vector<16x128xbf16>,
    %132 = tpu.iota {dimensions = array<i32: 0>} : vector<16x128xi32>
    %c3_i32 = arith.constant 3 : i32
    %133 = vector.broadcast %c3_i32 : i32 to vector<16x128xi32>
    %134 = arith.andi %132, %133 : vector<16x128xi32>
    %c0_i32_89 = arith.constant 0 : i32
    %135 = vector.broadcast %c0_i32_89 : i32 to vector<16x128xi32>
    %136 = arith.cmpi sgt, %134, %135 : vector<16x128xi32>
    %c3_i32_90 = arith.constant 3 : i32
    %137 = vector.broadcast %c3_i32_90 : i32 to vector<16x128xi32>
    %138 = arith.cmpi slt, %134, %137 : vector<16x128xi32>
    %c11 = arith.constant 11 : index
    %c0_91 = arith.constant 0 : index
    %139 = vector.load %arg14[%c11, %c0_91] : memref<96x128xbf16, #tpu.memory_space<vmem>>, vector<16x128xbf16>
    %cst_92 = arith.constant 0.000000e+00 : bf16
    %140 = vector.broadcast %cst_92 : bf16 to vector<16x128xbf16>
    %141 = arith.select %136, %139, %140 : vector<16x128xi1>, vector<16x128xbf16>
    %c59 = arith.constant 59 : index
    %c0_93 = arith.constant 0 : index
    %142 = vector.load %arg14[%c59, %c0_93] : memref<96x128xbf16, #tpu.memory_space<vmem>>, vector<16x128xbf16>
    %cst_94 = arith.constant 0.000000e+00 : bf16
    %143 = vector.broadcast %cst_94 : bf16 to vector<16x128xbf16>
    %144 = arith.select %136, %142, %143 : vector<16x128xi1>, vector<16x128xbf16>
    %145 = tpu.concatenate %141, %144 in 0 : vector<16x128xbf16>, vector<16x128xbf16> -> vector<32x128xbf16>
    %c12 = arith.constant 12 : index
    %c0_95 = arith.constant 0 : index
    %146 = vector.load %arg14[%c12, %c0_95] : memref<96x128xbf16, #tpu.memory_space<vmem>>, vector<16x128xbf16>
    %c60 = arith.constant 60 : index
    %c0_96 = arith.constant 0 : index
    %147 = vector.load %arg14[%c60, %c0_96] : memref<96x128xbf16, #tpu.memory_space<vmem>>, vector<16x128xbf16>
    %148 = tpu.concatenate %146, %147 in 0 : vector<16x128xbf16>, vector<16x128xbf16> -> vector<32x128xbf16>
    %c13 = arith.constant 13 : index
    %c0_97 = arith.constant 0 : index
    %149 = vector.load %arg14[%c13, %c0_97] : memref<96x128xbf16, #tpu.memory_space<vmem>>, vector<16x128xbf16>
    %cst_98 = arith.constant 0.000000e+00 : bf16
    %150 = vector.broadcast %cst_98 : bf16 to vector<16x128xbf16>
    %151 = arith.select %138, %149, %150 : vector<16x128xi1>, vector<16x128xbf16>
    %c61 = arith.constant 61 : index
    %c0_99 = arith.constant 0 : index
    %152 = vector.load %arg14[%c61, %c0_99] : memref<96x128xbf16, #tpu.memory_space<vmem>>, vector<16x128xbf16>
    %cst_100 = arith.constant 0.000000e+00 : bf16
    %153 = vector.broadcast %cst_100 : bf16 to vector<16x128xbf16>
    %154 = arith.select %138, %152, %153 : vector<16x128xi1>, vector<16x128xbf16>
    %155 = tpu.concatenate %151, %154 in 0 : vector<16x128xbf16>, vector<16x128xbf16> -> vector<32x128xbf16>
    %c15_101 = arith.constant 15 : index
    %c0_102 = arith.constant 0 : index
    %156 = vector.load %arg14[%c15_101, %c0_102] : memref<96x128xbf16, #tpu.memory_space<vmem>>, vector<16x128xbf16>
    %cst_103 = arith.constant 0.000000e+00 : bf16
    %157 = vector.broadcast %cst_103 : bf16 to vector<16x128xbf16>
    %158 = arith.select %136, %156, %157 : vector<16x128xi1>, vector<16x128xbf16>
    %c63 = arith.constant 63 : index
    %c0_104 = arith.constant 0 : index
    %159 = vector.load %arg14[%c63, %c0_104] : memref<96x128xbf16, #tpu.memory_space<vmem>>, vector<16x128xbf16>
    %cst_105 = arith.constant 0.000000e+00 : bf16
    %160 = vector.broadcast %cst_105 : bf16 to vector<16x128xbf16>
    %161 = arith.select %136, %159, %160 : vector<16x128xi1>, vector<16x128xbf16>
    %162 = tpu.concatenate %158, %161 in 0 : vector<16x128xbf16>, vector<16x128xbf16> -> vector<32x128xbf16>
    %c16_106 = arith.constant 16 : index
    %c0_107 = arith.constant 0 : index
    %163 = vector.load %arg14[%c16_106, %c0_107] : memref<96x128xbf16, #tpu.memory_space<vmem>>, vector<16x128xbf16>
    %c64_108 = arith.constant 64 : index
    %c0_109 = arith.constant 0 : index
    %164 = vector.load %arg14[%c64_108, %c0_109] : memref<96x128xbf16, #tpu.memory_space<vmem>>, vector<16x128xbf16>
    %165 = tpu.concatenate %163, %164 in 0 : vector<16x128xbf16>, vector<16x128xbf16> -> vector<32x128xbf16>
    %c17_110 = arith.constant 17 : index
    %c0_111 = arith.constant 0 : index
    %166 = vector.load %arg14[%c17_110, %c0_111] : memref<96x128xbf16, #tpu.memory_space<vmem>>, vector<16x128xbf16>
    %cst_112 = arith.constant 0.000000e+00 : bf16
    %167 = vector.broadcast %cst_112 : bf16 to vector<16x128xbf16>
    %168 = arith.select %138, %166, %167 : vector<16x128xi1>, vector<16x128xbf16>
    %c65 = arith.constant 65 : index
    %c0_113 = arith.constant 0 : index
    %169 = vector.load %arg14[%c65, %c0_113] : memref<96x128xbf16, #tpu.memory_space<vmem>>, vector<16x128xbf16>
    %cst_114 = arith.constant 0.000000e+00 : bf16
    %170 = vector.broadcast %cst_114 : bf16 to vector<16x128xbf16>
    %171 = arith.select %138, %169, %170 : vector<16x128xi1>, vector<16x128xbf16>
    %172 = tpu.concatenate %168, %171 in 0 : vector<16x128xbf16>, vector<16x128xbf16> -> vector<32x128xbf16>
    %c19 = arith.constant 19 : index
    %c0_115 = arith.constant 0 : index
    %173 = vector.load %arg14[%c19, %c0_115] : memref<96x128xbf16, #tpu.memory_space<vmem>>, vector<16x128xbf16>
    %cst_116 = arith.constant 0.000000e+00 : bf16
    %174 = vector.broadcast %cst_116 : bf16 to vector<16x128xbf16>
    %175 = arith.select %136, %173, %174 : vector<16x128xi1>, vector<16x128xbf16>
    %c67 = arith.constant 67 : index
    %c0_117 = arith.constant 0 : index
    %176 = vector.load %arg14[%c67, %c0_117] : memref<96x128xbf16, #tpu.memory_space<vmem>>, vector<16x128xbf16>
    %cst_118 = arith.constant 0.000000e+00 : bf16
    %177 = vector.broadcast %cst_118 : bf16 to vector<16x128xbf16>
    %178 = arith.select %136, %176, %177 : vector<16x128xi1>, vector<16x128xbf16>
    %179 = tpu.concatenate %175, %178 in 0 : vector<16x128xbf16>, vector<16x128xbf16> -> vector<32x128xbf16>
    %c20 = arith.constant 20 : index
    %c0_119 = arith.constant 0 : index
    %180 = vector.load %arg14[%c20, %c0_119] : memref<96x128xbf16, #tpu.memory_space<vmem>>, vector<16x128xbf16>
    %c68 = arith.constant 68 : index
    %c0_120 = arith.constant 0 : index
    %181 = vector.load %arg14[%c68, %c0_120] : memref<96x128xbf16, #tpu.memory_space<vmem>>, vector<16x128xbf16>
    %182 = tpu.concatenate %180, %181 in 0 : vector<16x128xbf16>, vector<16x128xbf16> -> vector<32x128xbf16>
    %c21 = arith.constant 21 : index
    %c0_121 = arith.constant 0 : index
    %183 = vector.load %arg14[%c21, %c0_121] : memref<96x128xbf16, #tpu.memory_space<vmem>>, vector<16x128xbf16>
    %cst_122 = arith.constant 0.000000e+00 : bf16
    %184 = vector.broadcast %cst_122 : bf16 to vector<16x128xbf16>
    %185 = arith.select %138, %183, %184 : vector<16x128xi1>, vector<16x128xbf16>
    %c69 = arith.constant 69 : index
    %c0_123 = arith.constant 0 : index
    %186 = vector.load %arg14[%c69, %c0_123] : memref<96x128xbf16, #tpu.memory_space<vmem>>, vector<16x128xbf16>
    %cst_124 = arith.constant 0.000000e+00 : bf16
    %187 = vector.broadcast %cst_124 : bf16 to vector<16x128xbf16>
    %188 = arith.select %138, %186, %187 : vector<16x128xi1>, vector<16x128xbf16>
    %189 = tpu.concatenate %185, %188 in 0 : vector<16x128xbf16>, vector<16x128xbf16> -> vector<32x128xbf16>
    %190 = tpu.concatenate %145, %148, %155, %162, %165, %172, %179, %182, %189 in 1 : vector<32x128xbf16>, vector<32x128xbf16>, vector<32x128xbf16>, vector<32x128xbf16>, vector<32x128xbf16>, vector<32x128xbf16>, vector<32x128xbf16>, vector<32x128xbf16>, vector<32x128xbf16> -> vector<32x1152xbf16>
    %c0_125 = arith.constant 0 : index
    %c0_126 = arith.constant 0 : index
    %191 = vector.load %arg5[%c0_125, %c0_126] : memref<1152x256xbf16, #tpu.memory_space<vmem>>, vector<1152x256xbf16>
    %cst_127 = arith.constant dense<0.000000e+00> : vector<32x256xf32>
    %192 = tpu.matmul %190, %191, %cst_127 {dimension_numbers = #tpu.dot_dimension_numbers<[1], [0], [0], [1], [0, 0, 1, 1], [], []>} : vector<32x1152xbf16>, vector<1152x256xbf16>, vector<32x256xf32> -> vector<32x256xf32>
    %c0_128 = arith.constant 0 : index
    %c0_129 = arith.constant 0 : index
    %193 = vector.load %arg6[%c0_128, %c0_129] : memref<1x256xf32, #tpu.memory_space<vmem>>, vector<1x256xf32>
    %194 = vector.broadcast %193 : vector<1x256xf32> to vector<32x256xf32>
    %195 = arith.addf %192, %194 : vector<32x256xf32>
    %cst_130 = arith.constant 0.000000e+00 : f32
    %196 = vector.broadcast %cst_130 : f32 to vector<32x256xf32>
    %197 = arith.maximumf %195, %196 : vector<32x256xf32>
    %cst_131 = arith.constant 0.000000e+00 : bf16
    %198 = vector.broadcast %cst_131 : bf16 to vector<16x256xbf16>
    %c0_132 = arith.constant 0 : index
    %c0_133 = arith.constant 0 : index
    %199 = vector.load %arg15[%c0_132, %c0_133] : memref<96x256xbf16, #tpu.memory_space<vmem>>, vector<16x256xbf16>
    tpu.vector_store %arg15[%c0_132, %c0_133], %198 {strides = array<i32>} : memref<96x256xbf16, #tpu.memory_space<vmem>>, vector<16x256xbf16>,
    %200 = vector.extract_strided_slice %197 {offsets = [0, 0], sizes = [16, 256], strides = [1, 1]} : vector<32x256xf32> to vector<16x256xf32>
    %201 = arith.truncf %200 : vector<16x256xf32> to vector<16x256xbf16>
    %c16_134 = arith.constant 16 : index
    %c0_135 = arith.constant 0 : index
    %202 = vector.load %arg15[%c16_134, %c0_135] : memref<96x256xbf16, #tpu.memory_space<vmem>>, vector<16x256xbf16>
    tpu.vector_store %arg15[%c16_134, %c0_135], %201 {strides = array<i32>} : memref<96x256xbf16, #tpu.memory_space<vmem>>, vector<16x256xbf16>,
    %c32_136 = arith.constant 32 : index
    %c0_137 = arith.constant 0 : index
    %203 = vector.load %arg15[%c32_136, %c0_137] : memref<96x256xbf16, #tpu.memory_space<vmem>>, vector<16x256xbf16>
    tpu.vector_store %arg15[%c32_136, %c0_137], %198 {strides = array<i32>} : memref<96x256xbf16, #tpu.memory_space<vmem>>, vector<16x256xbf16>,
    %c48_138 = arith.constant 48 : index
    %c0_139 = arith.constant 0 : index
    %204 = vector.load %arg15[%c48_138, %c0_139] : memref<96x256xbf16, #tpu.memory_space<vmem>>, vector<16x256xbf16>
    tpu.vector_store %arg15[%c48_138, %c0_139], %198 {strides = array<i32>} : memref<96x256xbf16, #tpu.memory_space<vmem>>, vector<16x256xbf16>,
    %205 = vector.extract_strided_slice %197 {offsets = [16, 0], sizes = [16, 256], strides = [1, 1]} : vector<32x256xf32> to vector<16x256xf32>
    %206 = arith.truncf %205 : vector<16x256xf32> to vector<16x256xbf16>
    %c64_140 = arith.constant 64 : index
    %c0_141 = arith.constant 0 : index
    %207 = vector.load %arg15[%c64_140, %c0_141] : memref<96x256xbf16, #tpu.memory_space<vmem>>, vector<16x256xbf16>
    tpu.vector_store %arg15[%c64_140, %c0_141], %206 {strides = array<i32>} : memref<96x256xbf16, #tpu.memory_space<vmem>>, vector<16x256xbf16>,
    %c80_142 = arith.constant 80 : index
    %c0_143 = arith.constant 0 : index
    %208 = vector.load %arg15[%c80_142, %c0_143] : memref<96x256xbf16, #tpu.memory_space<vmem>>, vector<16x256xbf16>
    tpu.vector_store %arg15[%c80_142, %c0_143], %198 {strides = array<i32>} : memref<96x256xbf16, #tpu.memory_space<vmem>>, vector<16x256xbf16>,
    %209 = tpu.iota {dimensions = array<i32: 0>} : vector<16x256xi32>
    %c3_i32_144 = arith.constant 3 : i32
    %210 = vector.broadcast %c3_i32_144 : i32 to vector<16x256xi32>
    %211 = arith.andi %209, %210 : vector<16x256xi32>
    %c0_i32_145 = arith.constant 0 : i32
    %212 = vector.broadcast %c0_i32_145 : i32 to vector<16x256xi32>
    %213 = arith.cmpi sgt, %211, %212 : vector<16x256xi32>
    %c3_i32_146 = arith.constant 3 : i32
    %214 = vector.broadcast %c3_i32_146 : i32 to vector<16x256xi32>
    %215 = arith.cmpi slt, %211, %214 : vector<16x256xi32>
    %c11_147 = arith.constant 11 : index
    %c0_148 = arith.constant 0 : index
    %216 = vector.load %arg15[%c11_147, %c0_148] : memref<96x256xbf16, #tpu.memory_space<vmem>>, vector<16x256xbf16>
    %cst_149 = arith.constant 0.000000e+00 : bf16
    %217 = vector.broadcast %cst_149 : bf16 to vector<16x256xbf16>
    %218 = arith.select %213, %216, %217 : vector<16x256xi1>, vector<16x256xbf16>
    %c59_150 = arith.constant 59 : index
    %c0_151 = arith.constant 0 : index
    %219 = vector.load %arg15[%c59_150, %c0_151] : memref<96x256xbf16, #tpu.memory_space<vmem>>, vector<16x256xbf16>
    %cst_152 = arith.constant 0.000000e+00 : bf16
    %220 = vector.broadcast %cst_152 : bf16 to vector<16x256xbf16>
    %221 = arith.select %213, %219, %220 : vector<16x256xi1>, vector<16x256xbf16>
    %222 = tpu.concatenate %218, %221 in 0 : vector<16x256xbf16>, vector<16x256xbf16> -> vector<32x256xbf16>
    %c12_153 = arith.constant 12 : index
    %c0_154 = arith.constant 0 : index
    %223 = vector.load %arg15[%c12_153, %c0_154] : memref<96x256xbf16, #tpu.memory_space<vmem>>, vector<16x256xbf16>
    %c60_155 = arith.constant 60 : index
    %c0_156 = arith.constant 0 : index
    %224 = vector.load %arg15[%c60_155, %c0_156] : memref<96x256xbf16, #tpu.memory_space<vmem>>, vector<16x256xbf16>
    %225 = tpu.concatenate %223, %224 in 0 : vector<16x256xbf16>, vector<16x256xbf16> -> vector<32x256xbf16>
    %c13_157 = arith.constant 13 : index
    %c0_158 = arith.constant 0 : index
    %226 = vector.load %arg15[%c13_157, %c0_158] : memref<96x256xbf16, #tpu.memory_space<vmem>>, vector<16x256xbf16>
    %cst_159 = arith.constant 0.000000e+00 : bf16
    %227 = vector.broadcast %cst_159 : bf16 to vector<16x256xbf16>
    %228 = arith.select %215, %226, %227 : vector<16x256xi1>, vector<16x256xbf16>
    %c61_160 = arith.constant 61 : index
    %c0_161 = arith.constant 0 : index
    %229 = vector.load %arg15[%c61_160, %c0_161] : memref<96x256xbf16, #tpu.memory_space<vmem>>, vector<16x256xbf16>
    %cst_162 = arith.constant 0.000000e+00 : bf16
    %230 = vector.broadcast %cst_162 : bf16 to vector<16x256xbf16>
    %231 = arith.select %215, %229, %230 : vector<16x256xi1>, vector<16x256xbf16>
    %232 = tpu.concatenate %228, %231 in 0 : vector<16x256xbf16>, vector<16x256xbf16> -> vector<32x256xbf16>
    %c15_163 = arith.constant 15 : index
    %c0_164 = arith.constant 0 : index
    %233 = vector.load %arg15[%c15_163, %c0_164] : memref<96x256xbf16, #tpu.memory_space<vmem>>, vector<16x256xbf16>
    %cst_165 = arith.constant 0.000000e+00 : bf16
    %234 = vector.broadcast %cst_165 : bf16 to vector<16x256xbf16>
    %235 = arith.select %213, %233, %234 : vector<16x256xi1>, vector<16x256xbf16>
    %c63_166 = arith.constant 63 : index
    %c0_167 = arith.constant 0 : index
    %236 = vector.load %arg15[%c63_166, %c0_167] : memref<96x256xbf16, #tpu.memory_space<vmem>>, vector<16x256xbf16>
    %cst_168 = arith.constant 0.000000e+00 : bf16
    %237 = vector.broadcast %cst_168 : bf16 to vector<16x256xbf16>
    %238 = arith.select %213, %236, %237 : vector<16x256xi1>, vector<16x256xbf16>
    %239 = tpu.concatenate %235, %238 in 0 : vector<16x256xbf16>, vector<16x256xbf16> -> vector<32x256xbf16>
    %c16_169 = arith.constant 16 : index
    %c0_170 = arith.constant 0 : index
    %240 = vector.load %arg15[%c16_169, %c0_170] : memref<96x256xbf16, #tpu.memory_space<vmem>>, vector<16x256xbf16>
    %c64_171 = arith.constant 64 : index
    %c0_172 = arith.constant 0 : index
    %241 = vector.load %arg15[%c64_171, %c0_172] : memref<96x256xbf16, #tpu.memory_space<vmem>>, vector<16x256xbf16>
    %242 = tpu.concatenate %240, %241 in 0 : vector<16x256xbf16>, vector<16x256xbf16> -> vector<32x256xbf16>
    %c17_173 = arith.constant 17 : index
    %c0_174 = arith.constant 0 : index
    %243 = vector.load %arg15[%c17_173, %c0_174] : memref<96x256xbf16, #tpu.memory_space<vmem>>, vector<16x256xbf16>
    %cst_175 = arith.constant 0.000000e+00 : bf16
    %244 = vector.broadcast %cst_175 : bf16 to vector<16x256xbf16>
    %245 = arith.select %215, %243, %244 : vector<16x256xi1>, vector<16x256xbf16>
    %c65_176 = arith.constant 65 : index
    %c0_177 = arith.constant 0 : index
    %246 = vector.load %arg15[%c65_176, %c0_177] : memref<96x256xbf16, #tpu.memory_space<vmem>>, vector<16x256xbf16>
    %cst_178 = arith.constant 0.000000e+00 : bf16
    %247 = vector.broadcast %cst_178 : bf16 to vector<16x256xbf16>
    %248 = arith.select %215, %246, %247 : vector<16x256xi1>, vector<16x256xbf16>
    %249 = tpu.concatenate %245, %248 in 0 : vector<16x256xbf16>, vector<16x256xbf16> -> vector<32x256xbf16>
    %c19_179 = arith.constant 19 : index
    %c0_180 = arith.constant 0 : index
    %250 = vector.load %arg15[%c19_179, %c0_180] : memref<96x256xbf16, #tpu.memory_space<vmem>>, vector<16x256xbf16>
    %cst_181 = arith.constant 0.000000e+00 : bf16
    %251 = vector.broadcast %cst_181 : bf16 to vector<16x256xbf16>
    %252 = arith.select %213, %250, %251 : vector<16x256xi1>, vector<16x256xbf16>
    %c67_182 = arith.constant 67 : index
    %c0_183 = arith.constant 0 : index
    %253 = vector.load %arg15[%c67_182, %c0_183] : memref<96x256xbf16, #tpu.memory_space<vmem>>, vector<16x256xbf16>
    %cst_184 = arith.constant 0.000000e+00 : bf16
    %254 = vector.broadcast %cst_184 : bf16 to vector<16x256xbf16>
    %255 = arith.select %213, %253, %254 : vector<16x256xi1>, vector<16x256xbf16>
    %256 = tpu.concatenate %252, %255 in 0 : vector<16x256xbf16>, vector<16x256xbf16> -> vector<32x256xbf16>
    %c20_185 = arith.constant 20 : index
    %c0_186 = arith.constant 0 : index
    %257 = vector.load %arg15[%c20_185, %c0_186] : memref<96x256xbf16, #tpu.memory_space<vmem>>, vector<16x256xbf16>
    %c68_187 = arith.constant 68 : index
    %c0_188 = arith.constant 0 : index
    %258 = vector.load %arg15[%c68_187, %c0_188] : memref<96x256xbf16, #tpu.memory_space<vmem>>, vector<16x256xbf16>
    %259 = tpu.concatenate %257, %258 in 0 : vector<16x256xbf16>, vector<16x256xbf16> -> vector<32x256xbf16>
    %c21_189 = arith.constant 21 : index
    %c0_190 = arith.constant 0 : index
    %260 = vector.load %arg15[%c21_189, %c0_190] : memref<96x256xbf16, #tpu.memory_space<vmem>>, vector<16x256xbf16>
    %cst_191 = arith.constant 0.000000e+00 : bf16
    %261 = vector.broadcast %cst_191 : bf16 to vector<16x256xbf16>
    %262 = arith.select %215, %260, %261 : vector<16x256xi1>, vector<16x256xbf16>
    %c69_192 = arith.constant 69 : index
    %c0_193 = arith.constant 0 : index
    %263 = vector.load %arg15[%c69_192, %c0_193] : memref<96x256xbf16, #tpu.memory_space<vmem>>, vector<16x256xbf16>
    %cst_194 = arith.constant 0.000000e+00 : bf16
    %264 = vector.broadcast %cst_194 : bf16 to vector<16x256xbf16>
    %265 = arith.select %215, %263, %264 : vector<16x256xi1>, vector<16x256xbf16>
    %266 = tpu.concatenate %262, %265 in 0 : vector<16x256xbf16>, vector<16x256xbf16> -> vector<32x256xbf16>
    %267 = tpu.concatenate %222, %225, %232, %239, %242, %249, %256, %259, %266 in 1 : vector<32x256xbf16>, vector<32x256xbf16>, vector<32x256xbf16>, vector<32x256xbf16>, vector<32x256xbf16>, vector<32x256xbf16>, vector<32x256xbf16>, vector<32x256xbf16>, vector<32x256xbf16> -> vector<32x2304xbf16>
    %c0_195 = arith.constant 0 : index
    %c0_196 = arith.constant 0 : index
    %268 = vector.load %arg7[%c0_195, %c0_196] : memref<2304x256xbf16, #tpu.memory_space<vmem>>, vector<2304x256xbf16>
    %cst_197 = arith.constant dense<0.000000e+00> : vector<32x256xf32>
    %269 = tpu.matmul %267, %268, %cst_197 {dimension_numbers = #tpu.dot_dimension_numbers<[1], [0], [0], [1], [0, 0, 1, 1], [], []>} : vector<32x2304xbf16>, vector<2304x256xbf16>, vector<32x256xf32> -> vector<32x256xf32>
    %c0_198 = arith.constant 0 : index
    %c0_199 = arith.constant 0 : index
    %270 = vector.load %arg8[%c0_198, %c0_199] : memref<1x256xf32, #tpu.memory_space<vmem>>, vector<1x256xf32>
    %271 = vector.broadcast %270 : vector<1x256xf32> to vector<32x256xf32>
    %272 = arith.addf %269, %271 : vector<32x256xf32>
    %cst_200 = arith.constant 0.000000e+00 : f32
    %273 = vector.broadcast %cst_200 : f32 to vector<32x256xf32>
    %274 = arith.maximumf %272, %273 : vector<32x256xf32>
    %275 = vector.shape_cast %274 : vector<32x256xf32> to vector<2x16x256xf32>
    %cst_201 = arith.constant dense<0.000000e+00> : vector<2x256xf32>
    %276 = vector.multi_reduction <add>, %275, %cst_201 [1] : vector<2x16x256xf32> to vector<2x256xf32>
    %cst_202 = arith.constant 6.250000e-02 : f32
    %277 = vector.broadcast %cst_202 : f32 to vector<2x256xf32>
    %278 = arith.mulf %276, %277 : vector<2x256xf32>
    %c0_203 = arith.constant 0 : index
    %c0_204 = arith.constant 0 : index
    %279 = vector.load %arg12[%c0_203, %c0_204] : memref<2x256xf32, #tpu.memory_space<vmem>>, vector<2x256xf32>
    tpu.vector_store %arg12[%c0_203, %c0_204], %278 {strides = array<i32>} : memref<2x256xf32, #tpu.memory_space<vmem>>, vector<2x256xf32>,
    %c0_205 = arith.constant 0 : index
    %c0_206 = arith.constant 0 : index
    %280 = vector.load %arg9[%c0_205, %c0_206] : memref<256x128xf32, #tpu.memory_space<vmem>>, vector<256x128xf32>
    %cst_207 = arith.constant dense<0.000000e+00> : vector<2x128xf32>
    %281 = tpu.matmul %278, %280, %cst_207 {dimension_numbers = #tpu.dot_dimension_numbers<[1], [0], [0], [1], [0, 0, 1, 1], [], []>} : vector<2x256xf32>, vector<256x128xf32>, vector<2x128xf32> -> vector<2x128xf32>
    %c0_208 = arith.constant 0 : index
    %c0_209 = arith.constant 0 : index
    %282 = vector.load %arg10[%c0_208, %c0_209] : memref<1x128xf32, #tpu.memory_space<vmem>>, vector<1x128xf32>
    %283 = vector.broadcast %282 : vector<1x128xf32> to vector<2x128xf32>
    %284 = arith.addf %281, %283 : vector<2x128xf32>
    %c0_210 = arith.constant 0 : index
    %c0_211 = arith.constant 0 : index
    %285 = vector.load %arg11[%c0_210, %c0_211] : memref<2x128xf32, #tpu.memory_space<vmem>>, vector<2x128xf32>
    tpu.vector_store %arg11[%c0_210, %c0_211], %284 {strides = array<i32>} : memref<2x128xf32, #tpu.memory_space<vmem>>, vector<2x128xf32>,
    return
  }
}

</mosaic_0001>

<bundles_post_ra>
// kernel: vgg_forward.1
= control target key start
LH: loop header
LB: loop body
LE: loop exit
PB: predicated region body
PF: predicated region fallthrough
CT: control target
= control target key end

     0   :  { %18 = vsyncpa [#allocation10], 0  ;;  %vm388_vm0 = vcmask 1044480   ;;  %vm12939_vm1 = vcmask 1045504   ;;  %v9350_v2 = vmov 65535   ;;  %vm291_vm2 = vcmask 220160   ;;  %s12909_s0 = inlined_call_operand.vmem [shape: bf16[512,27], index: 0, kind: input, shape index: {}]   ;;  %s12910_s1 = inlined_call_operand.vmem [shape: bf16[27,64], index: 1, kind: input, shape index: {}]   ;;  %s12911_s2 = inlined_call_operand.vmem [shape: f32[1,64], index: 2, kind: input, shape index: {}]   ;;  %s12912_s3 = inlined_call_operand.vmem [shape: bf16[576,128], index: 3, kind: input, shape index: {}]   ;;  %s12913_s4 = inlined_call_operand.vmem [shape: f32[1,128], index: 4, kind: input, shape index: {}]   ;;  %s12914_s5 = inlined_call_operand.vmem [shape: bf16[1152,256], index: 5, kind: input, shape index: {}]   ;;  %s12915_s6 = inlined_call_operand.vmem [shape: f32[1,256], index: 6, kind: input, shape index: {}]   ;;  %s12916_s7 = inlined_call_operand.vmem [shape: bf16[2304,256], index: 7, kind: input, shape index: {}]   ;;  %s12917_s8 = inlined_call_operand.vmem [shape: f32[1,256], index: 8, kind: input, shape index: {}]   ;;  %s12918_s9 = inlined_call_operand.vmem [shape: f32[256,128], index: 9, kind: input, shape index: {}]   ;;  %s12919_s10 = inlined_call_operand.vmem [shape: f32[1,128], index: 10, kind: input, shape index: {}]   ;;  %s12920_s11 = inlined_call_operand.hbm [shape: f32[2,128], index: 11, kind: output, shape index: {0}]   ;;  %s12921_s12 = inlined_call_operand.hbm [shape: f32[2,256], index: 12, kind: output, shape index: {1}]  }
   0x1   :  { %v8574_v0 = vld [vmem:[%s12910_s1] sm:$0xff]   ;;  %v8575_v1 = vld [vmem:[%s12910_s1 + $0x8] sm:$0x3f]   ;;  %v390_v3 = vsel %vm388_vm0, 4294967295, %v9350_v2  ;;  %v8577_v5 = vld [vmem:[%s12909_s0 + $0x30] sm:$0xff]   ;;  %v1313_v38 = vlaneseq  ;;  %vm1133_vm5 = vcmask 523264  }
   0x2   :  { %8328 = vmatprep.subr.bf16.mxu0 %v8574_v0  ;;  %8452 = vmatprep.subr.bf16.mxu1 %v8574_v0  ;;  %v8576_v4 = vld [vmem:[%s12909_s0] sm:$0xff]   ;;  %v391_v6 = vsel %vm12939_vm1, %v390_v3, 0  ;;  %v8578_v8 = vld [vmem:[%s12909_s0 + $0x8] sm:$0xff]   ;;  %v8579_v9 = vld [vmem:[%s12909_s0 + $0x38] sm:$0xff]   ;;  %v9351_v49 = vmov 0  }
   0x3   :  { %8329 = vmatpush3.bf16.msra.mxu0 %v8574_v0  ;;  %8454 = vmatpush3.bf16.msra.mxu1 %v8574_v0  ;;  %v393_v7 = vand.u32 %v8575_v1, %v391_v6  ;;  %v8580_v10 = vld [vmem:[%s12909_s0 + $0x10] sm:$0xff]   ;;  %v8581_v11 = vld [vmem:[%s12909_s0 + $0x40] sm:$0xff]   ;;  %v8582_v12 = vld [vmem:[%s12909_s0 + $0x18] sm:$0xff]   ;;  %v9556_v39 = vshrl.u32 %v1313_v38, 7  ;;  %1293 = vst.msk [vmem:[#allocation2] sm:$0xff] %vm1133_vm5, %v9351_v49 }
   0x4   :  { %8332 = vmatprep.mubr.msk.bf16.mxu0 %vm291_vm2, %v8576_v4  ;;  %8344 = vmatprep.mubr.msk.bf16.mxu1 %vm291_vm2, %v8577_v5  ;;  %v8583_v13 = vld [vmem:[%s12909_s0 + $0x48] sm:$0xff]   ;;  %v8584_v14 = vld [vmem:[%s12909_s0 + $0x20] sm:$0xff]   ;;  %v8585_v15 = vld [vmem:[%s12909_s0 + $0x50] sm:$0xff]   ;;  %1302 = vst.msk [vmem:[#allocation2 + $0x28] sm:$0xff] %vm1133_vm5, %v9351_v49 }
   0x5   :  { %8330 = vmatprep.subr.bf16.mxu0 %v393_v7  ;;  %8453 = vmatprep.subr.bf16.mxu1 %v393_v7  ;;  %v8586_v16 = vld [vmem:[%s12909_s0 + $0x28] sm:$0xff]   ;;  %v8587_v17 = vld [vmem:[%s12909_s0 + $0x58] sm:$0xff]   ;;  %v8588_v18 = vld [vmem:[%s12909_s0 + $0x60] sm:$0xff]   ;;  %12945 = vst [vmem:[#allocation15_spill] sm:$0xff] %v9556_v39  ;;  %v9559_v40 = vadd.s32 8, %v9556_v39  ;;  %v1316_v41 = vadd.s32 16, %v9556_v39 }
   0x6   :  { %v8589_v19 = vld [vmem:[%s12909_s0 + $0x68] sm:$0xff]   ;;  %v8590_v20 = vld [vmem:[%s12909_s0 + $0x70] sm:$0xff]   ;;  %v8591_v21 = vld [vmem:[%s12909_s0 + $0x78] sm:$0xff]   ;;  %v1317_v42 = vadd.s32 24, %v9556_v39  ;;  %v1322_v43 = vand.u32 7, %v9556_v39  ;;  %1303 = vst.msk [vmem:[#allocation2 + $0x30] sm:$0xff] %vm1133_vm5, %v9351_v49 }
   0x7   :  { %8331 = vmatpush3.bf16.msra.mxu0 %v393_v7  ;;  %8455 = vmatpush3.bf16.msra.mxu1 %v393_v7  ;;  %v8592_v22 = vld [vmem:[%s12909_s0 + $0x80] sm:$0xff]   ;;  %v8593_v23 = vld [vmem:[%s12909_s0 + $0x88] sm:$0xff]   ;;  %v8594_v24 = vld [vmem:[%s12909_s0 + $0x90] sm:$0xff]   ;;  %12946 = vst [vmem:[#allocation16_spill] sm:$0xff] %v9559_v40  ;;  %v1323_v44 = vand.u32 7, %v9559_v40  ;;  %v1324_v45 = vand.u32 7, %v1316_v41 }
   0x8   :  { %v8595_v25 = vld [vmem:[%s12909_s0 + $0x98] sm:$0xff]   ;;  %v8596_v26 = vld [vmem:[%s12909_s0 + $0xa0] sm:$0xff]   ;;  %v8597_v27 = vld [vmem:[%s12909_s0 + $0xa8] sm:$0xff]   ;;  %v1325_v46 = vand.u32 7, %v1317_v42  ;;  %vm9565_vm3 = vcmp.gt.s32.totalorder %v1322_v43, 0  ;;  %1312 = vst.msk [vmem:[#allocation2 + $0x58] sm:$0xff] %vm1133_vm5, %v9351_v49 }
   0x9   :  { %v8598_v28 = vld [vmem:[%s12909_s0 + $0xb0] sm:$0xff]   ;;  %v8599_v29 = vld [vmem:[%s12909_s0 + $0xb8] sm:$0xff]   ;;  %v8600_v30 = vld [vmem:[%s12909_s0 + $0xc0] sm:$0xff]   ;;  %vm9569_vm4 = vcmp.gt.s32.totalorder %v1323_v44, 0  ;;  %vm9578_vm7 = vcmp.gt.s32.totalorder %v1324_v45, 0  ;;  %3096 = vst [vmem:[#allocation3] sm:$0xff] %v9351_v49 }
   0xa   :  { %8333 = vmatmul.mubr.msk.bf16.vlgmr.msra.gmra.mrb[0].mxu0 %vm291_vm2, %v8578_v8  ;;  %8345 = vmatmul.mubr.msk.bf16.vlgmr.msra.gmra.mrb[0].mxu1 %vm291_vm2, %v8579_v9  ;;  %v8601_v31 = vld [vmem:[%s12909_s0 + $0xc8] sm:$0xff]   ;;  %v8602_v32 = vld [vmem:[%s12909_s0 + $0xd0] sm:$0xff]   ;;  %v8603_v33 = vld [vmem:[%s12909_s0 + $0xd8] sm:$0xff]   ;;  %vm9582_vm8 = vcmp.gt.s32.totalorder %v1325_v46, 0  ;;  %3099 = vst [vmem:[#allocation3 + $0x10] sm:$0xff] %v9351_v49  ;;  %vm9622_vm11 = vcmp.lt.s32.totalorder %v1322_v43, 7 }
   0xb   :  { %8336 = vmatprep.mubr.msk.bf16.mxu0 %vm291_vm2, %v8580_v10  ;;  %8348 = vmatprep.mubr.msk.bf16.mxu1 %vm291_vm2, %v8581_v11  ;;  %v8604_v34 = vld [vmem:[%s12909_s0 + $0xe0] sm:$0xff]   ;;  %v8605_v35 = vld [vmem:[%s12909_s0 + $0xe8] sm:$0xff]   ;;  %v8606_v36 = vld [vmem:[%s12909_s0 + $0xf0] sm:$0xff]   ;;  %3100 = vst [vmem:[#allocation3 + $0x18] sm:$0xff] %v9351_v49  ;;  %vm9631_vm13 = vcmp.lt.s32.totalorder %v1323_v44, 7  ;;  %vm9637_vm14 = vcmp.lt.s32.totalorder %v1324_v45, 7 }
   0xc   :  { %v8607_v37 = vld [vmem:[%s12909_s0 + $0xf8] sm:$0xff]   ;;  %vm1351_vm6 = vmpackc.low %vm9565_vm3, %vm9565_vm3  ;;  %3103 = vst [vmem:[#allocation3 + $0x28] sm:$0xff] %v9351_v49  ;;  %vm9641_vm15 = vcmp.lt.s32.totalorder %v1325_v46, 7  ;;  %v8608_v2 = vld [vmem:[%s12912_s3 + $0x100] sm:$0xff]   ;;  %v1318_v41 = vadd.s32 32, %v9556_v39  ;;  %v1319_v42 = vadd.s32 40, %v9556_v39 }
   0xd   :  { %vm1352_vm9 = vmpackc.low %vm9569_vm4, %vm9569_vm4  ;;  %4580 = vst [vmem:[#allocation4] sm:$0xff] %v9351_v49  ;;  %v1359_v52 = vsel %vm1351_vm6, 65537, %v9351_v49  ;;  %8396 = vmatprep.subr.bf16.mxu0 %v8608_v2  ;;  %v8609_v9 = vld [vmem:[%s12912_s3 + $0x108] sm:$0xff]   ;;  %v1723_v60 = vld [vmem:[#allocation2] sm:$0x80] }
   0xe   :  { %4581 = vst [vmem:[#allocation4 + $0x8] sm:$0xff] %v9351_v49  ;;  %4586 = vst [vmem:[#allocation4 + $0x20] sm:$0xff] %v9351_v49  ;;  %v1360_v53 = vsel %vm1352_vm9, 65537, %v9351_v49  ;;  %8397 = vmatpush3.bf16.msra.mxu0 %v8608_v2  ;;  %v1326_v48 = vand.u32 7, %v1318_v41  ;;  %v1327_v50 = vand.u32 7, %v1319_v42 }
   0xf   :  { %4587 = vst [vmem:[#allocation4 + $0x28] sm:$0xff] %v9351_v49  ;;  %4588 = vst [vmem:[#allocation4 + $0x30] sm:$0xff] %v9351_v49  ;;  %v9629_v55 = vcombine.low %v1359_v52, %v1360_v53  ;;  %8398 = vmatprep.subr.bf16.mxu0 %v8609_v9 }
  0x10   :  { %4589 = vst [vmem:[#allocation4 + $0x38] sm:$0xff] %v9351_v49  ;;  %4594 = vst [vmem:[#allocation4 + $0x50] sm:$0xff] %v9351_v49 }
  0x11   :  { %4595 = vst [vmem:[#allocation4 + $0x58] sm:$0xff] %v9351_v49  ;;  %vm1353_vm10 = vmpackc.low %vm9578_vm7, %vm9578_vm7  ;;  %v1381_v61 = vshrl.u32 %v9629_v55, 16  ;;  %v1384_v62 = vshll.u32 %v9629_v55, 16  ;;  %v2049_v55 = vld [vmem:[#allocation2 + $0x28] sm:$0x1f] }
  0x12   :  { %8337 = vmatmul.mubr.msk.bf16.gmra.mrb[4].mxu0 %vm291_vm2, %v8582_v12  ;;  %8349 = vmatmul.mubr.msk.bf16.gmra.mrb[4].mxu1 %vm291_vm2, %v8583_v13  ;;  %vm1354_vm12 = vmpackc.low %vm9582_vm8, %vm9582_vm8  ;;  %v1361_v57 = vsel %vm1353_vm10, 65537, %v9351_v49  ;;  %vm1754_vm10 = vsmask.f32 256 }
  0x13   :  { %8340 = vmatprep.mubr.msk.bf16.mxu0 %vm291_vm2, %v8584_v14  ;;  %8352 = vmatprep.mubr.msk.bf16.mxu1 %vm291_vm2, %v8585_v15  ;;  %v1362_v58 = vsel %vm1354_vm12, 65537, %v9351_v49  ;;  %vm1556_vm0 = vmpackc.low %vm9622_vm11, %vm9622_vm11  ;;  %v1383_v0 = vrot.slane %v1381_v61, 4  ;;  %v1386_v1 = vrot.slane %v1384_v62, 5  ;;  %v8610_v15 = vld [vmem:[%s12912_s3 + $0x110] sm:$0xff]  }
  0x14   :  { %v9650_v63 = vcombine.low %v1361_v57, %v1362_v58  ;;  %vm1558_vm3 = vmpackc.low %vm9637_vm14, %vm9637_vm14  ;;  %v1564_v5 = vsel %vm1556_vm0, 65537, %v9351_v49  ;;  %8399 = vmatpush3.bf16.msra.mxu0 %v8609_v9  ;;  %vm1342_vm0 = vcmp.lt.s32.totalorder %v1326_v48, 7  ;;  %v9749_v58 = vrot.slane %v1384_v62, 1 }
  0x15   :  { %vm1559_vm4 = vmpackc.low %vm9641_vm15, %vm9641_vm15  ;;  %v9668_v3 = vor.u32 %v1386_v1, %v1383_v0  ;;  %v1566_v7 = vsel %vm1558_vm3, 65537, %v9351_v49  ;;  %8400 = vmatprep.subr.bf16.mxu0 %v8610_v15 }
  0x16   :  { %v1392_v4 = vshll.u32 %v9650_v63, 16  ;;  %v1567_v8 = vsel %vm1559_vm4, 65537, %v9351_v49  ;;  %v1389_v13 = vshrl.u32 %v9650_v63, 16  ;;  %vm1560_vm4 = vmpackc.low %vm1342_vm0, %vm1342_vm0 }
  0x17   :  { %12963 = vst [vmem:[#allocation17_spill] sm:$0xff] %v9668_v3  ;;  %v9682_v12 = vcombine.low %v1566_v7, %v1567_v8  ;;  %v1568_v53 = vsel %vm1560_vm4, 65537, %v9351_v49 }
  0x18   :  { %v1394_v10 = vrot.slane %v1392_v4, 5  ;;  %v1391_v14 = vrot.slane %v1389_v13, 4  ;;  %8401 = vmatpush3.bf16.msra.mxu0 %v8610_v15  ;;  %v1728_v8 = vrot.slane %v1392_v4, 1 }
  0x1a   :  { %8341 = vmatmul.mubr.msk.bf16.gmra.mrb[8].mxu0 %vm291_vm2, %v8586_v16  ;;  %8353 = vmatmul.mubr.msk.bf16.gmra.mrb[8].mxu1 %vm291_vm2, %v8587_v17  ;;  %v1320_v16 = vadd.s32 48, %v9556_v39  ;;  %v1321_v17 = vadd.s32 56, %v9556_v39 }
  0x1b   :  { %8356 = vmatprep.mubr.msk.bf16.mxu1 %vm291_vm2, %v8588_v18 }
  0x22   :  { %8357 = vmatmul.mubr.msk.bf16.gmra.mrb[12].mxu1 %vm291_vm2, %v8589_v19  ;;  %v1593_v19 = vshrl.u32 %v9682_v12, 16 }
  0x23   :  { %8360 = vmatprep.mubr.msk.bf16.mxu1 %vm291_vm2, %v8590_v20  ;;  %v9694_v20 = vor.u32 %v1394_v10, %v1391_v14 }
  0x24   :  { %v1595_v15 = vrot.slane %v1593_v19, 3 }
  0x25   :  { %12964 = vst [vmem:[#allocation18_spill] sm:$0xff] %v9694_v20 }
  0x2a   :  { %8361 = vmatmul.mubr.msk.bf16.gmra.mrb[16].mxu1 %vm291_vm2, %v8591_v21  ;;  %v1328_v21 = vand.u32 7, %v1320_v16 }
  0x2b   :  { %8364 = vmatprep.mubr.msk.bf16.mxu1 %vm291_vm2, %v8592_v22  ;;  %v1329_v22 = vand.u32 7, %v1321_v17 }
  0x2c   :  { %vm1336_vm6 = vcmp.gt.s32.totalorder %v1328_v21, 0  ;;  %vm1344_vm15 = vcmp.lt.s32.totalorder %v1328_v21, 7 }
  0x2d   :  { %vm1337_vm7 = vcmp.gt.s32.totalorder %v1329_v22, 0  ;;  %vm1357_vm8 = vmpackc.low %vm1336_vm6, %vm1336_vm6 }
  0x2e   :  { %vm1358_vm9 = vmpackc.low %vm1337_vm7, %vm1337_vm7  ;;  %vm1334_vm7 = vcmp.gt.s32.totalorder %v1326_v48, 0 }
  0x2f   :  { %vm1562_vm3 = vmpackc.low %vm1344_vm15, %vm1344_vm15  ;;  %vm1725_vm15 = vsmask.f32 7424 }
  0x30   :  { %v1570_v51 = vsel %vm1562_vm3, 65537, %v9351_v49 }
  0x32   :  { %8365 = vmatmul.mubr.msk.bf16.gmra.mrb[20].mxu1 %vm291_vm2, %v8593_v23 }
  0x33   :  { %8368 = vmatprep.mubr.msk.bf16.mxu1 %vm291_vm2, %v8594_v24 }
  0x3a   :  { %8369 = vmatmul.mubr.msk.bf16.gmra.mrb[24].mxu1 %vm291_vm2, %v8595_v25  ;;  %v9701_v25 = vrot.slane %v1593_v19, 7 }
  0x3b   :  { %8372 = vmatprep.mubr.msk.bf16.mxu1 %vm291_vm2, %v8596_v26  ;;  %v1596_v26 = vshll.u32 %v9682_v12, 16 }
  0x3d   :  { %v1598_v4 = vrot.slane %v1596_v26, 4 }
  0x42   :  { %8373 = vmatmul.mubr.msk.bf16.gmra.mrb[28].mxu1 %vm291_vm2, %v8597_v27  ;;  %v12923_v27 = vand.u32 3, %v9556_v39 }
  0x43   :  { %8376 = vmatprep.mubr.msk.bf16.mxu1 %vm291_vm2, %v8598_v28  ;;  %v12922_v28 = vand.u32 3, %v9559_v40 }
  0x44   :  { %vm3108_vm11 = vcmp.lt.s32.totalorder %v12923_v27, 3 }
  0x45   :  { %vm3109_vm12 = vcmp.lt.s32.totalorder %v12922_v28, 3 }
  0x46   :  { %vm3188_vm14 = vmpackc.low %vm3109_vm12, %vm3109_vm12 }
  0x47   :  { %v3190_v43 = vsel %vm3188_vm14, 65537, %v9351_v49  ;;  %vm1737_vm14 = vcmp.ne.s16.totalorder %v9749_v58, 0 }
  0x4a   :  { %8377 = vmatmul.mubr.msk.bf16.gmra.mrb[32].mxu1 %vm291_vm2, %v8599_v29  ;;  %v1365_v29 = vsel %vm1357_vm8, 65537, %v9351_v49  ;;  %vm1335_vm8 = vcmp.gt.s32.totalorder %v1327_v50, 0 }
  0x4b   :  { %8380 = vmatprep.mubr.msk.bf16.mxu1 %vm291_vm2, %v8600_v30  ;;  %v8611_v30 = vld [vmem:[%s12912_s3 + $0x118] sm:$0xff]   ;;  %vm1356_vm12 = vmpackc.low %vm1335_vm8, %vm1335_vm8 }
  0x4c   :  { %8402 = vmatprep.subr.bf16.mxu0 %v8611_v30  ;;  %v1364_v0 = vsel %vm1356_vm12, 65537, %v9351_v49 }
  0x4d   :  { %8403 = vmatpush3.bf16.msra.mxu0 %v8611_v30 }
  0x52   :  { %8381 = vmatmul.mubr.msk.bf16.gmra.mrb[36].mxu1 %vm291_vm2, %v8601_v31  ;;  %v1366_v31 = vsel %vm1358_vm9, 65537, %v9351_v49  ;;  %vm1345_vm9 = vcmp.lt.s32.totalorder %v1329_v22, 7  ;;  %v1727_v22 = vor.u32 %v9749_v58, %v1381_v61 }
  0x53   :  { %8384 = vmatprep.mubr.msk.bf16.mxu1 %vm291_vm2, %v8602_v32 }
  0x5a   :  { %8385 = vmatmul.mubr.msk.bf16.gmra.mrb[40].mxu1 %vm291_vm2, %v8603_v33  ;;  %v1831_v33 = vor.u32 %v9701_v25, %v1596_v26  ;;  %v1730_v26 = vor.u32 %v1728_v8, %v1389_v13 }
  0x5b   :  { %8388 = vmatprep.mubr.msk.bf16.mxu1 %vm291_vm2, %v8604_v34  ;;  %v9722_v34 = vcombine.low %v1365_v29, %v1366_v31 }
  0x62   :  { %8389 = vmatmul.mubr.msk.bf16.gmra.mrb[44].mxu1 %vm291_vm2, %v8605_v35 }
  0x63   :  { %8392 = vmatprep.mubr.msk.bf16.mxu1 %vm291_vm2, %v8606_v36  ;;  %v1410_v36 = vshll.u32 %v9722_v34, 16 }
  0x65   :  { %v1412_v45 = vrot.slane %v1410_v36, 5 }
  0x6a   :  { %8393 = vmatmul.mubr.msk.bf16.gmra.mrb[48].mxu1 %vm291_vm2, %v8607_v37  ;;  %vm1557_vm2 = vmpackc.low %vm9631_vm13, %vm9631_vm13  ;;  %v1407_v37 = vshrl.u32 %v9722_v34, 16 }
  0x6b   :  { %v1565_v6 = vsel %vm1557_vm2, 65537, %v9351_v49  ;;  %vm3187_vm13 = vmpackc.low %vm3108_vm11, %vm3108_vm11  ;;  %vm1343_vm2 = vcmp.lt.s32.totalorder %v1327_v50, 7 }
  0x6c   :  { %v9680_v11 = vcombine.low %v1564_v5, %v1565_v6  ;;  %v3189_v38 = vsel %vm3187_vm13, 65537, %v9351_v49  ;;  %v1409_v44 = vrot.slane %v1407_v37, 4  ;;  %vm1561_vm6 = vmpackc.low %vm1343_vm2, %vm1343_vm2 }
  0x6d   :  { %v9737_v46 = vcombine.low %v3189_v38, %v3190_v43  ;;  %vm1355_vm11 = vmpackc.low %vm1334_vm7, %vm1334_vm7  ;;  %v1569_v54 = vsel %vm1561_vm6, 65537, %v9351_v49 }
  0x6e   :  { %v1585_v18 = vshrl.u32 %v9680_v11, 16  ;;  %v1588_v23 = vshll.u32 %v9680_v11, 16  ;;  %v9739_v47 = vor.u32 %v1412_v45, %v1409_v44  ;;  %vm1563_vm13 = vmpackc.low %vm1345_vm9, %vm1345_vm9  ;;  %v7637_v57 = vcombine.low %v1568_v53, %v1569_v54 }
  0x6f   :  { %12965 = vst [vmem:[#allocation19_spill] sm:$0xff] %v9737_v46  ;;  %v1571_v52 = vsel %vm1563_vm13, 65537, %v9351_v49  ;;  %v1363_v59 = vsel %vm1355_vm11, 65537, %v9351_v49  ;;  %v1742_v49 = vsel %vm1737_vm14, %v1723_v60, 0 }
  0x70   :  { %v1828_v24 = vrot.slane %v1585_v18, 7  ;;  %v9745_v56 = vcombine.low %v1570_v51, %v1571_v52  ;;  %v1602_v5 = vshrl.u32 %v7637_v57, 16  ;;  %v1605_v6 = vshll.u32 %v7637_v57, 16 }
  0x71   :  { %v9756_v7 = vcombine.low %v1363_v59, %v1364_v0  ;;  %v1587_v10 = vrot.slane %v1585_v18, 3  ;;  %v1590_v14 = vrot.slane %v1588_v23, 4  ;;  %v1756_v18 = vshrl.u32 %v1742_v49, 16 }
  0x72   :  { %v9713_v32 = vor.u32 %v1828_v24, %v1588_v23  ;;  %v9725_v35 = vsel %vm1754_vm10, %v1828_v24, %v1831_v33  ;;  %v12927_v1 = vshrl.u32 %v9745_v56, 16  ;;  %v12926_v2 = vshll.u32 %v9745_v56, 16 }
  0x73   :  { %v1604_v16 = vrot.slane %v1602_v5, 3  ;;  %v1607_v17 = vrot.slane %v1605_v6, 4  ;;  %v12925_v21 = vshll.u32 %v9756_v7, 16  ;;  %v9780_v11 = vor.u32 %v1590_v14, %v1587_v10 }
  0x74   :  { %v1613_v62 = vrot.slane %v12927_v1, 3  ;;  %v1616_v9 = vrot.slane %v12926_v2, 4  ;;  %v12924_v12 = vshrl.u32 %v9756_v7, 16  ;;  %v1599_v23 = vor.u32 %v1598_v4, %v1595_v15 }
  0x75   :  { %v1731_v19 = vrot.slane %v12925_v21, 1  ;;  %v1608_v29 = vor.u32 %v1607_v17, %v1604_v16 }
  0x76   :  { %v9778_v24 = vor.u32 %v1616_v9, %v1613_v62 }
  0x78   :  { %vm12941_vm0 = vcmp.ne.s16.totalorder %v9778_v24, 0 }
  0x79   :  { %19 = vsyncpa [#allocation12], 0  ;;  %vm12940_vm2 = vsmask.f32 4352  ;;  %v9788_v61 = vld [vmem:[#allocation2] sm:$0xf0]  ;;  %v1733_v30 = vor.u32 %v1731_v19, %v12924_v12  ;;  %v9800_v63 = vsel %vm1725_vm15, %v1727_v22, %v1728_v8  ;;  %v9815_v44 = vsel %vm1725_vm15, %v1730_v26, %v1731_v19 }
  0x7a   :  { %v1734_v31 = vrot.slane %v1410_v36, 1  ;;  %v9797_v33 = vld [vmem:[%s12911_s2] ss:$0 sm:$0xff]  ;;  %vm12944_vm3 = vcmask 1046528   ;;  %v9802_v13 = vrot.slane %v1756_v18, 7  ;;  %v9806_v38 = vsel %vm12941_vm0, %v2049_v55, 0 }
  0x7b   :  { %v9808_v41 = vrot.slane %v1602_v5, 7  ;;  %v9812_v36 = vsel %vm12940_vm2, %v9780_v11, %v1599_v23  ;;  %v9819_v48 = vsel %vm12940_vm2, %v1599_v23, %v1608_v29  ;;  %v8612_v57 = vld [vmem:[%s12912_s3 + $0x40] sm:$0xff]   ;;  %v8614_v60 = vld [vmem:[%s12912_s3 + $0x48] sm:$0xff]   ;;  %v9844_v49 = vsel %vm12940_vm2, %v1608_v29, %v9778_v24  ;;  %s9352_s14 = smov 64  }
  0x7c   :  { %v9826_v54 = vsel %vm1725_vm15, %v1733_v30, %v1734_v31  ;;  %v8613_v59 = vld [vmem:[%s12912_s3] sm:$0xff]   ;;  %v2097_v10 = vshrl.u32 %v9806_v38, 16  ;;  %8153 = vmatprep.subr.bf16.mxu1 %v8612_v57  ;;  %v8615_v26 = vld [vmem:[%s12912_s3 + $0x8] sm:$0xff]   ;;  %vm1738_vm4 = vcmp.ne.s16.totalorder %v9800_v63, 0  ;;  %vm1619_vm6 = vcmp.ne.s16.totalorder %v9780_v11, 0 }
  0x7d   :  { %v1834_v0 = vor.u32 %v9808_v41, %v1605_v6  ;;  %8154 = vmatpush3.bf16.msra.mxu1 %v8613_v59  ;;  %vm1620_vm7 = vcmp.ne.s16.totalorder %v9812_v36, 0  ;;  %vm12942_vm8 = vcmp.ne.s16.totalorder %v9815_v44, 0  ;;  %vm1531_vm9 = vcmask 1043456  }
  0x7e   :  { %8155 = vmatprep.subr.bf16.mxu1 %v8614_v60  ;;  %vm1379_vm11 = vsmask.f32 3328  ;;  %vm1740_vm12 = vcmp.ne.s16.totalorder %v9826_v54, 0  ;;  %vm1621_vm13 = vcmp.ne.s16.totalorder %v9819_v48, 0  ;;  %vm1419_vm1 = vcmp.ne.s16.totalorder %v9739_v47, 0 }
  0x7f   :  { %vm1839_vm0 = vcmp.ne.s16.totalorder %v9713_v32, 0 }
  0x81   :  { %8156 = vmatpush3.bf16.msra.mxu1 %v8615_v26 }
  0xdd   :  { %v8346_v42 = vpop.f32.mrb[0].mxu1  ;;  %v8334_v43 = vpop.f32.mrb[0].mxu0 }
  0xde   :  { %v486_v50 = vadd.f32 %v8346_v42, %v9797_v33  ;;  %v477_v51 = vpop.f32.mrb[1].mxu1  ;;  %v9823_v52 = vadd.f32 %v8334_v43, %v9797_v33  ;;  %v429_v53 = vpop.f32.mrb[1].mxu0  ;;  %v9864_v42 = vor.u32 %v1734_v31, %v1407_v37  ;;  %v8616_v43 = vld [vmem:[%s12912_s3 + $0x50] sm:$0xff]   ;;  %v9883_v31 = vsel %vm1754_vm10, %v9701_v25, %v1834_v0 }
  0xdf   :  { %v478_v5 = vadd.f32 %v9797_v33, %v477_v51  ;;  %v8347_v8 = vpop.f32.mrb[2].mxu1  ;;  %v9840_v62 = vadd.f32 %v9797_v33, %v429_v53  ;;  %v8335_v9 = vpop.f32.mrb[2].mxu0  ;;  %v8617_v37 = vld [vmem:[%s12912_s3 + $0x10] sm:$0xff]   ;;  %8157 = vmatprep.subr.bf16.mxu1 %v8616_v43 }
  0xe0   :  { %v698_v14 = vmax.f32 %v486_v50, 0.0  ;;  %v9848_v15 = vadd.f32 %v8347_v8, %v9797_v33  ;;  %v480_v4 = vpop.f32.mrb[3].mxu1  ;;  %v686_v6 = vmax.f32 %v9823_v52, 0.0  ;;  %v9852_v16 = vadd.f32 %v8335_v9, %v9797_v33  ;;  %v432_v17 = vpop.f32.mrb[3].mxu0  ;;  %8158 = vmatpush3.bf16.msra.mxu1 %v8617_v37 }
  0xe1   :  { %v696_v22 = vmax.f32 %v478_v5, 0.0  ;;  %v481_v18 = vadd.f32 %v9797_v33, %v480_v4  ;;  %v684_v19 = vmax.f32 %v9840_v62, 0.0  ;;  %v433_v23 = vadd.f32 %v9797_v33, %v432_v17 }
  0xe2   :  { %v12929_v29 = vmax.f32 %v9848_v15, 0.0  ;;  %v816_v55 = vrot.slane %v686_v6, 1  ;;  %v12928_v30 = vmax.f32 %v9852_v16, 0.0  ;;  %v9869_v52 = vrot.slane %v2097_v10, 4 }
  0xe3   :  { %v697_v50 = vmax.f32 %v481_v18, 0.0  ;;  %v685_v51 = vmax.f32 %v433_v23, 0.0  ;;  %v840_v57 = vrot.slane %v698_v14, 1  ;;  %v9885_v60 = vrot.slane %v696_v22, 1 }
  0xe4   :  { %v842_v59 = vrot.slane %v12929_v29, 1  ;;  %v9876_v34 = vrot.slane %v12928_v30, 1  ;;  %v813_v62 = vrot.slane %v684_v19, 1  ;;  %vm1741_vm2 = vcmp.ne.s16.totalorder %v9864_v42, 0 }
  0xe5   :  { %v838_v5 = vrot.slane %v697_v50, 1  ;;  %v8350_v8 = vpop.f32.mrb[4].mxu1  ;;  %v814_v9 = vrot.slane %v685_v51, 1  ;;  %v8338_v10 = vpop.f32.mrb[4].mxu0 }
  0xe6   :  { %v843_v4 = vsel %vm12944_vm3, %v840_v57, %v842_v59  ;;  %v502_v17 = vadd.f32 %v8350_v8, %v9797_v33  ;;  %v493_v18 = vpop.f32.mrb[5].mxu1  ;;  %v819_v23 = vsel %vm12944_vm3, %v816_v55, %v9876_v34  ;;  %v9892_v28 = vadd.f32 %v8338_v10, %v9797_v33  ;;  %v445_v25 = vpop.f32.mrb[5].mxu0 }
  0xe7   :  { %v1019_v0 = vmax.f32 %v698_v14, %v843_v4  ;;  %v839_v27 = vsel %vm12944_vm3, %v9885_v60, %v838_v5  ;;  %v841_v12 = vsel %vm12944_vm3, %v838_v5, %v840_v57  ;;  %v494_v26 = vadd.f32 %v9797_v33, %v493_v18  ;;  %v8351_v21 = vpop.f32.mrb[6].mxu1  ;;  %v8339_v2 = vpop.f32.mrb[6].mxu0 }
  0xe8   :  { %v1017_v8 = vmax.f32 %v696_v22, %v839_v27  ;;  %v1018_v1 = vmax.f32 %v697_v50, %v841_v12  ;;  %v702_v53 = vmax.f32 %v502_v17, 0.0  ;;  %v1007_v45 = vmax.f32 %v686_v6, %v819_v23  ;;  %v496_v30 = vpop.f32.mrb[7].mxu1  ;;  %v448_v29 = vpop.f32.mrb[7].mxu0 }
  0xe9   :  { %v700_v10 = vmax.f32 %v494_v26, 0.0  ;;  %v9899_v46 = vadd.f32 %v8351_v21, %v9797_v33  ;;  %v815_v14 = vsel %vm12944_vm3, %v813_v62, %v814_v9  ;;  %v817_v43 = vsel %vm12944_vm3, %v814_v9, %v816_v55 }
  0xea   :  { %v1081_v57 = vmax.f32 %v1017_v8, %v1019_v0  ;;  %v848_v5 = vrot.slane %v702_v53, 1  ;;  %v1005_v4 = vmax.f32 %v684_v19, %v815_v14  ;;  %v9903_v18 = vmax.f32 %v685_v51, %v817_v43 }
  0xeb   :  { %v844_v27 = vrot.slane %v700_v10, 1  ;;  %v12931_v12 = vmax.f32 %v9899_v46, 0.0  ;;  %v497_v6 = vadd.f32 %v9797_v33, %v496_v30  ;;  %v690_v22 = vmax.f32 %v9892_v28, 0.0 }
  0xec   :  { %1146 = vst.msk [vmem:[#allocation5 + $0x60] sm:$0xff] %vm1133_vm5, %v1081_v57  ;;  %v1069_v21 = vmax.f32 %v1005_v4, %v1007_v45  ;;  %v446_v50 = vadd.f32 %v9797_v33, %v445_v25  ;;  %v9911_v55 = vadd.f32 %v8339_v2, %v9797_v33  ;;  %v449_v37 = vadd.f32 %v9797_v33, %v448_v29 }
  0xed   :  { %v845_v19 = vsel %vm12944_vm3, %v842_v59, %v844_v27  ;;  %v9917_v51 = vrot.slane %v12931_v12, 1  ;;  %v701_v62 = vmax.f32 %v497_v6, 0.0  ;;  %v824_v30 = vrot.slane %v690_v22, 1  ;;  %v8342_v9 = vpop.f32.mrb[8].mxu0  ;;  %v8354_v28 = vpop.f32.mrb[8].mxu1 }
  0xee   :  { %1134 = vst.msk [vmem:[#allocation5] sm:$0xff] %vm1133_vm5, %v1069_v21  ;;  %v12966_v45 = vmax.f32 %v9848_v15, 0.0  ;;  %v688_v23 = vmax.f32 %v446_v50, 0.0  ;;  %v12933_v2 = vmax.f32 %v9911_v55, 0.0  ;;  %v689_v25 = vmax.f32 %v449_v37, 0.0  ;;  %v461_v29 = vpop.f32.mrb[9].mxu0 }
  0xef   :  { %v509_v0 = vpop.f32.mrb[9].mxu1  ;;  %v851_v59 = vsel %vm12944_vm3, %v848_v5, %v9917_v51  ;;  %v846_v26 = vrot.slane %v701_v62, 1  ;;  %v9926_v8 = vadd.f32 %v8342_v9, %v9797_v33  ;;  %v9929_v14 = vadd.f32 %v8354_v28, %v9797_v33  ;;  %v8343_v43 = vpop.f32.mrb[10].mxu0 }
  0xf0   :  { %v1020_v17 = vmax.f32 %v12966_v45, %v845_v19  ;;  %v8355_v57 = vpop.f32.mrb[10].mxu1  ;;  %v1023_v15 = vmax.f32 %v702_v53, %v851_v59  ;;  %v820_v6 = vrot.slane %v688_v23, 1  ;;  %v826_v21 = vrot.slane %v12933_v2, 1  ;;  %v464_v50 = vpop.f32.mrb[11].mxu0  ;;  %v8618_v19 = vld [vmem:[%s12912_s3 + $0x58] sm:$0xff]  }
  0xf1   :  { %v512_v37 = vpop.f32.mrb[11].mxu1  ;;  %v847_v9 = vsel %vm12944_vm3, %v844_v27, %v846_v26  ;;  %v849_v45 = vsel %vm12944_vm3, %v846_v26, %v848_v5  ;;  %v822_v28 = vrot.slane %v689_v25, 1  ;;  %8159 = vmatprep.subr.bf16.mxu1 %v8618_v19  ;;  %v12967_v26 = vmax.f32 %v9852_v16, 0.0 }
  0xf2   :  { %v1082_v4 = vmax.f32 %v1018_v1, %v1020_v17  ;;  %v1021_v40 = vmax.f32 %v700_v10, %v847_v9  ;;  %v9939_v53 = vmax.f32 %v701_v62, %v849_v45  ;;  %v821_v1 = vsel %vm12944_vm3, %v9876_v34, %v820_v6  ;;  %v8619_v10 = vld [vmem:[%s12912_s3 + $0x18] sm:$0xff]  }
  0xf3   :  { %v827_v17 = vsel %vm12944_vm3, %v824_v30, %v826_v21  ;;  %v1204_v59 = vld [vmem:[#allocation5 + $0x60] sm:$0xff]  ;;  %v823_v27 = vsel %vm12944_vm3, %v820_v6, %v822_v28  ;;  %v825_v5 = vsel %vm12944_vm3, %v822_v28, %v824_v30  ;;  %v1008_v12 = vmax.f32 %v12967_v26, %v821_v1  ;;  %8160 = vmatpush3.bf16.msra.mxu1 %v8619_v10 }
  0xf4   :  { %1147 = vst.msk [vmem:[#allocation5 + $0x68] sm:$0xff] %vm1133_vm5, %v1082_v4  ;;  %v1011_v2 = vmax.f32 %v690_v22, %v827_v17  ;;  %1236 = vst.msk [vmem:[#allocation6 + $0x30] sm:$0xff] %vm1133_vm5, %v1204_v59  ;;  %v1085_v62 = vmax.f32 %v1021_v40, %v1023_v15  ;;  %v1009_v34 = vmax.f32 %v688_v23, %v823_v27  ;;  %v12968_v6 = vmax.f32 %v9926_v8, 0.0 }
  0xf5   :  { %v1198_v4 = vld [vmem:[#allocation5] sm:$0xff]  ;;  %v9953_v9 = vmax.f32 %v689_v25, %v825_v5  ;;  %v1070_v22 = vmax.f32 %v9903_v18, %v1008_v12  ;;  %v706_v30 = vmax.f32 %v9929_v14, 0.0  ;;  %v8358_v16 = vpop.f32.mrb[12].mxu1  ;;  %v462_v40 = vadd.f32 %v9797_v33, %v461_v29 }
  0xf6   :  { %v832_v19 = vrot.slane %v12968_v6, 1  ;;  %1230 = vst.msk [vmem:[#allocation6] sm:$0xff] %vm1133_vm5, %v1198_v4  ;;  %1150 = vst.msk [vmem:[#allocation5 + $0x80] sm:$0xff] %vm1133_vm5, %v1085_v62  ;;  %v1073_v45 = vmax.f32 %v1009_v34, %v1011_v2  ;;  %v510_v23 = vadd.f32 %v9797_v33, %v509_v0  ;;  %v525_v25 = vpop.f32.mrb[13].mxu1  ;;  %v473_v12 = vadd.f32 %v8343_v43, %v9797_v33 }
  0xf7   :  { %1135 = vst.msk [vmem:[#allocation5 + $0x8] sm:$0xff] %vm1133_vm5, %v1070_v22  ;;  %v856_v18 = vrot.slane %v706_v30, 1  ;;  %v9966_v15 = vadd.f32 %v8355_v57, %v9797_v33  ;;  %v9968_v14 = vpop.f32.mrb[14].mxu1  ;;  %v692_v28 = vmax.f32 %v462_v40, 0.0  ;;  %v465_v2 = vadd.f32 %v9797_v33, %v464_v50 }
  0xf8   :  { %1138 = vst.msk [vmem:[#allocation5 + $0x20] sm:$0xff] %vm1133_vm5, %v1073_v45  ;;  %v704_v1 = vmax.f32 %v510_v23, 0.0  ;;  %v513_v29 = vadd.f32 %v9797_v33, %v512_v37  ;;  %v528_v0 = vpop.f32.mrb[15].mxu1  ;;  %v695_v59 = vmax.f32 %v473_v12, 0.0  ;;  %v9975_v43 = vadd.f32 %v8358_v16, %v9797_v33 }
  0xf9   :  { %v12934_v27 = vmax.f32 %v9966_v15, 0.0  ;;  %v9978_v57 = vadd.f32 %v9797_v33, %v525_v25  ;;  %v828_v5 = vrot.slane %v692_v28, 1  ;;  %v693_v10 = vmax.f32 %v465_v2, 0.0 }
  0xfa   :  { %v852_v26 = vrot.slane %v704_v1, 1  ;;  %v705_v62 = vmax.f32 %v513_v29, 0.0  ;;  %v834_v50 = vrot.slane %v695_v59, 1  ;;  %v12969_v2 = vmax.f32 %v9911_v55, 0.0 }
  0xfb   :  { %v1205_v17 = vld [vmem:[#allocation5 + $0x68] sm:$0xff]  ;;  %v858_v37 = vrot.slane %v12934_v27, 1  ;;  %v829_v22 = vsel %vm12944_vm3, %v826_v21, %v828_v5  ;;  %v830_v16 = vrot.slane %v693_v10, 1  ;;  %v12970_v27 = vmax.f32 %v9926_v8, 0.0  ;;  %v8620_v8 = vld [vmem:[%s12912_s3 + $0x60] sm:$0xff]  }
  0xfc   :  { %1237 = vst.msk [vmem:[#allocation6 + $0x38] sm:$0xff] %vm1133_vm5, %v1205_v17  ;;  %v853_v6 = vsel %vm12944_vm3, %v9917_v51, %v852_v26  ;;  %v854_v45 = vrot.slane %v705_v62, 1  ;;  %v835_v23 = vsel %vm12944_vm3, %v832_v19, %v834_v50  ;;  %v837_v25 = vsel %vm12944_vm3, %v834_v50, %v9885_v60  ;;  %8161 = vmatprep.subr.bf16.mxu1 %v8620_v8 }
  0xfd   :  { %v1206_v40 = vld [vmem:[#allocation5 + $0x80] sm:$0xff]  ;;  %v859_v12 = vsel %vm12944_vm3, %v856_v18, %v858_v37  ;;  %v1012_v29 = vmax.f32 %v12969_v2, %v829_v22  ;;  %v8362_v17 = vpop.f32.mrb[16].mxu1  ;;  %v1015_v51 = vmax.f32 %v12970_v27, %v835_v23  ;;  %v1016_v4 = vmax.f32 %v695_v59, %v837_v25 }
  0xfe   :  { %1238 = vst.msk [vmem:[#allocation6 + $0x40] sm:$0xff] %vm1133_vm5, %v1206_v40  ;;  %v1199_v21 = vld [vmem:[#allocation5 + $0x8] sm:$0xff]  ;;  %v1027_v34 = vmax.f32 %v706_v30, %v859_v12  ;;  %v831_v39 = vsel %vm12944_vm3, %v828_v5, %v830_v16  ;;  %v541_v3 = vpop.f32.mrb[17].mxu1  ;;  %v833_v60 = vsel %vm12944_vm3, %v830_v16, %v832_v19  ;;  %v855_v22 = vsel %vm12944_vm3, %v852_v26, %v854_v45 }
  0xff   :  { %v1200_v20 = vld [vmem:[#allocation5 + $0x20] sm:$0xff]  ;;  %1231 = vst.msk [vmem:[#allocation6 + $0x8] sm:$0xff] %vm1133_vm5, %v1199_v21  ;;  %v1013_v50 = vmax.f32 %v692_v28, %v831_v39  ;;  %v1074_v55 = vmax.f32 %v9953_v9, %v1012_v29  ;;  %v8363_v40 = vpop.f32.mrb[18].mxu1  ;;  %v1014_v30 = vmax.f32 %v693_v10, %v833_v60  ;;  %v857_v59 = vsel %vm12944_vm3, %v854_v45, %v856_v18  ;;  %v8621_v28 = vld [vmem:[%s12912_s3 + $0x20] sm:$0xff]  }
 0x100   :  { %1232 = vst.msk [vmem:[#allocation6 + $0x10] sm:$0xff] %vm1133_vm5, %v1200_v20  ;;  %v544_v27 = vpop.f32.mrb[19].mxu1  ;;  %v12971_v39 = vmax.f32 %v9899_v46, 0.0  ;;  %v1025_v9 = vmax.f32 %v704_v1, %v855_v22  ;;  %v1026_v16 = vmax.f32 %v705_v62, %v857_v59  ;;  %v12972_v20 = vmax.f32 %v9975_v43, 0.0  ;;  %8162 = vmatpush3.bf16.msra.mxu1 %v8621_v28 }
 0x101   :  { %v1077_v5 = vmax.f32 %v1013_v50, %v1015_v51  ;;  %1139 = vst.msk [vmem:[#allocation5 + $0x28] sm:$0xff] %vm1133_vm5, %v1074_v55  ;;  %v1078_v26 = vmax.f32 %v1014_v30, %v1016_v4  ;;  %v12973_v23 = vmax.f32 %v9978_v57, 0.0  ;;  %v537_v1 = vadd.f32 %v9968_v14, %v9797_v33 }
 0x102   :  { %v1024_v19 = vmax.f32 %v12971_v39, %v853_v6  ;;  %v864_v10 = vrot.slane %v12972_v20, 1  ;;  %v1089_v45 = vmax.f32 %v1025_v9, %v1027_v34  ;;  %v529_v4 = vadd.f32 %v9797_v33, %v528_v0 }
 0x103   :  { %1142 = vst.msk [vmem:[#allocation5 + $0x40] sm:$0xff] %vm1133_vm5, %v1077_v5  ;;  %v860_v46 = vrot.slane %v12973_v23, 1  ;;  %1143 = vst.msk [vmem:[#allocation5 + $0x48] sm:$0xff] %vm1133_vm5, %v1078_v26  ;;  %v550_v62 = vadd.f32 %v8362_v17, %v9797_v33  ;;  %v542_v34 = vadd.f32 %v9797_v33, %v541_v3  ;;  %v10029_v6 = vadd.f32 %v8363_v40, %v9797_v33 }
 0x104   :  { %v1086_v18 = vmax.f32 %v9939_v53, %v1024_v19  ;;  %1154 = vst.msk [vmem:[#allocation5 + $0xa0] sm:$0xff] %vm1133_vm5, %v1089_v45  ;;  %v545_v25 = vadd.f32 %v9797_v33, %v544_v27  ;;  %v711_v2 = vmax.f32 %v537_v1, 0.0  ;;  %v709_v14 = vmax.f32 %v529_v4, 0.0 }
 0x105   :  { %v861_v53 = vsel %vm12944_vm3, %v858_v37, %v860_v46  ;;  %v8366_v12 = vpop.f32.mrb[20].mxu1  ;;  %v12974_v0 = vmax.f32 %v9966_v15, 0.0  ;;  %v714_v17 = vmax.f32 %v550_v62, 0.0  ;;  %v712_v51 = vmax.f32 %v542_v34, 0.0 }
 0x106   :  { %1151 = vst.msk [vmem:[#allocation5 + $0x88] sm:$0xff] %vm1133_vm5, %v1086_v18  ;;  %v557_v21 = vpop.f32.mrb[21].mxu1  ;;  %v715_v60 = vmax.f32 %v10029_v6, 0.0  ;;  %v713_v50 = vmax.f32 %v545_v25, 0.0  ;;  %v10036_v37 = vadd.f32 %v8366_v12, %v9797_v33  ;;  %v866_v22 = vrot.slane %v711_v2, 1  ;;  %v8624_v6 = vld [vmem:[%s12912_s3 + $0x70] sm:$0xff]  }
 0x107   :  { %v1028_v29 = vmax.f32 %v12974_v0, %v861_v53  ;;  %v8367_v3 = vpop.f32.mrb[22].mxu1  ;;  %v862_v40 = vrot.slane %v709_v14, 1  ;;  %v872_v30 = vrot.slane %v714_v17, 1  ;;  %v868_v15 = vrot.slane %v712_v51, 1  ;;  %v8622_v0 = vld [vmem:[%s12912_s3 + $0x68] sm:$0xff]  }
 0x108   :  { %v1201_v55 = vld [vmem:[#allocation5 + $0x28] sm:$0xff]  ;;  %v560_v59 = vpop.f32.mrb[23].mxu1  ;;  %v874_v27 = vrot.slane %v715_v60, 1  ;;  %v870_v5 = vrot.slane %v713_v50, 1  ;;  %v718_v39 = vmax.f32 %v10036_v37, 0.0  ;;  %v867_v9 = vsel %vm12944_vm3, %v864_v10, %v866_v22  ;;  %8163 = vmatprep.subr.bf16.mxu1 %v8622_v0 }
 0x109   :  { %v1090_v8 = vmax.f32 %v1026_v16, %v1028_v29  ;;  %1233 = vst.msk [vmem:[#allocation6 + $0x18] sm:$0xff] %vm1133_vm5, %v1201_v55  ;;  %v863_v28 = vsel %vm12944_vm3, %v860_v46, %v862_v40  ;;  %v865_v26 = vsel %vm12944_vm3, %v862_v40, %v864_v10  ;;  %v10047_v16 = vadd.f32 %v9797_v33, %v557_v21  ;;  %v8623_v29 = vld [vmem:[%s12912_s3 + $0x28] sm:$0xff]  }
 0x10a   :  { %v1202_v19 = vld [vmem:[#allocation5 + $0x40] sm:$0xff]  ;;  %v1203_v20 = vld [vmem:[#allocation5 + $0x48] sm:$0xff]  ;;  %v12975_v18 = vmax.f32 %v9975_v43, 0.0  ;;  %v1029_v1 = vmax.f32 %v12973_v23, %v863_v28  ;;  %v1030_v4 = vmax.f32 %v709_v14, %v865_v26  ;;  %v869_v62 = vsel %vm12944_vm3, %v866_v22, %v868_v15  ;;  %8164 = vmatpush3.bf16.msra.mxu1 %v8623_v29 }
 0x10b   :  { %1155 = vst.msk [vmem:[#allocation5 + $0xa8] sm:$0xff] %vm1133_vm5, %v1090_v8  ;;  %1234 = vst.msk [vmem:[#allocation6 + $0x20] sm:$0xff] %vm1133_vm5, %v1202_v19  ;;  %v1208_v46 = vld [vmem:[#allocation5 + $0xa0] sm:$0xff]  ;;  %v875_v53 = vsel %vm12944_vm3, %v872_v30, %v874_v27  ;;  %v871_v34 = vsel %vm12944_vm3, %v868_v15, %v870_v5  ;;  %v873_v25 = vsel %vm12944_vm3, %v870_v5, %v872_v30  ;;  %8165 = vmatprep.subr.bf16.mxu1 %v8624_v6 }
 0x10c   :  { %v1031_v45 = vmax.f32 %v12975_v18, %v867_v9  ;;  %1235 = vst.msk [vmem:[#allocation6 + $0x28] sm:$0xff] %vm1133_vm5, %v1203_v20  ;;  %v1032_v12 = vmax.f32 %v711_v2, %v869_v62  ;;  %1240 = vst.msk [vmem:[#allocation6 + $0x50] sm:$0xff] %vm1133_vm5, %v1208_v46  ;;  %v1035_v57 = vmax.f32 %v714_v17, %v875_v53  ;;  %v880_v2 = vrot.slane %v718_v39, 1 }
 0x10d   :  { %v1207_v10 = vld [vmem:[#allocation5 + $0x88] sm:$0xff]  ;;  %v8370_v14 = vpop.f32.mrb[24].mxu1  ;;  %v1033_v21 = vmax.f32 %v712_v51, %v871_v34  ;;  %v10067_v55 = vmax.f32 %v713_v50, %v873_v25  ;;  %v716_v17 = vmax.f32 %v10047_v16, 0.0  ;;  %v10074_v8 = vadd.f32 %v8367_v3, %v9797_v33 }
 0x10e   :  { %1239 = vst.msk [vmem:[#allocation6 + $0x48] sm:$0xff] %vm1133_vm5, %v1207_v10  ;;  %v1093_v43 = vmax.f32 %v1029_v1, %v1031_v45  ;;  %v1094_v22 = vmax.f32 %v1030_v4, %v1032_v12  ;;  %v573_v40 = vpop.f32.mrb[25].mxu1  ;;  %v561_v30 = vadd.f32 %v9797_v33, %v560_v59  ;;  %v10078_v15 = vadd.f32 %v8370_v14, %v9797_v33  ;;  %v1262_v50 = vld [vmem:[#allocation6] ss:$2 sm:$0xff] }
 0x10f   :  { %v8371_v51 = vpop.f32.mrb[26].mxu1  ;;  %v1097_v5 = vmax.f32 %v1033_v21, %v1035_v57  ;;  %v10082_v19 = vadd.f32 %v9797_v33, %v573_v40  ;;  %v876_v3 = vrot.slane %v716_v17, 1  ;;  %v719_v16 = vmax.f32 %v10074_v8, 0.0  ;;  %v1268_v57 = vld [vmem:[#allocation6 + $0x30] ss:$2 sm:$0xff] }
 0x110   :  { %1158 = vst.msk [vmem:[#allocation5 + $0xc0] sm:$0xff] %vm1133_vm5, %v1093_v43  ;;  %1159 = vst.msk [vmem:[#allocation5 + $0xc8] sm:$0xff] %vm1133_vm5, %v1094_v22  ;;  %v576_v9 = vpop.f32.mrb[27].mxu1  ;;  %v1264_v28 = vld [vmem:[#allocation6 + $0x10] ss:$2 sm:$0xff]  ;;  %v717_v59 = vmax.f32 %v561_v30, 0.0  ;;  %v10091_v45 = vadd.f32 %v8371_v51, %v9797_v33 }
 0x111   :  { %v722_v20 = vmax.f32 %v10078_v15, 0.0  ;;  %1162 = vst.msk [vmem:[#allocation5 + $0xe0] sm:$0xff] %vm1133_vm5, %v1097_v5  ;;  %v720_v18 = vmax.f32 %v10082_v19, 0.0  ;;  %v577_v23 = vadd.f32 %v9797_v33, %v576_v9  ;;  %v1294_v1 = vpack.c.bf16 %v1264_v28, %v1262_v50 }
 0x112   :  { %v1209_v26 = vld [vmem:[#allocation5 + $0xa8] sm:$0xff]  ;;  %v877_v4 = vsel %vm12944_vm3, %v874_v27, %v876_v3  ;;  %v882_v62 = vrot.slane %v719_v16, 1  ;;  %v878_v10 = vrot.slane %v717_v59, 1  ;;  %v723_v12 = vmax.f32 %v10091_v45, 0.0 }
 0x113   :  { %1241 = vst.msk [vmem:[#allocation6 + $0x58] sm:$0xff] %vm1133_vm5, %v1209_v26  ;;  %v888_v46 = vrot.slane %v722_v20, 1  ;;  %v1266_v53 = vld [vmem:[#allocation6 + $0x20] ss:$2 sm:$0xff]  ;;  %v1036_v34 = vmax.f32 %v715_v60, %v877_v4  ;;  %v884_v25 = vrot.slane %v720_v18, 1  ;;  %v721_v43 = vmax.f32 %v577_v23, 0.0 }
 0x114   :  { %1298 = vst.msk [vmem:[#allocation2 + $0x8] sm:$0xff] %vm1133_vm5, %v1294_v1  ;;  %v883_v14 = vsel %vm12944_vm3, %v880_v2, %v882_v62  ;;  %v879_v27 = vsel %vm12944_vm3, %v876_v3, %v878_v10  ;;  %v881_v0 = vsel %vm12944_vm3, %v878_v10, %v880_v2  ;;  %v1295_v21 = vpack.c.bf16 %v1268_v57, %v1266_v53  ;;  %v8625_v60 = vld [vmem:[%s12912_s3 + $0x30] sm:$0xff]  }
 0x115   :  { %v8374_v29 = vpop.f32.mrb[28].mxu1  ;;  %v1039_v40 = vmax.f32 %v718_v39, %v883_v14  ;;  %v1037_v8 = vmax.f32 %v716_v17, %v879_v27  ;;  %v1038_v30 = vmax.f32 %v717_v59, %v881_v0  ;;  %v1098_v2 = vmax.f32 %v10067_v55, %v1036_v34  ;;  %8166 = vmatpush3.bf16.msra.mxu1 %v8625_v60  ;;  %v8626_v17 = vld [vmem:[%s12912_s3 + $0x78] sm:$0xff]  }
 0x116   :  { %v589_v15 = vpop.f32.mrb[29].mxu1  ;;  %v885_v50 = vsel %vm12944_vm3, %v882_v62, %v884_v25  ;;  %v890_v5 = vrot.slane %v723_v12, 1  ;;  %v886_v19 = vrot.slane %v721_v43, 1  ;;  %v10118_v9 = vadd.f32 %v8374_v29, %v9797_v33  ;;  %1299 = vst.msk [vmem:[#allocation2 + $0x10] sm:$0xff] %vm1133_vm5, %v1295_v21  ;;  %8167 = vmatprep.subr.bf16.mxu1 %v8626_v17 }
 0x117   :  { %v1210_v22 = vld [vmem:[#allocation5 + $0xc0] sm:$0xff]  ;;  %v1211_v51 = vld [vmem:[#allocation5 + $0xc8] sm:$0xff]  ;;  %v8375_v28 = vpop.f32.mrb[30].mxu1  ;;  %v1101_v37 = vmax.f32 %v1037_v8, %v1039_v40  ;;  %1163 = vst.msk [vmem:[#allocation5 + $0xe8] sm:$0xff] %vm1133_vm5, %v1098_v2  ;;  %v1040_v39 = vmax.f32 %v719_v16, %v885_v50  ;;  %v590_v34 = vadd.f32 %v9797_v33, %v589_v15 }
 0x118   :  { %1242 = vst.msk [vmem:[#allocation6 + $0x60] sm:$0xff] %vm1133_vm5, %v1210_v22  ;;  %1243 = vst.msk [vmem:[#allocation6 + $0x68] sm:$0xff] %vm1133_vm5, %v1211_v51  ;;  %v592_v55 = vpop.f32.mrb[31].mxu1  ;;  %v1212_v26 = vld [vmem:[#allocation5 + $0xe0] sm:$0xff]  ;;  %v891_v3 = vsel %vm12944_vm3, %v888_v46, %v890_v5  ;;  %v887_v59 = vsel %vm12944_vm3, %v884_v25, %v886_v19  ;;  %v889_v23 = vsel %vm12944_vm3, %v886_v19, %v888_v46  ;;  %v726_v1 = vmax.f32 %v10118_v9, 0.0 }
 0x119   :  { %1244 = vst.msk [vmem:[#allocation6 + $0x70] sm:$0xff] %vm1133_vm5, %v1212_v26  ;;  %1166 = vst.msk [vmem:[#allocation5 + $0x100] sm:$0xff] %vm1133_vm5, %v1101_v37  ;;  %v1043_v16 = vmax.f32 %v722_v20, %v891_v3  ;;  %v1041_v4 = vmax.f32 %v720_v18, %v887_v59  ;;  %v10132_v62 = vmax.f32 %v721_v43, %v889_v23  ;;  %v724_v43 = vmax.f32 %v590_v34, 0.0 }
 0x11a   :  { %v1102_v10 = vmax.f32 %v1038_v30, %v1040_v39  ;;  %v896_v53 = vrot.slane %v726_v1, 1  ;;  %v10136_v57 = vadd.f32 %v8375_v28, %v9797_v33  ;;  %v593_v46 = vadd.f32 %v9797_v33, %v592_v55 }
 0x11b   :  { %v10139_v25 = vld [vmem:[#allocation2 + $0x8] sm:$0xff]  ;;  %v1105_v20 = vmax.f32 %v1041_v4, %v1043_v16  ;;  %v892_v15 = vrot.slane %v724_v43, 1  ;;  %v8627_v4 = vld [vmem:[%s12912_s3 + $0x38] sm:$0xff]  }
 0x11c   :  { %v10141_v14 = vld [vmem:[#allocation2 + $0x8] sm:$0xf0]  ;;  %1167 = vst.msk [vmem:[#allocation5 + $0x108] sm:$0xff] %vm1133_vm5, %v1102_v10  ;;  %v1743_v18 = vsel %vm1738_vm4, %v10139_v25, 0  ;;  %v727_v27 = vmax.f32 %v10136_v57, 0.0  ;;  %v725_v0 = vmax.f32 %v593_v46, 0.0  ;;  %8168 = vmatpush3.bf16.msra.mxu1 %v8627_v4 }
 0x11d   :  { %v1760_v29 = vshrl.u32 %v1743_v18, 16  ;;  %v8378_v21 = vpop.f32.mrb[32].mxu1  ;;  %1170 = vst.msk [vmem:[#allocation5 + $0x120] sm:$0xff] %vm1133_vm5, %v1105_v20  ;;  %v1763_v6 = vshll.u32 %v1743_v18, 16  ;;  %v10153_v40 = vld [vmem:[#allocation2 + $0x10] sm:$0xff]  ;;  %v2050_v8 = vsel %vm1619_vm6, %v10141_v14, 0  ;;  %v893_v3 = vsel %vm12944_vm3, %v890_v5, %v892_v15 }
 0x11e   :  { %v10151_v60 = vadd.f32 %v8378_v21, %v9797_v33  ;;  %v605_v22 = vpop.f32.mrb[33].mxu1  ;;  %v1533_v30 = vrot.slane %v10139_v25, 4  ;;  %v1213_v2 = vld [vmem:[#allocation5 + $0xe8] sm:$0xff]  ;;  %v898_v51 = vrot.slane %v727_v27, 1  ;;  %v894_v50 = vrot.slane %v725_v0, 1 }
 0x11f   :  { %v10161_v19 = vrot.slane %v1760_v29, 7  ;;  %v8379_v9 = vpop.f32.mrb[34].mxu1  ;;  %1245 = vst.msk [vmem:[#allocation6 + $0x78] sm:$0xff] %vm1133_vm5, %v1213_v2  ;;  %v10166_v37 = vadd.f32 %v9797_v33, %v605_v22  ;;  %v2051_v39 = vsel %vm1620_vm7, %v10153_v40, 0  ;;  %v2062_v55 = vshrl.u32 %v2050_v8, 16 }
 0x120   :  { %v730_v28 = vmax.f32 %v10151_v60, 0.0  ;;  %v608_v17 = vpop.f32.mrb[35].mxu1  ;;  %v1214_v26 = vld [vmem:[#allocation5 + $0x100] sm:$0xff]  ;;  %v899_v59 = vsel %vm12944_vm3, %v896_v53, %v898_v51  ;;  %v895_v23 = vsel %vm12944_vm3, %v892_v15, %v894_v50  ;;  %v897_v16 = vsel %vm12944_vm3, %v894_v50, %v896_v53 }
 0x121   :  { %1246 = vst.msk [vmem:[#allocation6 + $0x80] sm:$0xff] %vm1133_vm5, %v1214_v26  ;;  %v1047_v10 = vmax.f32 %v726_v1, %v899_v59  ;;  %v1044_v34 = vmax.f32 %v723_v12, %v893_v3  ;;  %v1045_v46 = vmax.f32 %v724_v43, %v895_v23  ;;  %v10181_v20 = vmax.f32 %v725_v0, %v897_v16  ;;  %v1272_v59 = vld [vmem:[#allocation6 + $0x50] ss:$2 sm:$0xff]  ;;  %v1270_v57 = vld [vmem:[#allocation6 + $0x40] ss:$2 sm:$0xff] }
 0x122   :  { %v1765_v18 = vor.u32 %v1763_v6, %v10161_v19  ;;  %v904_v29 = vrot.slane %v730_v28, 1  ;;  %v728_v53 = vmax.f32 %v10166_v37, 0.0  ;;  %v2064_v21 = vrot.slane %v2062_v55, 4 }
 0x123   :  { %v1215_v5 = vld [vmem:[#allocation5 + $0x108] sm:$0xff]  ;;  %v1106_v1 = vmax.f32 %v10132_v62, %v1044_v34  ;;  %v1109_v45 = vmax.f32 %v1045_v46, %v1047_v10  ;;  %v2065_v22 = vshll.u32 %v2050_v8, 16  ;;  %v2070_v6 = vshrl.u32 %v2051_v39, 16 }
 0x124   :  { %1247 = vst.msk [vmem:[#allocation6 + $0x88] sm:$0xff] %vm1133_vm5, %v1215_v5  ;;  %v1216_v12 = vld [vmem:[#allocation5 + $0x120] sm:$0xff]  ;;  %v1766_v43 = vsel %vm1754_vm10, %v9802_v13, %v1765_v18  ;;  %v900_v0 = vrot.slane %v728_v53, 1  ;;  %v2073_v15 = vshll.u32 %v2051_v39, 16  ;;  %v1744_v62 = vsel %vm12942_vm8, %v10153_v40, 0 }
 0x125   :  { %v8382_v2 = vpop.f32.mrb[36].mxu1  ;;  %1248 = vst.msk [vmem:[#allocation6 + $0x90] sm:$0xff] %vm1133_vm5, %v1216_v12  ;;  %1171 = vst.msk [vmem:[#allocation5 + $0x128] sm:$0xff] %vm1133_vm5, %v1106_v1  ;;  %2165 = vrot.lane.b32.xlu0 %v1766_v43, %s9352_s14  ;;  %v10199_v13 = vadd.f32 %v8379_v9, %v9797_v33  ;;  %v609_v8 = vadd.f32 %v9797_v33, %v608_v17  ;;  %v2067_v55 = vrot.slane %v2065_v22, 5  ;;  %v2072_v26 = vrot.slane %v2070_v6, 4 }
 0x126   :  { %1174 = vst.msk [vmem:[#allocation5 + $0x140] sm:$0xff] %vm1133_vm5, %v1109_v45  ;;  %v621_v50 = vpop.f32.mrb[37].mxu1  ;;  %v901_v37 = vsel %vm12944_vm3, %v898_v51, %v900_v0  ;;  %v1768_v3 = vshrl.u32 %v1744_v62, 16  ;;  %v2075_v16 = vrot.slane %v2073_v15, 5  ;;  %v1771_v4 = vshll.u32 %v1744_v62, 16 }
 0x127   :  { %v8383_v23 = vpop.f32.mrb[38].mxu1  ;;  %v731_v39 = vmax.f32 %v10199_v13, 0.0  ;;  %v729_v10 = vmax.f32 %v609_v8, 0.0  ;;  %v2068_v46 = vor.u32 %v2067_v55, %v2064_v21  ;;  %v1048_v9 = vmax.f32 %v727_v27, %v901_v37 }
 0x128   :  { %v624_v34 = vpop.f32.mrb[39].mxu1  ;;  %v10204_v5 = vrot.slane %v1768_v3, 7  ;;  %v12976_v51 = vrot.slane %v9788_v61, 4  ;;  %v10213_v18 = vor.u32 %v2075_v16, %v2072_v26  ;;  %v10221_v21 = vrot.slane %v10153_v40, 4  ;;  %v1276_v3 = vld [vmem:[#allocation6 + $0x70] ss:$2 sm:$0xff] }
 0x129   :  { %v10217_v1 = vrot.slane %v731_v39, 1  ;;  %v902_v45 = vrot.slane %v729_v10, 1  ;;  %v1110_v61 = vmax.f32 %v10181_v20, %v1048_v9  ;;  %v1296_v12 = vpack.c.bf16 %v1272_v59, %v1270_v57 }
 0x12a   :  { %v1534_v17 = vsel %vm1531_vm9, %v12976_v51, %v1533_v30  ;;  %v1773_v27 = vor.u32 %v1771_v4, %v10204_v5  ;;  %v10227_v43 = vadd.f32 %v8382_v2, %v9797_v33  ;;  %v2077_v22 = vsel %vm1379_vm11, %v2068_v46, %v10213_v18  ;;  %v1274_v51 = vld [vmem:[#allocation6 + $0x60] ss:$2 sm:$0xff] }
 0x12b   :  { %2149 = vrot.lane.b32.xlu0 %v1534_v17, %s9352_s14  ;;  %v907_v6 = vsel %vm12944_vm3, %v904_v29, %v10217_v1  ;;  %v903_v15 = vsel %vm12944_vm3, %v900_v0, %v902_v45  ;;  %v905_v62 = vsel %vm12944_vm3, %v902_v45, %v904_v29  ;;  %8404 = vmatprep.mubr.msk.bf16.mxu0 %vm1133_vm5, %v2077_v22  ;;  %vm1622_vm8 = vcmp.ne.s16.totalorder %v9844_v49, 0 }
 0x12c   :  { %v1217_v8 = vld [vmem:[#allocation5 + $0x128] sm:$0xff]  ;;  %v1774_v33 = vsel %vm1754_vm10, %v10161_v19, %v1773_v27  ;;  %v1051_v20 = vmax.f32 %v730_v28, %v907_v6  ;;  %v1049_v2 = vmax.f32 %v728_v53, %v903_v15  ;;  %v10241_v55 = vmax.f32 %v729_v10, %v905_v62  ;;  %1175 = vst.msk [vmem:[#allocation5 + $0x148] sm:$0xff] %vm1133_vm5, %v1110_v61  ;;  %v10256_v28 = vld [vmem:[%s12911_s2] ss:$0 sm:$0xff] }
 0x12d   :  { %v1218_v37 = vld [vmem:[#allocation5 + $0x140] sm:$0xff]  ;;  %1300 = vst.msk [vmem:[#allocation2 + $0x18] sm:$0xff] %vm1133_vm5, %v1296_v12  ;;  %v8386_v29 = vpop.f32.mrb[40].mxu1  ;;  %1249 = vst.msk [vmem:[#allocation6 + $0x98] sm:$0xff] %vm1133_vm5, %v1217_v8  ;;  %2167 = vrot.lane.b32.xlu1 %v1774_v33, %s9352_s14  ;;  %v1536_v60 = vsel %vm1531_vm9, %v1533_v30, %v10221_v21  ;;  %v734_v19 = vmax.f32 %v10227_v43, 0.0  ;;  %v622_v53 = vadd.f32 %v10256_v28, %v621_v50  ;;  %v12977_v15 = vshll.u32 %v9806_v38, 16 }
 0x12e   :  { %1250 = vst.msk [vmem:[#allocation6 + $0xa0] sm:$0xff] %vm1133_vm5, %v1218_v37  ;;  %v10260_v0 = vadd.f32 %v10256_v28, %v8383_v23  ;;  %v637_v26 = vpop.f32.mrb[41].mxu1  ;;  %v1113_v59 = vmax.f32 %v1049_v2, %v1051_v20  ;;  %v625_v16 = vadd.f32 %v10256_v28, %v624_v34  ;;  %v10265_v9 = vadd.f32 %v10256_v28, %v8386_v29 }
 0x12f   :  { %v8387_v4 = vpop.f32.mrb[42].mxu1  ;;  %v912_v10 = vrot.slane %v734_v19, 1  ;;  %v732_v30 = vmax.f32 %v622_v53, 0.0  ;;  %v10270_v17 = vadd.f32 %v10256_v28, %v637_v26  ;;  %v1297_v45 = vpack.c.bf16 %v1276_v3, %v1274_v51 }
 0x130   :  { %v12943_v46 = vmax.f32 %v10260_v0, 0.0  ;;  %v640_v50 = vpop.f32.mrb[43].mxu1  ;;  %1178 = vst.msk [vmem:[#allocation5 + $0x160] sm:$0xff] %vm1133_vm5, %v1113_v59  ;;  %v733_v23 = vmax.f32 %v625_v16, 0.0  ;;  %v10273_v34 = vadd.f32 %v10256_v28, %v8387_v4  ;;  %v738_v61 = vmax.f32 %v10265_v9, 0.0 }
 0x131   :  { %2151 = vrot.lane.b32.xlu1 %v1536_v60, %s9352_s14  ;;  %v908_v57 = vrot.slane %v732_v30, 1  ;;  %v10280_v12 = vadd.f32 %v10256_v28, %v640_v50  ;;  %v736_v22 = vmax.f32 %v10270_v17, 0.0  ;;  %1301 = vst.msk [vmem:[#allocation2 + $0x20] sm:$0xff] %vm1133_vm5, %v1297_v45  ;;  %v10288_v62 = vrot.slane %v12977_v15, 5 }
 0x132   :  { %v914_v27 = vrot.slane %v12943_v46, 1  ;;  %v910_v43 = vrot.slane %v733_v23, 1  ;;  %v739_v6 = vmax.f32 %v10273_v34, 0.0  ;;  %v10295_v2 = vrot.slane %v738_v61, 1 }
 0x133   :  { %v1219_v8 = vld [vmem:[#allocation5 + $0x148] sm:$0xff]  ;;  %v909_v33 = vsel %vm12944_vm3, %v10217_v1, %v908_v57  ;;  %v916_v13 = vrot.slane %v736_v22, 1 }
 0x134   :  { %v10290_v37 = vld [vmem:[#allocation2 + $0x18] sm:$0xff]  ;;  %v915_v20 = vsel %vm12944_vm3, %v912_v10, %v914_v27  ;;  %1251 = vst.msk [vmem:[#allocation6 + $0xa8] sm:$0xff] %vm1133_vm5, %v1219_v8  ;;  %v911_v50 = vsel %vm12944_vm3, %v908_v57, %v910_v43  ;;  %v913_v45 = vsel %vm12944_vm3, %v910_v43, %v912_v10 }
 0x135   :  { %v2052_v38 = vsel %vm1621_vm13, %v10290_v37, 0  ;;  %v1745_v60 = vsel %vm1740_vm12, %v10290_v37, 0  ;;  %v10307_v1 = vrot.slane %v10290_v37, 4  ;;  %v1055_v53 = vmax.f32 %v734_v19, %v915_v20  ;;  %v8390_v26 = vpop.f32.mrb[44].mxu1 }
 0x136   :  { %v2079_v3 = vshrl.u32 %v2052_v38, 16  ;;  %v2082_v59 = vshll.u32 %v2052_v38, 16  ;;  %v1776_v16 = vshrl.u32 %v1745_v60, 16  ;;  %v1779_v4 = vshll.u32 %v1745_v60, 16  ;;  %v10310_v9 = vpop.f32.mrb[45].mxu1 }
 0x137   :  { %v1538_v51 = vsel %vm1531_vm9, %v10221_v21, %v10307_v1  ;;  %v1052_v19 = vmax.f32 %v731_v39, %v909_v33  ;;  %v10319_v15 = vpop.f32.mrb[46].mxu1  ;;  %v1220_v8 = vld [vmem:[#allocation5 + $0x160] sm:$0xff]  ;;  %v1053_v60 = vmax.f32 %v732_v30, %v911_v50  ;;  %v1054_v57 = vmax.f32 %v733_v23, %v913_v45 }
 0x138   :  { %v2081_v20 = vrot.slane %v2079_v3, 4  ;;  %v2084_v38 = vrot.slane %v2082_v59, 5  ;;  %v10321_v46 = vrot.slane %v1776_v16, 7  ;;  %2153 = vrot.lane.b32.xlu1 %v1538_v51, %s9352_s14  ;;  %v10324_v29 = vpop.f32.mrb[47].mxu1  ;;  %1252 = vst.msk [vmem:[#allocation6 + $0xb0] sm:$0xff] %vm1133_vm5, %v1220_v8  ;;  %v10332_v39 = vrot.slane %v739_v6, 1 }
 0x139   :  { %v1114_v10 = vmax.f32 %v10241_v55, %v1052_v19  ;;  %v1117_v3 = vmax.f32 %v1053_v60, %v1055_v53  ;;  %v1350_v30 = vld [vmem:[#allocation2 + $0x20] sm:$0xf]  ;;  %v10337_v59 = vld [vmem:[#allocation2 + $0x30] sm:$0xf0]  ;;  %v917_v23 = vsel %vm12944_vm3, %v914_v27, %v916_v13  ;;  %v2103_v45 = vor.u32 %v10288_v62, %v9869_v52 }
 0x13a   :  { %v10334_v43 = vor.u32 %v2084_v38, %v2081_v20  ;;  %v1781_v33 = vor.u32 %v1779_v4, %v10321_v46  ;;  %v923_v55 = vsel %vm12944_vm3, %v10295_v2, %v10332_v39  ;;  %v10346_v16 = vsel %vm1419_vm1, %v1350_v30, 0  ;;  %v10348_v51 = vld [vmem:[#allocation2 + $0x20] sm:$0xff]  ;;  %v1747_v50 = vld [vmem:[#allocation2 + $0x30] sm:$0x80] }
 0x13b   :  { %1179 = vst.msk [vmem:[#allocation5 + $0x168] sm:$0xff] %vm1133_vm5, %v1114_v10  ;;  %1182 = vst.msk [vmem:[#allocation5 + $0x180] sm:$0xff] %vm1133_vm5, %v1117_v3  ;;  %v1059_v27 = vmax.f32 %v738_v61, %v923_v55  ;;  %v8628_v19 = vld [vmem:[%s12912_s3 + $0xc0] sm:$0xff]   ;;  %v1539_v8 = vrot.slane %v1350_v30, 4  ;;  %v2053_v52 = vsel %vm1622_vm8, %v10348_v51, 0  ;;  %v1746_v62 = vsel %vm1741_vm2, %v10348_v51, 0 }
 0x13c   :  { %v2086_v53 = vsel %vm1379_vm11, %v10213_v18, %v10334_v43  ;;  %v1782_v4 = vsel %vm1754_vm10, %v10204_v5, %v1781_v33  ;;  %v12978_v18 = vmax.f32 %v10280_v12, 0.0  ;;  %v12979_v5 = vmax.f32 %v10260_v0, 0.0  ;;  %8217 = vmatprep.subr.bf16.mxu1 %v8628_v19 }
 0x13d   :  { %8405 = vmatmul.mubr.msk.bf16.vlgmr.msra.gmra.mrb[12].mxu0 %vm1133_vm5, %v2086_v53  ;;  %2169 = vrot.lane.b32.xlu0 %v1782_v4, %s9352_s14  ;;  %v8394_v60 = vpop.f32.mrb[48].mxu1  ;;  %v10375_v10 = vadd.f32 %v10256_v28, %v8390_v26  ;;  %v10379_v3 = vsel %vm1737_vm14, %v1747_v50, 0  ;;  %v1540_v0 = vsel %vm1531_vm9, %v10307_v1, %v1539_v8  ;;  %v10389_v26 = vsel %vm1839_vm0, %v10139_v25, 0 }
 0x13e   :  { %v918_v20 = vrot.slane %v12978_v18, 1  ;;  %v1056_v38 = vmax.f32 %v12979_v5, %v917_v23  ;;  %v669_v33 = vpop.f32.mrb[49].mxu1  ;;  %2155 = vrot.lane.b32.xlu1 %v1540_v0, %s9352_s14  ;;  %v12980_v50 = vmov %v12978_v18  ;;  %v2091_v8 = vshll.u32 %v2053_v52, 16 }
 0x13f   :  { %v8395_v55 = vpop.f32.mrb[50].mxu1  ;;  %v1787_v18 = vshll.u32 %v1746_v62, 16  ;;  %vm1840_vm14 = vcmp.ne.s16.totalorder %v9725_v35, 0 }
 0x140   :  { %v919_v30 = vsel %vm12944_vm3, %v916_v13, %v918_v20  ;;  %v921_v23 = vsel %vm12944_vm3, %v918_v20, %v10295_v2  ;;  %v1118_v4 = vmax.f32 %v1054_v57, %v1056_v38  ;;  %v2088_v13 = vshrl.u32 %v2053_v52, 16  ;;  %v672_v19 = vpop.f32.mrb[51].mxu1 }
 0x141   :  { %v1057_v58 = vmax.f32 %v736_v22, %v919_v30  ;;  %v10396_v53 = vmax.f32 %v12980_v50, %v921_v23  ;;  %v1784_v2 = vshrl.u32 %v1746_v62, 16  ;;  %v742_v20 = vmax.f32 %v10375_v10, 0.0 }
 0x142   :  { %v1221_v5 = vld [vmem:[#allocation5 + $0x168] sm:$0xff]  ;;  %1183 = vst.msk [vmem:[#allocation5 + $0x188] sm:$0xff] %vm1133_vm5, %v1118_v4  ;;  %v2090_v0 = vrot.slane %v2088_v13, 4  ;;  %v1222_v61 = vld [vmem:[#allocation5 + $0x180] sm:$0xff]  ;;  %v2093_v17 = vrot.slane %v2091_v8, 5  ;;  %v654_v57 = vadd.f32 %v10256_v28, %v10310_v9  ;;  %v665_v38 = vadd.f32 %v10256_v28, %v10319_v15 }
 0x143   :  { %v1121_v25 = vmax.f32 %v1057_v58, %v1059_v27  ;;  %1253 = vst.msk [vmem:[#allocation6 + $0xb8] sm:$0xff] %vm1133_vm5, %v1221_v5  ;;  %v1786_v12 = vrot.slane %v1784_v2, 7  ;;  %v928_v22 = vrot.slane %v742_v20, 1  ;;  %1254 = vst.msk [vmem:[#allocation6 + $0xc0] sm:$0xff] %vm1133_vm5, %v1222_v61  ;;  %v657_v27 = vadd.f32 %v10256_v28, %v10324_v29  ;;  %v1280_v4 = vld [vmem:[#allocation6 + $0x90] ss:$2 sm:$0xff] }
 0x144   :  { %v678_v52 = vadd.f32 %v10256_v28, %v8394_v60  ;;  %v10411_v62 = vadd.f32 %v10256_v28, %v669_v33  ;;  %v2094_v10 = vor.u32 %v2093_v17, %v2090_v0  ;;  %v740_v9 = vmax.f32 %v654_v57, 0.0  ;;  %v1278_v5 = vld [vmem:[#allocation6 + $0x80] ss:$2 sm:$0xff] }
 0x145   :  { %1186 = vst.msk [vmem:[#allocation5 + $0x1a0] sm:$0xff] %vm1133_vm5, %v1121_v25  ;;  %v1789_v30 = vor.u32 %v1787_v18, %v1786_v12  ;;  %v681_v61 = vadd.f32 %v10256_v28, %v8395_v55  ;;  %v743_v23 = vmax.f32 %v665_v38, 0.0  ;;  %v741_v58 = vmax.f32 %v657_v27, 0.0 }
 0x146   :  { %v746_v50 = vmax.f32 %v678_v52, 0.0  ;;  %v744_v15 = vmax.f32 %v10411_v62, 0.0  ;;  %v2095_v29 = vsel %vm1379_vm11, %v10334_v43, %v2094_v10  ;;  %v2104_v33 = vsel %vm1379_vm11, %v2094_v10, %v2103_v45 }
 0x147   :  { %v1790_v60 = vsel %vm1754_vm10, %v10321_v46, %v1789_v30  ;;  %v924_v13 = vrot.slane %v740_v9, 1  ;;  %8408 = vmatprep.mubr.msk.bf16.mxu0 %vm1133_vm5, %v2095_v29  ;;  %v930_v55 = vrot.slane %v743_v23, 1  ;;  %v926_v8 = vrot.slane %v741_v58, 1 }
 0x148   :  { %2171 = vrot.lane.b32.xlu0 %v1790_v60, %s9352_s14  ;;  %v936_v2 = vrot.slane %v746_v50, 1  ;;  %v932_v18 = vrot.slane %v744_v15, 1  ;;  %8409 = vmatmul.mubr.msk.bf16.gmra.mrb[16].mxu0 %vm1133_vm5, %v2104_v33  ;;  %v747_v0 = vmax.f32 %v681_v61, 0.0  ;;  %v1304_v46 = vpack.c.bf16 %v1280_v4, %v1278_v5 }
 0x149   :  { %v1223_v25 = vld [vmem:[#allocation5 + $0x188] sm:$0xff]  ;;  %v925_v43 = vsel %vm12944_vm3, %v10332_v39, %v924_v13  ;;  %v673_v45 = vadd.f32 %v10256_v28, %v672_v19  ;;  %v931_v17 = vsel %vm12944_vm3, %v928_v22, %v930_v55  ;;  %v927_v12 = vsel %vm12944_vm3, %v924_v13, %v926_v8 }
 0x14a   :  { %1255 = vst.msk [vmem:[#allocation6 + $0xc8] sm:$0xff] %vm1133_vm5, %v1223_v25  ;;  %v929_v57 = vsel %vm12944_vm3, %v926_v8, %v928_v22  ;;  %v1060_v38 = vmax.f32 %v739_v6, %v925_v43  ;;  %v1284_v27 = vld [vmem:[#allocation6 + $0xb0] ss:$2 sm:$0xff]  ;;  %v1063_v62 = vmax.f32 %v742_v20, %v931_v17  ;;  %v1061_v10 = vmax.f32 %v740_v9, %v927_v12  ;;  %v1282_v22 = vld [vmem:[#allocation6 + $0xa0] ss:$2 sm:$0xff] }
 0x14b   :  { %v1062_v39 = vmax.f32 %v741_v58, %v929_v57  ;;  %v933_v30 = vsel %vm12944_vm3, %v930_v55, %v932_v18  ;;  %1308 = vst.msk [vmem:[#allocation2 + $0x38] sm:$0xff] %vm1133_vm5, %v1304_v46  ;;  %v938_v19 = vrot.slane %v747_v0, 1  ;;  %v745_v61 = vmax.f32 %v673_v45, 0.0 }
 0x14c   :  { %v1224_v52 = vld [vmem:[#allocation5 + $0x1a0] sm:$0xff]  ;;  %v1122_v28 = vmax.f32 %v10396_v53, %v1060_v38  ;;  %v1064_v4 = vmax.f32 %v743_v23, %v933_v30  ;;  %v1125_v29 = vmax.f32 %v1061_v10, %v1063_v62  ;;  %v1305_v34 = vpack.c.bf16 %v1284_v27, %v1282_v22 }
 0x14d   :  { %1256 = vst.msk [vmem:[#allocation6 + $0xd0] sm:$0xff] %vm1133_vm5, %v1224_v52  ;;  %v939_v6 = vsel %vm12944_vm3, %v936_v2, %v938_v19  ;;  %v1004_v20 = vsel %vm12944_vm3, %v938_v19, 0.0  ;;  %v934_v9 = vrot.slane %v745_v61, 1  ;;  %v10445_v53 = vsel %vm1840_vm14, %v10153_v40, 0 }
 0x14e   :  { %1187 = vst.msk [vmem:[#allocation5 + $0x1a8] sm:$0xff] %vm1133_vm5, %v1122_v28  ;;  %v1126_v58 = vmax.f32 %v1062_v39, %v1064_v4  ;;  %1190 = vst.msk [vmem:[#allocation5 + $0x1c0] sm:$0xff] %vm1133_vm5, %v1125_v29  ;;  %v1067_v60 = vmax.f32 %v746_v50, %v939_v6  ;;  %v1068_v33 = vmax.f32 %v747_v0, %v1004_v20  ;;  %v1856_v23 = vshrl.u32 %v10389_v26, 16 }
 0x14f   :  { %1309 = vst.msk [vmem:[#allocation2 + $0x40] sm:$0xff] %vm1133_vm5, %v1305_v34  ;;  %v935_v13 = vsel %vm12944_vm3, %v932_v18, %v934_v9  ;;  %v937_v55 = vsel %vm12944_vm3, %v934_v9, %v936_v2  ;;  %v1858_v8 = vshll.u32 %v10389_v26, 16  ;;  %v1863_v50 = vshll.u32 %v10445_v53, 16 }
 0x150   :  { %1191 = vst.msk [vmem:[#allocation5 + $0x1c8] sm:$0xff] %vm1133_vm5, %v1126_v58  ;;  %v1065_v5 = vmax.f32 %v744_v15, %v935_v13  ;;  %v1066_v25 = vmax.f32 %v745_v61, %v937_v55  ;;  %v1792_v0 = vshrl.u32 %v10379_v3, 16  ;;  %v12981_v3 = vrot.slane %v10337_v59, 4 }
 0x151   :  { %v1860_v46 = vrot.slane %v1858_v8, 1  ;;  %v10458_v45 = vrot.slane %v1863_v50, 1  ;;  %vm1841_vm3 = vcmp.ne.s16.totalorder %v9883_v31, 0 }
 0x152   :  { %v10453_v43 = vld [vmem:[#allocation2 + $0x38] sm:$0xff]  ;;  %v1129_v2 = vmax.f32 %v1065_v5, %v1067_v60  ;;  %v1130_v17 = vmax.f32 %v1066_v25, %v1068_v33  ;;  %v1794_v63 = vrot.slane %v1792_v0, 7  ;;  %v10493_v33 = vld [vmem:[#allocation2 + $0x28] sm:$0xf] }
 0x153   :  { %v10456_v40 = vld [vmem:[#allocation2 + $0x38] sm:$0xf0]  ;;  %v1547_v18 = vrot.slane %v10453_v43, 4  ;;  %v1750_v26 = vsel %vm1738_vm4, %v10453_v43, 0  ;;  %v1861_v12 = vor.u32 %v1860_v46, %v1856_v23  ;;  %vm12982_vm4 = vcmp.ne.s16.totalorder %v9815_v44, 0 }
 0x154   :  { %v2056_v15 = vsel %vm1619_vm6, %v10456_v40, 0  ;;  %1194 = vst.msk [vmem:[#allocation5 + $0x1e0] sm:$0xff] %vm1133_vm5, %v1129_v2  ;;  %v1796_v27 = vshrl.u32 %v1750_v26, 16  ;;  %1195 = vst.msk [vmem:[#allocation5 + $0x1e8] sm:$0xff] %vm1133_vm5, %v1130_v17  ;;  %v1799_v10 = vshll.u32 %v1750_v26, 16  ;;  %v2034_v46 = vrot.slane %v10141_v14, 4 }
 0x155   :  { %v1225_v57 = vld [vmem:[#allocation5 + $0x1a8] sm:$0xff]  ;;  %v1548_v38 = vsel %vm1531_vm9, %v12981_v3, %v1547_v18  ;;  %v2106_v52 = vshrl.u32 %v2056_v15, 16  ;;  %v1226_v62 = vld [vmem:[#allocation5 + $0x1c0] sm:$0xff]  ;;  %v2109_v30 = vshll.u32 %v2056_v15, 16  ;;  %v10478_v59 = vsel %vm1725_vm15, %v1861_v12, %v10458_v45 }
 0x156   :  { %1257 = vst.msk [vmem:[#allocation6 + $0xd8] sm:$0xff] %vm1133_vm5, %v1225_v57  ;;  %2157 = vrot.lane.b32.xlu1 %v1548_v38, %s9352_s14  ;;  %v10474_v39 = vld [vmem:[#allocation2 + $0x40] sm:$0xff]  ;;  %1258 = vst.msk [vmem:[#allocation6 + $0xe0] sm:$0xff] %vm1133_vm5, %v1226_v62  ;;  %v1798_v19 = vrot.slane %v1796_v27, 7  ;;  %v2055_v0 = vld [vmem:[#allocation2 + $0x58] sm:$0x1f]  ;;  %v10516_v14 = vsel %vm1531_vm9, %v2034_v46, %v10221_v21 }
 0x157   :  { %v1227_v28 = vld [vmem:[#allocation5 + $0x1c8] sm:$0xff]  ;;  %v10482_v61 = vrot.slane %v10474_v39, 4  ;;  %v2057_v4 = vsel %vm1620_vm7, %v10474_v39, 0  ;;  %v2108_v22 = vrot.slane %v2106_v52, 4  ;;  %v2111_v29 = vrot.slane %v2109_v30, 5 }
 0x158   :  { %1259 = vst.msk [vmem:[#allocation6 + $0xe8] sm:$0xff] %vm1133_vm5, %v1227_v28  ;;  %v2114_v34 = vshrl.u32 %v2057_v4, 16  ;;  %v2117_v6 = vshll.u32 %v2057_v4, 16  ;;  %v1751_v20 = vsel %vm12982_vm4, %v10474_v39, 0  ;;  %v1801_v9 = vor.u32 %v1799_v10, %v1798_v19  ;;  %v1286_v26 = vld [vmem:[#allocation6 + $0xc0] ss:$2 sm:$0xff] }
 0x159   :  { %v1550_v58 = vsel %vm1531_vm9, %v1547_v18, %v10482_v61  ;;  %v1804_v60 = vshrl.u32 %v1751_v20, 16  ;;  %v1807_v50 = vshll.u32 %v1751_v20, 16  ;;  %v2112_v5 = vor.u32 %v2111_v29, %v2108_v22  ;;  %v1827_v30 = vld [vmem:[#allocation2 + $0x28] sm:$0x1]  ;;  %v10543_v20 = vld [vmem:[#allocation2 + $0x58] sm:$0xf] }
 0x15a   :  { %2159 = vrot.lane.b32.xlu1 %v1550_v58, %s9352_s14  ;;  %v2116_v23 = vrot.slane %v2114_v34, 4  ;;  %v2119_v13 = vrot.slane %v2117_v6, 5  ;;  %v1802_v55 = vsel %vm1754_vm10, %v1794_v63, %v1801_v9  ;;  %v10507_v18 = vsel %vm1419_vm1, %v10493_v33, 0 }
 0x15b   :  { %v10497_v8 = vrot.slane %v1804_v60, 7  ;;  %v1228_v44 = vld [vmem:[#allocation5 + $0x1e0] sm:$0xff]  ;;  %2173 = vrot.lane.b32.xlu0 %v1802_v55, %s9352_s14  ;;  %v1229_v2 = vld [vmem:[#allocation5 + $0x1e8] sm:$0xff]  ;;  %v1846_v38 = vsel %vm1841_vm3, %v10290_v37, 0  ;;  %vm12983_vm4 = vcmp.ne.s16.totalorder %v9778_v24, 0  ;;  %v1867_v52 = vshrl.u32 %v10445_v53, 16 }
 0x15c   :  { %v10501_v25 = vor.u32 %v2119_v13, %v2116_v23  ;;  %1260 = vst.msk [vmem:[#allocation6 + $0xf0] sm:$0xff] %vm1133_vm5, %v1228_v44  ;;  %1261 = vst.msk [vmem:[#allocation6 + $0xf8] sm:$0xff] %vm1133_vm5, %v1229_v2  ;;  %v10527_v27 = vsel %vm12983_vm4, %v2055_v0, 0  ;;  %v1871_v21 = vshll.u32 %v1846_v38, 16  ;;  %v12984_v62 = vshrl.u32 %v9745_v56, 16 }
 0x15d   :  { %v1809_v17 = vor.u32 %v1807_v50, %v10497_v8  ;;  %v1288_v15 = vld [vmem:[#allocation6 + $0xd0] ss:$2 sm:$0xff]  ;;  %v1851_v10 = vsel %vm1840_vm14, %v10474_v39, 0  ;;  %v1869_v28 = vor.u32 %v1867_v52, %v10458_v45  ;;  %v1850_v22 = vsel %vm1839_vm0, %v10453_v43, 0 }
 0x15e   :  { %v2121_v12 = vsel %vm1379_vm11, %v2112_v5, %v10501_v25  ;;  %v1306_v57 = vpack.c.bf16 %v1288_v15, %v1286_v26  ;;  %v1836_v63 = vrot.slane %v12984_v62, 7  ;;  %v1899_v4 = vshll.u32 %v1851_v10, 16 }
 0x15f   :  { %8412 = vmatprep.mubr.msk.bf16.mxu0 %vm1133_vm5, %v2121_v12  ;;  %v1810_v3 = vsel %vm1754_vm10, %v1798_v19, %v1809_v17  ;;  %v1873_v19 = vrot.slane %v1871_v21, 1  ;;  %v2141_v29 = vshrl.u32 %v10527_v27, 16  ;;  %v2144_v53 = vshll.u32 %v10527_v27, 16  ;;  %v1290_v35 = vld [vmem:[#allocation6 + $0xe0] ss:$2 sm:$0xff] }
 0x160   :  { %2175 = vrot.lane.b32.xlu0 %v1810_v3, %s9352_s14  ;;  %1310 = vst.msk [vmem:[#allocation2 + $0x48] sm:$0xff] %vm1133_vm5, %v1306_v57  ;;  %v12985_v34 = vshll.u32 %v9745_v56, 16  ;;  %vm1843_vm4 = vcmp.ne.s16.totalorder %v1836_v63, 0  ;;  %v1875_v45 = vshrl.u32 %v1846_v38, 16  ;;  %v1903_v58 = vshrl.u32 %v1851_v10, 16 }
 0x161   :  { %v10546_v9 = vsel %vm1725_vm15, %v1869_v28, %v1873_v19  ;;  %v1848_v60 = vsel %vm1843_vm4, %v1827_v30, 0  ;;  %v1892_v55 = vshrl.u32 %v1850_v22, 16  ;;  %v1894_v50 = vshll.u32 %v1850_v22, 16  ;;  %v1849_v22 = vld [vmem:[#allocation2 + $0x58] sm:$0x1] }
 0x162   :  { %v1837_v6 = vor.u32 %v1836_v63, %v12985_v34  ;;  %v1887_v13 = vshll.u32 %v1848_v60, 16  ;;  %v1877_v44 = vor.u32 %v1875_v45, %v1873_v19  ;;  %v1901_v5 = vrot.slane %v1899_v4, 1 }
 0x163   :  { %v1292_v32 = vld [vmem:[#allocation6 + $0xf0] ss:$2 sm:$0xff]  ;;  %v1896_v17 = vrot.slane %v1894_v50, 1  ;;  %v10558_v26 = vsel %vm1419_vm1, %v10543_v20, 0  ;;  %v2143_v50 = vrot.slane %v2141_v29, 4 }
 0x164   :  { %v1838_v23 = vsel %vm1754_vm10, %v9808_v41, %v1837_v6  ;;  %v1307_v56 = vpack.c.bf16 %v1292_v32, %v1290_v35  ;;  %v1889_v2 = vrot.slane %v1887_v13, 1  ;;  %v1905_v32 = vor.u32 %v1903_v58, %v1901_v5 }
 0x165   :  { %vm1842_vm0 = vcmp.ne.s16.totalorder %v1838_v23, 0  ;;  %v1897_v35 = vor.u32 %v1896_v17, %v1892_v55  ;;  %v2146_v58 = vrot.slane %v2144_v53, 5  ;;  %vm12990_vm14 = vsmask.f32 4352 }
 0x166   :  { %v1847_v46 = vsel %vm1842_vm0, %v10348_v51, 0  ;;  %1311 = vst.msk [vmem:[#allocation2 + $0x50] sm:$0xff] %vm1133_vm5, %v1307_v56 }
 0x167   :  { %v10551_v0 = vld [vmem:[#allocation2 + $0x48] sm:$0xff]  ;;  %v1879_v57 = vshll.u32 %v1847_v46, 16  ;;  %v1883_v30 = vshrl.u32 %v1847_v46, 16  ;;  %v10584_v56 = vsel %vm1725_vm15, %v1897_v35, %v1901_v5  ;;  %v1854_v46 = vsel %vm1843_vm4, %v1849_v22, 0  ;;  %vm12991_vm4 = vmmov %vm12990_vm14 }
 0x168   :  { %v10561_v41 = vrot.slane %v10551_v0, 4  ;;  %v2058_v15 = vsel %vm1621_vm13, %v10551_v0, 0  ;;  %v1752_v12 = vsel %vm1740_vm12, %v10551_v0, 0  ;;  %v1852_v10 = vsel %vm1841_vm3, %v10551_v0, 0 }
 0x169   :  { %v2123_v3 = vshrl.u32 %v2058_v15, 16  ;;  %v2126_v38 = vshll.u32 %v2058_v15, 16  ;;  %v1812_v27 = vshrl.u32 %v1752_v12, 16  ;;  %v1815_v52 = vshll.u32 %v1752_v12, 16 }
 0x16a   :  { %v1552_v21 = vsel %vm1531_vm9, %v10482_v61, %v10561_v41  ;;  %v1881_v62 = vrot.slane %v1879_v57, 1  ;;  %v1907_v4 = vshll.u32 %v1852_v10, 16  ;;  %v1923_v12 = vshll.u32 %v1854_v46, 16 }
 0x16b   :  { %2161 = vrot.lane.b32.xlu1 %v1552_v21, %s9352_s14  ;;  %v2125_v54 = vrot.slane %v2123_v3, 4  ;;  %v2128_v28 = vrot.slane %v2126_v38, 5  ;;  %v1814_v19 = vrot.slane %v1812_v27, 7  ;;  %v2147_v21 = vor.u32 %v2146_v58, %v2143_v50  ;;  %v1346_v50 = vld [vmem:[#allocation2] sm:$0xf8] }
 0x16c   :  { %v10578_v34 = vsel %vm1725_vm15, %v1877_v44, %v1881_v62  ;;  %v1885_v6 = vor.u32 %v1883_v30, %v1881_v62  ;;  %v1909_v13 = vrot.slane %v1907_v4, 1  ;;  %v2036_v4 = vrot.slane %v10348_v51, 4 }
 0x16d   :  { %v2129_v45 = vor.u32 %v2128_v28, %v2125_v54  ;;  %v1817_v60 = vor.u32 %v1815_v52, %v1814_v19  ;;  %v1429_v55 = vld [vmem:[#allocation2 + $0x50] sm:$0xf]  ;;  %v1911_v54 = vshrl.u32 %v1852_v10, 16  ;;  %v1925_v22 = vrot.slane %v1923_v12, 1  ;;  %v10645_v12 = vld [vmem:[#allocation2 + $0x8] sm:$0xff] }
 0x16e   :  { %v10581_v31 = vsel %vm1725_vm15, %v1885_v6, %v1889_v2  ;;  %v10591_v17 = vld [vmem:[#allocation2 + $0x50] sm:$0xff]  ;;  %v10594_v29 = vsel %vm1725_vm15, %v1905_v32, %v1909_v13  ;;  %v10600_v63 = vsel %vm1419_vm1, %v1429_v55, 0  ;;  %v1553_v5 = vrot.slane %v1429_v55, 4 }
 0x16f   :  { %v2130_v15 = vsel %vm1379_vm11, %v10501_v25, %v2129_v45  ;;  %v1818_v44 = vsel %vm1754_vm10, %v10497_v8, %v1817_v60  ;;  %v2059_v8 = vsel %vm1622_vm8, %v10591_v17, 0  ;;  %v1753_v25 = vsel %vm1741_vm2, %v10591_v17, 0 }
 0x170   :  { %8413 = vmatmul.mubr.msk.bf16.gmra.mrb[20].mxu0 %vm1133_vm5, %v2130_v15  ;;  %2177 = vrot.lane.b32.xlu0 %v1818_v44, %s9352_s14  ;;  %v2132_v53 = vshrl.u32 %v2059_v8, 16  ;;  %v2135_v2 = vshll.u32 %v2059_v8, 16  ;;  %v1554_v57 = vsel %vm1531_vm9, %v10561_v41, %v1553_v5  ;;  %v1820_v3 = vshrl.u32 %v1753_v25, 16  ;;  %v12989_v8 = vld [vmem:[#allocation17_spill] sm:$0xff] }
 0x171   :  { %v1853_v38 = vsel %vm1842_vm0, %v10591_v17, 0  ;;  %2163 = vrot.lane.b32.xlu1 %v1554_v57, %s9352_s14  ;;  %v1823_v30 = vshll.u32 %v1753_v25, 16  ;;  %v1913_v35 = vor.u32 %v1911_v54, %v1909_v13  ;;  %v12986_v15 = vshll.u32 %v9756_v7, 16  ;;  %vm12992_vm0 = vmmov %vm12991_vm4 }
 0x172   :  { %v2134_v27 = vrot.slane %v2132_v53, 4  ;;  %v2137_v52 = vrot.slane %v2135_v2, 5  ;;  %v1822_v62 = vrot.slane %v1820_v3, 7  ;;  %v1915_v42 = vshll.u32 %v1853_v38, 16  ;;  %v9294_v3 = vld [vmem:[#allocation2] sm:$0xf0] }
 0x173   :  { %v1919_v32 = vshrl.u32 %v1853_v38, 16  ;;  %v1403_v10 = vrot.slane %v12986_v15, 5  ;;  %v12987_v58 = vshrl.u32 %v9756_v7, 16  ;;  %vm1415_vm1 = vcmp.ne.s16.totalorder %v12989_v8, 0 }
 0x174   :  { %v2138_v28 = vor.u32 %v2137_v52, %v2134_v27  ;;  %v1825_v6 = vor.u32 %v1823_v30, %v1822_v62  ;;  %v1917_v60 = vrot.slane %v1915_v42, 1  ;;  %v1420_v7 = vsel %vm1415_vm1, %v1346_v50, 0 }
 0x175   :  { %2181 = vrot.lane.b32.xlu1 %v10478_v59, %s9352_s14  ;;  %v1400_v5 = vrot.slane %v12987_v58, 4  ;;  %v2038_v59 = vrot.slane %v10493_v33, 4  ;;  %v1437_v33 = vshrl.u32 %v1420_v7, 16  ;;  %v1440_v2 = vshll.u32 %v1420_v7, 16 }
 0x176   :  { %v2139_v23 = vsel %vm1379_vm11, %v2129_v45, %v2138_v28  ;;  %v2148_v46 = vsel %vm1379_vm11, %v2138_v28, %v2147_v21  ;;  %v1826_v44 = vsel %vm1754_vm10, %v1814_v19, %v1825_v6  ;;  %v10623_v55 = vsel %vm1725_vm15, %v1913_v35, %v1917_v60  ;;  %v12988_v45 = vld [vmem:[#allocation18_spill] sm:$0xff] }
 0x177   :  { %8416 = vmatprep.mubr.msk.bf16.mxu0 %vm1133_vm5, %v2139_v23  ;;  %v1921_v13 = vor.u32 %v1919_v32, %v1917_v60  ;;  %2179 = vrot.lane.b32.xlu0 %v1826_v44, %s9352_s14  ;;  %v10633_v25 = vsel %vm1379_vm11, %v12989_v8, %v12988_v45  ;;  %v2037_v19 = vsel %vm1531_vm9, %v10307_v1, %v2036_v4  ;;  %v1624_v1 = vsel %vm1619_vm6, %v9294_v3, 0  ;;  %v8631_v8 = vld [vmem:[%s12912_s3 + $0x88] sm:$0xff]  }
 0x178   :  { %8417 = vmatmul.mubr.msk.bf16.gmra.mrb[24].mxu0 %vm1133_vm5, %v2148_v46  ;;  %vm1416_vm2 = vcmp.ne.s16.totalorder %v10633_v25, 0  ;;  %v1472_v38 = vshrl.u32 %v10346_v16, 16  ;;  %v1475_v21 = vshll.u32 %v10346_v16, 16  ;;  %v1439_v62 = vrot.slane %v1437_v33, 3  ;;  %v10670_v46 = vld [vmem:[#allocation2 + $0x10] sm:$0xff] }
 0x179   :  { %v10639_v53 = vsel %vm1725_vm15, %v1921_v13, %v1925_v22  ;;  %2199 = vrot.lane.b32.xlu1 %v2037_v19, %s9352_s14  ;;  %v1421_v57 = vsel %vm1416_vm2, %v10645_v12, 0  ;;  %v1442_v30 = vrot.slane %v1440_v2, 4  ;;  %v1404_v54 = vor.u32 %v1403_v10, %v1400_v5  ;;  %v1425_v19 = vld [vmem:[#allocation2 + $0x30] sm:$0xf8] }
 0x17a   :  { %v1445_v27 = vshrl.u32 %v1421_v57, 16  ;;  %v1448_v52 = vshll.u32 %v1421_v57, 16  ;;  %v2039_v42 = vsel %vm1531_vm9, %v2036_v4, %v2038_v59  ;;  %v1636_v60 = vshrl.u32 %v1624_v1, 16 }
 0x17b   :  { %2197 = vrot.lane.b32.xlu0 %v10516_v14, %s9352_s14  ;;  %v1443_v6 = vor.u32 %v1442_v30, %v1439_v62  ;;  %v10660_v35 = vsel %vm1379_vm11, %v12988_v45, %v1404_v54  ;;  %v10664_v16 = vsel %vm1379_vm11, %v1404_v54, %v9739_v47  ;;  %v2043_v14 = vrot.slane %v10456_v40, 4 }
 0x17c   :  { %v1447_v28 = vrot.slane %v1445_v27, 3  ;;  %v1450_v22 = vrot.slane %v1448_v52, 4  ;;  %vm1417_vm3 = vcmp.ne.s16.totalorder %v10660_v35, 0  ;;  %v1474_v4 = vrot.slane %v1472_v38, 3 }
 0x17d   :  { %2201 = vrot.lane.b32.xlu1 %v2039_v42, %s9352_s14  ;;  %v1477_v23 = vrot.slane %v1475_v21, 4  ;;  %v1422_v50 = vsel %vm1417_vm3, %v10670_v46, 0  ;;  %vm1418_vm12 = vcmp.ne.s16.totalorder %v10664_v16, 0  ;;  %v2044_v47 = vsel %vm1531_vm9, %v2043_v14, %v10482_v61 }
 0x17e   :  { %v1451_v32 = vor.u32 %v1450_v22, %v1447_v28  ;;  %v1454_v15 = vshrl.u32 %v1422_v50, 16  ;;  %v1457_v10 = vshll.u32 %v1422_v50, 16  ;;  %v1639_v44 = vshll.u32 %v1624_v1, 16 }
 0x17f   :  { %2183 = vrot.lane.b32.xlu0 %v10546_v9, %s9352_s14  ;;  %v1423_v9 = vsel %vm1418_vm12, %v10290_v37, 0  ;;  %v10685_v45 = vrot.slane %v1636_v60, 4  ;;  %v1625_v61 = vsel %vm1620_vm7, %v10645_v12, 0  ;;  %v1478_v57 = vor.u32 %v1477_v23, %v1474_v4 }
 0x180   :  { %v10679_v40 = vsel %vm12990_vm14, %v1443_v6, %v1451_v32  ;;  %v1456_v13 = vrot.slane %v1454_v15, 3  ;;  %v1459_v58 = vrot.slane %v1457_v10, 4  ;;  %v1463_v5 = vshrl.u32 %v1423_v9, 16  ;;  %vm12993_vm14 = vmmov %vm12992_vm0 }
 0x181   :  { %2203 = vrot.lane.b32.xlu1 %v2044_v47, %s9352_s14  ;;  %v1466_v59 = vshll.u32 %v1423_v9, 16  ;;  %v10692_v3 = vrot.slane %v1639_v44, 5  ;;  %v1977_v1 = vshrl.u32 %v10507_v18, 16  ;;  %v1980_v38 = vshll.u32 %v10507_v18, 16 }
 0x182   :  { %v1460_v7 = vor.u32 %v1459_v58, %v1456_v13  ;;  %v1465_v33 = vrot.slane %v1463_v5, 3  ;;  %v1644_v27 = vshrl.u32 %v1625_v61, 16  ;;  %v1430_v62 = vsel %vm1415_vm1, %v1425_v19, 0 }
 0x183   :  { %2185 = vrot.lane.b32.xlu0 %v10578_v34, %s9352_s14  ;;  %v1468_v2 = vrot.slane %v1466_v59, 4  ;;  %v2021_v34 = vshrl.u32 %v10558_v26, 16  ;;  %v1516_v30 = vshrl.u32 %v10600_v63, 16  ;;  %v1647_v54 = vshll.u32 %v1625_v61, 16 }
 0x184   :  { %v10700_v52 = vsel %vm12991_vm4, %v1451_v32, %v1460_v7  ;;  %v1431_v18 = vsel %vm1416_vm2, %v10453_v43, 0  ;;  %v1626_v42 = vsel %vm1621_vm13, %v10670_v46, 0  ;;  %v1484_v6 = vshll.u32 %v1430_v62, 16  ;;  %vm12994_vm4 = vmmov %vm12992_vm0 }
 0x185   :  { %2191 = vrot.lane.b32.xlu1 %v10594_v29, %s9352_s14  ;;  %v1469_v21 = vor.u32 %v1468_v2, %v1465_v33  ;;  %v1481_v29 = vshrl.u32 %v1430_v62, 16  ;;  %v1519_v60 = vshll.u32 %v10600_v63, 16  ;;  %v1489_v14 = vshrl.u32 %v1431_v18, 16 }
 0x186   :  { %v1492_v32 = vshll.u32 %v1431_v18, 16  ;;  %v2045_v4 = vrot.slane %v10591_v17, 4  ;;  %v1646_v23 = vrot.slane %v1644_v27, 4  ;;  %v1486_v50 = vrot.slane %v1484_v6, 4 }
 0x187   :  { %2187 = vrot.lane.b32.xlu0 %v10581_v31, %s9352_s14  ;;  %v10714_v28 = vsel %vm12992_vm0, %v1460_v7, %v1469_v21  ;;  %v10717_v22 = vsel %vm12993_vm14, %v1469_v21, %v1478_v57  ;;  %v1483_v31 = vrot.slane %v1481_v29, 3  ;;  %v1432_v47 = vsel %vm1417_vm3, %v10474_v39, 0  ;;  %vm12996_vm14 = vmmov %vm12992_vm0 }
 0x188   :  { %v1653_v15 = vshrl.u32 %v1626_v42, 16  ;;  %v1656_v10 = vshll.u32 %v1626_v42, 16  ;;  %v1491_v63 = vrot.slane %v1489_v14, 3  ;;  %v1494_v44 = vrot.slane %v1492_v32, 4 }
 0x189   :  { %2193 = vrot.lane.b32.xlu1 %v10623_v55, %s9352_s14  ;;  %v1649_v9 = vrot.slane %v1647_v54, 5  ;;  %v1487_v55 = vor.u32 %v1486_v50, %v1483_v31  ;;  %v1498_v13 = vshrl.u32 %v1432_v47, 16  ;;  %v1501_v58 = vshll.u32 %v1432_v47, 16 }
 0x18a   :  { %v1518_v5 = vrot.slane %v1516_v30, 3  ;;  %v1521_v59 = vrot.slane %v1519_v60, 4  ;;  %v2024_v61 = vshll.u32 %v10558_v26, 16  ;;  %v1495_v19 = vor.u32 %v1494_v44, %v1491_v63 }
 0x18b   :  { %2189 = vrot.lane.b32.xlu0 %v10584_v56, %s9352_s14  ;;  %v2046_v7 = vsel %vm1531_vm9, %v10561_v41, %v2045_v4  ;;  %v2047_v56 = vrot.slane %v10543_v20, 4  ;;  %v1500_v33 = vrot.slane %v1498_v13, 3  ;;  %v1503_v2 = vrot.slane %v1501_v58, 4  ;;  %v1927_v20 = vld [vmem:[#allocation2 + $0x8] sm:$0xf8] }
 0x18c   :  { %v1655_v57 = vrot.slane %v1653_v15, 4  ;;  %v1658_v27 = vrot.slane %v1656_v10, 5  ;;  %v10736_v21 = vsel %vm12994_vm4, %v1487_v55, %v1495_v19  ;;  %v1642_v26 = vor.u32 %v10692_v3, %v10685_v45  ;;  %vm12997_vm4 = vmmov %vm12992_vm0 }
 0x18d   :  { %2195 = vrot.lane.b32.xlu1 %v10639_v53, %s9352_s14  ;;  %v1433_v53 = vsel %vm1418_vm12, %v10551_v0, 0  ;;  %v1650_v62 = vor.u32 %v1649_v9, %v1646_v23  ;;  %v1504_v41 = vor.u32 %v1503_v2, %v1500_v33  ;;  %v10743_v54 = vrot.slane %v1977_v1, 3 }
 0x18e   :  { %v1507_v30 = vshrl.u32 %v1433_v53, 16  ;;  %v10745_v18 = vrot.slane %v1980_v38, 4  ;;  %v10747_v29 = vrot.slane %v2021_v34, 3  ;;  %v1510_v42 = vshll.u32 %v1433_v53, 16 }
 0x18f   :  { %2205 = vrot.lane.b32.xlu0 %v2046_v7, %s9352_s14  ;;  %v10749_v6 = vrot.slane %v2024_v61, 4  ;;  %v2048_v60 = vsel %vm1531_vm9, %v2045_v4, %v2047_v56  ;;  %v10753_v31 = vsel %vm12992_vm0, %v1495_v19, %v1504_v41  ;;  %v10756_v45 = vor.u32 %v1658_v27, %v1655_v57  ;;  %vm12995_vm9 = vmmov %vm12992_vm0  ;;  %v1934_v19 = vld [vmem:[#allocation2 + $0x38] sm:$0xf8] }
 0x190   :  { %v1509_v14 = vrot.slane %v1507_v30, 3  ;;  %v1512_v3 = vrot.slane %v1510_v42, 4  ;;  %v1522_v1 = vor.u32 %v1521_v59, %v1518_v5  ;;  %v1929_v38 = vsel %vm1415_vm1, %v1927_v20, 0 }
 0x191   :  { %v1651_v34 = vsel %vm1379_vm11, %v1642_v26, %v1650_v62  ;;  %v1930_v32 = vsel %vm1416_vm2, %v10670_v46, 0  ;;  %v1942_v4 = vshrl.u32 %v1929_v38, 16  ;;  %v1945_v23 = vshll.u32 %v1929_v38, 16 }
 0x192   :  { %v10767_v50 = vsel %vm1622_vm8, %v10290_v37, 0  ;;  %v1513_v47 = vor.u32 %v1512_v3, %v1509_v14  ;;  %v1950_v15 = vshrl.u32 %v1930_v32, 16  ;;  %v1953_v10 = vshll.u32 %v1930_v32, 16 }
 0x193   :  { %2207 = vrot.lane.b32.xlu0 %v2048_v60, %s9352_s14  ;;  %v1944_v44 = vrot.slane %v1942_v4, 3  ;;  %v1947_v9 = vrot.slane %v1945_v23, 4  ;;  %v1931_v55 = vsel %vm1417_vm3, %v10290_v37, 0  ;;  %v1932_v13 = vsel %vm1418_vm12, %v10348_v51, 0  ;;  %v8629_v51 = vld [vmem:[%s12912_s3 + $0x80] sm:$0xff]  }
 0x194   :  { %v1660_v5 = vsel %vm1379_vm11, %v1650_v62, %v10756_v45  ;;  %v10779_v59 = vsel %vm12995_vm9, %v1504_v41, %v1513_v47  ;;  %v10782_v61 = vsel %vm12996_vm14, %v1513_v47, %v1522_v1  ;;  %v1952_v56 = vrot.slane %v1950_v15, 3  ;;  %v8630_v62 = vld [vmem:[%s12912_s3 + $0xc8] sm:$0xff]   ;;  %v8632_v47 = vld [vmem:[%s12912_s3 + $0xd0] sm:$0xff]   ;;  %vm13002_vm9 = vmmov %vm12992_vm0 }
 0x195   :  { %v1948_v7 = vor.u32 %v1947_v9, %v1944_v44  ;;  %v1955_v37 = vrot.slane %v1953_v10, 4  ;;  %v1959_v33 = vshrl.u32 %v1931_v55, 16  ;;  %v1962_v2 = vshll.u32 %v1931_v55, 16  ;;  %vm13003_vm14 = vmmov %vm12992_vm0 }
 0x196   :  { %v1968_v57 = vshrl.u32 %v1932_v13, 16  ;;  %v1971_v27 = vshll.u32 %v1932_v13, 16  ;;  %v1983_v53 = vor.u32 %v10745_v18, %v10743_v54  ;;  %v1936_v20 = vsel %vm1415_vm1, %v1934_v19, 0  ;;  %vm12998_vm1 = vmmov %vm12992_vm0 }
 0x197   :  { %v2166_v63 = vpop.permute.xlu0 %2165  ;;  %v1956_v41 = vor.u32 %v1955_v37, %v1952_v56  ;;  %v1961_v30 = vrot.slane %v1959_v33, 3  ;;  %v1937_v42 = vsel %vm1416_vm2, %v10474_v39, 0  ;;  %v1964_v14 = vrot.slane %v1962_v2, 4  ;;  %vm12999_vm2 = vmmov %vm12992_vm0 }
 0x198   :  { %v2243_v58 = vsel %vm1133_vm5, %v1651_v34, %v2166_v63  ;;  %v1970_v3 = vrot.slane %v1968_v57, 3  ;;  %v1973_v54 = vrot.slane %v1971_v27, 4  ;;  %v1986_v1 = vshrl.u32 %v1936_v20, 16  ;;  %v8634_v57 = vld [vmem:[%s12912_s3 + $0xd8] sm:$0xff]  }
 0x199   :  { %2686 = vmatprep.mubr.bf16.mxu1 %v2243_v58  ;;  %v10800_v18 = vsel %vm12997_vm4, %v1948_v7, %v1956_v41  ;;  %v1989_v38 = vshll.u32 %v1936_v20, 16  ;;  %v1994_v34 = vshrl.u32 %v1937_v42, 16  ;;  %v1965_v25 = vor.u32 %v1964_v14, %v1961_v30 }
 0x19a   :  { %v1974_v32 = vor.u32 %v1973_v54, %v1970_v3  ;;  %v1997_v4 = vshll.u32 %v1937_v42, 16  ;;  %v1988_v15 = vrot.slane %v1986_v1, 3  ;;  %v1662_v56 = vshrl.u32 %v10767_v50, 16  ;;  %v8635_v3 = vld [vmem:[%s12912_s3 + $0x98] sm:$0xff]   ;;  %v1555_v54 = vld [vmem:[#allocation2 + $0x20] sm:$0x1f] }
 0x19b   :  { %v1991_v10 = vrot.slane %v1989_v38, 4  ;;  %v1996_v63 = vrot.slane %v1994_v34, 3  ;;  %v1966_v55 = vsel %vm12998_vm1, %v1956_v41, %v1965_v25  ;;  %v1665_v37 = vshll.u32 %v10767_v50, 16 }
 0x19c   :  { %v10814_v13 = vsel %vm12999_vm2, %v1965_v25, %v1974_v32  ;;  %v10817_v35 = vsel %vm12992_vm0, %v1974_v32, %v1983_v53  ;;  %v1999_v58 = vrot.slane %v1997_v4, 4  ;;  %v2027_v41 = vor.u32 %v10749_v6, %v10747_v29  ;;  %v8637_v32 = vld [vmem:[%s12912_s3 + $0xa0] sm:$0xff]  }
 0x19d   :  { %v2150_v26 = vpop.permute.xlu0 %2149  ;;  %v1992_v33 = vor.u32 %v1991_v10, %v1988_v15  ;;  %v1667_v14 = vrot.slane %v1665_v37, 5  ;;  %vm13004_vm4 = vcmp.ne.s16.totalorder %v9778_v24, 0  ;;  %v8643_v37 = vld [vmem:[%s12912_s3 + $0xb8] sm:$0xff]  }
 0x19e   :  { %v2211_v60 = vsel %vm1133_vm5, %v10679_v40, %v2150_v26  ;;  %v1938_v40 = vsel %vm1417_vm3, %v10551_v0, 0  ;;  %v2000_v27 = vor.u32 %v1999_v58, %v1996_v63  ;;  %vm13000_vm3 = vmmov %vm12992_vm0  ;;  %v1628_v25 = vsel %vm13004_vm4, %v1555_v54, 0  ;;  %v8639_v63 = vld [vmem:[%s12912_s3 + $0xa8] sm:$0xff]  }
 0x19f   :  { %2687 = vmatmul.mubr.bf16.vlgmr.msra.gmra.mrb[52].mxu1 %v2211_v60  ;;  %v2168_v23 = vpop.permute.xlu1 %2167  ;;  %v2003_v44 = vshrl.u32 %v1938_v40, 16  ;;  %v2006_v7 = vshll.u32 %v1938_v40, 16  ;;  %v1664_v60 = vrot.slane %v1662_v56, 4  ;;  %v8638_v40 = vld [vmem:[%s12912_s3 + $0xe8] sm:$0xff]  }
 0x1a0   :  { %8218 = vmatpush3.bf16.msra.mxu1 %v8629_v51  ;;  %v2247_v9 = vsel %vm1133_vm5, %v1660_v5, %v2168_v23  ;;  %v8633_v5 = vld [vmem:[%s12912_s3 + $0x90] sm:$0xff]   ;;  %v1939_v51 = vsel %vm1418_vm12, %v10591_v17, 0  ;;  %v10835_v16 = vsel %vm13000_vm3, %v1992_v33, %v2000_v27  ;;  %vm13001_vm12 = vmmov %vm12992_vm0  ;;  %v1671_v23 = vshrl.u32 %v1628_v25, 16 }
 0x1a1   :  { %8219 = vmatprep.subr.bf16.mxu1 %v8630_v62  ;;  %2694 = vmatprep.mubr.bf16.mxu1 %v2247_v9  ;;  %v2005_v19 = vrot.slane %v2003_v44, 3  ;;  %v2008_v53 = vrot.slane %v2006_v7, 4  ;;  %v2012_v26 = vshrl.u32 %v1939_v51, 16  ;;  %v2015_v50 = vshll.u32 %v1939_v51, 16  ;;  %v8640_v9 = vld [vmem:[%s12912_s3 + $0xf0] sm:$0xff]   ;;  %v8642_v7 = vld [vmem:[%s12912_s3 + $0xf8] sm:$0xff]  }
 0x1a2   :  { %v1673_v58 = vrot.slane %v1671_v23, 4 }
 0x1a3   :  { %v2152_v2 = vpop.permute.xlu1 %2151  ;;  %v2009_v30 = vor.u32 %v2008_v53, %v2005_v19  ;;  %v2014_v20 = vrot.slane %v2012_v26, 3  ;;  %v2017_v42 = vrot.slane %v2015_v50, 4  ;;  %v1631_v53 = vsel %vm1620_vm7, %v10453_v43, 0 }
 0x1a4   :  { %8220 = vmatpush3.bf16.msra.mxu1 %v8631_v8  ;;  %v2215_v62 = vsel %vm1133_vm5, %v10700_v52, %v2152_v2  ;;  %v8636_v52 = vld [vmem:[%s12912_s3 + $0xe0] sm:$0xff]   ;;  %v1668_v8 = vor.u32 %v1667_v14, %v1664_v60 }
 0x1a5   :  { %8221 = vmatprep.subr.bf16.mxu1 %v8632_v47  ;;  %v10844_v29 = vsel %vm13001_vm12, %v2000_v27, %v2009_v30  ;;  %v2018_v6 = vor.u32 %v2017_v42, %v2014_v20  ;;  %v1674_v47 = vshll.u32 %v1628_v25, 16 }
 0x1a6   :  { %v1669_v10 = vsel %vm1379_vm11, %v10756_v45, %v1668_v8  ;;  %v8641_v45 = vld [vmem:[%s12912_s3 + $0xb0] sm:$0xff]  }
 0x1a7   :  { %2695 = vmatmul.mubr.bf16.gmra.mrb[56].mxu1 %v2215_v62  ;;  %v10847_v38 = vsel %vm13002_vm9, %v2009_v30, %v2018_v6  ;;  %v10850_v34 = vsel %vm13003_vm14, %v2018_v6, %v2027_v41  ;;  %v1676_v19 = vrot.slane %v1674_v47, 5  ;;  %v1688_v62 = vshrl.u32 %v1631_v53, 16 }
 0x1a8   :  { %8222 = vmatpush3.bf16.msra.mxu1 %v8633_v5  ;;  %v1691_v41 = vshll.u32 %v1631_v53, 16  ;;  %v1632_v30 = vsel %vm1621_vm13, %v10474_v39, 0  ;;  %v1633_v47 = vsel %vm1622_vm8, %v10551_v0, 0 }
 0x1a9   :  { %8223 = vmatprep.subr.bf16.mxu1 %v8634_v57  ;;  %v1677_v56 = vor.u32 %v1676_v19, %v1673_v58  ;;  %v9296_v57 = vld [vmem:[#allocation2 + $0x30] sm:$0xf0]  ;;  %v1697_v14 = vshrl.u32 %v1632_v30, 16 }
 0x1aa   :  { %v2154_v1 = vpop.permute.xlu1 %2153  ;;  %v1630_v27 = vsel %vm1619_vm6, %v9296_v57, 0  ;;  %v1693_v60 = vrot.slane %v1691_v41, 5  ;;  %vm13005_vm6 = vmmov %vm13004_vm4 }
 0x1ab   :  { %v10858_v4 = vsel %vm1133_vm5, %v1966_v55, %v2154_v1  ;;  %v2219_v55 = vsel %vm1133_vm5, %v10714_v28, %v2154_v1  ;;  %v1678_v33 = vsel %vm1379_vm11, %v1668_v8, %v1677_v56  ;;  %v1680_v26 = vshrl.u32 %v1630_v27, 16 }
 0x1ac   :  { %8224 = vmatpush3.bf16.msra.mxu1 %v8635_v3  ;;  %v1683_v50 = vshll.u32 %v1630_v27, 16  ;;  %v1700_v3 = vshll.u32 %v1632_v30, 16 }
 0x1ad   :  { %8225 = vmatprep.subr.bf16.mxu1 %v8636_v52  ;;  %v1682_v20 = vrot.slane %v1680_v26, 4  ;;  %v1699_v52 = vrot.slane %v1697_v14, 4 }
 0x1ae   :  { %v1685_v42 = vrot.slane %v1683_v50, 5  ;;  %v1702_v6 = vrot.slane %v1700_v3, 5  ;;  %v9298_v3 = vld [vmem:[#allocation2 + $0x20] sm:$0xff] }
 0x1af   :  { %v2170_v15 = vpop.permute.xlu0 %2169 }
 0x1b0   :  { %8226 = vmatpush3.bf16.msra.mxu1 %v8637_v32  ;;  %v2251_v44 = vsel %vm1133_vm5, %v1669_v10, %v2170_v15  ;;  %v2156_v28 = vpop.permute.xlu1 %2155  ;;  %v1686_v11 = vor.u32 %v1685_v42, %v1682_v20  ;;  %v1703_v8 = vor.u32 %v1702_v6, %v1699_v52  ;;  %v1706_v10 = vshrl.u32 %v1633_v47, 16 }
 0x1b1   :  { %8227 = vmatprep.subr.bf16.mxu1 %v8638_v40  ;;  %2702 = vmatprep.mubr.bf16.mxu1 %v2251_v44  ;;  %v2223_v2 = vsel %vm1133_vm5, %v10717_v22, %v2156_v28  ;;  %v1690_v22 = vrot.slane %v1688_v62, 4 }
 0x1b2   :  { %2703 = vmatmul.mubr.bf16.gmra.mrb[60].mxu1 %v2219_v55 }
 0x1b3   :  { %v1694_v54 = vor.u32 %v1693_v60, %v1690_v22  ;;  %v9297_v22 = vld [vmem:[#allocation2 + $0x18] sm:$0xff] }
 0x1b4   :  { %8228 = vmatpush3.bf16.msra.mxu1 %v8639_v63  ;;  %v1709_v63 = vshll.u32 %v1633_v47, 16 }
 0x1b5   :  { %8229 = vmatprep.subr.bf16.mxu1 %v8640_v9  ;;  %v1695_v1 = vsel %vm1379_vm11, %v1686_v11, %v1694_v54  ;;  %v1704_v40 = vsel %vm1379_vm11, %v1694_v54, %v1703_v8  ;;  %v1629_v9 = vld [vmem:[#allocation2 + $0x50] sm:$0x1f] }
 0x1b6   :  { %v1711_v55 = vrot.slane %v1709_v63, 5  ;;  %v1634_v58 = vsel %vm13005_vm6, %v1629_v9, 0 }
 0x1b8   :  { %8230 = vmatpush3.bf16.msra.mxu1 %v8641_v45  ;;  %v1715_v45 = vshrl.u32 %v1634_v58, 16 }
 0x1b9   :  { %8231 = vmatprep.subr.bf16.mxu1 %v8642_v7  ;;  %v1718_v7 = vshll.u32 %v1634_v58, 16 }
 0x1ba   :  { %v2172_v5 = vpop.permute.xlu0 %2171 }
 0x1bb   :  { %v2255_v51 = vsel %vm1133_vm5, %v1678_v33, %v2172_v5  ;;  %v1717_v5 = vrot.slane %v1715_v45, 4  ;;  %v1720_v33 = vrot.slane %v1718_v7, 5  ;;  %v8646_v45 = vld [vmem:[%s12914_s5 + $0x4] ss:$8 sps:$4 sm:$0xff]   ;;  %v8649_v7 = vld [vmem:[%s12914_s5 + $0x14] ss:$8 sps:$4 sm:$0xff]  }
 0x1bc   :  { %8232 = vmatpush3.bf16.msra.mxu1 %v8643_v37  ;;  %2710 = vmatprep.mubr.bf16.mxu1 %v2255_v51 }
 0x1bd   :  { %2711 = vmatmul.mubr.bf16.gmra.mrb[64].mxu1 %v2223_v2  ;;  %v1721_v51 = vor.u32 %v1720_v33, %v1717_v5  ;;  %4307 = vmatprep.subr.bf16.mxu1 %v8646_v45  ;;  %v8653_v5 = vld [vmem:[%s12914_s5 + $0x30] ss:$8 sps:$4 sm:$0xff]  }
 0x1c8   :  { %v2158_v36 = vpop.permute.xlu1 %2157 }
 0x1c9   :  { %v2227_v48 = vsel %vm1133_vm5, %v10736_v21, %v2158_v36  ;;  %v1708_v21 = vrot.slane %v1706_v10, 4 }
 0x1cb   :  { %v1712_v19 = vor.u32 %v1711_v55, %v1708_v21 }
 0x1cc   :  { %v2160_v15 = vpop.permute.xlu1 %2159 }
 0x1cd   :  { %v2174_v43 = vpop.permute.xlu0 %2173  ;;  %v2231_v44 = vsel %vm1133_vm5, %v10753_v31, %v2160_v15  ;;  %v1713_v37 = vsel %vm1379_vm11, %v1703_v8, %v1712_v19  ;;  %v1722_v57 = vsel %vm1379_vm11, %v1712_v19, %v1721_v51  ;;  %v8656_v51 = vld [vmem:[%s12914_s5 + $0x40] ss:$8 sps:$4 sm:$0xff]  }
 0x1ce   :  { %v2259_v25 = vsel %vm1133_vm5, %v1695_v1, %v2174_v43 }
 0x1cf   :  { %2718 = vmatprep.mubr.bf16.mxu1 %v2259_v25 }
 0x1d0   :  { %2719 = vmatmul.mubr.bf16.gmra.mrb[68].mxu1 %v2227_v48 }
 0x1d2   :  { %v2176_v32 = vpop.permute.xlu0 %2175 }
 0x1d3   :  { %v2263_v23 = vsel %vm1133_vm5, %v1704_v40, %v2176_v32 }
 0x1d4   :  { %2726 = vmatprep.mubr.bf16.mxu1 %v2263_v23 }
 0x1d8   :  { %2727 = vmatmul.mubr.bf16.gmra.mrb[72].mxu1 %v2231_v44 }
 0x1dd   :  { %v2162_v56 = vpop.permute.xlu1 %2161 }
 0x1de   :  { %v2235_v31 = vsel %vm1133_vm5, %v10779_v59, %v2162_v56  ;;  %v2325_v1 = vsel %vm1133_vm5, %v10844_v29, %v2162_v56  ;;  %v8647_v56 = vld [vmem:[%s12914_s5 + $0x10] ss:$8 sps:$4 sm:$0xff]  }
 0x1e2   :  { %v2178_v49 = vpop.permute.xlu0 %2177 }
 0x1e3   :  { %v2267_v28 = vsel %vm1133_vm5, %v1713_v37, %v2178_v49  ;;  %v2164_v2 = vpop.permute.xlu1 %2163  ;;  %v8650_v49 = vld [vmem:[%s12914_s5 + $0x20] ss:$8 sps:$4 sm:$0xff]   ;;  %v8652_v37 = vld [vmem:[%s12914_s5 + $0x24] ss:$8 sps:$4 sm:$0xff]  }
 0x1e4   :  { %2734 = vmatprep.mubr.bf16.mxu1 %v2267_v28  ;;  %v2239_v53 = vsel %vm1133_vm5, %v10782_v61, %v2164_v2  ;;  %v8655_v28 = vld [vmem:[%s12914_s5 + $0x34] ss:$8 sps:$4 sm:$0xff]   ;;  %v8658_v2 = vld [vmem:[%s12914_s5 + $0x44] ss:$8 sps:$4 sm:$0xff]  }
 0x1e5   :  { %2735 = vmatmul.mubr.bf16.gmra.mrb[76].mxu1 %v2235_v31 }
 0x1e7   :  { %v2182_v62 = vpop.permute.xlu1 %2181 }
 0x1e8   :  { %v2275_v59 = vsel %vm1133_vm5, %v10645_v12, %v2182_v62 }
 0x1e9   :  { %v2180_v24 = vpop.permute.xlu0 %2179 }
 0x1ea   :  { %v2271_v27 = vsel %vm1133_vm5, %v1722_v57, %v2180_v24 }
 0x1eb   :  { %2742 = vmatprep.mubr.bf16.mxu1 %v2271_v27  ;;  %v2200_v30 = vpop.permute.xlu1 %2199  ;;  %v8661_v27 = vld [vmem:[%s12914_s5 + $0x54] ss:$8 sps:$4 sm:$0xff]  }
 0x1ec   :  { %v2314_v61 = vsel %vm1133_vm5, %v10814_v13, %v2200_v30  ;;  %v8664_v30 = vld [vmem:[%s12914_s5 + $0x64] ss:$8 sps:$4 sm:$0xff]  }
 0x1ed   :  { %2743 = vmatmul.mubr.bf16.gmra.mrb[80].mxu1 %v2239_v53  ;;  %v2198_v26 = vpop.permute.xlu0 %2197 }
 0x1ee   :  { %v2307_v50 = vsel %vm1133_vm5, %v10800_v18, %v2198_v26 }
 0x1ef   :  { %2783 = vmatprep.mubr.bf16.mxu1 %v2307_v50  ;;  %v2202_v18 = vpop.permute.xlu1 %2201  ;;  %v8659_v50 = vld [vmem:[%s12914_s5 + $0x50] ss:$8 sps:$4 sm:$0xff]  }
 0x1f0   :  { %v2318_v12 = vsel %vm1133_vm5, %v10817_v35, %v2202_v18  ;;  %v9299_v35 = vld [vmem:[#allocation2 + $0x38] sm:$0xff] }
 0x1f1   :  { %v2184_v41 = vpop.permute.xlu0 %2183 }
 0x1f2   :  { %v2279_v20 = vsel %vm1133_vm5, %v10670_v46, %v2184_v41  ;;  %v8662_v41 = vld [vmem:[%s12914_s5 + $0x60] ss:$8 sps:$4 sm:$0xff]  }
 0x1f3   :  { %v2204_v14 = vpop.permute.xlu1 %2203 }
 0x1f4   :  { %v2322_v13 = vsel %vm1133_vm5, %v10835_v16, %v2204_v14  ;;  %v8673_v14 = vld [vmem:[%s12914_s5 + $0x94] ss:$8 sps:$4 sm:$0xff]  }
 0x1f5   :  { %2784 = vmatmul.mubr.bf16.vlgmr.msra.gmra.mrb[84].mxu1 %v2275_v59  ;;  %v2186_v42 = vpop.permute.xlu0 %2185 }
 0x1f6   :  { %2791 = vmatprep.mubr.bf16.mxu1 %v10858_v4  ;;  %v2283_v60 = vsel %vm1133_vm5, %v9297_v22, %v2186_v42  ;;  %v8667_v42 = vld [vmem:[%s12914_s5 + $0x74] ss:$8 sps:$4 sm:$0xff]  }
 0x1f7   :  { %v2192_v8 = vpop.permute.xlu1 %2191 }
 0x1f8   :  { %v2295_v32 = vsel %vm1133_vm5, %v10474_v39, %v2192_v8  ;;  %v8674_v8 = vld [vmem:[%s12914_s5 + $0xa0] ss:$8 sps:$4 sm:$0xff]  }
 0x1f9   :  { %v2188_v4 = vpop.permute.xlu0 %2187 }
 0x1fa   :  { %v2287_v46 = vsel %vm1133_vm5, %v9298_v3, %v2188_v4  ;;  %v8670_v4 = vld [vmem:[%s12914_s5 + $0x84] ss:$8 sps:$4 sm:$0xff]  }
 0x1fb   :  { %v2194_v29 = vpop.permute.xlu1 %2193 }
 0x1fc   :  { %v2299_v10 = vsel %vm1133_vm5, %v10551_v0, %v2194_v29 }
 0x1fd   :  { %2792 = vmatmul.mubr.bf16.gmra.mrb[88].mxu1 %v2279_v20  ;;  %v2190_v52 = vpop.permute.xlu0 %2189 }
 0x1fe   :  { %2799 = vmatprep.mubr.bf16.mxu1 %v2314_v61  ;;  %v2291_v43 = vsel %vm1133_vm5, %v9299_v35, %v2190_v52 }
 0x1ff   :  { %v2196_v39 = vpop.permute.xlu1 %2195 }
 0x200   :  { %v2303_v44 = vsel %vm1133_vm5, %v10591_v17, %v2196_v39  ;;  %v8644_v17 = vld [vmem:[%s12914_s5] ss:$8 sps:$4 sm:$0xff]  }
 0x201   :  { %v2206_v16 = vpop.permute.xlu0 %2205  ;;  %4308 = vmatpush1.bf16.msra.mxu1 %v8644_v17  ;;  %v8680_v39 = vld [vmem:[%s12914_s5 + $0xc0] ss:$8 sps:$4 sm:$0xff]  }
 0x202   :  { %v2329_v23 = vsel %vm1133_vm5, %v10847_v38, %v2206_v16  ;;  %4309 = vmatprep.subr.bf16.mxu1 %v8649_v7  ;;  %v8676_v16 = vld [vmem:[%s12914_s5 + $0xa4] ss:$8 sps:$4 sm:$0xff]   ;;  %v8685_v7 = vld [vmem:[%s12914_s5 + $0xd4] ss:$8 sps:$4 sm:$0xff]  }
 0x205   :  { %2800 = vmatmul.mubr.bf16.gmra.mrb[92].mxu1 %v2283_v60  ;;  %v2208_v15 = vpop.permute.xlu0 %2207  ;;  %v8665_v60 = vld [vmem:[%s12914_s5 + $0x70] ss:$8 sps:$4 sm:$0xff]  }
 0x206   :  { %2807 = vmatprep.mubr.bf16.mxu1 %v2318_v12  ;;  %v2333_v63 = vsel %vm1133_vm5, %v10850_v34, %v2208_v15  ;;  %4310 = vmatpush1.bf16.msra.mxu1 %v8647_v56  ;;  %v8668_v12 = vld [vmem:[%s12914_s5 + $0x80] ss:$8 sps:$4 sm:$0xff]   ;;  %v8683_v56 = vld [vmem:[%s12914_s5 + $0xd0] ss:$8 sps:$4 sm:$0xff]   ;;  %vm13006_vm5 = vcmask 1046528  }
 0x207   :  { %4311 = vmatprep.subr.bf16.mxu1 %v8652_v37  ;;  %v8686_v37 = vld [vmem:[%s12914_s5 + $0xe0] ss:$8 sps:$4 sm:$0xff]   ;;  %vm13007_vm7 = vmmov %vm13006_vm5 }
 0x208   :  { %vm13008_vm8 = vmmov %vm13006_vm5 }
 0x209   :  { %vm13013_vm13 = vmmov %vm13006_vm5 }
 0x20a   :  { %4312 = vmatpush1.bf16.msra.mxu1 %v8650_v49  ;;  %v8688_v49 = vld [vmem:[%s12914_s5 + $0xe4] ss:$8 sps:$4 sm:$0xff]   ;;  %vm13018_vm2 = vmmov %vm13006_vm5 }
 0x20b   :  { %4313 = vmatprep.subr.bf16.mxu1 %v8655_v28  ;;  %v8691_v28 = vld [vmem:[%s12914_s5 + $0xf4] ss:$8 sps:$4 sm:$0xff]   ;;  %vm13019_vm12 = vmmov %vm13018_vm2 }
 0x20c   :  { %vm13020_vm9 = vmmov %vm13018_vm2 }
 0x20d   :  { %2808 = vmatmul.mubr.bf16.gmra.mrb[96].mxu1 %v2287_v46  ;;  %v8671_v46 = vld [vmem:[%s12914_s5 + $0x90] ss:$8 sps:$4 sm:$0xff]   ;;  %vm13021_vm14 = vmmov %vm13018_vm2 }
 0x20e   :  { %2815 = vmatprep.mubr.bf16.mxu1 %v2322_v13  ;;  %4314 = vmatpush1.bf16.msra.mxu1 %v8653_v5  ;;  %v8689_v5 = vld [vmem:[%s12914_s5 + $0xf0] ss:$8 sps:$4 sm:$0xff]   ;;  %vm13022_vm4 = vmmov %vm13018_vm2 }
 0x20f   :  { %4315 = vmatprep.subr.bf16.mxu1 %v8658_v2  ;;  %vm13023_vm6 = vmmov %vm13018_vm2 }
 0x210   :  { %v10931_v11 = vpop.f32.mrb[12].mxu0 }
 0x211   :  { %v10933_v54 = vpop.f32.mrb[13].mxu0 }
 0x212   :  { %v10935_v6 = vpop.f32.mrb[14].mxu0  ;;  %4316 = vmatpush1.bf16.msra.mxu1 %v8656_v51 }
 0x213   :  { %v10937_v36 = vpop.f32.mrb[15].mxu0  ;;  %4317 = vmatprep.subr.bf16.mxu1 %v8661_v27 }
 0x215   :  { %2816 = vmatmul.mubr.bf16.gmra.mrb[100].mxu1 %v2291_v43 }
 0x216   :  { %2823 = vmatprep.mubr.bf16.mxu1 %v2325_v1  ;;  %4318 = vmatpush1.bf16.msra.mxu1 %v8659_v50 }
 0x217   :  { %4319 = vmatprep.subr.bf16.mxu1 %v8664_v30 }
 0x21a   :  { %4320 = vmatpush1.bf16.msra.mxu1 %v8662_v41 }
 0x21b   :  { %v10942_v25 = vpop.f32.mrb[16].mxu0  ;;  %4321 = vmatprep.subr.bf16.mxu1 %v8667_v42 }
 0x21c   :  { %v10944_v48 = vpop.f32.mrb[17].mxu0 }
 0x21d   :  { %v10948_v40 = vpop.f32.mrb[18].mxu0  ;;  %2824 = vmatmul.mubr.bf16.gmra.mrb[104].mxu1 %v2295_v32  ;;  %v8679_v32 = vld [vmem:[%s12914_s5 + $0xb4] ss:$8 sps:$4 sm:$0xff]  }
 0x21e   :  { %v10952_v47 = vpop.f32.mrb[19].mxu0  ;;  %2831 = vmatprep.mubr.bf16.mxu1 %v2329_v23  ;;  %4322 = vmatpush1.bf16.msra.mxu1 %v8665_v60  ;;  %v8677_v23 = vld [vmem:[%s12914_s5 + $0xb0] ss:$8 sps:$4 sm:$0xff]  }
 0x21f   :  { %4323 = vmatprep.subr.bf16.mxu1 %v8670_v4 }
 0x222   :  { %4324 = vmatpush1.bf16.msra.mxu1 %v8668_v12 }
 0x223   :  { %4325 = vmatprep.subr.bf16.mxu1 %v8673_v14 }
 0x225   :  { %2832 = vmatmul.mubr.bf16.gmra.mrb[108].mxu1 %v2299_v10 }
 0x226   :  { %2839 = vmatprep.mubr.bf16.mxu1 %v2333_v63  ;;  %4326 = vmatpush1.bf16.msra.mxu1 %v8671_v46 }
 0x227   :  { %4327 = vmatprep.subr.bf16.mxu1 %v8676_v16  ;;  %v11110_v16 = vld [vmem:[%s12913_s4] ss:$0 sm:$0xff] }
 0x22a   :  { %4328 = vmatpush1.bf16.msra.mxu1 %v8674_v8 }
 0x22b   :  { %4329 = vmatprep.subr.bf16.mxu1 %v8679_v32 }
 0x22d   :  { %2840 = vmatmul.mubr.bf16.gmra.mrb[112].mxu1 %v2303_v44  ;;  %v8682_v44 = vld [vmem:[%s12914_s5 + $0xc4] ss:$8 sps:$4 sm:$0xff]  }
 0x22e   :  { %4330 = vmatpush1.bf16.msra.mxu1 %v8677_v23 }
 0x22f   :  { %4331 = vmatprep.subr.bf16.mxu1 %v8682_v44 }
 0x232   :  { %4332 = vmatpush1.bf16.msra.mxu1 %v8680_v39 }
 0x233   :  { %4333 = vmatprep.subr.bf16.mxu1 %v8685_v7 }
 0x236   :  { %4334 = vmatpush1.bf16.msra.mxu1 %v8683_v56 }
 0x237   :  { %4335 = vmatprep.subr.bf16.mxu1 %v8688_v49 }
 0x23a   :  { %4336 = vmatpush1.bf16.msra.mxu1 %v8686_v37 }
 0x23b   :  { %4337 = vmatprep.subr.bf16.mxu1 %v8691_v28 }
 0x23e   :  { %4338 = vmatpush1.bf16.msra.mxu1 %v8689_v5 }
 0x243   :  { %v10960_v9 = vpop.f32.mrb[20].mxu0 }
 0x244   :  { %v10962_v38 = vpop.f32.mrb[21].mxu0 }
 0x245   :  { %v10964_v21 = vpop.f32.mrb[22].mxu0 }
 0x246   :  { %v10966_v55 = vpop.f32.mrb[23].mxu0 }
 0x24b   :  { %v10968_v58 = vpop.f32.mrb[24].mxu0 }
 0x24c   :  { %v10970_v0 = vpop.f32.mrb[25].mxu0 }
 0x24d   :  { %v10972_v19 = vpop.f32.mrb[26].mxu0 }
 0x24e   :  { %v10974_v34 = vpop.f32.mrb[27].mxu0 }
 0x272   :  { %v8169_v33 = vpop.f32.mrb[52].mxu1 }
 0x273   :  { %v8170_v31 = vpop.f32.mrb[53].mxu1 }
 0x274   :  { %v11006_v24 = vadd.f32 %v8170_v31, %v8169_v33  ;;  %v8172_v57 = vpop.f32.mrb[54].mxu1  ;;  %v8694_v33 = vld [vmem:[%s12914_s5 + $0x104] ss:$8 sps:$4 sm:$0xff]  }
 0x275   :  { %v8173_v53 = vpop.f32.mrb[55].mxu1  ;;  %4360 = vmatprep.subr.bf16.mxu1 %v8694_v33 }
 0x276   :  { %v11011_v26 = vadd.f32 %v8173_v53, %v8172_v57 }
 0x278   :  { %v2692_v44 = vadd.f32 %v11011_v26, %v11110_v16 }
 0x27a   :  { %v8175_v62 = vpop.f32.mrb[56].mxu1 }
 0x27b   :  { %v8176_v59 = vpop.f32.mrb[57].mxu1 }
 0x27c   :  { %v11022_v20 = vadd.f32 %v8176_v59, %v8175_v62  ;;  %v8178_v61 = vpop.f32.mrb[58].mxu1 }
 0x27d   :  { %v8179_v18 = vpop.f32.mrb[59].mxu1 }
 0x27e   :  { %v11027_v22 = vadd.f32 %v8179_v18, %v8178_v61 }
 0x285   :  { %v8181_v3 = vpop.f32.mrb[60].mxu1 }
 0x286   :  { %v8182_v13 = vpop.f32.mrb[61].mxu1 }
 0x287   :  { %v11044_v52 = vadd.f32 %v8182_v13, %v8181_v3  ;;  %v8184_v35 = vpop.f32.mrb[62].mxu1 }
 0x288   :  { %v8185_v43 = vpop.f32.mrb[63].mxu1 }
 0x289   :  { %v11046_v1 = vadd.f32 %v8185_v43, %v8184_v35 }
 0x290   :  { %v8187_v29 = vpop.f32.mrb[64].mxu1 }
 0x291   :  { %v8188_v15 = vpop.f32.mrb[65].mxu1 }
 0x292   :  { %v11060_v10 = vadd.f32 %v8188_v15, %v8187_v29  ;;  %v8190_v63 = vpop.f32.mrb[66].mxu1  ;;  %v2689_v29 = vadd.f32 %v11006_v24, %v11110_v16 }
 0x293   :  { %v8191_v17 = vpop.f32.mrb[67].mxu1 }
 0x294   :  { %v11068_v45 = vadd.f32 %v8191_v17, %v8190_v63 }
 0x2a3   :  { %v8193_v31 = vpop.f32.mrb[68].mxu1 }
 0x2a4   :  { %v8194_v51 = vpop.f32.mrb[69].mxu1 }
 0x2a5   :  { %v11091_v2 = vadd.f32 %v8194_v51, %v8193_v31  ;;  %v8196_v57 = vpop.f32.mrb[70].mxu1  ;;  %v2697_v31 = vadd.f32 %v11022_v20, %v11110_v16 }
 0x2a6   :  { %v8197_v27 = vpop.f32.mrb[71].mxu1 }
 0x2a7   :  { %v11093_v53 = vadd.f32 %v8197_v27, %v8196_v57  ;;  %v2700_v27 = vadd.f32 %v11027_v22, %v11110_v16 }
 0x2ab   :  { %v8199_v50 = vpop.f32.mrb[72].mxu1 }
 0x2ac   :  { %v8200_v62 = vpop.f32.mrb[73].mxu1 }
 0x2ad   :  { %v11095_v59 = vadd.f32 %v8200_v62, %v8199_v50  ;;  %v8202_v41 = vpop.f32.mrb[74].mxu1 }
 0x2ae   :  { %v8203_v30 = vpop.f32.mrb[75].mxu1 }
 0x2af   :  { %v11097_v61 = vadd.f32 %v8203_v30, %v8202_v41 }
 0x2b8   :  { %v8205_v42 = vpop.f32.mrb[76].mxu1 }
 0x2b9   :  { %v8206_v18 = vpop.f32.mrb[77].mxu1 }
 0x2ba   :  { %v11099_v60 = vadd.f32 %v8206_v18, %v8205_v42  ;;  %v8208_v12 = vpop.f32.mrb[78].mxu1 }
 0x2bb   :  { %v8209_v4 = vpop.f32.mrb[79].mxu1 }
 0x2bc   :  { %v11101_v14 = vadd.f32 %v8209_v4, %v8208_v12 }
 0x2c0   :  { %v8211_v3 = vpop.f32.mrb[80].mxu1 }
 0x2c1   :  { %v8212_v46 = vpop.f32.mrb[81].mxu1 }
 0x2c2   :  { %v11103_v13 = vadd.f32 %v8212_v46, %v8211_v3  ;;  %v8214_v35 = vpop.f32.mrb[82].mxu1  ;;  %v2705_v46 = vadd.f32 %v11044_v52, %v11110_v16 }
 0x2c3   :  { %v8215_v43 = vpop.f32.mrb[83].mxu1 }
 0x2c4   :  { %v11105_v8 = vadd.f32 %v8215_v43, %v8214_v35 }
 0x2c8   :  { %v8233_v32 = vpop.f32.mrb[84].mxu1 }
 0x2c9   :  { %v8234_v23 = vpop.f32.mrb[85].mxu1 }
 0x2ca   :  { %v8235_v15 = vadd.f32 %v8234_v23, %v8233_v32  ;;  %v8236_v63 = vpop.f32.mrb[86].mxu1  ;;  %v2708_v23 = vadd.f32 %v11046_v1, %v11110_v16 }
 0x2cb   :  { %v8237_v39 = vpop.f32.mrb[87].mxu1 }
 0x2cc   :  { %v2786_v17 = vadd.f32 %v8235_v15, %v2689_v29  ;;  %v8238_v7 = vadd.f32 %v8237_v39, %v8236_v63 }
 0x2ce   :  { %v2883_v56 = vadd.f32 %v10933_v54, %v2786_v17  ;;  %v2789_v49 = vadd.f32 %v8238_v7, %v2692_v44 }
 0x2d0   :  { %v2945_v37 = vmax.f32 %v2883_v56, 0.0  ;;  %v2886_v28 = vadd.f32 %v10937_v36, %v2789_v49  ;;  %v8239_v5 = vpop.f32.mrb[88].mxu1 }
 0x2d1   :  { %v8240_v33 = vpop.f32.mrb[89].mxu1 }
 0x2d2   :  { %v2946_v24 = vmax.f32 %v2886_v28, 0.0  ;;  %v8241_v51 = vadd.f32 %v8240_v33, %v8239_v5  ;;  %v8242_v57 = vpop.f32.mrb[90].mxu1  ;;  %v2977_v50 = vrot.slane %v2945_v37, 1  ;;  %v2713_v5 = vadd.f32 %v11060_v10, %v11110_v16  ;;  %v13014_v10 = vld [vmem:[#allocation16_spill] sm:$0xff] }
 0x2d3   :  { %v8243_v26 = vpop.f32.mrb[91].mxu1 }
 0x2d4   :  { %v2978_v62 = vrot.slane %v2946_v24, 1  ;;  %v2794_v41 = vadd.f32 %v8241_v51, %v2697_v31  ;;  %v8244_v54 = vadd.f32 %v8243_v26, %v8242_v57  ;;  %v13009_v57 = vld [vmem:[#allocation15_spill] sm:$0xff]  ;;  %v2716_v26 = vadd.f32 %v11068_v45, %v11110_v16 }
 0x2d6   :  { %v2979_v30 = vsel %vm13006_vm5, %v2977_v50, %v2978_v62  ;;  %v2891_v36 = vadd.f32 %v10931_v11, %v2794_v41  ;;  %v2797_v42 = vadd.f32 %v8244_v54, %v2700_v27  ;;  %v13010_v27 = vand.u32 3, %v13009_v57 }
 0x2d7   :  { %v3025_v18 = vmax.f32 %v2945_v37, %v2979_v30  ;;  %v13015_v30 = vand.u32 3, %v13014_v10 }
 0x2d8   :  { %v2947_v12 = vmax.f32 %v2891_v36, 0.0  ;;  %v2894_v20 = vadd.f32 %v10935_v6, %v2797_v42  ;;  %v8245_v4 = vpop.f32.mrb[92].mxu1  ;;  %vm11137_vm11 = vcmp.gt.s32.totalorder %v13010_v27, 0 }
 0x2d9   :  { %v8246_v3 = vpop.f32.mrb[93].mxu1  ;;  %vm11146_vm1 = vcmp.gt.s32.totalorder %v13015_v30, 0  ;;  %vm3112_vm0 = vmpackc.low %vm11137_vm11, %vm11137_vm11 }
 0x2da   :  { %v2980_v22 = vrot.slane %v2947_v12, 1  ;;  %v2948_v35 = vmax.f32 %v2894_v20, 0.0  ;;  %v8247_v43 = vadd.f32 %v8246_v3, %v8245_v4  ;;  %v8248_v32 = vpop.f32.mrb[94].mxu1  ;;  %vm3113_vm3 = vmpackc.low %vm11146_vm1, %vm11146_vm1 }
 0x2db   :  { %v8249_v29 = vpop.f32.mrb[95].mxu1  ;;  %vm13026_vm11 = vmmov %vm13018_vm2 }
 0x2dc   :  { %v2981_v11 = vsel %vm13007_vm7, %v2978_v62, %v2980_v22  ;;  %v2982_v15 = vrot.slane %v2948_v35, 1  ;;  %v2802_v63 = vadd.f32 %v8247_v43, %v2705_v46  ;;  %v8250_v39 = vadd.f32 %v8249_v29, %v8248_v32  ;;  %vm13024_vm7 = vmmov %vm13018_vm2 }
 0x2dd   :  { %v3026_v44 = vmax.f32 %v2946_v24, %v2981_v11  ;;  %v9300_v11 = vld [vmem:[#allocation3] sm:$0xff]  ;;  %vm13027_vm1 = vmmov %vm13018_vm2 }
 0x2de   :  { %v2983_v6 = vsel %vm13008_vm8, %v2980_v22, %v2982_v15  ;;  %v2899_v17 = vadd.f32 %v10944_v48, %v2802_v63  ;;  %v2805_v7 = vadd.f32 %v8250_v39, %v2708_v23  ;;  %v3115_v63 = vsel %vm3113_vm3, 65537, %v9300_v11  ;;  %vm13025_vm8 = vmmov %vm13018_vm2 }
 0x2df   :  { %v3041_v52 = vmax.f32 %v3025_v18, %v3026_v44  ;;  %v3027_v56 = vmax.f32 %v2947_v12, %v2983_v6  ;;  %v2724_v39 = vadd.f32 %v11093_v53, %v11110_v16  ;;  %vm3134_vm3 = vsmask.f32 2304 }
 0x2e0   :  { %v2949_v49 = vmax.f32 %v2899_v17, 0.0  ;;  %v2902_v37 = vadd.f32 %v10952_v47, %v2805_v7  ;;  %v8251_v28 = vpop.f32.mrb[96].mxu1 }
 0x2e1   :  { %3081 = vst [vmem:[#allocation8] sm:$0xff] %v3041_v52  ;;  %v8252_v1 = vpop.f32.mrb[97].mxu1 }
 0x2e2   :  { %v2984_v33 = vrot.slane %v2949_v49, 1  ;;  %v2950_v31 = vmax.f32 %v2902_v37, 0.0  ;;  %v8253_v51 = vadd.f32 %v8252_v1, %v8251_v28  ;;  %v8254_v24 = vpop.f32.mrb[98].mxu1 }
 0x2e3   :  { %v8255_v47 = vpop.f32.mrb[99].mxu1 }
 0x2e4   :  { %v2985_v50 = vsel %vm13013_vm13, %v2982_v15, %v2984_v33  ;;  %v2986_v62 = vrot.slane %v2950_v31, 1  ;;  %v2810_v41 = vadd.f32 %v8253_v51, %v2713_v5  ;;  %v8256_v54 = vadd.f32 %v8255_v47, %v8254_v24 }
 0x2e5   :  { %v3028_v42 = vmax.f32 %v2948_v35, %v2985_v50  ;;  %v3114_v15 = vsel %vm3112_vm0, 65537, %v9300_v11  ;;  %v2729_v24 = vadd.f32 %v11095_v59, %v11110_v16  ;;  %v2732_v50 = vadd.f32 %v11097_v61, %v11110_v16  ;;  %vm13029_vm0 = vmmov %vm13027_vm1 }
 0x2e6   :  { %v2987_v18 = vsel %vm13018_vm2, %v2984_v33, %v2986_v62  ;;  %v2907_v12 = vadd.f32 %v10942_v25, %v2810_v41  ;;  %v2813_v20 = vadd.f32 %v8256_v54, %v2716_v26  ;;  %v2721_v25 = vadd.f32 %v11091_v2, %v11110_v16  ;;  %vm13028_vm2 = vmmov %vm13027_vm1 }
 0x2e7   :  { %v3043_v45 = vmax.f32 %v3027_v56, %v3028_v42  ;;  %v3029_v4 = vmax.f32 %v2949_v49, %v2987_v18  ;;  %v7684_v37 = vcombine.low %v3114_v15, %v3115_v63  ;;  %vm3175_vm13 = vcmask 1041408  }
 0x2e8   :  { %v2951_v3 = vmax.f32 %v2907_v12, 0.0  ;;  %v2910_v46 = vadd.f32 %v10948_v40, %v2813_v20  ;;  %v8257_v22 = vpop.f32.mrb[100].mxu1 }
 0x2e9   :  { %3082 = vst [vmem:[#allocation8 + $0x8] sm:$0xff] %v3043_v45  ;;  %v8258_v35 = vpop.f32.mrb[101].mxu1  ;;  %v11169_v47 = vshrl.u32 %v7684_v37, 16 }
 0x2ea   :  { %v2988_v43 = vrot.slane %v2951_v3, 1  ;;  %v2952_v32 = vmax.f32 %v2910_v46, 0.0  ;;  %v8259_v23 = vadd.f32 %v8258_v35, %v8257_v22  ;;  %v8260_v29 = vpop.f32.mrb[102].mxu1  ;;  %v2737_v35 = vadd.f32 %v11099_v60, %v11110_v16 }
 0x2eb   :  { %v8261_v44 = vpop.f32.mrb[103].mxu1  ;;  %v3122_v30 = vrot.slane %v11169_v47, 2 }
 0x2ec   :  { %v2989_v6 = vsel %vm13019_vm12, %v2986_v62, %v2988_v43  ;;  %v2990_v40 = vrot.slane %v2952_v32, 1  ;;  %v2818_v17 = vadd.f32 %v8259_v23, %v2721_v25  ;;  %v8262_v7 = vadd.f32 %v8261_v44, %v8260_v29 }
 0x2ed   :  { %v3030_v52 = vmax.f32 %v2950_v31, %v2989_v6 }
 0x2ee   :  { %v2991_v56 = vsel %vm13020_vm9, %v2988_v43, %v2990_v40  ;;  %v2915_v2 = vadd.f32 %v10962_v38, %v2818_v17  ;;  %v2821_v49 = vadd.f32 %v8262_v7, %v2724_v39  ;;  %v11171_v38 = vshll.u32 %v7684_v37, 16 }
 0x2ef   :  { %v3045_v28 = vmax.f32 %v3029_v4, %v3030_v52  ;;  %v3031_v1 = vmax.f32 %v2951_v3, %v2991_v56 }
 0x2f0   :  { %v2953_v5 = vmax.f32 %v2915_v2, 0.0  ;;  %v2918_v33 = vadd.f32 %v10966_v55, %v2821_v49  ;;  %v8263_v51 = vpop.f32.mrb[104].mxu1  ;;  %v3125_v59 = vrot.slane %v11171_v38, 3  ;;  %v3089_v2 = vld [vmem:[#allocation8] ss:$2 sm:$0xff] }
 0x2f1   :  { %3083 = vst [vmem:[#allocation8 + $0x10] sm:$0xff] %v3045_v28  ;;  %v8264_v53 = vpop.f32.mrb[105].mxu1 }
 0x2f2   :  { %v2992_v27 = vrot.slane %v2953_v5, 1  ;;  %v2954_v48 = vmax.f32 %v2918_v33, 0.0  ;;  %v8265_v31 = vadd.f32 %v8264_v53, %v8263_v51  ;;  %v8266_v26 = vpop.f32.mrb[106].mxu1  ;;  %v11181_v46 = vor.u32 %v3125_v59, %v3122_v30 }
 0x2f3   :  { %v8267_v62 = vpop.f32.mrb[107].mxu1 }
 0x2f4   :  { %v2993_v55 = vsel %vm13021_vm14, %v2990_v40, %v2992_v27  ;;  %v2994_v41 = vrot.slane %v2954_v48, 1  ;;  %v2826_v54 = vadd.f32 %v8265_v31, %v2729_v24  ;;  %v8268_v10 = vadd.f32 %v8267_v62, %v8266_v26  ;;  %v3110_v40 = vld [vmem:[#allocation3] sm:$0xe0] }
 0x2f5   :  { %v3032_v36 = vmax.f32 %v2952_v32, %v2993_v55  ;;  %vm3127_vm5 = vcmp.ne.s16.totalorder %v11181_v46, 0 }
 0x2f6   :  { %v2995_v42 = vsel %vm13022_vm4, %v2992_v27, %v2994_v41  ;;  %v2923_v18 = vadd.f32 %v10960_v9, %v2826_v54  ;;  %v2829_v12 = vadd.f32 %v8268_v10, %v2732_v50  ;;  %v2740_v9 = vadd.f32 %v11101_v14, %v11110_v16  ;;  %v11204_v10 = vld [vmem:[#allocation3] sm:$0xc0] }
 0x2f7   :  { %v3047_v20 = vmax.f32 %v3031_v1, %v3032_v36  ;;  %v3033_v45 = vmax.f32 %v2953_v5, %v2995_v42  ;;  %v3128_v1 = vsel %vm3127_vm5, %v3110_v40, 0  ;;  %v3176_v36 = vrot.slane %v11204_v10, 6 }
 0x2f8   :  { %v2955_v4 = vmax.f32 %v2923_v18, 0.0  ;;  %v2926_v61 = vadd.f32 %v10964_v21, %v2829_v12  ;;  %v8269_v3 = vpop.f32.mrb[108].mxu1  ;;  %v3136_v62 = vshrl.u32 %v3128_v1, 16  ;;  %v3139_v55 = vshll.u32 %v3128_v1, 16 }
 0x2f9   :  { %3084 = vst [vmem:[#allocation8 + $0x18] sm:$0xff] %v3047_v20  ;;  %v8270_v22 = vpop.f32.mrb[109].mxu1  ;;  %v3247_v40 = vrot.slane %v11171_v38, 1 }
 0x2fa   :  { %v2996_v25 = vrot.slane %v2955_v4, 1  ;;  %v2956_v43 = vmax.f32 %v2926_v61, 0.0  ;;  %v8271_v32 = vadd.f32 %v8270_v22, %v8269_v3  ;;  %v8272_v23 = vpop.f32.mrb[110].mxu1  ;;  %v3138_v42 = vrot.slane %v3136_v62, 5 }
 0x2fb   :  { %v8273_v29 = vpop.f32.mrb[111].mxu1  ;;  %v3141_v18 = vrot.slane %v3139_v55, 6  ;;  %vm11252_vm9 = vcmp.ne.s16.totalorder %v3247_v40, 0 }
 0x2fc   :  { %v2997_v11 = vsel %vm13023_vm6, %v2994_v41, %v2996_v25  ;;  %v2998_v15 = vrot.slane %v2956_v43, 1  ;;  %v2834_v21 = vadd.f32 %v8271_v32, %v2737_v35  ;;  %v8274_v63 = vadd.f32 %v8273_v29, %v8272_v23 }
 0x2fd   :  { %v3034_v39 = vmax.f32 %v2954_v48, %v2997_v11 }
 0x2fe   :  { %v2999_v44 = vsel %vm13024_vm7, %v2996_v25, %v2998_v15  ;;  %v2931_v60 = vadd.f32 %v10970_v0, %v2834_v21  ;;  %v2837_v6 = vadd.f32 %v8274_v63, %v2740_v9  ;;  %v2745_v0 = vadd.f32 %v11103_v13, %v11110_v16  ;;  %v8692_v63 = vld [vmem:[%s12914_s5 + $0x100] ss:$8 sps:$4 sm:$0xff]  }
 0x2ff   :  { %v3049_v17 = vmax.f32 %v3033_v45, %v3034_v39  ;;  %v3035_v7 = vmax.f32 %v2955_v4, %v2999_v44  ;;  %vm3208_vm7 = vsmask.f32 1280 }
 0x300   :  { %v2957_v52 = vmax.f32 %v2931_v60, 0.0  ;;  %v2934_v14 = vadd.f32 %v10974_v34, %v2837_v6  ;;  %v8275_v56 = vpop.f32.mrb[112].mxu1  ;;  %v3091_v49 = vld [vmem:[#allocation8 + $0x10] ss:$2 sm:$0xff]  ;;  %v2748_v34 = vadd.f32 %v11105_v8, %v11110_v16  ;;  %v8697_v60 = vld [vmem:[%s12914_s5 + $0x114] ss:$8 sps:$4 sm:$0xff]  }
 0x301   :  { %3085 = vst [vmem:[#allocation8 + $0x20] sm:$0xff] %v3049_v17  ;;  %v8276_v37 = vpop.f32.mrb[113].mxu1  ;;  %v11192_v28 = vpack.c.bf16 %v3091_v49, %v3089_v2  ;;  %v8695_v17 = vld [vmem:[%s12914_s5 + $0x110] ss:$8 sps:$4 sm:$0xff]  }
 0x302   :  { %v3000_v5 = vrot.slane %v2957_v52, 1  ;;  %v2958_v33 = vmax.f32 %v2934_v14, 0.0  ;;  %v8277_v51 = vadd.f32 %v8276_v37, %v8275_v56  ;;  %v8278_v53 = vpop.f32.mrb[114].mxu1  ;;  %v8698_v14 = vld [vmem:[%s12914_s5 + $0x120] ss:$8 sps:$4 sm:$0xff]  }
 0x303   :  { %v8279_v24 = vpop.f32.mrb[115].mxu1  ;;  %3098 = vst [vmem:[#allocation3 + $0x8] sm:$0xff] %v11192_v28  ;;  %v8703_v56 = vld [vmem:[%s12914_s5 + $0x134] ss:$8 sps:$4 sm:$0xff]  }
 0x304   :  { %v3001_v27 = vsel %vm13025_vm8, %v2998_v15, %v3000_v5  ;;  %v3002_v48 = vrot.slane %v2958_v33, 1  ;;  %v2842_v31 = vadd.f32 %v8277_v51, %v2745_v0  ;;  %v8280_v26 = vadd.f32 %v8279_v24, %v8278_v53  ;;  %v3130_v37 = vld [vmem:[#allocation3 + $0x18] sm:$0xe0]  ;;  %v8701_v0 = vld [vmem:[%s12914_s5 + $0x130] ss:$8 sps:$4 sm:$0xff]  }
 0x305   :  { %v3036_v50 = vmax.f32 %v2956_v43, %v3001_v27  ;;  %v3142_v43 = vor.u32 %v3141_v18, %v3138_v42  ;;  %v3245_v53 = vld [vmem:[#allocation3] sm:$0x80]  ;;  %v8704_v24 = vld [vmem:[%s12914_s5 + $0x140] ss:$8 sps:$4 sm:$0xff]   ;;  %v11259_v27 = vld [vmem:[#allocation3 + $0x18] sm:$0xc0] }
 0x306   :  { %v3003_v13 = vsel %vm13026_vm11, %v3000_v5, %v3002_v48  ;;  %v2939_v41 = vadd.f32 %v10968_v58, %v2842_v31  ;;  %v2845_v54 = vadd.f32 %v8280_v26, %v2748_v34  ;;  %v8706_v5 = vld [vmem:[%s12914_s5 + $0x144] ss:$8 sps:$4 sm:$0xff]   ;;  %v8709_v26 = vld [vmem:[%s12914_s5 + $0x154] ss:$8 sps:$4 sm:$0xff]   ;;  %v3251_v62 = vsel %vm11252_vm9, %v3245_v53, 0 }
 0x307   :  { %v3051_v30 = vmax.f32 %v3035_v7, %v3036_v50  ;;  %v3037_v8 = vmax.f32 %v2957_v52, %v3003_v13  ;;  %v8700_v7 = vld [vmem:[%s12914_s5 + $0x124] ss:$8 sps:$4 sm:$0xff]   ;;  %v11229_v52 = vor.u32 %v3247_v40, %v11169_v47  ;;  %v3182_v55 = vrot.slane %v11259_v27, 6  ;;  %v8707_v13 = vld [vmem:[%s12914_s5 + $0x150] ss:$8 sps:$4 sm:$0xff]  }
 0x308   :  { %v2959_v16 = vmax.f32 %v2939_v41, 0.0  ;;  %v2942_v59 = vadd.f32 %v10972_v19, %v2845_v54  ;;  %v8722_v40 = vld [vmem:[%s12914_s5 + $0x1a0] ss:$8 sps:$4 sm:$0xff]   ;;  %vm13035_vm8 = vcmask 1045504   ;;  %v9055_v34 = vld [vmem:[%s12916_s7 + $0x410] ss:$8 sps:$4 sm:$0xff]  }
 0x309   :  { %3086 = vst [vmem:[#allocation8 + $0x28] sm:$0xff] %v3051_v30  ;;  %vm3250_vm12 = vcmp.ne.s16.totalorder %v11229_v52, 0 }
 0x30a   :  { %v3004_v12 = vrot.slane %v2959_v16, 1  ;;  %v2960_v20 = vmax.f32 %v2942_v59, 0.0  ;;  %v3111_v45 = vld [vmem:[#allocation3 + $0x8] sm:$0x3f]  ;;  %v3252_v51 = vsel %vm3250_vm12, %v11192_v28, 0 }
 0x30b   :  { %v3129_v58 = vsel %vm3127_vm5, %v3111_v45, 0  ;;  %v3177_v4 = vrot.slane %v3111_v45, 6  ;;  %v3262_v50 = vshrl.u32 %v3252_v51, 16  ;;  %v8712_v59 = vld [vmem:[%s12914_s5 + $0x164] ss:$8 sps:$4 sm:$0xff]   ;;  %v3265_v45 = vshll.u32 %v3252_v51, 16 }
 0x30c   :  { %v3005_v61 = vsel %vm13027_vm1, %v3002_v48, %v3004_v12  ;;  %v3006_v3 = vrot.slane %v2960_v20, 1  ;;  %v3144_v22 = vshrl.u32 %v3129_v58, 16  ;;  %v3147_v35 = vshll.u32 %v3129_v58, 16  ;;  %v8710_v58 = vld [vmem:[%s12914_s5 + $0x160] ss:$8 sps:$4 sm:$0xff]  }
 0x30d   :  { %v3038_v25 = vmax.f32 %v2958_v33, %v3005_v61  ;;  %v3178_v19 = vsel %vm3175_vm13, %v3176_v36, %v3177_v4  ;;  %v3132_v33 = vsel %vm3127_vm5, %v3130_v37, 0  ;;  %v3258_v36 = vshrl.u32 %v3251_v62, 16  ;;  %v8733_v37 = vld [vmem:[%s12914_s5 + $0x1d4] ss:$8 sps:$4 sm:$0xff]   ;;  %v8731_v51 = vld [vmem:[%s12914_s5 + $0x1d0] ss:$8 sps:$4 sm:$0xff]  }
 0x30e   :  { %v3007_v32 = vsel %vm13028_vm2, %v3004_v12, %v3006_v3  ;;  %v3024_v23 = vsel %vm13029_vm0, %v3006_v3, 0.0  ;;  %v3146_v9 = vrot.slane %v3144_v22, 5  ;;  %v3149_v29 = vrot.slane %v3147_v35, 6  ;;  %4339 = vmatprep.mubr.bf16.mxu1 %v3178_v19  ;;  %v8715_v22 = vld [vmem:[%s12914_s5 + $0x174] ss:$8 sps:$4 sm:$0xff]   ;;  %vm13036_vm2 = vmmov %vm13035_vm8 }
 0x30f   :  { %v3053_v11 = vmax.f32 %v3037_v8, %v3038_v25  ;;  %v3039_v15 = vmax.f32 %v2959_v16, %v3007_v32  ;;  %v3040_v21 = vmax.f32 %v2960_v20, %v3024_v23  ;;  %v3154_v48 = vshrl.u32 %v3132_v33, 16  ;;  %v8713_v32 = vld [vmem:[%s12914_s5 + $0x170] ss:$8 sps:$4 sm:$0xff]  }
 0x310   :  { %v3150_v39 = vor.u32 %v3149_v29, %v3146_v9  ;;  %v3093_v2 = vld [vmem:[#allocation8 + $0x20] ss:$2 sm:$0xff]  ;;  %v3157_v31 = vshll.u32 %v3132_v33, 16  ;;  %v3264_v42 = vrot.slane %v3262_v50, 7  ;;  %v3260_v35 = vrot.slane %v3258_v36, 7 }
 0x311   :  { %3087 = vst [vmem:[#allocation8 + $0x30] sm:$0xff] %v3053_v11  ;;  %v3055_v44 = vmax.f32 %v3039_v15, %v3040_v21  ;;  %v3156_v54 = vrot.slane %v3154_v48, 5  ;;  %v8718_v9 = vld [vmem:[%s12914_s5 + $0x184] ss:$8 sps:$4 sm:$0xff]   ;;  %v8716_v29 = vld [vmem:[%s12914_s5 + $0x180] ss:$8 sps:$4 sm:$0xff]  }
 0x312   :  { %v3151_v6 = vsel %vm3134_vm3, %v3142_v43, %v3150_v39  ;;  %v3159_v30 = vrot.slane %v3157_v31, 6  ;;  %v3267_v25 = vor.u32 %v3265_v45, %v3264_v42  ;;  %v8721_v11 = vld [vmem:[%s12914_s5 + $0x194] ss:$8 sps:$4 sm:$0xff]   ;;  %v8719_v15 = vld [vmem:[%s12914_s5 + $0x190] ss:$8 sps:$4 sm:$0xff]  }
 0x313   :  { %3088 = vst [vmem:[#allocation8 + $0x38] sm:$0xff] %v3055_v44  ;;  %4340 = vmatmul.mubr.bf16.vlgmr.msra.gmra.mrb[116].mxu1 %v3151_v6  ;;  %v13032_v21 = vld [vmem:[#allocation19_spill] sm:$0xff]  ;;  %v8724_v44 = vld [vmem:[%s12914_s5 + $0x1a4] ss:$8 sps:$4 sm:$0xff]   ;;  %vm3332_vm1 = vsmask.f32 6400 }
 0x314   :  { %4361 = vmatpush1.bf16.msra.mxu1 %v8692_v63  ;;  %v3160_v4 = vor.u32 %v3159_v30, %v3156_v54  ;;  %v3268_v23 = vsel %vm1754_vm10, %v3260_v35, %v3267_v25  ;;  %v11300_v63 = vshrl.u32 %v13032_v21, 16  ;;  %v11303_v39 = vshll.u32 %v13032_v21, 16  ;;  %v8736_v31 = vld [vmem:[%s12914_s5 + $0x1e4] ss:$8 sps:$4 sm:$0xff]   ;;  %v8737_v45 = vld [vmem:[%s12914_s5 + $0x1f0] ss:$8 sps:$4 sm:$0xff]  }
 0x315   :  { %4362 = vmatprep.subr.bf16.mxu1 %v8697_v60  ;;  %v8745_v21 = vld [vmem:[%s12914_s5 + $0x214] ss:$8 sps:$4 sm:$0xff]  }
 0x316   :  { %v3197_v60 = vrot.slane %v11300_v63, 1  ;;  %v3200_v6 = vrot.slane %v11303_v39, 2 }
 0x318   :  { %4363 = vmatpush1.bf16.msra.mxu1 %v8695_v17  ;;  %v8727_v17 = vld [vmem:[%s12914_s5 + $0x1b4] ss:$8 sps:$4 sm:$0xff]  }
 0x319   :  { %4364 = vmatprep.subr.bf16.mxu1 %v8700_v7  ;;  %v11316_v7 = vor.u32 %v3200_v6, %v3197_v60 }
 0x31a   :  { %v3095_v49 = vld [vmem:[#allocation8 + $0x30] ss:$2 sm:$0xff] }
 0x31b   :  { %v11237_v1 = vpack.c.bf16 %v3095_v49, %v3093_v2  ;;  %vm3202_vm14 = vcmp.ne.s16.totalorder %v11316_v7, 0  ;;  %v8728_v2 = vld [vmem:[%s12914_s5 + $0x1c0] ss:$8 sps:$4 sm:$0xff]  }
 0x31c   :  { %4365 = vmatpush1.bf16.msra.mxu1 %v8698_v14  ;;  %v8725_v14 = vld [vmem:[%s12914_s5 + $0x1b0] ss:$8 sps:$4 sm:$0xff]   ;;  %v3186_v49 = vld [vmem:[#allocation3 + $0x8] sm:$0x7f] }
 0x31d   :  { %4366 = vmatprep.subr.bf16.mxu1 %v8703_v56  ;;  %3102 = vst [vmem:[#allocation3 + $0x20] sm:$0xff] %v11237_v1  ;;  %v8730_v56 = vld [vmem:[%s12914_s5 + $0x1c4] ss:$8 sps:$4 sm:$0xff]   ;;  %v3204_v33 = vsel %vm3202_vm14, %v3186_v49, 0  ;;  %v3256_v53 = vsel %vm3250_vm12, %v11237_v1, 0 }
 0x31e   :  { %v3218_v50 = vshrl.u32 %v3204_v33, 16  ;;  %v3221_v62 = vshll.u32 %v3204_v33, 16  ;;  %v8743_v49 = vld [vmem:[%s12914_s5 + $0x210] ss:$8 sps:$4 sm:$0xff]  }
 0x320   :  { %4367 = vmatpush1.bf16.msra.mxu1 %v8701_v0  ;;  %v3284_v0 = vrot.slane %v11300_v63, 7  ;;  %v3220_v36 = vrot.slane %v3218_v50, 6  ;;  %v3223_v42 = vrot.slane %v3221_v62, 7  ;;  %v8749_v50 = vld [vmem:[%s12914_s5 + $0x230] ss:$8 sps:$4 sm:$0xff]  }
 0x321   :  { %4368 = vmatprep.subr.bf16.mxu1 %v8706_v5  ;;  %v3203_v5 = vsel %vm3202_vm14, %v11204_v10, 0  ;;  %v3253_v10 = vld [vmem:[#allocation3 + $0x18] sm:$0x80]  ;;  %v8754_v62 = vld [vmem:[%s12914_s5 + $0x244] ss:$8 sps:$4 sm:$0xff]  }
 0x322   :  { %v3213_v48 = vshll.u32 %v3203_v5, 16  ;;  %vm11372_vm6 = vcmp.ne.s16.totalorder %v3284_v0, 0  ;;  %v3224_v25 = vor.u32 %v3223_v42, %v3220_v36  ;;  %v8764_v36 = vld [vmem:[%s12914_s5 + $0x280] ss:$8 sps:$4 sm:$0xff]   ;;  %v8769_v42 = vld [vmem:[%s12914_s5 + $0x294] ss:$8 sps:$4 sm:$0xff]  }
 0x324   :  { %4369 = vmatpush1.bf16.msra.mxu1 %v8704_v24  ;;  %v3131_v41 = vld [vmem:[#allocation3 + $0x20] sm:$0x3f]  ;;  %v3210_v24 = vshrl.u32 %v3203_v5, 16 }
 0x325   :  { %4370 = vmatprep.subr.bf16.mxu1 %v8709_v26  ;;  %v3133_v8 = vsel %vm3127_vm5, %v3131_v41, 0  ;;  %v3183_v16 = vrot.slane %v3131_v41, 6  ;;  %v11347_v26 = vor.u32 %v3284_v0, %v11303_v39  ;;  %v3255_v41 = vsel %vm11252_vm9, %v3253_v10, 0  ;;  %v3205_v54 = vld [vmem:[#allocation3 + $0x20] sm:$0x7f] }
 0x326   :  { %v3162_v18 = vshrl.u32 %v3133_v8, 16  ;;  %v3165_v12 = vshll.u32 %v3133_v8, 16  ;;  %v3212_v30 = vrot.slane %v3210_v24, 6  ;;  %v3215_v8 = vrot.slane %v3213_v48, 7  ;;  %v8746_v24 = vld [vmem:[%s12914_s5 + $0x220] ss:$8 sps:$4 sm:$0xff]  }
 0x327   :  { %v3184_v20 = vsel %vm3175_vm13, %v3182_v55, %v3183_v16  ;;  %v3275_v55 = vshrl.u32 %v3256_v53, 16  ;;  %v8739_v16 = vld [vmem:[%s12914_s5 + $0x1f4] ss:$8 sps:$4 sm:$0xff]   ;;  %vm3286_vm4 = vcmp.ne.s16.totalorder %v11347_v26, 0  ;;  %v9150_v26 = vld [vmem:[%s12916_s7 + $0x604] ss:$8 sps:$4 sm:$0xff]  }
 0x328   :  { %4371 = vmatpush1.bf16.msra.mxu1 %v8707_v13  ;;  %4349 = vmatprep.mubr.bf16.mxu1 %v3184_v20  ;;  %v3164_v61 = vrot.slane %v3162_v18, 5  ;;  %v3167_v3 = vrot.slane %v3165_v12, 6  ;;  %v8734_v13 = vld [vmem:[%s12914_s5 + $0x1e0] ss:$8 sps:$4 sm:$0xff]   ;;  %v3271_v18 = vshrl.u32 %v3255_v41, 16  ;;  %v3207_v20 = vsel %vm3202_vm14, %v3205_v54, 0 }
 0x329   :  { %4372 = vmatprep.subr.bf16.mxu1 %v8712_v59  ;;  %v3206_v59 = vsel %vm3202_vm14, %v11259_v27, 0  ;;  %v3277_v12 = vrot.slane %v3275_v55, 7  ;;  %v3288_v27 = vsel %vm3286_vm4, %v11192_v28, 0  ;;  %v8751_v48 = vld [vmem:[%s12914_s5 + $0x234] ss:$8 sps:$4 sm:$0xff]  }
 0x32a   :  { %v3168_v19 = vor.u32 %v3167_v3, %v3164_v61  ;;  %v3278_v61 = vshll.u32 %v3256_v53, 16  ;;  %v3228_v3 = vshrl.u32 %v3206_v59, 16  ;;  %v3295_v0 = vshrl.u32 %v3288_v27, 16  ;;  %v8752_v55 = vld [vmem:[%s12914_s5 + $0x240] ss:$8 sps:$4 sm:$0xff]  }
 0x32b   :  { %v8755_v41 = vld [vmem:[%s12914_s5 + $0x250] ss:$8 sps:$4 sm:$0xff]   ;;  %v8760_v54 = vld [vmem:[%s12914_s5 + $0x264] ss:$8 sps:$4 sm:$0xff]  }
 0x32c   :  { %4373 = vmatpush1.bf16.msra.mxu1 %v8710_v58  ;;  %v3169_v43 = vsel %vm3134_vm3, %v3160_v4, %v3168_v19  ;;  %v8742_v58 = vld [vmem:[%s12914_s5 + $0x204] ss:$8 sps:$4 sm:$0xff]   ;;  %v3216_v4 = vor.u32 %v3215_v8, %v3212_v30  ;;  %v3231_v19 = vshll.u32 %v3206_v59, 16  ;;  %v8758_v30 = vld [vmem:[%s12914_s5 + $0x260] ss:$8 sps:$4 sm:$0xff]  }
 0x32d   :  { %4350 = vmatmul.mubr.bf16.gmra.mrb[120].mxu1 %v3169_v43  ;;  %4374 = vmatprep.subr.bf16.mxu1 %v8715_v22  ;;  %v3283_v22 = vld [vmem:[#allocation3 + $0x10] sm:$0x1]  ;;  %v3236_v43 = vshrl.u32 %v3207_v20, 16  ;;  %v8763_v8 = vld [vmem:[%s12914_s5 + $0x274] ss:$8 sps:$4 sm:$0xff]  }
 0x32e   :  { %4392 = vmatprep.mubr.bf16.mxu1 %v3268_v23  ;;  %v3273_v23 = vrot.slane %v3271_v18, 7  ;;  %v3225_v60 = vsel %vm3208_vm7, %v3216_v4, %v3224_v25  ;;  %v3233_v6 = vrot.slane %v3231_v19, 7  ;;  %v8766_v59 = vld [vmem:[%s12914_s5 + $0x284] ss:$8 sps:$4 sm:$0xff]   ;;  %v8767_v18 = vld [vmem:[%s12914_s5 + $0x290] ss:$8 sps:$4 sm:$0xff]  }
 0x32f   :  { %v8773_v4 = vld [vmem:[%s12914_s5 + $0x2b0] ss:$8 sps:$4 sm:$0xff]   ;;  %v8871_v25 = vld [vmem:[%s12916_s7 + $0x124] ss:$8 sps:$4 sm:$0xff]   ;;  %v8776_v19 = vld [vmem:[%s12914_s5 + $0x2c0] ss:$8 sps:$4 sm:$0xff]  }
 0x330   :  { %4375 = vmatpush1.bf16.msra.mxu1 %v8713_v32  ;;  %v3239_v32 = vshll.u32 %v3207_v20, 16  ;;  %v8770_v20 = vld [vmem:[%s12914_s5 + $0x2a0] ss:$8 sps:$4 sm:$0xff]  }
 0x331   :  { %4376 = vmatprep.subr.bf16.mxu1 %v8718_v9  ;;  %v3280_v9 = vor.u32 %v3278_v61, %v3277_v12  ;;  %v8772_v12 = vld [vmem:[%s12914_s5 + $0x2a4] ss:$8 sps:$4 sm:$0xff]   ;;  %v8865_v61 = vld [vmem:[%s12916_s7 + $0x114] ss:$8 sps:$4 sm:$0xff]  }
 0x334   :  { %4377 = vmatpush1.bf16.msra.mxu1 %v8716_v29  ;;  %v3297_v29 = vshll.u32 %v3288_v27, 16  ;;  %v8862_v27 = vld [vmem:[%s12916_s7 + $0x104] ss:$8 sps:$4 sm:$0xff]  }
 0x335   :  { %4378 = vmatprep.subr.bf16.mxu1 %v8721_v11  ;;  %v8740_v11 = vld [vmem:[%s12914_s5 + $0x200] ss:$8 sps:$4 sm:$0xff]   ;;  %6923 = vmatprep.subr.bf16.mxu0 %v8862_v27 }
 0x336   :  { %v8800_v27 = vld [vmem:[%s12914_s5 + $0x340] ss:$8 sps:$4 sm:$0xff]  }
 0x338   :  { %4379 = vmatpush1.bf16.msra.mxu1 %v8719_v15  ;;  %v3289_v15 = vsel %vm11372_vm6, %v3283_v22, 0  ;;  %v8863_v22 = vld [vmem:[%s12916_s7 + $0x110] ss:$8 sps:$4 sm:$0xff]  }
 0x339   :  { %4380 = vmatprep.subr.bf16.mxu1 %v8724_v44  ;;  %v3230_v44 = vrot.slane %v3228_v3, 6  ;;  %v8778_v3 = vld [vmem:[%s12914_s5 + $0x2c4] ss:$8 sps:$4 sm:$0xff]  }
 0x33b   :  { %v3234_v5 = vor.u32 %v3233_v6, %v3230_v44  ;;  %v8782_v6 = vld [vmem:[%s12914_s5 + $0x2e0] ss:$8 sps:$4 sm:$0xff]  }
 0x33c   :  { %4381 = vmatpush1.bf16.msra.mxu1 %v8722_v40  ;;  %v3238_v40 = vrot.slane %v3236_v43, 6  ;;  %v8781_v43 = vld [vmem:[%s12914_s5 + $0x2d4] ss:$8 sps:$4 sm:$0xff]  }
 0x33d   :  { %4382 = vmatprep.subr.bf16.mxu1 %v8727_v17  ;;  %v3241_v17 = vrot.slane %v3239_v32, 7  ;;  %v8869_v32 = vld [vmem:[%s12916_s7 + $0x120] ss:$8 sps:$4 sm:$0xff]  }
 0x33f   :  { %v3242_v33 = vor.u32 %v3241_v17, %v3238_v40  ;;  %v8787_v17 = vld [vmem:[%s12914_s5 + $0x2f4] ss:$8 sps:$4 sm:$0xff]  }
 0x340   :  { %4383 = vmatpush1.bf16.msra.mxu1 %v8725_v14  ;;  %v3281_v14 = vsel %vm1754_vm10, %v3273_v23, %v3280_v9  ;;  %v8877_v23 = vld [vmem:[%s12916_s7 + $0x134] ss:$8 sps:$4 sm:$0xff]   ;;  %v8779_v9 = vld [vmem:[%s12914_s5 + $0x2d0] ss:$8 sps:$4 sm:$0xff]  }
 0x341   :  { %4384 = vmatprep.subr.bf16.mxu1 %v8730_v56  ;;  %v3299_v56 = vrot.slane %v3297_v29, 1  ;;  %v3292_v29 = vsel %vm3286_vm4, %v11237_v1, 0 }
 0x342   :  { %v3310_v44 = vshll.u32 %v3292_v29, 16 }
 0x344   :  { %4385 = vmatpush1.bf16.msra.mxu1 %v8728_v2  ;;  %v3302_v2 = vshll.u32 %v3289_v15, 16  ;;  %v3291_v15 = vld [vmem:[#allocation3 + $0x28] sm:$0x1] }
 0x345   :  { %4386 = vmatprep.subr.bf16.mxu1 %v8733_v37  ;;  %v8748_v37 = vld [vmem:[%s12914_s5 + $0x224] ss:$8 sps:$4 sm:$0xff]   ;;  %v3293_v40 = vsel %vm11372_vm6, %v3291_v15, 0  ;;  %v3322_v15 = vrot.slane %v11169_v47, 6 }
 0x346   :  { %v3304_v53 = vrot.slane %v3302_v2, 1  ;;  %v3315_v2 = vshll.u32 %v3293_v40, 16  ;;  %v8821_v40 = vld [vmem:[%s12914_s5 + $0x3b0] ss:$8 sps:$4 sm:$0xff]   ;;  %v8826_v47 = vld [vmem:[%s12914_s5 + $0x3c4] ss:$8 sps:$4 sm:$0xff]  }
 0x348   :  { %4387 = vmatpush1.bf16.msra.mxu1 %v8731_v51  ;;  %v3300_v51 = vor.u32 %v3299_v56, %v3295_v0  ;;  %v3312_v56 = vrot.slane %v3310_v44, 1  ;;  %v8790_v0 = vld [vmem:[%s12914_s5 + $0x304] ss:$8 sps:$4 sm:$0xff]   ;;  %v8818_v44 = vld [vmem:[%s12914_s5 + $0x3a0] ss:$8 sps:$4 sm:$0xff]  }
 0x349   :  { %4388 = vmatprep.subr.bf16.mxu1 %v8736_v31  ;;  %v3243_v31 = vsel %vm3208_vm7, %v3234_v5, %v3242_v33  ;;  %v3308_v5 = vshrl.u32 %v3292_v29, 16  ;;  %v8887_v33 = vld [vmem:[%s12916_s7 + $0x150] ss:$8 sps:$4 sm:$0xff]  }
 0x34a   :  { %v3305_v10 = vsel %vm1725_vm15, %v3300_v51, %v3304_v53  ;;  %v3317_v53 = vrot.slane %v3315_v2, 1  ;;  %v8815_v29 = vld [vmem:[%s12914_s5 + $0x390] ss:$8 sps:$4 sm:$0xff]  }
 0x34b   :  { %v3313_v51 = vor.u32 %v3312_v56, %v3308_v5  ;;  %v8832_v5 = vld [vmem:[%s12914_s5 + $0x3e4] ss:$8 sps:$4 sm:$0xff]  }
 0x34c   :  { %4389 = vmatpush1.bf16.msra.mxu1 %v8734_v13  ;;  %v8757_v13 = vld [vmem:[%s12914_s5 + $0x254] ss:$8 sps:$4 sm:$0xff]  }
 0x34d   :  { %4390 = vmatprep.subr.bf16.mxu1 %v8739_v16  ;;  %v8761_v16 = vld [vmem:[%s12914_s5 + $0x270] ss:$8 sps:$4 sm:$0xff]  }
 0x350   :  { %4391 = vmatpush1.bf16.msra.mxu1 %v8737_v45  ;;  %v8775_v45 = vld [vmem:[%s12914_s5 + $0x2b4] ss:$8 sps:$4 sm:$0xff]  }
 0x351   :  { %4413 = vmatprep.subr.bf16.mxu1 %v8742_v58  ;;  %v8860_v58 = vld [vmem:[%s12916_s7 + $0x100] ss:$8 sps:$4 sm:$0xff]  }
 0x352   :  { %6924 = vmatpush1.bf16.msra.mxu0 %v8860_v58  ;;  %v8919_v58 = vld [vmem:[%s12916_s7 + $0x1a4] ss:$8 sps:$4 sm:$0xff]  }
 0x353   :  { %4393 = vmatmul.mubr.bf16.vlgmr.msra.gmra.mrb[116].mxu1 %v3225_v60  ;;  %6925 = vmatprep.subr.bf16.mxu0 %v8865_v61  ;;  %v8883_v60 = vld [vmem:[%s12916_s7 + $0x144] ss:$8 sps:$4 sm:$0xff]   ;;  %v8917_v61 = vld [vmem:[%s12916_s7 + $0x1a0] ss:$8 sps:$4 sm:$0xff]  }
 0x354   :  { %4402 = vmatprep.mubr.bf16.mxu1 %v3281_v14  ;;  %4414 = vmatpush1.bf16.msra.mxu1 %v8740_v11  ;;  %v8784_v11 = vld [vmem:[%s12914_s5 + $0x2e4] ss:$8 sps:$4 sm:$0xff]   ;;  %v8881_v14 = vld [vmem:[%s12916_s7 + $0x140] ss:$8 sps:$4 sm:$0xff]  }
 0x355   :  { %4415 = vmatprep.subr.bf16.mxu1 %v8745_v21  ;;  %v8875_v21 = vld [vmem:[%s12916_s7 + $0x130] ss:$8 sps:$4 sm:$0xff]  }
 0x356   :  { %6926 = vmatpush1.bf16.msra.mxu0 %v8863_v22  ;;  %v8808_v22 = vld [vmem:[%s12914_s5 + $0x364] ss:$8 sps:$4 sm:$0xff]  }
 0x357   :  { %6927 = vmatprep.subr.bf16.mxu0 %v8871_v25  ;;  %v8806_v25 = vld [vmem:[%s12914_s5 + $0x360] ss:$8 sps:$4 sm:$0xff]  }
 0x358   :  { %4416 = vmatpush1.bf16.msra.mxu1 %v8743_v49  ;;  %v8889_v49 = vld [vmem:[%s12916_s7 + $0x154] ss:$8 sps:$4 sm:$0xff]  }
 0x359   :  { %4417 = vmatprep.subr.bf16.mxu1 %v8748_v37  ;;  %v8785_v37 = vld [vmem:[%s12914_s5 + $0x2f0] ss:$8 sps:$4 sm:$0xff]  }
 0x35a   :  { %6928 = vmatpush1.bf16.msra.mxu0 %v8869_v32  ;;  %v8814_v32 = vld [vmem:[%s12914_s5 + $0x384] ss:$8 sps:$4 sm:$0xff]  }
 0x35b   :  { %4403 = vmatmul.mubr.bf16.gmra.mrb[120].mxu1 %v3243_v31  ;;  %6929 = vmatprep.subr.bf16.mxu0 %v8877_v23  ;;  %v8793_v31 = vld [vmem:[%s12914_s5 + $0x314] ss:$8 sps:$4 sm:$0xff]   ;;  %v8812_v23 = vld [vmem:[%s12914_s5 + $0x380] ss:$8 sps:$4 sm:$0xff]  }
 0x35c   :  { %4418 = vmatpush1.bf16.msra.mxu1 %v8746_v24  ;;  %4445 = vmatprep.mubr.bf16.mxu1 %v3305_v10  ;;  %v8895_v24 = vld [vmem:[%s12916_s7 + $0x164] ss:$8 sps:$4 sm:$0xff]   ;;  %v8893_v10 = vld [vmem:[%s12916_s7 + $0x160] ss:$8 sps:$4 sm:$0xff]  }
 0x35d   :  { %4419 = vmatprep.subr.bf16.mxu1 %v8751_v48  ;;  %v8788_v48 = vld [vmem:[%s12914_s5 + $0x300] ss:$8 sps:$4 sm:$0xff]  }
 0x35e   :  { %6930 = vmatpush1.bf16.msra.mxu0 %v8875_v21  ;;  %v3323_v21 = vrot.slane %v11171_v38, 7  ;;  %v3320_v38 = vld [vmem:[#allocation3 + $0x8] sm:$0xfe] }
 0x35f   :  { %6931 = vmatprep.subr.bf16.mxu0 %v8883_v60  ;;  %v8823_v60 = vld [vmem:[%s12914_s5 + $0x3b4] ss:$8 sps:$4 sm:$0xff]  }
 0x360   :  { %4420 = vmatpush1.bf16.msra.mxu1 %v8749_v50  ;;  %v3318_v50 = vsel %vm1725_vm15, %v3313_v51, %v3317_v53  ;;  %v8830_v53 = vld [vmem:[%s12914_s5 + $0x3e0] ss:$8 sps:$4 sm:$0xff]  }
 0x361   :  { %4421 = vmatprep.subr.bf16.mxu1 %v8754_v62  ;;  %v8901_v62 = vld [vmem:[%s12916_s7 + $0x174] ss:$8 sps:$4 sm:$0xff]  }
 0x362   :  { %6932 = vmatpush1.bf16.msra.mxu0 %v8881_v14  ;;  %v8829_v14 = vld [vmem:[%s12914_s5 + $0x3d4] ss:$8 sps:$4 sm:$0xff]  }
 0x363   :  { %6933 = vmatprep.subr.bf16.mxu0 %v8889_v49  ;;  %v8827_v49 = vld [vmem:[%s12914_s5 + $0x3d0] ss:$8 sps:$4 sm:$0xff]  }
 0x364   :  { %4422 = vmatpush1.bf16.msra.mxu1 %v8752_v55  ;;  %v8791_v55 = vld [vmem:[%s12914_s5 + $0x310] ss:$8 sps:$4 sm:$0xff]  }
 0x365   :  { %4423 = vmatprep.subr.bf16.mxu1 %v8757_v13  ;;  %v11539_v13 = vld [vmem:[#allocation3 + $0x10] sm:$0x3] }
 0x366   :  { %6934 = vmatpush1.bf16.msra.mxu0 %v8887_v33 }
 0x367   :  { %6935 = vmatprep.subr.bf16.mxu0 %v8895_v24  ;;  %v3329_v24 = vld [vmem:[#allocation3 + $0x28] sm:$0x3] }
 0x368   :  { %4424 = vmatpush1.bf16.msra.mxu1 %v8755_v41  ;;  %v11541_v41 = vld [vmem:[#allocation3 + $0x8] sm:$0xfc] }
 0x369   :  { %4425 = vmatprep.subr.bf16.mxu1 %v8760_v54  ;;  %v8899_v54 = vld [vmem:[%s12916_s7 + $0x170] ss:$8 sps:$4 sm:$0xff]  }
 0x36a   :  { %6936 = vmatpush1.bf16.msra.mxu0 %v8893_v10 }
 0x36b   :  { %6937 = vmatprep.subr.bf16.mxu0 %v8901_v62 }
 0x36c   :  { %4426 = vmatpush1.bf16.msra.mxu1 %v8758_v30  ;;  %v3374_v30 = vrot.slane %v11541_v41, 2 }
 0x36d   :  { %4427 = vmatprep.subr.bf16.mxu1 %v8763_v8  ;;  %v3375_v8 = vrot.slane %v11539_v13, 2 }
 0x36e   :  { %6938 = vmatpush1.bf16.msra.mxu0 %v8899_v54  ;;  %v8833_v54 = vld [vmem:[%s12914_s5 + $0x3f0] ss:$8 sps:$4 sm:$0xff]  }
 0x370   :  { %4428 = vmatpush1.bf16.msra.mxu1 %v8761_v16  ;;  %v8907_v16 = vld [vmem:[%s12916_s7 + $0x184] ss:$8 sps:$4 sm:$0xff]  }
 0x371   :  { %4429 = vmatprep.subr.bf16.mxu1 %v8766_v59  ;;  %v8794_v59 = vld [vmem:[%s12914_s5 + $0x320] ss:$8 sps:$4 sm:$0xff]   ;;  %6939 = vmatprep.subr.bf16.mxu0 %v8907_v16 }
 0x374   :  { %4430 = vmatpush1.bf16.msra.mxu1 %v8764_v36  ;;  %v8799_v36 = vld [vmem:[%s12914_s5 + $0x334] ss:$8 sps:$4 sm:$0xff]  }
 0x375   :  { %4431 = vmatprep.subr.bf16.mxu1 %v8769_v42  ;;  %v8905_v42 = vld [vmem:[%s12916_s7 + $0x180] ss:$8 sps:$4 sm:$0xff]  }
 0x376   :  { %6940 = vmatpush1.bf16.msra.mxu0 %v8905_v42 }
 0x378   :  { %4432 = vmatpush1.bf16.msra.mxu1 %v8767_v18  ;;  %v3376_v18 = vsel %vm13035_vm8, %v3374_v30, %v3375_v8  ;;  %v11666_v30 = vld [vmem:[#allocation3 + $0x20] sm:$0xfc]  ;;  %vm3394_vm8 = vsmask.f32 5376 }
 0x379   :  { %4433 = vmatprep.subr.bf16.mxu1 %v8772_v12  ;;  %v8913_v12 = vld [vmem:[%s12916_s7 + $0x194] ss:$8 sps:$4 sm:$0xff]  }
 0x37a   :  { %6941 = vmatprep.subr.bf16.mxu0 %v8913_v12 }
 0x37c   :  { %4434 = vmatpush1.bf16.msra.mxu1 %v8770_v20  ;;  %v8797_v20 = vld [vmem:[%s12914_s5 + $0x330] ss:$8 sps:$4 sm:$0xff]  }
 0x37d   :  { %4435 = vmatprep.subr.bf16.mxu1 %v8775_v45  ;;  %v8802_v45 = vld [vmem:[%s12914_s5 + $0x344] ss:$8 sps:$4 sm:$0xff]  }
 0x380   :  { %4436 = vmatpush1.bf16.msra.mxu1 %v8773_v4  ;;  %v8805_v4 = vld [vmem:[%s12914_s5 + $0x354] ss:$8 sps:$4 sm:$0xff]  }
 0x381   :  { %4437 = vmatprep.subr.bf16.mxu1 %v8778_v3  ;;  %v8803_v3 = vld [vmem:[%s12914_s5 + $0x350] ss:$8 sps:$4 sm:$0xff]  }
 0x384   :  { %4438 = vmatpush1.bf16.msra.mxu1 %v8776_v19  ;;  %v8811_v19 = vld [vmem:[%s12914_s5 + $0x374] ss:$8 sps:$4 sm:$0xff]  }
 0x385   :  { %4439 = vmatprep.subr.bf16.mxu1 %v8781_v43  ;;  %v8809_v43 = vld [vmem:[%s12914_s5 + $0x370] ss:$8 sps:$4 sm:$0xff]  }
 0x388   :  { %4440 = vmatpush1.bf16.msra.mxu1 %v8779_v9  ;;  %v8817_v9 = vld [vmem:[%s12914_s5 + $0x394] ss:$8 sps:$4 sm:$0xff]  }
 0x389   :  { %4441 = vmatprep.subr.bf16.mxu1 %v8784_v11  ;;  %v8820_v11 = vld [vmem:[%s12914_s5 + $0x3a4] ss:$8 sps:$4 sm:$0xff]  }
 0x38c   :  { %4442 = vmatpush1.bf16.msra.mxu1 %v8782_v6  ;;  %v11627_v6 = vor.u32 %v3323_v21, %v3322_v15  ;;  %v8847_v15 = vld [vmem:[%s12914_s5 + $0x434] ss:$8 sps:$4 sm:$0xff]  }
 0x38d   :  { %4443 = vmatprep.subr.bf16.mxu1 %v8787_v17  ;;  %v8824_v17 = vld [vmem:[%s12914_s5 + $0x3c0] ss:$8 sps:$4 sm:$0xff]  }
 0x38e   :  { %vm3325_vm11 = vcmp.ne.s16.totalorder %v11627_v6, 0  ;;  %v9196_v6 = vld [vmem:[%s12916_s7 + $0x700] ss:$8 sps:$4 sm:$0xff]  }
 0x38f   :  { %v3327_v56 = vsel %vm3325_vm11, %v11539_v13, 0  ;;  %v3326_v2 = vsel %vm3325_vm11, %v3320_v38, 0  ;;  %v3331_v13 = vsel %vm3325_vm11, %v3329_v24, 0  ;;  %v8853_v38 = vld [vmem:[%s12914_s5 + $0x454] ss:$8 sps:$4 sm:$0xff]  }
 0x390   :  { %4444 = vmatpush1.bf16.msra.mxu1 %v8785_v37  ;;  %v3342_v37 = vshrl.u32 %v3327_v56, 16  ;;  %v3334_v33 = vshrl.u32 %v3326_v2, 16  ;;  %v3337_v51 = vshll.u32 %v3326_v2, 16  ;;  %v3363_v12 = vshll.u32 %v3331_v13, 16 }
 0x391   :  { %4466 = vmatprep.subr.bf16.mxu1 %v8790_v0  ;;  %v3345_v0 = vshll.u32 %v3327_v56, 16  ;;  %v8851_v56 = vld [vmem:[%s12914_s5 + $0x450] ss:$8 sps:$4 sm:$0xff]  }
 0x392   :  { %v3336_v62 = vrot.slane %v3334_v33, 1  ;;  %v3391_v33 = vld [vmem:[#allocation3 + $0x28] sm:$0x7] }
 0x393   :  { %4446 = vmatmul.mubr.bf16.vlgmr.msra.gmra.mrb[116].mxu1 %v11192_v28  ;;  %v8796_v28 = vld [vmem:[%s12914_s5 + $0x324] ss:$8 sps:$4 sm:$0xff]   ;;  %v3347_v10 = vrot.slane %v3345_v0, 2 }
 0x394   :  { %4455 = vmatprep.mubr.bf16.mxu1 %v3318_v50  ;;  %4467 = vmatpush1.bf16.msra.mxu1 %v8788_v48  ;;  %v3328_v48 = vld [vmem:[#allocation3 + $0x20] sm:$0xfe]  ;;  %v8835_v50 = vld [vmem:[%s12914_s5 + $0x3f4] ss:$8 sps:$4 sm:$0xff]  }
 0x395   :  { %4468 = vmatprep.subr.bf16.mxu1 %v8793_v31  ;;  %v3344_v31 = vrot.slane %v3342_v37, 1  ;;  %v8856_v37 = vld [vmem:[%s12914_s5 + $0x464] ss:$8 sps:$4 sm:$0xff]  }
 0x397   :  { %v3348_v16 = vor.u32 %v3347_v10, %v3344_v31 }
 0x398   :  { %4469 = vmatpush1.bf16.msra.mxu1 %v8791_v55  ;;  %v3339_v55 = vrot.slane %v3337_v51, 2 }
 0x399   :  { %4470 = vmatprep.subr.bf16.mxu1 %v8796_v28  ;;  %v3330_v28 = vsel %vm3325_vm11, %v3328_v48, 0 }
 0x39a   :  { %v3340_v8 = vor.u32 %v3339_v55, %v3336_v62  ;;  %v3355_v42 = vshll.u32 %v3330_v28, 16  ;;  %v8857_v62 = vld [vmem:[%s12914_s5 + $0x470] ss:$8 sps:$4 sm:$0xff]  }
 0x39b   :  { %4456 = vmatmul.mubr.bf16.gmra.mrb[120].mxu1 %v11237_v1  ;;  %v8911_v1 = vld [vmem:[%s12916_s7 + $0x190] ss:$8 sps:$4 sm:$0xff]  }
 0x39c   :  { %4471 = vmatpush1.bf16.msra.mxu1 %v8794_v59  ;;  %4498 = vmatprep.mubr.bf16.mxu1 %v3376_v18  ;;  %v8838_v59 = vld [vmem:[%s12914_s5 + $0x404] ss:$8 sps:$4 sm:$0xff]   ;;  %v3360_v18 = vshrl.u32 %v3331_v13, 16 }
 0x39d   :  { %4472 = vmatprep.subr.bf16.mxu1 %v8799_v36  ;;  %6942 = vmatpush1.bf16.msra.mxu0 %v8911_v1  ;;  %v3352_v36 = vshrl.u32 %v3330_v28, 16  ;;  %v8836_v1 = vld [vmem:[%s12914_s5 + $0x400] ss:$8 sps:$4 sm:$0xff]   ;;  %v8868_v28 = vld [vmem:[%s12916_s7 + $0x4] ss:$8 sps:$4 sm:$0xff]  }
 0x39e   :  { %6943 = vmatprep.subr.bf16.mxu0 %v8919_v58  ;;  %v3349_v58 = vsel %vm3332_vm1, %v3340_v8, %v3348_v16 }
 0x3a0   :  { %4473 = vmatpush1.bf16.msra.mxu1 %v8797_v20  ;;  %v3380_v20 = vrot.slane %v11666_v30, 2 }
 0x3a1   :  { %4474 = vmatprep.subr.bf16.mxu1 %v8802_v45  ;;  %6944 = vmatpush1.bf16.msra.mxu0 %v8917_v61  ;;  %v3381_v45 = vrot.slane %v3329_v24, 2  ;;  %v3357_v61 = vrot.slane %v3355_v42, 2  ;;  %v8859_v24 = vld [vmem:[%s12914_s5 + $0x474] ss:$8 sps:$4 sm:$0xff]  }
 0x3a2   :  { %v8874_v42 = vld [vmem:[%s12916_s7 + $0x14] ss:$8 sps:$4 sm:$0xff]  }
 0x3a4   :  { %4475 = vmatpush1.bf16.msra.mxu1 %v8800_v27  ;;  %v8841_v27 = vld [vmem:[%s12914_s5 + $0x414] ss:$8 sps:$4 sm:$0xff]  }
 0x3a5   :  { %4476 = vmatprep.subr.bf16.mxu1 %v8805_v4  ;;  %v3354_v4 = vrot.slane %v3352_v36, 1 }
 0x3a8   :  { %4477 = vmatpush1.bf16.msra.mxu1 %v8803_v3  ;;  %v3362_v3 = vrot.slane %v3360_v18, 1 }
 0x3a9   :  { %4478 = vmatprep.subr.bf16.mxu1 %v8808_v22  ;;  %v3365_v22 = vrot.slane %v3363_v12, 2 }
 0x3ac   :  { %4479 = vmatpush1.bf16.msra.mxu1 %v8806_v25  ;;  %v3382_v25 = vsel %vm13036_vm2, %v3380_v20, %v3381_v45 }
 0x3ad   :  { %4480 = vmatprep.subr.bf16.mxu1 %v8811_v19  ;;  %v8839_v19 = vld [vmem:[%s12914_s5 + $0x410] ss:$8 sps:$4 sm:$0xff]  }
 0x3b0   :  { %4481 = vmatpush1.bf16.msra.mxu1 %v8809_v43  ;;  %v8844_v43 = vld [vmem:[%s12914_s5 + $0x424] ss:$8 sps:$4 sm:$0xff]  }
 0x3b1   :  { %4482 = vmatprep.subr.bf16.mxu1 %v8814_v32  ;;  %v3358_v32 = vor.u32 %v3357_v61, %v3354_v4  ;;  %v8878_v61 = vld [vmem:[%s12916_s7 + $0x20] ss:$8 sps:$4 sm:$0xff]  }
 0x3b4   :  { %4483 = vmatpush1.bf16.msra.mxu1 %v8812_v23  ;;  %v3366_v23 = vor.u32 %v3365_v22, %v3362_v3  ;;  %v8886_v3 = vld [vmem:[%s12916_s7 + $0x34] ss:$8 sps:$4 sm:$0xff]  }
 0x3b5   :  { %4484 = vmatprep.subr.bf16.mxu1 %v8817_v9  ;;  %v3385_v9 = vrot.slane %v11300_v63, 5  ;;  %v8845_v63 = vld [vmem:[%s12914_s5 + $0x430] ss:$8 sps:$4 sm:$0xff]  }
 0x3b6   :  { %v3367_v21 = vsel %vm3332_vm1, %v3358_v32, %v3366_v23  ;;  %v8898_v32 = vld [vmem:[%s12916_s7 + $0x54] ss:$8 sps:$4 sm:$0xff]   ;;  %v8896_v23 = vld [vmem:[%s12916_s7 + $0x50] ss:$8 sps:$4 sm:$0xff]  }
 0x3b8   :  { %4485 = vmatpush1.bf16.msra.mxu1 %v8815_v29  ;;  %v3386_v29 = vrot.slane %v11303_v39, 6  ;;  %v9301_v39 = vld [vmem:[#allocation3] sm:$0xff] }
 0x3b9   :  { %4486 = vmatprep.subr.bf16.mxu1 %v8820_v11  ;;  %v8842_v11 = vld [vmem:[%s12914_s5 + $0x420] ss:$8 sps:$4 sm:$0xff]  }
 0x3bc   :  { %4487 = vmatpush1.bf16.msra.mxu1 %v8818_v44  ;;  %v11695_v44 = vor.u32 %v3386_v29, %v3385_v9  ;;  %v8904_v9 = vld [vmem:[%s12916_s7 + $0x64] ss:$8 sps:$4 sm:$0xff]   ;;  %v8902_v29 = vld [vmem:[%s12916_s7 + $0x60] ss:$8 sps:$4 sm:$0xff]  }
 0x3bd   :  { %4488 = vmatprep.subr.bf16.mxu1 %v8823_v60  ;;  %v8850_v60 = vld [vmem:[%s12914_s5 + $0x444] ss:$8 sps:$4 sm:$0xff]  }
 0x3be   :  { %vm3388_vm0 = vcmp.ne.s16.totalorder %v11695_v44, 0 }
 0x3bf   :  { %v3392_v10 = vsel %vm3388_vm0, %v11666_v30, 0 }
 0x3c0   :  { %4489 = vmatpush1.bf16.msra.mxu1 %v8821_v40  ;;  %v3384_v40 = vld [vmem:[#allocation3 + $0x10] sm:$0x7]  ;;  %v3417_v8 = vshll.u32 %v3392_v10, 16 }
 0x3c1   :  { %4490 = vmatprep.subr.bf16.mxu1 %v8826_v47  ;;  %v8848_v47 = vld [vmem:[%s12914_s5 + $0x440] ss:$8 sps:$4 sm:$0xff]  }
 0x3c2   :  { %v3419_v12 = vrot.slane %v3417_v8, 3  ;;  %v3583_v8 = vsub.s32 1, %v13009_v57 }
 0x3c4   :  { %4491 = vmatpush1.bf16.msra.mxu1 %v8824_v17  ;;  %v3389_v17 = vsel %vm3388_vm0, %v11541_v41, 0  ;;  %v8854_v41 = vld [vmem:[%s12914_s5 + $0x460] ss:$8 sps:$4 sm:$0xff]  }
 0x3c5   :  { %4492 = vmatprep.subr.bf16.mxu1 %v8829_v14  ;;  %v3390_v14 = vsel %vm3388_vm0, %v3384_v40, 0  ;;  %v3396_v2 = vshrl.u32 %v3389_v17, 16  ;;  %v8923_v40 = vld [vmem:[%s12916_s7 + $0x1b0] ss:$8 sps:$4 sm:$0xff]  }
 0x3c6   :  { %v3404_v0 = vshrl.u32 %v3390_v14, 16 }
 0x3c7   :  { %v3398_v51 = vrot.slane %v3396_v2, 2  ;;  %v8934_v2 = vld [vmem:[%s12916_s7 + $0xb4] ss:$8 sps:$4 sm:$0xff]  }
 0x3c8   :  { %4493 = vmatpush1.bf16.msra.mxu1 %v8827_v49  ;;  %v3399_v49 = vshll.u32 %v3389_v17, 16  ;;  %v3406_v48 = vrot.slane %v3404_v0, 2  ;;  %v8928_v17 = vld [vmem:[%s12916_s7 + $0xa4] ss:$8 sps:$4 sm:$0xff]   ;;  %v8935_v0 = vld [vmem:[%s12916_s7 + $0x1d0] ss:$8 sps:$4 sm:$0xff]  }
 0x3c9   :  { %4494 = vmatprep.subr.bf16.mxu1 %v8832_v5  ;;  %v3407_v5 = vshll.u32 %v3390_v14, 16  ;;  %v8929_v14 = vld [vmem:[%s12916_s7 + $0x1c0] ss:$8 sps:$4 sm:$0xff]  }
 0x3cb   :  { %v3409_v31 = vrot.slane %v3407_v5, 3  ;;  %v8938_v5 = vld [vmem:[%s12916_s7 + $0xc0] ss:$8 sps:$4 sm:$0xff]  }
 0x3cc   :  { %4495 = vmatpush1.bf16.msra.mxu1 %v8830_v53  ;;  %v3401_v53 = vrot.slane %v3399_v49, 3  ;;  %v8937_v49 = vld [vmem:[%s12916_s7 + $0x1d4] ss:$8 sps:$4 sm:$0xff]  }
 0x3cd   :  { %4496 = vmatprep.subr.bf16.mxu1 %v8835_v50  ;;  %v3393_v50 = vsel %vm3388_vm0, %v3391_v33, 0  ;;  %v3410_v13 = vor.u32 %v3409_v31, %v3406_v48  ;;  %v8941_v33 = vld [vmem:[%s12916_s7 + $0x1e0] ss:$8 sps:$4 sm:$0xff]   ;;  %v8944_v48 = vld [vmem:[%s12916_s7 + $0xd0] ss:$8 sps:$4 sm:$0xff]  }
 0x3ce   :  { %v3402_v55 = vor.u32 %v3401_v53, %v3398_v51  ;;  %v3422_v16 = vshrl.u32 %v3393_v50, 16  ;;  %v3425_v30 = vshll.u32 %v3393_v50, 16  ;;  %v8943_v51 = vld [vmem:[%s12916_s7 + $0x1e4] ss:$8 sps:$4 sm:$0xff]   ;;  %v8946_v53 = vld [vmem:[%s12916_s7 + $0xd4] ss:$8 sps:$4 sm:$0xff]  }
 0x3cf   :  { %v8947_v31 = vld [vmem:[%s12916_s7 + $0x1f0] ss:$8 sps:$4 sm:$0xff]   ;;  %v8955_v50 = vld [vmem:[%s12916_s7 + $0x204] ss:$8 sps:$4 sm:$0xff]  }
 0x3d0   :  { %4497 = vmatpush1.bf16.msra.mxu1 %v8833_v54  ;;  %v3414_v54 = vshrl.u32 %v3392_v10, 16  ;;  %v3411_v36 = vsel %vm3394_vm8, %v3402_v55, %v3410_v13  ;;  %v3424_v20 = vrot.slane %v3422_v16, 2  ;;  %v3427_v45 = vrot.slane %v3425_v30, 3  ;;  %v8952_v10 = vld [vmem:[%s12916_s7 + $0xe4] ss:$8 sps:$4 sm:$0xff]  }
 0x3d1   :  { %4519 = vmatprep.subr.bf16.mxu1 %v8838_v59  ;;  %v8866_v59 = vld [vmem:[%s12916_s7] ss:$8 sps:$4 sm:$0xff]   ;;  %v8958_v55 = vld [vmem:[%s12916_s7 + $0xf4] ss:$8 sps:$4 sm:$0xff]   ;;  %v8956_v13 = vld [vmem:[%s12916_s7 + $0xf0] ss:$8 sps:$4 sm:$0xff]  }
 0x3d2   :  { %v3416_v18 = vrot.slane %v3414_v54, 2  ;;  %v3428_v4 = vor.u32 %v3427_v45, %v3424_v20  ;;  %v3575_v54 = vld [vmem:[%s12915_s6] sm:$0x3]  ;;  %v4596_v45 = vld [vmem:[#allocation4] sm:$0xe0] }
 0x3d3   :  { %4499 = vmatmul.mubr.bf16.vlgmr.msra.gmra.mrb[116].mxu1 %v3349_v58  ;;  %v8880_v58 = vld [vmem:[%s12916_s7 + $0x24] ss:$8 sps:$4 sm:$0xff]   ;;  %v3584_v30 = vrot.slane %v3575_v54, %v3583_v8 }
 0x3d4   :  { %4508 = vmatprep.mubr.bf16.mxu1 %v3382_v25  ;;  %4520 = vmatpush1.bf16.msra.mxu1 %v8836_v1  ;;  %v8872_v1 = vld [vmem:[%s12916_s7 + $0x10] ss:$8 sps:$4 sm:$0xff]  }
 0x3d5   :  { %4521 = vmatprep.subr.bf16.mxu1 %v8841_v27  ;;  %v3420_v27 = vor.u32 %v3419_v12, %v3416_v18  ;;  %v8884_v25 = vld [vmem:[%s12916_s7 + $0x30] ss:$8 sps:$4 sm:$0xff]   ;;  %v4597_v18 = vld [vmem:[#allocation4 + $0x8] sm:$0xe0] }
 0x3d7   :  { %v3429_v22 = vsel %vm3394_vm8, %v3420_v27, %v3428_v4  ;;  %v11875_v4 = vld [vmem:[#allocation4 + $0x8] sm:$0xc0] }
 0x3d8   :  { %4522 = vmatpush1.bf16.msra.mxu1 %v8839_v19  ;;  %v8892_v19 = vld [vmem:[%s12916_s7 + $0x44] ss:$8 sps:$4 sm:$0xff]  }
 0x3d9   :  { %4523 = vmatprep.subr.bf16.mxu1 %v8844_v43  ;;  %v8890_v43 = vld [vmem:[%s12916_s7 + $0x40] ss:$8 sps:$4 sm:$0xff]  }
 0x3db   :  { %4509 = vmatmul.mubr.bf16.gmra.mrb[120].mxu1 %v3367_v21  ;;  %v8916_v21 = vld [vmem:[%s12916_s7 + $0x84] ss:$8 sps:$4 sm:$0xff]  }
 0x3dc   :  { %4524 = vmatpush1.bf16.msra.mxu1 %v8842_v11  ;;  %4551 = vmatprep.mubr.bf16.mxu1 %v9301_v39  ;;  %v8910_v11 = vld [vmem:[%s12916_s7 + $0x74] ss:$8 sps:$4 sm:$0xff]  }
 0x3dd   :  { %4525 = vmatprep.subr.bf16.mxu1 %v8847_v15  ;;  %v8908_v15 = vld [vmem:[%s12916_s7 + $0x70] ss:$8 sps:$4 sm:$0xff]  }
 0x3e0   :  { %4526 = vmatpush1.bf16.msra.mxu1 %v8845_v63  ;;  %v8914_v63 = vld [vmem:[%s12916_s7 + $0x80] ss:$8 sps:$4 sm:$0xff]  }
 0x3e1   :  { %4527 = vmatprep.subr.bf16.mxu1 %v8850_v60  ;;  %v8920_v60 = vld [vmem:[%s12916_s7 + $0x90] ss:$8 sps:$4 sm:$0xff]  }
 0x3e4   :  { %4528 = vmatpush1.bf16.msra.mxu1 %v8848_v47  ;;  %v8925_v47 = vld [vmem:[%s12916_s7 + $0x1b4] ss:$8 sps:$4 sm:$0xff]  }
 0x3e5   :  { %4529 = vmatprep.subr.bf16.mxu1 %v8853_v38  ;;  %6945 = vmatprep.subr.bf16.mxu0 %v8925_v47  ;;  %v8926_v38 = vld [vmem:[%s12916_s7 + $0xa0] ss:$8 sps:$4 sm:$0xff]  }
 0x3e6   :  { %6946 = vmatpush1.bf16.msra.mxu0 %v8923_v40 }
 0x3e8   :  { %4530 = vmatpush1.bf16.msra.mxu1 %v8851_v56  ;;  %v8931_v56 = vld [vmem:[%s12916_s7 + $0x1c4] ss:$8 sps:$4 sm:$0xff]  }
 0x3e9   :  { %4531 = vmatprep.subr.bf16.mxu1 %v8856_v37  ;;  %6947 = vmatprep.subr.bf16.mxu0 %v8931_v56  ;;  %v8932_v37 = vld [vmem:[%s12916_s7 + $0xb0] ss:$8 sps:$4 sm:$0xff]  }
 0x3ea   :  { %6948 = vmatpush1.bf16.msra.mxu0 %v8929_v14 }
 0x3eb   :  { %6949 = vmatprep.subr.bf16.mxu0 %v8937_v49 }
 0x3ec   :  { %4532 = vmatpush1.bf16.msra.mxu1 %v8854_v41  ;;  %v8940_v41 = vld [vmem:[%s12916_s7 + $0xc4] ss:$8 sps:$4 sm:$0xff]  }
 0x3ed   :  { %4533 = vmatprep.subr.bf16.mxu1 %v8859_v24  ;;  %v8949_v24 = vld [vmem:[%s12916_s7 + $0x1f4] ss:$8 sps:$4 sm:$0xff]  }
 0x3ee   :  { %6950 = vmatpush1.bf16.msra.mxu0 %v8935_v0 }
 0x3ef   :  { %6951 = vmatprep.subr.bf16.mxu0 %v8943_v51 }
 0x3f0   :  { %4534 = vmatpush1.bf16.msra.mxu1 %v8857_v62  ;;  %v8950_v62 = vld [vmem:[%s12916_s7 + $0xe0] ss:$8 sps:$4 sm:$0xff]  }
 0x3f1   :  { %6870 = vmatprep.subr.bf16.mxu1 %v8868_v28  ;;  %v3579_v28 = vsub.s32 0, %v13009_v57 }
 0x3f2   :  { %6952 = vmatpush1.bf16.msra.mxu0 %v8941_v33 }
 0x3f3   :  { %4552 = vmatmul.mubr.bf16.vlgmr.msra.gmra.mrb[116].mxu1 %v3411_v36  ;;  %6953 = vmatprep.subr.bf16.mxu0 %v8949_v24  ;;  %v3580_v16 = vrot.slane %v3575_v54, %v3579_v28 }
 0x3f4   :  { %4561 = vmatprep.mubr.bf16.mxu1 %v9301_v39  ;;  %6871 = vmatpush1.bf16.msra.mxu1 %v8866_v59  ;;  %v8922_v39 = vld [vmem:[%s12916_s7 + $0x94] ss:$8 sps:$4 sm:$0xff]  }
 0x3f5   :  { %6872 = vmatprep.subr.bf16.mxu1 %v8874_v42 }
 0x3f6   :  { %6954 = vmatpush1.bf16.msra.mxu0 %v8947_v31 }
 0x3f7   :  { %6976 = vmatprep.subr.bf16.mxu0 %v8955_v50 }
 0x3f8   :  { %6873 = vmatpush1.bf16.msra.mxu1 %v8872_v1 }
 0x3f9   :  { %6874 = vmatprep.subr.bf16.mxu1 %v8880_v58 }
 0x3fb   :  { %4562 = vmatmul.mubr.bf16.gmra.mrb[120].mxu1 %v3429_v22 }
 0x3fc   :  { %6875 = vmatpush1.bf16.msra.mxu1 %v8878_v61  ;;  %v4601_v61 = vsel %vm3127_vm5, %v4597_v18, 0 }
 0x3fd   :  { %6876 = vmatprep.subr.bf16.mxu1 %v8886_v3 }
 0x400   :  { %6877 = vmatpush1.bf16.msra.mxu1 %v8884_v25  ;;  %v4600_v25 = vsel %vm3127_vm5, %v4596_v45, 0 }
 0x401   :  { %6878 = vmatprep.subr.bf16.mxu1 %v8892_v19 }
 0x404   :  { %6879 = vmatpush1.bf16.msra.mxu1 %v8890_v43 }
 0x405   :  { %6880 = vmatprep.subr.bf16.mxu1 %v8898_v32 }
 0x408   :  { %6881 = vmatpush1.bf16.msra.mxu1 %v8896_v23  ;;  %v4715_v23 = vsel %vm3202_vm14, %v11875_v4, 0 }
 0x409   :  { %6882 = vmatprep.subr.bf16.mxu1 %v8904_v9  ;;  %v4630_v9 = vshrl.u32 %v4601_v61, 16  ;;  %v4742_v49 = vshrl.u32 %v4715_v23, 16 }
 0x40b   :  { %v11904_v54 = vrot.slane %v4742_v49, 6 }
 0x40c   :  { %6883 = vmatpush1.bf16.msra.mxu1 %v8902_v29 }
 0x40d   :  { %6884 = vmatprep.subr.bf16.mxu1 %v8910_v11 }
 0x410   :  { %6885 = vmatpush1.bf16.msra.mxu1 %v8908_v15  ;;  %v4633_v15 = vshll.u32 %v4601_v61, 16 }
 0x411   :  { %6886 = vmatprep.subr.bf16.mxu1 %v8916_v21  ;;  %v4613_v21 = vshrl.u32 %v4600_v25, 16 }
 0x413   :  { %v4615_v33 = vrot.slane %v4613_v21, 5 }
 0x414   :  { %6887 = vmatpush1.bf16.msra.mxu1 %v8914_v63  ;;  %v4616_v63 = vshll.u32 %v4600_v25, 16 }
 0x415   :  { %6888 = vmatprep.subr.bf16.mxu1 %v8922_v39 }
 0x416   :  { %v4618_v51 = vrot.slane %v4616_v63, 6  ;;  %v8961_v63 = vld [vmem:[%s12916_s7 + $0x214] ss:$8 sps:$4 sm:$0xff]  }
 0x418   :  { %6889 = vmatpush1.bf16.msra.mxu1 %v8920_v60 }
 0x419   :  { %6890 = vmatprep.subr.bf16.mxu1 %v8928_v17  ;;  %v4604_v17 = vld [vmem:[#allocation4 + $0x30] sm:$0xe0] }
 0x41a   :  { %v4608_v31 = vsel %vm3127_vm5, %v4604_v17, 0 }
 0x41b   :  { %v4649_v18 = vshrl.u32 %v4608_v31, 16 }
 0x41c   :  { %6891 = vmatpush1.bf16.msra.mxu1 %v8926_v38  ;;  %v4605_v38 = vld [vmem:[#allocation4 + $0x38] sm:$0xe0] }
 0x41d   :  { %6892 = vmatprep.subr.bf16.mxu1 %v8934_v2  ;;  %v11890_v2 = vrot.slane %v4630_v9, 5  ;;  %v11923_v9 = vld [vmem:[#allocation4 + $0x30] sm:$0xc0] }
 0x41e   :  { %v4704_v49 = vrot.slane %v11923_v9, 6 }
 0x420   :  { %6893 = vmatpush1.bf16.msra.mxu1 %v8932_v37  ;;  %v4745_v37 = vshll.u32 %v4715_v23, 16 }
 0x421   :  { %6894 = vmatprep.subr.bf16.mxu1 %v8940_v41  ;;  %v11894_v41 = vrot.slane %v4633_v15, 6  ;;  %v4652_v15 = vshll.u32 %v4608_v31, 16 }
 0x424   :  { %6895 = vmatpush1.bf16.msra.mxu1 %v8938_v5  ;;  %v11892_v5 = vld [vmem:[#allocation4] sm:$0xc0] }
 0x425   :  { %6896 = vmatprep.subr.bf16.mxu1 %v8946_v53 }
 0x428   :  { %6897 = vmatpush1.bf16.msra.mxu1 %v8944_v48  ;;  %v4609_v48 = vsel %vm3127_vm5, %v4605_v38, 0 }
 0x429   :  { %6898 = vmatprep.subr.bf16.mxu1 %v8952_v10 }
 0x42c   :  { %6899 = vmatpush1.bf16.msra.mxu1 %v8950_v62  ;;  %v4695_v62 = vrot.slane %v11875_v4, 6 }
 0x42d   :  { %6900 = vmatprep.subr.bf16.mxu1 %v8958_v55 }
 0x430   :  { %6901 = vmatpush1.bf16.msra.mxu1 %v8956_v13  ;;  %v4692_v13 = vrot.slane %v11892_v5, 6 }
 0x4c6   :  { %v4553_v59 = vpop.f32.mrb[116].mxu1 }
 0x4c7   :  { %v8456_v36 = vadd.f32 %v4553_v59, %v3580_v16  ;;  %v4555_v42 = vpop.f32.mrb[117].mxu1 }
 0x4c8   :  { %v8457_v12 = vadd.f32 %v4555_v42, %v3584_v30  ;;  %v4557_v20 = vpop.f32.mrb[118].mxu1  ;;  %v4669_v42 = vshll.u32 %v4609_v48, 16 }
 0x4c9   :  { %v8458_v1 = vadd.f32 %v4557_v20, %v3580_v16  ;;  %v4559_v58 = vpop.f32.mrb[119].mxu1  ;;  %v4572_v3 = vmax.f32 %v8456_v36, 0.0  ;;  %v4666_v36 = vshrl.u32 %v4609_v48, 16  ;;  %v8953_v20 = vld [vmem:[%s12916_s7 + $0x200] ss:$8 sps:$4 sm:$0xff]  }
 0x4ca   :  { %v8459_v27 = vadd.f32 %v4559_v58, %v3584_v30  ;;  %v4573_v19 = vmax.f32 %v8457_v12, 0.0  ;;  %v4636_v58 = vor.u32 %v11894_v41, %v11890_v2 }
 0x4cb   :  { %v4574_v22 = vmax.f32 %v8458_v1, 0.0 }
 0x4cc   :  { %v4575_v43 = vmax.f32 %v8459_v27, 0.0  ;;  %v4619_v27 = vor.u32 %v4618_v51, %v4615_v33  ;;  %v8964_v33 = vld [vmem:[%s12916_s7 + $0x224] ss:$8 sps:$4 sm:$0xff]  }
 0x4cd   :  { %v11881_v32 = vpack.c.bf16 %v4574_v22, %v4572_v3 }
 0x4ce   :  { %v11886_v29 = vpack.c.bf16 %v4575_v43, %v4573_v19  ;;  %v4563_v11 = vpop.f32.mrb[120].mxu1  ;;  %v11921_v19 = vld [vmem:[#allocation4 + $0x38] sm:$0xc0] }
 0x4cf   :  { %4584 = vst [vmem:[#allocation4 + $0x10] sm:$0xff] %v11881_v32  ;;  %v8460_v39 = vadd.f32 %v4563_v11, %v3580_v16  ;;  %v4565_v60 = vpop.f32.mrb[121].mxu1  ;;  %v4707_v2 = vrot.slane %v11921_v19, 6 }
 0x4d0   :  { %4585 = vst [vmem:[#allocation4 + $0x18] sm:$0xff] %v11886_v29  ;;  %v8461_v40 = vadd.f32 %v4565_v60, %v3584_v30  ;;  %v4567_v47 = vpop.f32.mrb[122].mxu1 }
 0x4d1   :  { %v8462_v14 = vadd.f32 %v4567_v47, %v3580_v16  ;;  %v4569_v56 = vpop.f32.mrb[123].mxu1  ;;  %v4576_v53 = vmax.f32 %v8460_v39, 0.0  ;;  %v11906_v16 = vrot.slane %v4745_v37, 7 }
 0x4d2   :  { %v8463_v0 = vadd.f32 %v4569_v56, %v3584_v30  ;;  %v4577_v10 = vmax.f32 %v8461_v40, 0.0 }
 0x4d3   :  { %v4578_v24 = vmax.f32 %v8462_v14, 0.0  ;;  %v4748_v51 = vor.u32 %v11906_v16, %v11904_v54 }
 0x4d4   :  { %v4579_v50 = vmax.f32 %v8463_v0, 0.0  ;;  %v8959_v0 = vld [vmem:[%s12916_s7 + $0x210] ss:$8 sps:$4 sm:$0xff]  }
 0x4d5   :  { %v11901_v55 = vpack.c.bf16 %v4578_v24, %v4576_v53  ;;  %v4668_v24 = vrot.slane %v4666_v36, 5 }
 0x4d6   :  { %v11908_v30 = vpack.c.bf16 %v4579_v50, %v4577_v10  ;;  %v4598_v59 = vld [vmem:[#allocation4 + $0x10] sm:$0x3f]  ;;  %v4671_v10 = vrot.slane %v4669_v42, 6  ;;  %v4651_v50 = vrot.slane %v4649_v18, 5 }
 0x4d7   :  { %4592 = vst [vmem:[#allocation4 + $0x40] sm:$0xff] %v11901_v55  ;;  %v4599_v12 = vld [vmem:[#allocation4 + $0x18] sm:$0x3f]  ;;  %v4602_v45 = vsel %vm3127_vm5, %v4598_v59, 0  ;;  %v4693_v1 = vrot.slane %v4598_v59, 6 }
 0x4d8   :  { %v4713_v4 = vld [vmem:[#allocation4 + $0x18] sm:$0x7f]  ;;  %4593 = vst [vmem:[#allocation4 + $0x48] sm:$0xff] %v11908_v30  ;;  %v4603_v61 = vsel %vm3127_vm5, %v4599_v12, 0  ;;  %v4696_v3 = vrot.slane %v4599_v12, 6  ;;  %v4621_v22 = vshrl.u32 %v4602_v45, 16 }
 0x4d9   :  { %v4624_v25 = vshll.u32 %v4602_v45, 16  ;;  %v4638_v43 = vshrl.u32 %v4603_v61, 16  ;;  %v4641_v23 = vshll.u32 %v4603_v61, 16  ;;  %v4717_v11 = vsel %vm3202_vm14, %v4713_v4, 0  ;;  %v8962_v42 = vld [vmem:[%s12916_s7 + $0x220] ss:$8 sps:$4 sm:$0xff]  }
 0x4da   :  { %v4697_v21 = vsel %vm3175_vm13, %v4695_v62, %v4696_v3  ;;  %v4623_v39 = vrot.slane %v4621_v22, 5  ;;  %v4750_v40 = vshrl.u32 %v4717_v11, 16  ;;  %v4694_v47 = vsel %vm3175_vm13, %v4692_v13, %v4693_v1  ;;  %v8967_v4 = vld [vmem:[%s12916_s7 + $0x234] ss:$8 sps:$4 sm:$0xff]  }
 0x4db   :  { %v4626_v60 = vrot.slane %v4624_v25, 6  ;;  %6955 = vmatprep.mubr.bf16.mxu0 %v4697_v21  ;;  %v4640_v38 = vrot.slane %v4638_v43, 5  ;;  %v4643_v17 = vrot.slane %v4641_v23, 6  ;;  %v4753_v14 = vshll.u32 %v4717_v11, 16  ;;  %v8965_v21 = vld [vmem:[%s12916_s7 + $0x230] ss:$8 sps:$4 sm:$0xff]  }
 0x4dc   :  { %6956 = vmatmul.mubr.bf16.vlgmr.msra.gmra.mrb[28].mxu0 %v4694_v47  ;;  %v4752_v37 = vrot.slane %v4750_v40, 6  ;;  %v4654_v62 = vrot.slane %v4652_v15, 6  ;;  %v4672_v22 = vor.u32 %v4671_v10, %v4668_v24  ;;  %v8968_v47 = vld [vmem:[%s12916_s7 + $0x240] ss:$8 sps:$4 sm:$0xff]   ;;  %v8991_v24 = vld [vmem:[%s12916_s7 + $0x2b4] ss:$8 sps:$4 sm:$0xff]  }
 0x4dd   :  { %v4627_v56 = vor.u32 %v4626_v60, %v4623_v39  ;;  %6977 = vmatpush1.bf16.msra.mxu0 %v8953_v20  ;;  %v4644_v41 = vor.u32 %v4643_v17, %v4640_v38  ;;  %v4755_v53 = vrot.slane %v4753_v14, 7  ;;  %v8970_v39 = vld [vmem:[%s12916_s7 + $0x244] ss:$8 sps:$4 sm:$0xff]   ;;  %v8973_v38 = vld [vmem:[%s12916_s7 + $0x254] ss:$8 sps:$4 sm:$0xff]  }
 0x4de   :  { %6978 = vmatprep.subr.bf16.mxu0 %v8961_v63  ;;  %v4606_v31 = vld [vmem:[#allocation4 + $0x40] sm:$0x3f]  ;;  %v4655_v11 = vor.u32 %v4654_v62, %v4651_v50  ;;  %v8976_v14 = vld [vmem:[%s12916_s7 + $0x264] ss:$8 sps:$4 sm:$0xff]   ;;  %v8992_v10 = vld [vmem:[%s12916_s7 + $0x2c0] ss:$8 sps:$4 sm:$0xff]  }
 0x4df   :  { %v4628_v48 = vsel %vm3134_vm3, %v4619_v27, %v4627_v56  ;;  %v4645_v13 = vsel %vm3134_vm3, %v4636_v58, %v4644_v41  ;;  %v4607_v59 = vld [vmem:[#allocation4 + $0x48] sm:$0x3f]  ;;  %v4610_v12 = vsel %vm3127_vm5, %v4606_v31, 0  ;;  %v4705_v20 = vrot.slane %v4606_v31, 6  ;;  %v8974_v56 = vld [vmem:[%s12916_s7 + $0x260] ss:$8 sps:$4 sm:$0xff]  }
 0x4e0   :  { %v4756_v45 = vor.u32 %v4755_v53, %v4752_v37  ;;  %6902 = vmatprep.mubr.bf16.mxu1 %v4645_v13  ;;  %v4611_v54 = vsel %vm3127_vm5, %v4607_v59, 0  ;;  %v4708_v16 = vrot.slane %v4607_v59, 6  ;;  %v4657_v36 = vshrl.u32 %v4610_v12, 16  ;;  %v8971_v17 = vld [vmem:[%s12916_s7 + $0x250] ss:$8 sps:$4 sm:$0xff]   ;;  %vm13039_vm5 = vmmov %vm13036_vm2 }
 0x4e1   :  { %v4660_v1 = vshll.u32 %v4610_v12, 16  ;;  %6979 = vmatpush1.bf16.msra.mxu0 %v8959_v0  ;;  %6903 = vmatmul.mubr.bf16.vlgmr.msra.gmra.mrb[124].mxu1 %v4628_v48  ;;  %v4674_v18 = vshrl.u32 %v4611_v54, 16  ;;  %v4677_v58 = vshll.u32 %v4611_v54, 16  ;;  %v4706_v3 = vsel %vm3175_vm13, %v4704_v49, %v4705_v20  ;;  %v8977_v49 = vld [vmem:[%s12916_s7 + $0x270] ss:$8 sps:$4 sm:$0xff]  }
 0x4e2   :  { %v4709_v27 = vsel %vm3175_vm13, %v4707_v2, %v4708_v16  ;;  %6980 = vmatprep.subr.bf16.mxu0 %v8964_v33  ;;  %v4659_v46 = vrot.slane %v4657_v36, 5  ;;  %v4757_v23 = vsel %vm3208_vm7, %v4748_v51, %v4756_v45  ;;  %v8979_v2 = vld [vmem:[%s12916_s7 + $0x274] ss:$8 sps:$4 sm:$0xff]   ;;  %v8982_v37 = vld [vmem:[%s12916_s7 + $0x284] ss:$8 sps:$4 sm:$0xff]   ;;  %v4714_v59 = vsel %vm3202_vm14, %v11892_v5, 0  ;;  %vm13040_vm13 = vmmov %vm13036_vm2 }
 0x4e3   :  { %v4662_v61 = vrot.slane %v4660_v1, 6  ;;  %6965 = vmatprep.mubr.bf16.mxu0 %v4709_v27  ;;  %v4676_v25 = vrot.slane %v4674_v18, 5  ;;  %v4679_v43 = vrot.slane %v4677_v58, 6  ;;  %v8980_v0 = vld [vmem:[%s12916_s7 + $0x280] ss:$8 sps:$4 sm:$0xff]   ;;  %v4721_v12 = vsel %vm3202_vm14, %v11921_v19, 0 }
 0x4e4   :  { %6966 = vmatmul.mubr.bf16.gmra.mrb[32].mxu0 %v4706_v3  ;;  %v8985_v41 = vld [vmem:[%s12916_s7 + $0x294] ss:$8 sps:$4 sm:$0xff]   ;;  %v8983_v33 = vld [vmem:[%s12916_s7 + $0x290] ss:$8 sps:$4 sm:$0xff]   ;;  %v8988_v51 = vld [vmem:[%s12916_s7 + $0x2a4] ss:$8 sps:$4 sm:$0xff]  }
 0x4e5   :  { %v4663_v15 = vor.u32 %v4662_v61, %v4659_v46  ;;  %6981 = vmatpush1.bf16.msra.mxu0 %v8962_v42  ;;  %7008 = vmatprep.mubr.bf16.mxu0 %v4757_v23  ;;  %v4680_v63 = vor.u32 %v4679_v43, %v4676_v25  ;;  %v8986_v53 = vld [vmem:[%s12916_s7 + $0x2a0] ss:$8 sps:$4 sm:$0xff]   ;;  %v8989_v48 = vld [vmem:[%s12916_s7 + $0x2b0] ss:$8 sps:$4 sm:$0xff]   ;;  %v8994_v31 = vld [vmem:[%s12916_s7 + $0x2c4] ss:$8 sps:$4 sm:$0xff]  }
 0x4e6   :  { %6982 = vmatprep.subr.bf16.mxu0 %v8967_v4  ;;  %v4712_v50 = vld [vmem:[#allocation4 + $0x10] sm:$0x7f]  ;;  %v8997_v62 = vld [vmem:[%s12916_s7 + $0x2d4] ss:$8 sps:$4 sm:$0xff]   ;;  %v8995_v45 = vld [vmem:[%s12916_s7 + $0x2d0] ss:$8 sps:$4 sm:$0xff]  }
 0x4e7   :  { %v4681_v60 = vsel %vm3134_vm3, %v4672_v22, %v4680_v63  ;;  %v4664_v40 = vsel %vm3134_vm3, %v4655_v11, %v4663_v15  ;;  %v4719_v13 = vld [vmem:[#allocation4 + $0x48] sm:$0x7f]  ;;  %v4716_v20 = vsel %vm3202_vm14, %v4712_v50, 0  ;;  %v9000_v5 = vld [vmem:[%s12916_s7 + $0x2e4] ss:$8 sps:$4 sm:$0xff]   ;;  %v4725_v16 = vshrl.u32 %v4714_v59, 16 }
 0x4e8   :  { %6912 = vmatprep.mubr.bf16.mxu1 %v4681_v60  ;;  %v4723_v54 = vsel %vm3202_vm14, %v4719_v13, 0  ;;  %v4728_v36 = vshll.u32 %v4714_v59, 16  ;;  %v4733_v1 = vshrl.u32 %v4716_v20, 16  ;;  %v4736_v19 = vshll.u32 %v4716_v20, 16  ;;  %v8998_v4 = vld [vmem:[%s12916_s7 + $0x2e0] ss:$8 sps:$4 sm:$0xff]  }
 0x4e9   :  { %6983 = vmatpush1.bf16.msra.mxu0 %v8965_v21  ;;  %6913 = vmatmul.mubr.bf16.gmra.mrb[128].mxu1 %v4664_v40  ;;  %v4778_v42 = vshrl.u32 %v4721_v12, 16  ;;  %v4781_v18 = vshll.u32 %v4721_v12, 16  ;;  %v4786_v58 = vshrl.u32 %v4723_v54, 16  ;;  %v4789_v27 = vshll.u32 %v4723_v54, 16  ;;  %v4718_v46 = vld [vmem:[#allocation4 + $0x40] sm:$0x7f] }
 0x4ea   :  { %6984 = vmatprep.subr.bf16.mxu0 %v8970_v39  ;;  %v9003_v61 = vld [vmem:[%s12916_s7 + $0x2f4] ss:$8 sps:$4 sm:$0xff]   ;;  %v4727_v3 = vrot.slane %v4725_v16, 6  ;;  %v4730_v22 = vrot.slane %v4728_v36, 7  ;;  %v4720_v25 = vsel %vm3202_vm14, %v11923_v9, 0  ;;  %v4735_v43 = vrot.slane %v4733_v1, 6 }
 0x4eb   :  { %v4738_v23 = vrot.slane %v4736_v19, 7  ;;  %v4780_v11 = vrot.slane %v4778_v42, 6  ;;  %v4783_v15 = vrot.slane %v4781_v18, 7  ;;  %v4788_v21 = vrot.slane %v4786_v58, 6  ;;  %v9001_v60 = vld [vmem:[%s12916_s7 + $0x2f0] ss:$8 sps:$4 sm:$0xff]  }
 0x4ec   :  { %v4791_v63 = vrot.slane %v4789_v27, 7  ;;  %v4722_v39 = vsel %vm3202_vm14, %v4718_v46, 0  ;;  %v4803_v40 = vsel %vm3250_vm12, %v11886_v29, 0  ;;  %v4731_v9 = vor.u32 %v4730_v22, %v4727_v3  ;;  %v9007_v59 = vld [vmem:[%s12916_s7 + $0x310] ss:$8 sps:$4 sm:$0xff]  }
 0x4ed   :  { %6985 = vmatpush1.bf16.msra.mxu0 %v8968_v47  ;;  %v9006_v47 = vld [vmem:[%s12916_s7 + $0x304] ss:$8 sps:$4 sm:$0xff]   ;;  %v4764_v7 = vshll.u32 %v4720_v25, 16  ;;  %v4832_v20 = vshll.u32 %v4803_v40, 16  ;;  %v9010_v36 = vld [vmem:[%s12916_s7 + $0x320] ss:$8 sps:$4 sm:$0xff]  }
 0x4ee   :  { %6986 = vmatprep.subr.bf16.mxu0 %v8973_v38  ;;  %v4761_v38 = vshrl.u32 %v4720_v25, 16  ;;  %v9012_v12 = vld [vmem:[%s12916_s7 + $0x324] ss:$8 sps:$4 sm:$0xff]   ;;  %v9015_v1 = vld [vmem:[%s12916_s7 + $0x334] ss:$8 sps:$4 sm:$0xff]   ;;  %vm7412_vm3 = vcmask 1041409  }
 0x4ef   :  { %v9013_v18 = vld [vmem:[%s12916_s7 + $0x330] ss:$8 sps:$4 sm:$0xff]   ;;  %v9018_v58 = vld [vmem:[%s12916_s7 + $0x344] ss:$8 sps:$4 sm:$0xff]   ;;  %v9016_v27 = vld [vmem:[%s12916_s7 + $0x340] ss:$8 sps:$4 sm:$0xff]  }
 0x4f0   :  { %v9019_v46 = vld [vmem:[%s12916_s7 + $0x350] ss:$8 sps:$4 sm:$0xff]   ;;  %v9022_v3 = vld [vmem:[%s12916_s7 + $0x360] ss:$8 sps:$4 sm:$0xff]   ;;  %v9027_v22 = vld [vmem:[%s12916_s7 + $0x374] ss:$8 sps:$4 sm:$0xff]  }
 0x4f1   :  { %6987 = vmatpush1.bf16.msra.mxu0 %v8971_v17  ;;  %v4797_v17 = vld [vmem:[#allocation4 + $0x8] sm:$0x80]  ;;  %v9025_v25 = vld [vmem:[%s12916_s7 + $0x370] ss:$8 sps:$4 sm:$0xff]   ;;  %vm7418_vm14 = vcmask 1047559  }
 0x4f2   :  { %6988 = vmatprep.subr.bf16.mxu0 %v8976_v14  ;;  %v4739_v14 = vor.u32 %v4738_v23, %v4735_v43  ;;  %v9030_v43 = vld [vmem:[%s12916_s7 + $0x384] ss:$8 sps:$4 sm:$0xff]   ;;  %v9028_v23 = vld [vmem:[%s12916_s7 + $0x380] ss:$8 sps:$4 sm:$0xff]  }
 0x4f5   :  { %6989 = vmatpush1.bf16.msra.mxu0 %v8974_v56  ;;  %v4769_v56 = vshrl.u32 %v4722_v39, 16 }
 0x4f6   :  { %6990 = vmatprep.subr.bf16.mxu0 %v8979_v2  ;;  %v4772_v2 = vshll.u32 %v4722_v39, 16  ;;  %v9039_v39 = vld [vmem:[%s12916_s7 + $0x3b4] ss:$8 sps:$4 sm:$0xff]  }
 0x4f9   :  { %6991 = vmatpush1.bf16.msra.mxu0 %v8977_v49  ;;  %v4784_v49 = vor.u32 %v4783_v15, %v4780_v11  ;;  %v9033_v11 = vld [vmem:[%s12916_s7 + $0x394] ss:$8 sps:$4 sm:$0xff]   ;;  %v9031_v15 = vld [vmem:[%s12916_s7 + $0x390] ss:$8 sps:$4 sm:$0xff]  }
 0x4fa   :  { %6992 = vmatprep.subr.bf16.mxu0 %v8982_v37  ;;  %v4792_v37 = vor.u32 %v4791_v63, %v4788_v21  ;;  %v9036_v21 = vld [vmem:[%s12916_s7 + $0x3a4] ss:$8 sps:$4 sm:$0xff]   ;;  %v9034_v63 = vld [vmem:[%s12916_s7 + $0x3a0] ss:$8 sps:$4 sm:$0xff]  }
 0x4fc   :  { %v4793_v50 = vsel %vm3208_vm7, %v4784_v49, %v4792_v37 }
 0x4fd   :  { %6993 = vmatpush1.bf16.msra.mxu0 %v8980_v0  ;;  %v4829_v0 = vshrl.u32 %v4803_v40, 16  ;;  %v9042_v40 = vld [vmem:[%s12916_s7 + $0x3c4] ss:$8 sps:$4 sm:$0xff]  }
 0x4fe   :  { %6994 = vmatprep.subr.bf16.mxu0 %v8985_v41  ;;  %v9004_v41 = vld [vmem:[%s12916_s7 + $0x300] ss:$8 sps:$4 sm:$0xff]  }
 0x4ff   :  { %v4831_v13 = vrot.slane %v4829_v0, 7 }
 0x501   :  { %6995 = vmatpush1.bf16.msra.mxu0 %v8983_v33  ;;  %v4801_v33 = vsel %vm11252_vm9, %v4797_v17, 0  ;;  %v4834_v16 = vor.u32 %v4832_v20, %v4831_v13  ;;  %v9043_v17 = vld [vmem:[%s12916_s7 + $0x3d0] ss:$8 sps:$4 sm:$0xff]   ;;  %v4804_v13 = vld [vmem:[#allocation4 + $0x30] sm:$0x80] }
 0x502   :  { %6996 = vmatprep.subr.bf16.mxu0 %v8988_v51  ;;  %v9009_v51 = vld [vmem:[%s12916_s7 + $0x314] ss:$8 sps:$4 sm:$0xff]   ;;  %v4808_v52 = vsel %vm11252_vm9, %v4804_v13, 0 }
 0x505   :  { %6997 = vmatpush1.bf16.msra.mxu0 %v8986_v53  ;;  %v4763_v53 = vrot.slane %v4761_v38, 6  ;;  %v4802_v38 = vsel %vm3250_vm12, %v11881_v32, 0 }
 0x506   :  { %6998 = vmatprep.subr.bf16.mxu0 %v8991_v24  ;;  %v4740_v24 = vsel %vm3208_vm7, %v4731_v9, %v4739_v14  ;;  %v9040_v9 = vld [vmem:[%s12916_s7 + $0x3c0] ss:$8 sps:$4 sm:$0xff]   ;;  %v4796_v14 = vld [vmem:[#allocation4] sm:$0x80]  ;;  %v4817_v49 = vshrl.u32 %v4802_v38, 16 }
 0x507   :  { %v4800_v37 = vsel %vm11252_vm9, %v4796_v14, 0  ;;  %v9084_v14 = vld [vmem:[%s12916_s7 + $0x4a4] ss:$8 sps:$4 sm:$0xff]  }
 0x509   :  { %6999 = vmatpush1.bf16.msra.mxu0 %v8989_v48  ;;  %v4766_v48 = vrot.slane %v4764_v7, 7  ;;  %v4811_v7 = vsel %vm3250_vm12, %v11908_v30, 0 }
 0x50a   :  { %7000 = vmatprep.subr.bf16.mxu0 %v8994_v31  ;;  %v4771_v31 = vrot.slane %v4769_v56, 6  ;;  %v9048_v56 = vld [vmem:[%s12916_s7 + $0x3e4] ss:$8 sps:$4 sm:$0xff]   ;;  %v4855_v0 = vshrl.u32 %v4811_v7, 16 }
 0x50d   :  { %7001 = vmatpush1.bf16.msra.mxu0 %v8992_v10  ;;  %v4774_v10 = vrot.slane %v4772_v2, 7  ;;  %v4805_v2 = vld [vmem:[#allocation4 + $0x38] sm:$0x80] }
 0x50e   :  { %7002 = vmatprep.subr.bf16.mxu0 %v8997_v62  ;;  %v4825_v62 = vshrl.u32 %v4801_v33, 16  ;;  %v4809_v33 = vsel %vm11252_vm9, %v4805_v2, 0  ;;  %v9085_v2 = vld [vmem:[%s12916_s7 + $0x4b0] ss:$8 sps:$4 sm:$0xff]   ;;  %vm7416_vm9 = vcmask 1045509  }
 0x50f   :  { %v4775_v54 = vor.u32 %v4774_v10, %v4771_v31  ;;  %v4857_v31 = vrot.slane %v4855_v0, 7  ;;  %v4810_v10 = vsel %vm3250_vm12, %v11901_v55, 0  ;;  %v9093_v0 = vld [vmem:[%s12916_s7 + $0x4d4] ss:$8 sps:$4 sm:$0xff]   ;;  %vm7414_vm12 = vcmask 1043459  }
 0x511   :  { %7003 = vmatpush1.bf16.msra.mxu0 %v8995_v45  ;;  %v4767_v45 = vor.u32 %v4766_v48, %v4763_v53  ;;  %v4813_v53 = vshrl.u32 %v4800_v37, 16  ;;  %v4851_v48 = vshrl.u32 %v4809_v33, 16  ;;  %v9088_v37 = vld [vmem:[%s12916_s7 + $0x4c0] ss:$8 sps:$4 sm:$0xff]   ;;  %v9096_v33 = vld [vmem:[%s12916_s7 + $0x4e4] ss:$8 sps:$4 sm:$0xff]  }
 0x512   :  { %7004 = vmatprep.subr.bf16.mxu0 %v9000_v5  ;;  %v4827_v5 = vrot.slane %v4825_v62, 7  ;;  %v4820_v62 = vshll.u32 %v4802_v38, 16  ;;  %v9081_v38 = vld [vmem:[%s12916_s7 + $0x494] ss:$8 sps:$4 sm:$0xff]  }
 0x513   :  { %v4776_v19 = vsel %vm3208_vm7, %v4767_v45, %v4775_v54  ;;  %v4815_v20 = vrot.slane %v4813_v53, 7  ;;  %v4843_v54 = vshrl.u32 %v4810_v10, 16  ;;  %v9099_v53 = vld [vmem:[%s12916_s7 + $0x4f4] ss:$8 sps:$4 sm:$0xff]  }
 0x514   :  { %v4835_v42 = vsel %vm1754_vm10, %v4827_v5, %v4834_v16  ;;  %v4853_v5 = vrot.slane %v4851_v48, 7  ;;  %v4867_v48 = vsel %vm3286_vm4, %v11886_v29, 0 }
 0x515   :  { %7005 = vmatpush1.bf16.msra.mxu0 %v8998_v4  ;;  %v9021_v4 = vld [vmem:[%s12916_s7 + $0x354] ss:$8 sps:$4 sm:$0xff]  }
 0x516   :  { %7006 = vmatprep.subr.bf16.mxu0 %v9003_v61  ;;  %v9024_v61 = vld [vmem:[%s12916_s7 + $0x364] ss:$8 sps:$4 sm:$0xff]  }
 0x519   :  { %7007 = vmatpush1.bf16.msra.mxu0 %v9001_v60  ;;  %v9037_v60 = vld [vmem:[%s12916_s7 + $0x3b0] ss:$8 sps:$4 sm:$0xff]  }
 0x51a   :  { %7029 = vmatprep.subr.bf16.mxu0 %v9006_v47  ;;  %v9045_v47 = vld [vmem:[%s12916_s7 + $0x3d4] ss:$8 sps:$4 sm:$0xff]  }
 0x51c   :  { %7009 = vmatmul.mubr.bf16.vlgmr.msra.gmra.mrb[28].mxu0 %v4740_v24  ;;  %v4819_v24 = vrot.slane %v4817_v49, 7  ;;  %v9090_v49 = vld [vmem:[%s12916_s7 + $0x4c4] ss:$8 sps:$4 sm:$0xff]  }
 0x51d   :  { %7018 = vmatprep.mubr.bf16.mxu0 %v4793_v50  ;;  %7030 = vmatpush1.bf16.msra.mxu0 %v9004_v41  ;;  %v9046_v41 = vld [vmem:[%s12916_s7 + $0x3e0] ss:$8 sps:$4 sm:$0xff]   ;;  %v9049_v50 = vld [vmem:[%s12916_s7 + $0x3f0] ss:$8 sps:$4 sm:$0xff]  }
 0x51e   :  { %7031 = vmatprep.subr.bf16.mxu0 %v9009_v51  ;;  %v9051_v51 = vld [vmem:[%s12916_s7 + $0x3f4] ss:$8 sps:$4 sm:$0xff]   ;;  %v4822_v45 = vor.u32 %v4820_v62, %v4819_v24  ;;  %v9097_v24 = vld [vmem:[%s12916_s7 + $0x4f0] ss:$8 sps:$4 sm:$0xff]   ;;  %v9100_v62 = vld [vmem:[%s12916_s7 + $0x500] ss:$8 sps:$4 sm:$0xff]  }
 0x521   :  { %7032 = vmatpush1.bf16.msra.mxu0 %v9007_v59  ;;  %v9054_v59 = vld [vmem:[%s12916_s7 + $0x404] ss:$8 sps:$4 sm:$0xff]  }
 0x522   :  { %7033 = vmatprep.subr.bf16.mxu0 %v9012_v12  ;;  %v4858_v12 = vshll.u32 %v4811_v7, 16  ;;  %v9082_v7 = vld [vmem:[%s12916_s7 + $0x4a0] ss:$8 sps:$4 sm:$0xff]  }
 0x524   :  { %7019 = vmatmul.mubr.bf16.gmra.mrb[32].mxu0 %v4776_v19  ;;  %v4860_v16 = vor.u32 %v4858_v12, %v4857_v31  ;;  %v4823_v19 = vsel %vm1754_vm10, %v4815_v20, %v4822_v45  ;;  %v9102_v31 = vld [vmem:[%s12916_s7 + $0x504] ss:$8 sps:$4 sm:$0xff]   ;;  %v9103_v20 = vld [vmem:[%s12916_s7 + $0x510] ss:$8 sps:$4 sm:$0xff]  }
 0x525   :  { %7034 = vmatpush1.bf16.msra.mxu0 %v9010_v36  ;;  %7061 = vmatprep.mubr.bf16.mxu0 %v4835_v42  ;;  %v9052_v36 = vld [vmem:[%s12916_s7 + $0x400] ss:$8 sps:$4 sm:$0xff]   ;;  %v4839_v42 = vshrl.u32 %v4808_v52, 16  ;;  %v9108_v45 = vld [vmem:[%s12916_s7 + $0x524] ss:$8 sps:$4 sm:$0xff]  }
 0x526   :  { %7035 = vmatprep.subr.bf16.mxu0 %v9015_v1  ;;  %v9057_v1 = vld [vmem:[%s12916_s7 + $0x414] ss:$8 sps:$4 sm:$0xff]   ;;  %v9106_v52 = vld [vmem:[%s12916_s7 + $0x520] ss:$8 sps:$4 sm:$0xff]  }
 0x529   :  { %7036 = vmatpush1.bf16.msra.mxu0 %v9013_v18  ;;  %v4845_v18 = vrot.slane %v4843_v54, 7  ;;  %v4891_v54 = vshrl.u32 %v4867_v48, 16 }
 0x52a   :  { %7037 = vmatprep.subr.bf16.mxu0 %v9018_v58  ;;  %v4861_v58 = vsel %vm1754_vm10, %v4853_v5, %v4860_v16 }
 0x52d   :  { %7038 = vmatpush1.bf16.msra.mxu0 %v9016_v27  ;;  %v4846_v27 = vshll.u32 %v4810_v10, 16  ;;  %v4865_v10 = vld [vmem:[#allocation4 + $0x28] sm:$0x1] }
 0x52e   :  { %7039 = vmatprep.subr.bf16.mxu0 %v9021_v4  ;;  %v9060_v4 = vld [vmem:[%s12916_s7 + $0x424] ss:$8 sps:$4 sm:$0xff]   ;;  %v4869_v13 = vsel %vm11372_vm6, %v4865_v10, 0  ;;  %v9147_v10 = vld [vmem:[%s12916_s7 + $0x5f4] ss:$8 sps:$4 sm:$0xff]  }
 0x52f   :  { %v4898_v12 = vshll.u32 %v4869_v13, 16  ;;  %v4931_v13 = vld [vmem:[#allocation4 + $0x18] sm:$0xfe] }
 0x531   :  { %7040 = vmatpush1.bf16.msra.mxu0 %v9019_v46  ;;  %v4841_v46 = vrot.slane %v4839_v42, 7  ;;  %v4900_v16 = vrot.slane %v4898_v12, 1  ;;  %v9112_v42 = vld [vmem:[%s12916_s7 + $0x540] ss:$8 sps:$4 sm:$0xff]  }
 0x532   :  { %7041 = vmatprep.subr.bf16.mxu0 %v9024_v61  ;;  %v4848_v61 = vor.u32 %v4846_v27, %v4845_v18  ;;  %v9115_v18 = vld [vmem:[%s12916_s7 + $0x550] ss:$8 sps:$4 sm:$0xff]   ;;  %v9123_v27 = vld [vmem:[%s12916_s7 + $0x574] ss:$8 sps:$4 sm:$0xff]  }
 0x535   :  { %7042 = vmatpush1.bf16.msra.mxu0 %v9022_v3  ;;  %v9058_v3 = vld [vmem:[%s12916_s7 + $0x420] ss:$8 sps:$4 sm:$0xff]  }
 0x536   :  { %7043 = vmatprep.subr.bf16.mxu0 %v9027_v22  ;;  %v9063_v22 = vld [vmem:[%s12916_s7 + $0x434] ss:$8 sps:$4 sm:$0xff]  }
 0x539   :  { %7044 = vmatpush1.bf16.msra.mxu0 %v9025_v25  ;;  %v4849_v25 = vsel %vm1754_vm10, %v4841_v46, %v4848_v61  ;;  %v9121_v61 = vld [vmem:[%s12916_s7 + $0x570] ss:$8 sps:$4 sm:$0xff]   ;;  %vm13037_vm10 = vmmov %vm13036_vm2 }
 0x53a   :  { %7045 = vmatprep.subr.bf16.mxu0 %v9030_v43  ;;  %v9061_v43 = vld [vmem:[%s12916_s7 + $0x430] ss:$8 sps:$4 sm:$0xff]  }
 0x53d   :  { %7046 = vmatpush1.bf16.msra.mxu0 %v9028_v23  ;;  %v9066_v23 = vld [vmem:[%s12916_s7 + $0x444] ss:$8 sps:$4 sm:$0xff]  }
 0x53e   :  { %7047 = vmatprep.subr.bf16.mxu0 %v9033_v11  ;;  %v9064_v11 = vld [vmem:[%s12916_s7 + $0x440] ss:$8 sps:$4 sm:$0xff]  }
 0x541   :  { %7048 = vmatpush1.bf16.msra.mxu0 %v9031_v15  ;;  %v9069_v15 = vld [vmem:[%s12916_s7 + $0x454] ss:$8 sps:$4 sm:$0xff]  }
 0x542   :  { %7049 = vmatprep.subr.bf16.mxu0 %v9036_v21  ;;  %v9067_v21 = vld [vmem:[%s12916_s7 + $0x450] ss:$8 sps:$4 sm:$0xff]  }
 0x545   :  { %7050 = vmatpush1.bf16.msra.mxu0 %v9034_v63  ;;  %v9072_v63 = vld [vmem:[%s12916_s7 + $0x464] ss:$8 sps:$4 sm:$0xff]  }
 0x546   :  { %7051 = vmatprep.subr.bf16.mxu0 %v9039_v39  ;;  %v9070_v39 = vld [vmem:[%s12916_s7 + $0x460] ss:$8 sps:$4 sm:$0xff]  }
 0x549   :  { %7052 = vmatpush1.bf16.msra.mxu0 %v9037_v60  ;;  %v9075_v60 = vld [vmem:[%s12916_s7 + $0x474] ss:$8 sps:$4 sm:$0xff]  }
 0x54a   :  { %7053 = vmatprep.subr.bf16.mxu0 %v9042_v40  ;;  %v9073_v40 = vld [vmem:[%s12916_s7 + $0x470] ss:$8 sps:$4 sm:$0xff]  }
 0x54d   :  { %7054 = vmatpush1.bf16.msra.mxu0 %v9040_v9  ;;  %v9078_v9 = vld [vmem:[%s12916_s7 + $0x484] ss:$8 sps:$4 sm:$0xff]  }
 0x54e   :  { %7055 = vmatprep.subr.bf16.mxu0 %v9045_v47  ;;  %v9076_v47 = vld [vmem:[%s12916_s7 + $0x480] ss:$8 sps:$4 sm:$0xff]  }
 0x551   :  { %7056 = vmatpush1.bf16.msra.mxu0 %v9043_v17  ;;  %v9079_v17 = vld [vmem:[%s12916_s7 + $0x490] ss:$8 sps:$4 sm:$0xff]  }
 0x552   :  { %7057 = vmatprep.subr.bf16.mxu0 %v9048_v56  ;;  %v9087_v56 = vld [vmem:[%s12916_s7 + $0x4b4] ss:$8 sps:$4 sm:$0xff]  }
 0x555   :  { %7058 = vmatpush1.bf16.msra.mxu0 %v9046_v41  ;;  %v9091_v41 = vld [vmem:[%s12916_s7 + $0x4d0] ss:$8 sps:$4 sm:$0xff]  }
 0x556   :  { %7059 = vmatprep.subr.bf16.mxu0 %v9051_v51  ;;  %v9094_v51 = vld [vmem:[%s12916_s7 + $0x4e0] ss:$8 sps:$4 sm:$0xff]  }
 0x559   :  { %7060 = vmatpush1.bf16.msra.mxu0 %v9049_v50  ;;  %v4893_v50 = vshll.u32 %v4867_v48, 16  ;;  %v4870_v48 = vld [vmem:[#allocation4 + $0x40] sm:$0xff] }
 0x55a   :  { %7082 = vmatprep.subr.bf16.mxu0 %v9054_v59 }
 0x55b   :  { %v4895_v59 = vrot.slane %v4893_v50, 1 }
 0x55c   :  { %7062 = vmatmul.mubr.bf16.vlgmr.msra.gmra.mrb[28].mxu0 %v4823_v19  ;;  %v9114_v19 = vld [vmem:[%s12916_s7 + $0x544] ss:$8 sps:$4 sm:$0xff]  }
 0x55d   :  { %7071 = vmatprep.mubr.bf16.mxu0 %v4861_v58  ;;  %7083 = vmatpush1.bf16.msra.mxu0 %v9052_v36  ;;  %v4896_v5 = vor.u32 %v4895_v59, %v4891_v54  ;;  %v9120_v58 = vld [vmem:[%s12916_s7 + $0x564] ss:$8 sps:$4 sm:$0xff]   ;;  %v9145_v54 = vld [vmem:[%s12916_s7 + $0x5f0] ss:$8 sps:$4 sm:$0xff]  }
 0x55e   :  { %7084 = vmatprep.subr.bf16.mxu0 %v9057_v1  ;;  %v9109_v1 = vld [vmem:[%s12916_s7 + $0x530] ss:$8 sps:$4 sm:$0xff]  }
 0x55f   :  { %v4901_v36 = vsel %vm1725_vm15, %v4896_v5, %v4900_v16  ;;  %v4935_v16 = vsel %vm3325_vm11, %v4931_v13, 0  ;;  %v9169_v13 = vld [vmem:[%s12916_s7 + $0x670] ss:$8 sps:$4 sm:$0xff]  }
 0x561   :  { %7085 = vmatpush1.bf16.msra.mxu0 %v9055_v34  ;;  %v9118_v34 = vld [vmem:[%s12916_s7 + $0x560] ss:$8 sps:$4 sm:$0xff]  }
 0x562   :  { %7086 = vmatprep.subr.bf16.mxu0 %v9060_v4 }
 0x564   :  { %7072 = vmatmul.mubr.bf16.gmra.mrb[32].mxu0 %v4849_v25 }
 0x565   :  { %7087 = vmatpush1.bf16.msra.mxu0 %v9058_v3  ;;  %7114 = vmatprep.mubr.bf16.mxu0 %v11886_v29  ;;  %v9105_v29 = vld [vmem:[%s12916_s7 + $0x514] ss:$8 sps:$4 sm:$0xff]  }
 0x566   :  { %7088 = vmatprep.subr.bf16.mxu0 %v9063_v22  ;;  %v9126_v22 = vld [vmem:[%s12916_s7 + $0x584] ss:$8 sps:$4 sm:$0xff]  }
 0x569   :  { %7089 = vmatpush1.bf16.msra.mxu0 %v9061_v43  ;;  %v9124_v43 = vld [vmem:[%s12916_s7 + $0x580] ss:$8 sps:$4 sm:$0xff]  }
 0x56a   :  { %7090 = vmatprep.subr.bf16.mxu0 %v9066_v23  ;;  %v9129_v23 = vld [vmem:[%s12916_s7 + $0x594] ss:$8 sps:$4 sm:$0xff]  }
 0x56d   :  { %7091 = vmatpush1.bf16.msra.mxu0 %v9064_v11 }
 0x56e   :  { %7092 = vmatprep.subr.bf16.mxu0 %v9069_v15 }
 0x571   :  { %7093 = vmatpush1.bf16.msra.mxu0 %v9067_v21  ;;  %v9127_v21 = vld [vmem:[%s12916_s7 + $0x590] ss:$8 sps:$4 sm:$0xff]  }
 0x572   :  { %7094 = vmatprep.subr.bf16.mxu0 %v9072_v63 }
 0x575   :  { %7095 = vmatpush1.bf16.msra.mxu0 %v9070_v39  ;;  %v9132_v39 = vld [vmem:[%s12916_s7 + $0x5a4] ss:$8 sps:$4 sm:$0xff]  }
 0x576   :  { %7096 = vmatprep.subr.bf16.mxu0 %v9075_v60 }
 0x579   :  { %7097 = vmatpush1.bf16.msra.mxu0 %v9073_v40  ;;  %v9130_v40 = vld [vmem:[%s12916_s7 + $0x5a0] ss:$8 sps:$4 sm:$0xff]  }
 0x57a   :  { %7098 = vmatprep.subr.bf16.mxu0 %v9078_v9  ;;  %v9135_v9 = vld [vmem:[%s12916_s7 + $0x5b4] ss:$8 sps:$4 sm:$0xff]  }
 0x57d   :  { %7099 = vmatpush1.bf16.msra.mxu0 %v9076_v47  ;;  %v9133_v47 = vld [vmem:[%s12916_s7 + $0x5b0] ss:$8 sps:$4 sm:$0xff]  }
 0x57e   :  { %7100 = vmatprep.subr.bf16.mxu0 %v9081_v38  ;;  %v9138_v38 = vld [vmem:[%s12916_s7 + $0x5c4] ss:$8 sps:$4 sm:$0xff]  }
 0x581   :  { %7101 = vmatpush1.bf16.msra.mxu0 %v9079_v17  ;;  %v9136_v17 = vld [vmem:[%s12916_s7 + $0x5c0] ss:$8 sps:$4 sm:$0xff]  }
 0x582   :  { %7102 = vmatprep.subr.bf16.mxu0 %v9084_v14  ;;  %v4871_v14 = vld [vmem:[#allocation4 + $0x48] sm:$0xff] }
 0x585   :  { %7103 = vmatpush1.bf16.msra.mxu0 %v9082_v7  ;;  %v9141_v7 = vld [vmem:[%s12916_s7 + $0x5d4] ss:$8 sps:$4 sm:$0xff]  }
 0x586   :  { %7104 = vmatprep.subr.bf16.mxu0 %v9087_v56  ;;  %v4866_v56 = vsel %vm3286_vm4, %v11881_v32, 0 }
 0x587   :  { %v4879_v12 = vshrl.u32 %v4866_v56, 16 }
 0x589   :  { %7105 = vmatpush1.bf16.msra.mxu0 %v9085_v2  ;;  %v4864_v2 = vld [vmem:[#allocation4 + $0x20] sm:$0x1] }
 0x58a   :  { %7106 = vmatprep.subr.bf16.mxu0 %v9090_v49  ;;  %v4875_v49 = vsel %vm3286_vm4, %v4871_v14, 0  ;;  %v9156_v14 = vld [vmem:[%s12916_s7 + $0x624] ss:$8 sps:$4 sm:$0xff]  }
 0x58b   :  { %v4917_v5 = vshrl.u32 %v4875_v49, 16 }
 0x58d   :  { %7107 = vmatpush1.bf16.msra.mxu0 %v9088_v37  ;;  %v9139_v37 = vld [vmem:[%s12916_s7 + $0x5d0] ss:$8 sps:$4 sm:$0xff]  }
 0x58e   :  { %7108 = vmatprep.subr.bf16.mxu0 %v9093_v0  ;;  %v4873_v0 = vld [vmem:[#allocation4 + $0x58] sm:$0x1] }
 0x591   :  { %7109 = vmatpush1.bf16.msra.mxu0 %v9091_v41  ;;  %v9144_v41 = vld [vmem:[%s12916_s7 + $0x5e4] ss:$8 sps:$4 sm:$0xff]  }
 0x592   :  { %7110 = vmatprep.subr.bf16.mxu0 %v9096_v33  ;;  %v4881_v33 = vshll.u32 %v4866_v56, 16 }
 0x594   :  { %v4883_v50 = vrot.slane %v4881_v33, 1 }
 0x595   :  { %7111 = vmatpush1.bf16.msra.mxu0 %v9094_v51  ;;  %v4868_v51 = vsel %vm11372_vm6, %v4864_v2, 0 }
 0x596   :  { %7112 = vmatprep.subr.bf16.mxu0 %v9099_v53  ;;  %v4877_v53 = vsel %vm11372_vm6, %v4873_v0, 0  ;;  %v9159_v0 = vld [vmem:[%s12916_s7 + $0x634] ss:$8 sps:$4 sm:$0xff]  }
 0x597   :  { %v4924_v59 = vshll.u32 %v4877_v53, 16  ;;  %v9160_v53 = vld [vmem:[%s12916_s7 + $0x640] ss:$8 sps:$4 sm:$0xff]  }
 0x599   :  { %7113 = vmatpush1.bf16.msra.mxu0 %v9097_v24  ;;  %v9142_v24 = vld [vmem:[%s12916_s7 + $0x5e0] ss:$8 sps:$4 sm:$0xff]  }
 0x59a   :  { %7135 = vmatprep.subr.bf16.mxu0 %v9102_v31  ;;  %v12393_v31 = vld [vmem:[#allocation4 + $0x28] sm:$0x3] }
 0x59c   :  { %7115 = vmatmul.mubr.bf16.vlgmr.msra.gmra.mrb[28].mxu0 %v11881_v32  ;;  %v4919_v32 = vshll.u32 %v4875_v49, 16 }
 0x59d   :  { %7124 = vmatprep.mubr.bf16.mxu0 %v11908_v30  ;;  %7136 = vmatpush1.bf16.msra.mxu0 %v9100_v62  ;;  %v9111_v30 = vld [vmem:[%s12916_s7 + $0x534] ss:$8 sps:$4 sm:$0xff]   ;;  %v4886_v62 = vshll.u32 %v4868_v51, 16  ;;  %v9157_v51 = vld [vmem:[%s12916_s7 + $0x630] ss:$8 sps:$4 sm:$0xff]  }
 0x59e   :  { %7137 = vmatprep.subr.bf16.mxu0 %v9105_v29  ;;  %v4921_v29 = vrot.slane %v4919_v32, 1  ;;  %v9162_v32 = vld [vmem:[%s12916_s7 + $0x644] ss:$8 sps:$4 sm:$0xff]  }
 0x5a1   :  { %7138 = vmatpush1.bf16.msra.mxu0 %v9103_v20  ;;  %v4872_v20 = vld [vmem:[#allocation4 + $0x50] sm:$0x1] }
 0x5a2   :  { %7139 = vmatprep.subr.bf16.mxu0 %v9108_v45  ;;  %v4874_v45 = vsel %vm3286_vm4, %v4870_v48, 0  ;;  %v9163_v48 = vld [vmem:[%s12916_s7 + $0x650] ss:$8 sps:$4 sm:$0xff]  }
 0x5a4   :  { %7125 = vmatmul.mubr.bf16.gmra.mrb[32].mxu0 %v11901_v55  ;;  %v9117_v55 = vld [vmem:[%s12916_s7 + $0x554] ss:$8 sps:$4 sm:$0xff]  }
 0x5a5   :  { %7140 = vmatpush1.bf16.msra.mxu0 %v9106_v52  ;;  %7167 = vmatprep.mubr.bf16.mxu0 %v4901_v36  ;;  %v4937_v52 = vsel %vm3325_vm11, %v12393_v31, 0  ;;  %v4888_v36 = vrot.slane %v4886_v62, 1  ;;  %v9171_v62 = vld [vmem:[%s12916_s7 + $0x674] ss:$8 sps:$4 sm:$0xff]  }
 0x5a6   :  { %7141 = vmatprep.subr.bf16.mxu0 %v9111_v30  ;;  %v4884_v30 = vor.u32 %v4883_v50, %v4879_v12  ;;  %v9166_v50 = vld [vmem:[%s12916_s7 + $0x660] ss:$8 sps:$4 sm:$0xff]   ;;  %v9177_v12 = vld [vmem:[%s12916_s7 + $0x694] ss:$8 sps:$4 sm:$0xff]  }
 0x5a9   :  { %7142 = vmatpush1.bf16.msra.mxu0 %v9109_v1  ;;  %v4922_v1 = vor.u32 %v4921_v29, %v4917_v5  ;;  %v9174_v29 = vld [vmem:[%s12916_s7 + $0x684] ss:$8 sps:$4 sm:$0xff]   ;;  %v9183_v5 = vld [vmem:[%s12916_s7 + $0x6b4] ss:$8 sps:$4 sm:$0xff]  }
 0x5aa   :  { %7143 = vmatprep.subr.bf16.mxu0 %v9114_v19  ;;  %v4926_v19 = vrot.slane %v4924_v59, 1  ;;  %v9172_v59 = vld [vmem:[%s12916_s7 + $0x680] ss:$8 sps:$4 sm:$0xff]  }
 0x5ac   :  { %v4927_v35 = vsel %vm1725_vm15, %v4922_v1, %v4926_v19  ;;  %v4939_v1 = vld [vmem:[#allocation4 + $0x48] sm:$0xfe] }
 0x5ad   :  { %7144 = vmatpush1.bf16.msra.mxu0 %v9112_v42  ;;  %v4876_v42 = vsel %vm11372_vm6, %v4872_v20, 0  ;;  %v9175_v20 = vld [vmem:[%s12916_s7 + $0x690] ss:$8 sps:$4 sm:$0xff]   ;;  %v9189_v19 = vld [vmem:[%s12916_s7 + $0x6d4] ss:$8 sps:$4 sm:$0xff]  }
 0x5ae   :  { %7145 = vmatprep.subr.bf16.mxu0 %v9117_v55  ;;  %v4907_v55 = vshll.u32 %v4874_v45, 16 }
 0x5b1   :  { %7146 = vmatpush1.bf16.msra.mxu0 %v9115_v18  ;;  %v4964_v18 = vshrl.u32 %v4935_v16, 16 }
 0x5b2   :  { %7147 = vmatprep.subr.bf16.mxu0 %v9120_v58  ;;  %v4967_v58 = vshll.u32 %v4935_v16, 16  ;;  %v9181_v16 = vld [vmem:[%s12916_s7 + $0x6b0] ss:$8 sps:$4 sm:$0xff]  }
 0x5b4   :  { %v12323_v4 = vpop.f32.mrb[124].mxu1 }
 0x5b5   :  { %7148 = vmatpush1.bf16.msra.mxu0 %v9118_v34  ;;  %v12325_v46 = vpop.f32.mrb[125].mxu1  ;;  %v4972_v34 = vshrl.u32 %v4937_v52, 16 }
 0x5b6   :  { %v12330_v3 = vpop.f32.mrb[126].mxu1  ;;  %7149 = vmatprep.subr.bf16.mxu0 %v9123_v27  ;;  %v4975_v27 = vshll.u32 %v4937_v52, 16  ;;  %v9186_v52 = vld [vmem:[%s12916_s7 + $0x6c4] ss:$8 sps:$4 sm:$0xff]  }
 0x5b7   :  { %v12335_v25 = vpop.f32.mrb[127].mxu1 }
 0x5b9   :  { %7150 = vmatpush1.bf16.msra.mxu0 %v9121_v61  ;;  %v9148_v61 = vld [vmem:[%s12916_s7 + $0x600] ss:$8 sps:$4 sm:$0xff]  }
 0x5ba   :  { %7151 = vmatprep.subr.bf16.mxu0 %v9126_v22  ;;  %v9153_v22 = vld [vmem:[%s12916_s7 + $0x614] ss:$8 sps:$4 sm:$0xff]  }
 0x5bc   :  { %v12343_v11 = vpop.f32.mrb[128].mxu1 }
 0x5bd   :  { %7152 = vmatpush1.bf16.msra.mxu0 %v9124_v43  ;;  %v12345_v15 = vpop.f32.mrb[129].mxu1  ;;  %v4889_v43 = vsel %vm1725_vm15, %v4884_v30, %v4888_v36  ;;  %v4930_v30 = vld [vmem:[#allocation4 + $0x10] sm:$0xfe]  ;;  %v12489_v36 = vld [vmem:[#allocation4 + $0x20] sm:$0x3] }
 0x5be   :  { %v12350_v63 = vpop.f32.mrb[130].mxu1  ;;  %7153 = vmatprep.subr.bf16.mxu0 %v9129_v23  ;;  %v4909_v23 = vrot.slane %v4907_v55, 1  ;;  %v4934_v55 = vsel %vm3325_vm11, %v4930_v30, 0 }
 0x5bf   :  { %v12355_v60 = vpop.f32.mrb[131].mxu1 }
 0x5c1   :  { %7154 = vmatpush1.bf16.msra.mxu0 %v9127_v21  ;;  %v4912_v21 = vshll.u32 %v4876_v42, 16  ;;  %v12497_v42 = vld [vmem:[#allocation4 + $0x58] sm:$0x3] }
 0x5c2   :  { %7155 = vmatprep.subr.bf16.mxu0 %v9132_v39  ;;  %v4966_v39 = vrot.slane %v4964_v18, 1  ;;  %v4936_v18 = vsel %vm3325_vm11, %v12489_v36, 0 }
 0x5c3   :  { %v4914_v56 = vrot.slane %v4912_v21, 1 }
 0x5c5   :  { %7156 = vmatpush1.bf16.msra.mxu0 %v9130_v40  ;;  %v4969_v40 = vrot.slane %v4967_v58, 2  ;;  %v4943_v58 = vsel %vm3325_vm11, %v4939_v1, 0  ;;  %v12545_v1 = vld [vmem:[#allocation4 + $0x18] sm:$0xfc] }
 0x5c6   :  { %7157 = vmatprep.subr.bf16.mxu0 %v9135_v9  ;;  %v4974_v9 = vrot.slane %v4972_v34, 1  ;;  %v9187_v34 = vld [vmem:[%s12916_s7 + $0x6d0] ss:$8 sps:$4 sm:$0xff]   ;;  %v5000_v21 = vshrl.u32 %v4943_v58, 16 }
 0x5c7   :  { %v4970_v2 = vor.u32 %v4969_v40, %v4966_v39  ;;  %v5003_v39 = vshll.u32 %v4943_v58, 16  ;;  %v5029_v58 = vrot.slane %v12545_v1, 2 }
 0x5c9   :  { %7158 = vmatpush1.bf16.msra.mxu0 %v9133_v47  ;;  %v4977_v47 = vrot.slane %v4975_v27, 2  ;;  %v4945_v27 = vsel %vm3325_vm11, %v12497_v42, 0 }
 0x5ca   :  { %7159 = vmatprep.subr.bf16.mxu0 %v9138_v38  ;;  %v9151_v38 = vld [vmem:[%s12916_s7 + $0x610] ss:$8 sps:$4 sm:$0xff]   ;;  %v5008_v40 = vshrl.u32 %v4945_v27, 16 }
 0x5cb   :  { %v4978_v49 = vor.u32 %v4977_v47, %v4974_v9  ;;  %v5011_v9 = vshll.u32 %v4945_v27, 16  ;;  %v4938_v47 = vld [vmem:[#allocation4 + $0x40] sm:$0xfe]  ;;  %v9202_v27 = vld [vmem:[%s12916_s7 + $0x720] ss:$8 sps:$4 sm:$0xff]  }
 0x5cd   :  { %7160 = vmatpush1.bf16.msra.mxu0 %v9136_v17  ;;  %v4905_v17 = vshrl.u32 %v4874_v45, 16  ;;  %v4979_v33 = vsel %vm3332_vm1, %v4970_v2, %v4978_v49  ;;  %v9180_v45 = vld [vmem:[%s12916_s7 + $0x6a4] ss:$8 sps:$4 sm:$0xff]  }
 0x5ce   :  { %7161 = vmatprep.subr.bf16.mxu0 %v9141_v7 }
 0x5cf   :  { %v4910_v7 = vor.u32 %v4909_v23, %v4905_v17  ;;  %v4958_v23 = vshll.u32 %v4936_v18, 16  ;;  %v12518_v17 = vld [vmem:[#allocation4 + $0x50] sm:$0x3] }
 0x5d1   :  { %7162 = vmatpush1.bf16.msra.mxu0 %v9139_v37  ;;  %v9154_v37 = vld [vmem:[%s12916_s7 + $0x620] ss:$8 sps:$4 sm:$0xff]   ;;  %v4960_v49 = vrot.slane %v4958_v23, 2 }
 0x5d2   :  { %7163 = vmatprep.subr.bf16.mxu0 %v9144_v41  ;;  %v4915_v41 = vsel %vm1725_vm15, %v4910_v7, %v4914_v56  ;;  %v9208_v23 = vld [vmem:[%s12916_s7 + $0x740] ss:$8 sps:$4 sm:$0xff]   ;;  %vm13038_vm15 = vmmov %vm13036_vm2 }
 0x5d5   :  { %7164 = vmatpush1.bf16.msra.mxu0 %v9142_v24  ;;  %v9165_v24 = vld [vmem:[%s12916_s7 + $0x654] ss:$8 sps:$4 sm:$0xff]  }
 0x5d6   :  { %7165 = vmatprep.subr.bf16.mxu0 %v9147_v10  ;;  %v9168_v10 = vld [vmem:[%s12916_s7 + $0x664] ss:$8 sps:$4 sm:$0xff]  }
 0x5d9   :  { %7166 = vmatpush1.bf16.msra.mxu0 %v9145_v54  ;;  %v9178_v54 = vld [vmem:[%s12916_s7 + $0x6a0] ss:$8 sps:$4 sm:$0xff]  }
 0x5da   :  { %7188 = vmatprep.subr.bf16.mxu0 %v9150_v26  ;;  %v9184_v26 = vld [vmem:[%s12916_s7 + $0x6c0] ss:$8 sps:$4 sm:$0xff]  }
 0x5dc   :  { %7168 = vmatmul.mubr.bf16.vlgmr.msra.gmra.mrb[28].mxu0 %v4889_v43  ;;  %v4950_v43 = vshll.u32 %v4934_v55, 16 }
 0x5dd   :  { %7177 = vmatprep.mubr.bf16.mxu0 %v4927_v35  ;;  %7189 = vmatpush1.bf16.msra.mxu0 %v9148_v61  ;;  %v9192_v61 = vld [vmem:[%s12916_s7 + $0x6e4] ss:$8 sps:$4 sm:$0xff]   ;;  %v4955_v35 = vshrl.u32 %v4936_v18, 16 }
 0x5de   :  { %7190 = vmatprep.subr.bf16.mxu0 %v9153_v22  ;;  %v4947_v22 = vshrl.u32 %v4934_v55, 16  ;;  %v4952_v56 = vrot.slane %v4950_v43, 2 }
 0x5df   :  { %v4957_v2 = vrot.slane %v4955_v35, 1  ;;  %v9210_v35 = vld [vmem:[%s12916_s7 + $0x744] ss:$8 sps:$4 sm:$0xff]  }
 0x5e0   :  { %v4949_v7 = vrot.slane %v4947_v22, 1 }
 0x5e1   :  { %7191 = vmatpush1.bf16.msra.mxu0 %v9151_v38  ;;  %v9190_v38 = vld [vmem:[%s12916_s7 + $0x6e0] ss:$8 sps:$4 sm:$0xff]  }
 0x5e2   :  { %7192 = vmatprep.subr.bf16.mxu0 %v9156_v14  ;;  %v9195_v14 = vld [vmem:[%s12916_s7 + $0x6f4] ss:$8 sps:$4 sm:$0xff]  }
 0x5e4   :  { %7178 = vmatmul.mubr.bf16.gmra.mrb[32].mxu0 %v4915_v41  ;;  %v5005_v41 = vrot.slane %v5003_v39, 2  ;;  %v9211_v39 = vld [vmem:[%s12916_s7 + $0x750] ss:$8 sps:$4 sm:$0xff]  }
 0x5e5   :  { %7193 = vmatpush1.bf16.msra.mxu0 %v9154_v37  ;;  %7220 = vmatprep.mubr.bf16.mxu0 %v4979_v33  ;;  %v5002_v37 = vrot.slane %v5000_v21, 1  ;;  %v5010_v33 = vrot.slane %v5008_v40, 1  ;;  %v9213_v21 = vld [vmem:[%s12916_s7 + $0x754] ss:$8 sps:$4 sm:$0xff]   ;;  %v9216_v40 = vld [vmem:[%s12916_s7 + $0x764] ss:$8 sps:$4 sm:$0xff]  }
 0x5e6   :  { %7194 = vmatprep.subr.bf16.mxu0 %v9159_v0  ;;  %v4942_v0 = vsel %vm3325_vm11, %v4938_v47, 0  ;;  %v9219_v47 = vld [vmem:[%s12916_s7 + $0x774] ss:$8 sps:$4 sm:$0xff]  }
 0x5e9   :  { %7195 = vmatpush1.bf16.msra.mxu0 %v9157_v51  ;;  %v5013_v51 = vrot.slane %v5011_v9, 2  ;;  %v9214_v9 = vld [vmem:[%s12916_s7 + $0x760] ss:$8 sps:$4 sm:$0xff]  }
 0x5ea   :  { %7196 = vmatprep.subr.bf16.mxu0 %v9162_v32  ;;  %v4944_v32 = vsel %vm3325_vm11, %v12518_v17, 0 }
 0x5ed   :  { %7197 = vmatpush1.bf16.msra.mxu0 %v9160_v53  ;;  %v9193_v53 = vld [vmem:[%s12916_s7 + $0x6f0] ss:$8 sps:$4 sm:$0xff]  }
 0x5ee   :  { %7198 = vmatprep.subr.bf16.mxu0 %v9165_v24  ;;  %v4953_v24 = vor.u32 %v4952_v56, %v4949_v7  ;;  %v9220_v7 = vld [vmem:[%s12916_s7 + $0x780] ss:$8 sps:$4 sm:$0xff]   ;;  %v9225_v56 = vld [vmem:[%s12916_s7 + $0x794] ss:$8 sps:$4 sm:$0xff]  }
 0x5f1   :  { %7199 = vmatpush1.bf16.msra.mxu0 %v9163_v48  ;;  %v4961_v48 = vor.u32 %v4960_v49, %v4957_v2  ;;  %v9223_v2 = vld [vmem:[%s12916_s7 + $0x790] ss:$8 sps:$4 sm:$0xff]   ;;  %v9228_v49 = vld [vmem:[%s12916_s7 + $0x7a4] ss:$8 sps:$4 sm:$0xff]  }
 0x5f2   :  { %7200 = vmatprep.subr.bf16.mxu0 %v9168_v10  ;;  %v9198_v10 = vld [vmem:[%s12916_s7 + $0x704] ss:$8 sps:$4 sm:$0xff]  }
 0x5f5   :  { %7201 = vmatpush1.bf16.msra.mxu0 %v9166_v50  ;;  %v4983_v50 = vshrl.u32 %v4942_v0, 16 }
 0x5f6   :  { %7202 = vmatprep.subr.bf16.mxu0 %v9171_v62  ;;  %v4986_v62 = vshll.u32 %v4942_v0, 16  ;;  %v9231_v0 = vld [vmem:[%s12916_s7 + $0x7b4] ss:$8 sps:$4 sm:$0xff]  }
 0x5f9   :  { %7203 = vmatpush1.bf16.msra.mxu0 %v9169_v13  ;;  %v4991_v13 = vshrl.u32 %v4944_v32, 16 }
 0x5fa   :  { %7204 = vmatprep.subr.bf16.mxu0 %v9174_v29  ;;  %v4994_v29 = vshll.u32 %v4944_v32, 16  ;;  %v9237_v32 = vld [vmem:[%s12916_s7 + $0x7d4] ss:$8 sps:$4 sm:$0xff]  }
 0x5fd   :  { %7205 = vmatpush1.bf16.msra.mxu0 %v9172_v59  ;;  %v5006_v59 = vor.u32 %v5005_v41, %v5002_v37  ;;  %v9226_v37 = vld [vmem:[%s12916_s7 + $0x7a0] ss:$8 sps:$4 sm:$0xff]   ;;  %v9229_v41 = vld [vmem:[%s12916_s7 + $0x7b0] ss:$8 sps:$4 sm:$0xff]  }
 0x5fe   :  { %7206 = vmatprep.subr.bf16.mxu0 %v9177_v12  ;;  %v5014_v12 = vor.u32 %v5013_v51, %v5010_v33  ;;  %v9234_v33 = vld [vmem:[%s12916_s7 + $0x7c4] ss:$8 sps:$4 sm:$0xff]   ;;  %v9232_v51 = vld [vmem:[%s12916_s7 + $0x7c0] ss:$8 sps:$4 sm:$0xff]  }
 0x600   :  { %v5015_v30 = vsel %vm3332_vm1, %v5006_v59, %v5014_v12  ;;  %v9241_v59 = vld [vmem:[%s12916_s7 + $0x7f0] ss:$8 sps:$4 sm:$0xff]  }
 0x601   :  { %7207 = vmatpush1.bf16.msra.mxu0 %v9175_v20  ;;  %v4962_v20 = vsel %vm3332_vm1, %v4953_v24, %v4961_v48  ;;  %v9240_v24 = vld [vmem:[%s12916_s7 + $0x7e4] ss:$8 sps:$4 sm:$0xff]   ;;  %v9238_v48 = vld [vmem:[%s12916_s7 + $0x7e0] ss:$8 sps:$4 sm:$0xff]  }
 0x602   :  { %7208 = vmatprep.subr.bf16.mxu0 %v9180_v45  ;;  %v9201_v45 = vld [vmem:[%s12916_s7 + $0x714] ss:$8 sps:$4 sm:$0xff]  }
 0x605   :  { %7209 = vmatpush1.bf16.msra.mxu0 %v9178_v54  ;;  %v4985_v54 = vrot.slane %v4983_v50, 1  ;;  %v5047_v50 = vld [vmem:[#allocation4 + $0x28] sm:$0x7] }
 0x606   :  { %7210 = vmatprep.subr.bf16.mxu0 %v9183_v5  ;;  %v4988_v5 = vrot.slane %v4986_v62, 2  ;;  %v12632_v62 = vld [vmem:[#allocation4 + $0x10] sm:$0xfc]  ;;  %v5051_v12 = vsel %vm3388_vm0, %v5047_v50, 0  ;;  %v5046_v50 = vld [vmem:[#allocation4 + $0x20] sm:$0x7] }
 0x608   :  { %v4989_v55 = vor.u32 %v4988_v5, %v4985_v54  ;;  %v5042_v5 = vrot.slane %v12497_v42, 2  ;;  %v12659_v42 = vld [vmem:[#allocation4 + $0x40] sm:$0xfc] }
 0x609   :  { %7211 = vmatpush1.bf16.msra.mxu0 %v9181_v16  ;;  %v4993_v16 = vrot.slane %v4991_v13, 1  ;;  %v12634_v13 = vld [vmem:[#allocation4 + $0x48] sm:$0xfc] }
 0x60a   :  { %7212 = vmatprep.subr.bf16.mxu0 %v9186_v52  ;;  %v4996_v52 = vrot.slane %v4994_v29, 2  ;;  %v5049_v29 = vsel %vm3388_vm0, %v12545_v1, 0  ;;  %v5041_v54 = vrot.slane %v12634_v13, 2  ;;  %v9244_v1 = vld [vmem:[%s12916_s7 + $0x800] ss:$8 sps:$4 sm:$0xff]  }
 0x60c   :  { %v4997_v18 = vor.u32 %v4996_v52, %v4993_v16  ;;  %v5076_v16 = vshrl.u32 %v5049_v29, 16  ;;  %v5079_v52 = vshll.u32 %v5049_v29, 16  ;;  %v9280_v29 = vld [vmem:[%s12916_s7 + $0x8c0] ss:$8 sps:$4 sm:$0xff]  }
 0x60d   :  { %7213 = vmatpush1.bf16.msra.mxu0 %v9184_v26  ;;  %v9199_v26 = vld [vmem:[%s12916_s7 + $0x710] ss:$8 sps:$4 sm:$0xff]  }
 0x60e   :  { %7214 = vmatprep.subr.bf16.mxu0 %v9189_v19  ;;  %v9204_v19 = vld [vmem:[%s12916_s7 + $0x724] ss:$8 sps:$4 sm:$0xff]   ;;  %v4998_v22 = vsel %vm3332_vm1, %v4989_v55, %v4997_v18  ;;  %v5043_v55 = vsel %vm13039_vm5, %v5041_v54, %v5042_v5  ;;  %v5078_v18 = vrot.slane %v5076_v16, 2  ;;  %v9283_v54 = vld [vmem:[%s12916_s7 + $0x8d0] ss:$8 sps:$4 sm:$0xff]  }
 0x611   :  { %7215 = vmatpush1.bf16.msra.mxu0 %v9187_v34  ;;  %v5030_v34 = vrot.slane %v12393_v31, 2  ;;  %v9205_v31 = vld [vmem:[%s12916_s7 + $0x730] ss:$8 sps:$4 sm:$0xff]  }
 0x612   :  { %7216 = vmatprep.subr.bf16.mxu0 %v9192_v61  ;;  %v9207_v61 = vld [vmem:[%s12916_s7 + $0x734] ss:$8 sps:$4 sm:$0xff]  }
 0x613   :  { %v5031_v43 = vsel %vm13037_vm10, %v5029_v58, %v5030_v34  ;;  %v5081_v58 = vrot.slane %v5079_v52, 3 }
 0x615   :  { %7217 = vmatpush1.bf16.msra.mxu0 %v9190_v38  ;;  %v9217_v38 = vld [vmem:[%s12916_s7 + $0x770] ss:$8 sps:$4 sm:$0xff]  }
 0x616   :  { %7218 = vmatprep.subr.bf16.mxu0 %v9195_v14  ;;  %v9222_v14 = vld [vmem:[%s12916_s7 + $0x784] ss:$8 sps:$4 sm:$0xff]  }
 0x619   :  { %7219 = vmatpush1.bf16.msra.mxu0 %v9193_v53  ;;  %v9235_v53 = vld [vmem:[%s12916_s7 + $0x7d0] ss:$8 sps:$4 sm:$0xff]  }
 0x61a   :  { %7241 = vmatprep.subr.bf16.mxu0 %v9198_v10  ;;  %v9243_v10 = vld [vmem:[%s12916_s7 + $0x7f4] ss:$8 sps:$4 sm:$0xff]  }
 0x61c   :  { %7221 = vmatmul.mubr.bf16.vlgmr.msra.gmra.mrb[28].mxu0 %v4962_v20  ;;  %v5026_v20 = vrot.slane %v12632_v62, 2 }
 0x61d   :  { %7230 = vmatprep.mubr.bf16.mxu0 %v5015_v30  ;;  %7242 = vmatpush1.bf16.msra.mxu0 %v9196_v6  ;;  %v9246_v6 = vld [vmem:[%s12916_s7 + $0x804] ss:$8 sps:$4 sm:$0xff]   ;;  %v5084_v30 = vshrl.u32 %v5051_v12, 16 }
 0x61e   :  { %7243 = vmatprep.subr.bf16.mxu0 %v9201_v45  ;;  %v5027_v45 = vrot.slane %v12489_v36, 2 }
 0x61f   :  { %v5086_v34 = vrot.slane %v5084_v30, 2 }
 0x620   :  { %v5028_v36 = vsel %vm13038_vm15, %v5026_v20, %v5027_v45  ;;  %v5050_v20 = vsel %vm3388_vm0, %v5046_v50, 0  ;;  %v5055_v45 = vsel %vm3388_vm0, %v12634_v13, 0  ;;  %v7423_v50 = vld [vmem:[%s12918_s9 + $0x8] sm:$0xff] }
 0x621   :  { %7244 = vmatpush1.bf16.msra.mxu0 %v9199_v26  ;;  %v5087_v26 = vshll.u32 %v5051_v12, 16  ;;  %v5053_v12 = vld [vmem:[#allocation4 + $0x58] sm:$0x7]  ;;  %v5067_v30 = vshrl.u32 %v5050_v20, 16 }
 0x622   :  { %7245 = vmatprep.subr.bf16.mxu0 %v9204_v19  ;;  %v9249_v19 = vld [vmem:[%s12916_s7 + $0x814] ss:$8 sps:$4 sm:$0xff]   ;;  %v5057_v5 = vsel %vm3388_vm0, %v5053_v12, 0 }
 0x623   :  { %v5120_v13 = vshrl.u32 %v5057_v5, 16 }
 0x624   :  { %7231 = vmatmul.mubr.bf16.gmra.mrb[32].mxu0 %v4998_v22  ;;  %v9252_v22 = vld [vmem:[%s12916_s7 + $0x824] ss:$8 sps:$4 sm:$0xff]  }
 0x625   :  { %7246 = vmatpush1.bf16.msra.mxu0 %v9202_v27  ;;  %7273 = vmatprep.mubr.bf16.mxu0 %v5031_v43  ;;  %v5089_v27 = vrot.slane %v5087_v26, 3  ;;  %v5038_v43 = vrot.slane %v12659_v42, 2  ;;  %v5070_v26 = vshll.u32 %v5050_v20, 16  ;;  %v7424_v20 = vld [vmem:[%s12918_s9 + $0x10] sm:$0xff] }
 0x626   :  { %7247 = vmatprep.subr.bf16.mxu0 %v9207_v61  ;;  %v9247_v61 = vld [vmem:[%s12916_s7 + $0x810] ss:$8 sps:$4 sm:$0xff]  }
 0x629   :  { %7248 = vmatpush1.bf16.msra.mxu0 %v9205_v31  ;;  %v5039_v31 = vrot.slane %v12518_v17, 2  ;;  %v9253_v17 = vld [vmem:[%s12916_s7 + $0x830] ss:$8 sps:$4 sm:$0xff]  }
 0x62a   :  { %7249 = vmatprep.subr.bf16.mxu0 %v9210_v35  ;;  %v5082_v35 = vor.u32 %v5081_v58, %v5078_v18  ;;  %v5052_v18 = vld [vmem:[#allocation4 + $0x50] sm:$0x7]  ;;  %v9291_v58 = vld [vmem:[%s12916_s7 + $0x8f4] ss:$8 sps:$4 sm:$0xff]  }
 0x62d   :  { %7250 = vmatpush1.bf16.msra.mxu0 %v9208_v23  ;;  %v5090_v23 = vor.u32 %v5089_v27, %v5086_v34 }
 0x62e   :  { %7251 = vmatprep.subr.bf16.mxu0 %v9213_v21  ;;  %v9250_v21 = vld [vmem:[%s12916_s7 + $0x820] ss:$8 sps:$4 sm:$0xff]  }
 0x631   :  { %7252 = vmatpush1.bf16.msra.mxu0 %v9211_v39  ;;  %v9255_v39 = vld [vmem:[%s12916_s7 + $0x834] ss:$8 sps:$4 sm:$0xff]  }
 0x632   :  { %7253 = vmatprep.subr.bf16.mxu0 %v9216_v40  ;;  %v5040_v40 = vsel %vm13040_vm13, %v5038_v43, %v5039_v31  ;;  %v5054_v43 = vsel %vm3388_vm0, %v12659_v42, 0 }
 0x635   :  { %7254 = vmatpush1.bf16.msra.mxu0 %v9214_v9  ;;  %v5091_v9 = vsel %vm3394_vm8, %v5082_v35, %v5090_v23  ;;  %v5122_v23 = vrot.slane %v5120_v13, 2 }
 0x636   :  { %7255 = vmatprep.subr.bf16.mxu0 %v9219_v47  ;;  %v9258_v47 = vld [vmem:[%s12916_s7 + $0x844] ss:$8 sps:$4 sm:$0xff]  }
 0x639   :  { %7256 = vmatpush1.bf16.msra.mxu0 %v9217_v38  ;;  %v9256_v38 = vld [vmem:[%s12916_s7 + $0x840] ss:$8 sps:$4 sm:$0xff]  }
 0x63a   :  { %7257 = vmatprep.subr.bf16.mxu0 %v9222_v14  ;;  %v9261_v14 = vld [vmem:[%s12916_s7 + $0x854] ss:$8 sps:$4 sm:$0xff]  }
 0x63d   :  { %7258 = vmatpush1.bf16.msra.mxu0 %v9220_v7  ;;  %v9259_v7 = vld [vmem:[%s12916_s7 + $0x850] ss:$8 sps:$4 sm:$0xff]  }
 0x63e   :  { %7259 = vmatprep.subr.bf16.mxu0 %v9225_v56  ;;  %v9264_v56 = vld [vmem:[%s12916_s7 + $0x864] ss:$8 sps:$4 sm:$0xff]  }
 0x641   :  { %7260 = vmatpush1.bf16.msra.mxu0 %v9223_v2  ;;  %v9262_v2 = vld [vmem:[%s12916_s7 + $0x860] ss:$8 sps:$4 sm:$0xff]  }
 0x642   :  { %7261 = vmatprep.subr.bf16.mxu0 %v9228_v49  ;;  %v9267_v49 = vld [vmem:[%s12916_s7 + $0x874] ss:$8 sps:$4 sm:$0xff]  }
 0x645   :  { %7262 = vmatpush1.bf16.msra.mxu0 %v9226_v37  ;;  %v9265_v37 = vld [vmem:[%s12916_s7 + $0x870] ss:$8 sps:$4 sm:$0xff]  }
 0x646   :  { %7263 = vmatprep.subr.bf16.mxu0 %v9231_v0  ;;  %v9270_v0 = vld [vmem:[%s12916_s7 + $0x884] ss:$8 sps:$4 sm:$0xff]  }
 0x649   :  { %7264 = vmatpush1.bf16.msra.mxu0 %v9229_v41  ;;  %v9268_v41 = vld [vmem:[%s12916_s7 + $0x880] ss:$8 sps:$4 sm:$0xff]  }
 0x64a   :  { %7265 = vmatprep.subr.bf16.mxu0 %v9234_v33  ;;  %v9273_v33 = vld [vmem:[%s12916_s7 + $0x894] ss:$8 sps:$4 sm:$0xff]  }
 0x64d   :  { %7266 = vmatpush1.bf16.msra.mxu0 %v9232_v51  ;;  %v9271_v51 = vld [vmem:[%s12916_s7 + $0x890] ss:$8 sps:$4 sm:$0xff]  }
 0x64e   :  { %7267 = vmatprep.subr.bf16.mxu0 %v9237_v32  ;;  %v9276_v32 = vld [vmem:[%s12916_s7 + $0x8a4] ss:$8 sps:$4 sm:$0xff]  }
 0x651   :  { %7268 = vmatpush1.bf16.msra.mxu0 %v9235_v53  ;;  %v9274_v53 = vld [vmem:[%s12916_s7 + $0x8a0] ss:$8 sps:$4 sm:$0xff]  }
 0x652   :  { %7269 = vmatprep.subr.bf16.mxu0 %v9240_v24  ;;  %v9279_v24 = vld [vmem:[%s12916_s7 + $0x8b4] ss:$8 sps:$4 sm:$0xff]  }
 0x655   :  { %7270 = vmatpush1.bf16.msra.mxu0 %v9238_v48  ;;  %v9277_v48 = vld [vmem:[%s12916_s7 + $0x8b0] ss:$8 sps:$4 sm:$0xff]  }
 0x656   :  { %7271 = vmatprep.subr.bf16.mxu0 %v9243_v10  ;;  %v9282_v10 = vld [vmem:[%s12916_s7 + $0x8c4] ss:$8 sps:$4 sm:$0xff]  }
 0x659   :  { %7272 = vmatpush1.bf16.msra.mxu0 %v9241_v59  ;;  %v9285_v59 = vld [vmem:[%s12916_s7 + $0x8d4] ss:$8 sps:$4 sm:$0xff]  }
 0x65a   :  { %7294 = vmatprep.subr.bf16.mxu0 %v9246_v6  ;;  %v5048_v6 = vsel %vm3388_vm0, %v12632_v62, 0  ;;  %v9288_v62 = vld [vmem:[%s12916_s7 + $0x8e4] ss:$8 sps:$4 sm:$0xff]  }
 0x65b   :  { %v5059_v16 = vshrl.u32 %v5048_v6, 16  ;;  %v5062_v52 = vshll.u32 %v5048_v6, 16 }
 0x65c   :  { %7274 = vmatmul.mubr.bf16.vlgmr.msra.gmra.mrb[28].mxu0 %v5028_v36  ;;  %v5123_v36 = vshll.u32 %v5057_v5, 16  ;;  %v7442_v5 = vld [vmem:[%s12918_s9 + $0xa0] sm:$0xff] }
 0x65d   :  { %7283 = vmatprep.mubr.bf16.mxu0 %v5043_v55  ;;  %7295 = vmatpush1.bf16.msra.mxu0 %v9244_v1  ;;  %v5112_v1 = vshrl.u32 %v5055_v45, 16  ;;  %v9286_v55 = vld [vmem:[%s12916_s7 + $0x8e0] ss:$8 sps:$4 sm:$0xff]   ;;  %v5061_v34 = vrot.slane %v5059_v16, 2  ;;  %v5064_v27 = vrot.slane %v5062_v52, 3 }
 0x65e   :  { %7296 = vmatprep.subr.bf16.mxu0 %v9249_v19  ;;  %v5115_v19 = vshll.u32 %v5055_v45, 16  ;;  %v7425_v45 = vld [vmem:[%s12918_s9 + $0x18] sm:$0xff]  ;;  %v7426_v16 = vld [vmem:[%s12918_s9 + $0x20] sm:$0xff] }
 0x65f   :  { %v5114_v31 = vrot.slane %v5112_v1, 2  ;;  %v7445_v1 = vld [vmem:[%s12918_s9 + $0xb8] sm:$0xff] }
 0x660   :  { %v5117_v35 = vrot.slane %v5115_v19, 3 }
 0x661   :  { %7297 = vmatpush1.bf16.msra.mxu0 %v9247_v61  ;;  %v5069_v61 = vrot.slane %v5067_v30, 2  ;;  %v7427_v30 = vld [vmem:[%s12918_s9 + $0x28] sm:$0xff] }
 0x662   :  { %7298 = vmatprep.subr.bf16.mxu0 %v9252_v22  ;;  %v5072_v22 = vrot.slane %v5070_v26, 3  ;;  %v5118_v42 = vor.u32 %v5117_v35, %v5114_v31  ;;  %v7444_v26 = vld [vmem:[%s12918_s9 + $0xb0] sm:$0xff]  ;;  %v8430_v19 = vpack.c.bf16 %v7427_v30, %v7426_v16  ;;  %v7449_v31 = vld [vmem:[%s12918_s9 + $0xd8] sm:$0xff] }
 0x663   :  { %v8432_v13 = vpack.c.bf16 %v7445_v1, %v7444_v26 }
 0x664   :  { %7284 = vmatmul.mubr.bf16.gmra.mrb[32].mxu0 %v5040_v40  ;;  %v9289_v40 = vld [vmem:[%s12916_s7 + $0x8f0] ss:$8 sps:$4 sm:$0xff]  }
 0x665   :  { %7299 = vmatpush1.bf16.msra.mxu0 %v9250_v21  ;;  %7326 = vmatprep.mubr.bf16.mxu0 %v5091_v9  ;;  %v5125_v21 = vrot.slane %v5123_v36, 3  ;;  %v5065_v9 = vor.u32 %v5064_v27, %v5061_v34  ;;  %v7428_v36 = vld [vmem:[%s12918_s9 + $0x30] sm:$0xff] }
 0x666   :  { %7300 = vmatprep.subr.bf16.mxu0 %v9255_v39  ;;  %v5056_v39 = vsel %vm3388_vm0, %v5052_v18, 0  ;;  %v7446_v18 = vld [vmem:[%s12918_s9 + $0xc0] sm:$0xff] }
 0x669   :  { %7301 = vmatpush1.bf16.msra.mxu0 %v9253_v17  ;;  %v5073_v17 = vor.u32 %v5072_v22, %v5069_v61  ;;  %v7430_v61 = vld [vmem:[%s12918_s9 + $0x40] sm:$0xff]  ;;  %v7431_v22 = vld [vmem:[%s12918_s9 + $0x48] sm:$0xff] }
 0x66a   :  { %7302 = vmatprep.subr.bf16.mxu0 %v9258_v47  ;;  %v5095_v47 = vshrl.u32 %v5054_v43, 16  ;;  %v8438_v35 = vpack.c.bf16 %v7431_v22, %v7430_v61 }
 0x66d   :  { %7303 = vmatpush1.bf16.msra.mxu0 %v9256_v38  ;;  %v5098_v38 = vshll.u32 %v5054_v43, 16  ;;  %v7448_v43 = vld [vmem:[%s12918_s9 + $0xd0] sm:$0xff] }
 0x66e   :  { %7304 = vmatprep.subr.bf16.mxu0 %v9261_v14  ;;  %v5103_v14 = vshrl.u32 %v5056_v39, 16 }
 0x66f   :  { %v5100_v44 = vrot.slane %v5098_v38, 3  ;;  %v7434_v38 = vld [vmem:[%s12918_s9 + $0x60] sm:$0xff] }
 0x671   :  { %7305 = vmatpush1.bf16.msra.mxu0 %v9259_v7  ;;  %v5106_v7 = vshll.u32 %v5056_v39, 16  ;;  %v7433_v39 = vld [vmem:[%s12918_s9 + $0x58] sm:$0xff] }
 0x672   :  { %7306 = vmatprep.subr.bf16.mxu0 %v9264_v56  ;;  %v5126_v56 = vor.u32 %v5125_v21, %v5122_v23  ;;  %v8440_v23 = vpack.c.bf16 %v7449_v31, %v7448_v43  ;;  %v7432_v21 = vld [vmem:[%s12918_s9 + $0x50] sm:$0xff] }
 0x675   :  { %7307 = vmatpush1.bf16.msra.mxu0 %v9262_v2  ;;  %v5074_v2 = vsel %vm3394_vm8, %v5065_v9, %v5073_v17  ;;  %v7451_v9 = vld [vmem:[%s12918_s9 + $0xe8] sm:$0xff]  ;;  %v8442_v17 = vpack.c.bf16 %v7433_v39, %v7432_v21 }
 0x676   :  { %7308 = vmatprep.subr.bf16.mxu0 %v9267_v49  ;;  %v5097_v49 = vrot.slane %v5095_v47, 2 }
 0x679   :  { %7309 = vmatpush1.bf16.msra.mxu0 %v9265_v37  ;;  %v5105_v37 = vrot.slane %v5103_v14, 2  ;;  %v7435_v14 = vld [vmem:[%s12918_s9 + $0x68] sm:$0xff] }
 0x67a   :  { %7310 = vmatprep.subr.bf16.mxu0 %v9270_v0  ;;  %v5108_v0 = vrot.slane %v5106_v7, 3  ;;  %v7452_v7 = vld [vmem:[%s12918_s9 + $0xf0] sm:$0xff] }
 0x67d   :  { %7311 = vmatpush1.bf16.msra.mxu0 %v9268_v41  ;;  %v5127_v41 = vsel %vm3394_vm8, %v5118_v42, %v5126_v56  ;;  %v7453_v42 = vld [vmem:[%s12918_s9 + $0xf8] sm:$0xff]  ;;  %v8446_v56 = vpack.c.bf16 %v7435_v14, %v7434_v38 }
 0x67e   :  { %7312 = vmatprep.subr.bf16.mxu0 %v9273_v33  ;;  %v5101_v33 = vor.u32 %v5100_v44, %v5097_v49  ;;  %v7436_v49 = vld [vmem:[%s12918_s9 + $0x70] sm:$0xff]  ;;  %v7437_v44 = vld [vmem:[%s12918_s9 + $0x78] sm:$0xff] }
 0x681   :  { %7313 = vmatpush1.bf16.msra.mxu0 %v9271_v51  ;;  %v5109_v51 = vor.u32 %v5108_v0, %v5105_v37  ;;  %v8450_v37 = vpack.c.bf16 %v7437_v44, %v7436_v49  ;;  %v5418_v0 = vld [vmem:[%s12917_s8] sm:$0x3]  ;;  %s9354_s8 = smov [#allocation11]  }
 0x682   :  { %7314 = vmatprep.subr.bf16.mxu0 %v9276_v32 }
 0x683   :  { %v5110_v32 = vsel %vm3394_vm8, %v5101_v33, %v5109_v51  ;;  %v5427_v33 = vrot.slane %v5418_v0, %v3583_v8 }
 0x685   :  { %7315 = vmatpush1.bf16.msra.mxu0 %v9274_v53  ;;  %v7438_v53 = vld [vmem:[%s12918_s9 + $0x80] sm:$0xff]  ;;  %v6921_v26 = vadd.f32 %v12355_v60, %v5427_v33 }
 0x686   :  { %7316 = vmatprep.subr.bf16.mxu0 %v9279_v24  ;;  %v7439_v24 = vld [vmem:[%s12918_s9 + $0x88] sm:$0xff] }
 0x689   :  { %7317 = vmatpush1.bf16.msra.mxu0 %v9277_v48  ;;  %v7422_v48 = vld [vmem:[%s12918_s9] sm:$0xff] }
 0x68a   :  { %7318 = vmatprep.subr.bf16.mxu0 %v9282_v10  ;;  %v8420_v10 = vpack.c.bf16 %v7439_v24, %v7438_v53  ;;  %v8422_v12 = vpack.c.bf16 %v7423_v50, %v7422_v48  ;;  %v6911_v50 = vadd.f32 %v12335_v25, %v5427_v33 }
 0x68c   :  { %8421 = vmatprep.subr.bf16.mxu1 %v8420_v10 }
 0x68d   :  { %7319 = vmatpush1.bf16.msra.mxu0 %v9280_v29  ;;  %v7440_v29 = vld [vmem:[%s12918_s9 + $0x90] sm:$0xff]  ;;  %8423 = vmatpush3.bf16.msra.mxu1 %v8422_v12 }
 0x68e   :  { %7320 = vmatprep.subr.bf16.mxu0 %v9285_v59  ;;  %v7441_v59 = vld [vmem:[%s12918_s9 + $0x98] sm:$0xff] }
 0x68f   :  { %v8424_v6 = vpack.c.bf16 %v7441_v59, %v7440_v29 }
 0x691   :  { %7321 = vmatpush1.bf16.msra.mxu0 %v9283_v54  ;;  %v8426_v54 = vpack.c.bf16 %v7425_v45, %v7424_v20  ;;  %8425 = vmatprep.subr.bf16.mxu1 %v8424_v6 }
 0x692   :  { %7322 = vmatprep.subr.bf16.mxu0 %v9288_v62  ;;  %v7443_v62 = vld [vmem:[%s12918_s9 + $0xa8] sm:$0xff] }
 0x693   :  { %8427 = vmatpush3.bf16.msra.mxu1 %v8426_v54  ;;  %v8428_v52 = vpack.c.bf16 %v7443_v62, %v7442_v5 }
 0x695   :  { %7323 = vmatpush1.bf16.msra.mxu0 %v9286_v55  ;;  %v7429_v55 = vld [vmem:[%s12918_s9 + $0x38] sm:$0xff]  ;;  %8429 = vmatprep.subr.bf16.mxu1 %v8428_v52 }
 0x696   :  { %7324 = vmatprep.subr.bf16.mxu0 %v9291_v58  ;;  %v7447_v58 = vld [vmem:[%s12918_s9 + $0xc8] sm:$0xff]  ;;  %v8434_v34 = vpack.c.bf16 %v7429_v55, %v7428_v36 }
 0x697   :  { %8431 = vmatpush3.bf16.msra.mxu1 %v8430_v19  ;;  %v8436_v27 = vpack.c.bf16 %v7447_v58, %v7446_v18 }
 0x698   :  { %8433 = vmatprep.subr.bf16.mxu1 %v8432_v13 }
 0x699   :  { %7325 = vmatpush1.bf16.msra.mxu0 %v9289_v40  ;;  %v7450_v40 = vld [vmem:[%s12918_s9 + $0xe0] sm:$0xff]  ;;  %s7552_s9 = sshll.u32 %s9354_s8, 4  ;;  %s7553_s9 = int_to_ptr.vmem [resolvable:$true] %s7552_s9 }
 0x69a   :  { %v8444_v47 = vpack.c.bf16 %v7451_v9, %v7450_v40  ;;  %s9302_s19 = scalar_lea.vmem %s7553_s9, 64  ;;  %p9307_p1 = scmp.lt.s32.totalorder %s7553_s9, %s7553_s9 }
 0x69b   :  { %8435 = vmatpush3.bf16.msra.mxu1 %v8434_v34  ;;  %p9303_p0 = scmp.ne.s32.totalorder %s7553_s9, %s9302_s19  ;;  %p9308_p2 = scmp.lt.s32.totalorder %s9302_s19, %s9302_s19 }
 0x69c   :  { %7327 = vmatmul.mubr.bf16.vlgmr.msra.gmra.mrb[28].mxu0 %v5074_v2  ;;  %8437 = vmatprep.subr.bf16.mxu1 %v8436_v27  ;;  %v8448_v2 = vpack.c.bf16 %v7453_v42, %v7452_v7 }
 0x69d   :  { %7336 = vmatprep.mubr.bf16.mxu0 %v5127_v41  ;;  %v5423_v41 = vrot.slane %v5418_v0, %v3579_v28  ;;  %p9309_p3 = por %p9308_p2, %p9307_p1 }
 0x69f   :  { %8439 = vmatpush3.bf16.msra.mxu1 %v8438_v35  ;;  %v6905_v51 = vadd.f32 %v12323_v4, %v5423_v41  ;;  %v6909_v24 = vadd.f32 %v12330_v3, %v5423_v41  ;;  %v6915_v4 = vadd.f32 %v12343_v11, %v5423_v41  ;;  %v6919_v16 = vadd.f32 %v12350_v63, %v5423_v41  ;;  %p9310_p4 = pnand %p9309_p3, %p9303_p0 }
 0x6a0   :  { %8441 = vmatprep.subr.bf16.mxu1 %v8440_v23 }
 0x6a3   :  { %8443 = vmatpush3.bf16.msra.mxu1 %v8442_v17 }
 0x6a4   :  { %7337 = vmatmul.mubr.bf16.gmra.mrb[32].mxu0 %v5110_v32  ;;  %8445 = vmatprep.subr.bf16.mxu1 %v8444_v47  ;;  %v6907_v32 = vadd.f32 %v12325_v46, %v5427_v33  ;;  %v6917_v46 = vadd.f32 %v12345_v15, %v5427_v33 }
 0x6a7   :  { %8447 = vmatpush3.bf16.msra.mxu1 %v8446_v56 }
 0x6a8   :  { %8449 = vmatprep.subr.bf16.mxu1 %v8448_v2 }
 0x6ab   :  { %8451 = vmatpush3.bf16.msra.mxu1 %v8450_v37  ;;  %v9353_v37 = vmov 1983009808  }
 0x6ac   :  { %v7393_v0 = vunpack.c.l.s4 %v9353_v37 }
 0x76f   :  { %v7328_v53 = vpop.f32.mrb[28].mxu0 }
 0x770   :  { %v8465_v48 = vadd.f32 %v7328_v53, %v6905_v51  ;;  %v7330_v10 = vpop.f32.mrb[29].mxu0  ;;  %v7394_v53 = vunpack.c.0.s8 %v7393_v0 }
 0x771   :  { %v8467_v29 = vadd.f32 %v7330_v10, %v6907_v32  ;;  %v7332_v59 = vpop.f32.mrb[30].mxu0 }
 0x772   :  { %v8469_v12 = vadd.f32 %v7332_v59, %v6909_v24  ;;  %v7334_v6 = vpop.f32.mrb[31].mxu0  ;;  %v7347_v28 = vmax.f32 %v8465_v48, 0.0 }
 0x773   :  { %v8471_v20 = vadd.f32 %v7334_v6, %v6911_v50  ;;  %v7348_v54 = vmax.f32 %v8467_v29, 0.0  ;;  %v7397_v50 = vsub.s32 %v7394_v53, %v13009_v57 }
 0x774   :  { %v7349_v45 = vmax.f32 %v8469_v12, 0.0 }
 0x775   :  { %v7350_v8 = vmax.f32 %v8471_v20, 0.0 }
 0x776   :  { %v7355_v5 = vadd.f32 %v7349_v45, %v7347_v28 }
 0x777   :  { %v7362_v62 = vadd.f32 %v7350_v8, %v7348_v54  ;;  %v7338_v3 = vpop.f32.mrb[32].mxu0 }
 0x778   :  { %v7356_v52 = vrot.slane %v7355_v5, 4  ;;  %v8473_v25 = vadd.f32 %v7338_v3, %v6915_v4  ;;  %v7340_v30 = vpop.f32.mrb[33].mxu0 }
 0x779   :  { %v7363_v1 = vrot.slane %v7362_v62, 4  ;;  %v8475_v19 = vadd.f32 %v7340_v30, %v6917_v46  ;;  %v7342_v13 = vpop.f32.mrb[34].mxu0 }
 0x77a   :  { %v7357_v36 = vadd.f32 %v7356_v52, %v7355_v5  ;;  %v8477_v55 = vadd.f32 %v7342_v13, %v6919_v16  ;;  %v7344_v18 = vpop.f32.mrb[35].mxu0  ;;  %v7351_v27 = vmax.f32 %v8473_v25, 0.0 }
 0x77b   :  { %v7364_v58 = vadd.f32 %v7363_v1, %v7362_v62  ;;  %v8479_v11 = vadd.f32 %v7344_v18, %v6921_v26  ;;  %v7352_v22 = vmax.f32 %v8475_v19, 0.0 }
 0x77c   :  { %v7358_v34 = vrot.slane %v7357_v36, 2  ;;  %v7353_v15 = vmax.f32 %v8477_v55, 0.0 }
 0x77d   :  { %v7365_v61 = vrot.slane %v7364_v58, 2  ;;  %v7354_v43 = vmax.f32 %v8479_v11, 0.0 }
 0x77e   :  { %v7359_v63 = vadd.f32 %v7358_v34, %v7357_v36  ;;  %v7369_v31 = vadd.f32 %v7353_v15, %v7351_v27 }
 0x77f   :  { %v7366_v35 = vadd.f32 %v7365_v61, %v7364_v58  ;;  %v7376_v23 = vadd.f32 %v7354_v43, %v7352_v22 }
 0x780   :  { %v7360_v21 = vrot.slane %v7359_v63, 1  ;;  %v7370_v60 = vrot.slane %v7369_v31, 4 }
 0x781   :  { %v7377_v39 = vrot.slane %v7376_v23, 4  ;;  %v7367_v40 = vrot.slane %v7366_v35, 1 }
 0x782   :  { %v7361_v9 = vadd.f32 %v7360_v21, %v7359_v63  ;;  %v7371_v17 = vadd.f32 %v7370_v60, %v7369_v31 }
 0x783   :  { %v7378_v47 = vadd.f32 %v7377_v39, %v7376_v23  ;;  %v7368_v38 = vadd.f32 %v7367_v40, %v7366_v35 }
 0x784   :  { %v7383_v14 = vmul.f32 0.0625, %v7361_v9  ;;  %v7372_v7 = vrot.slane %v7371_v17, 2 }
 0x785   :  { %v7379_v42 = vrot.slane %v7378_v47, 2  ;;  %v7384_v56 = vmul.f32 0.0625, %v7368_v38 }
 0x786   :  { %v7373_v2 = vadd.f32 %v7372_v7, %v7371_v17 }
 0x787   :  { %v7380_v49 = vadd.f32 %v7379_v42, %v7378_v47  ;;  %v7391_v44 = vcombine.low %v7383_v14, %v7384_v56 }
 0x788   :  { %v7374_v41 = vrot.slane %v7373_v2, 1 }
 0x789   :  { %v7381_v33 = vrot.slane %v7380_v49, 1  ;;  %v7398_v6 = vrot.slane %v7391_v44, %v7397_v50 }
 0x78a   :  { %v7375_v51 = vadd.f32 %v7374_v41, %v7373_v2 }
 0x78b   :  { %v7382_v32 = vadd.f32 %v7381_v33, %v7380_v49 }
 0x78c   :  { %v7385_v24 = vmul.f32 0.0625, %v7375_v51 }
 0x78d   :  { %v7386_v48 = vmul.f32 0.0625, %v7382_v32 }
 0x78e   :  { %v7461_v10 = vsel %vm7412_vm3, %v7385_v24, %v7383_v14 }
 0x78f   :  { %v7399_v29 = vcombine.low %v7385_v24, %v7386_v48  ;;  %v7462_v59 = vsel %vm7412_vm3, %v7386_v48, %v7384_v56 }
 0x790   :  { %7529 = vmatprep.mubr.f32.mxu1 %v7462_v59 }
 0x791   :  { %v7406_v12 = vrot.slane %v7399_v29, %v7397_v50  ;;  %7530 = vmatmul.mubr.f32.vlgmr.msra.gmra.mrb[132].mxu1 %v7461_v10 }
 0x793   :  { %v7411_v20 = vrot.slane %v7406_v12, 7 }
 0x795   :  { %v7413_v28 = vsel %vm7412_vm3, %v7411_v20, %v7398_v6 }
 0x796   :  { %v7415_v45 = vsel %vm7414_vm12, %v7411_v20, %v7413_v28 }
 0x797   :  { %v7417_v54 = vsel %vm7416_vm9, %v7411_v20, %v7415_v45 }
 0x798   :  { %v7419_v8 = vsel %vm7418_vm14, %v7411_v20, %v7417_v54 }
 0x799   :  { %7421 = vst [vmem:[#allocation11] sm:$0xf] %v7419_v8 }
 0x79a   :  { %9313 = shalt.err (!%p9310_p4)
}
 0x79b   :  { %s9314_s22 = scalar_lea.hbm %s12921_s12, 64 }
 0x79c   :  { %p9315_p5 = scmp.ne.s32.totalorder %s12921_s12, %s9314_s22  ;;  %p9318_p6 = scmp.lt.u32.totalorder %s9314_s22, %s12921_s12 }
 0x79e   :  { %p9320_p7 = pnand %p9318_p6, %p9315_p5 }
 0x7a0   :  { %9323 = shalt.err (!%p9320_p7)
}
 0x7a1   :  { %7555 = dma.vmem_to_hbm [thread:$0]  %s7553_s9, 64, %s12921_s12, [#allocation12]   ;;  %v8118_v5 = vld [vmem:[%s12919_s10] ss:$0 sm:$0xff] }
 0x7a2   :  { %s9355_s7 = smov [#allocation9]  }
 0x7a3   :  { %s7542_s28 = sshll.u32 %s9355_s7, 4  ;;  %s7543_s28 = int_to_ptr.vmem [resolvable:$true] %s7542_s28 }
 0x7a4   :  { %s9324_s1 = scalar_lea.vmem %s7543_s28, 32  ;;  %p9329_p9 = scmp.lt.s32.totalorder %s7543_s28, %s7543_s28 }
 0x7a5   :  { %p9325_p8 = scmp.ne.s32.totalorder %s7543_s28, %s9324_s1  ;;  %p9330_p10 = scmp.lt.s32.totalorder %s9324_s1, %s9324_s1 }
 0x7a7   :  { %p9331_p11 = por %p9330_p10, %p9329_p9 }
 0x7a9   :  { %p9332_p12 = pnand %p9331_p11, %p9325_p8 }
 0x864   :  { %v8325_v57 = vpop.f32.mrb[132].mxu1 }
 0x865   :  { %v8326_v4 = vpop.f32.mrb[133].mxu1 }
 0x866   :  { %v8327_v46 = vadd.f32 %v8326_v4, %v8325_v57 }
 0x868   :  { %v7532_v62 = vadd.f32 %v8327_v46, %v8118_v5 }
 0x86a   :  { %7535 = vst [vmem:[#allocation9] sm:$0x3] %v7532_v62 }
 0x86b   :  { %9335 = shalt.err (!%p9332_p12)
}
 0x86c   :  { %s9336_s30 = scalar_lea.hbm %s12920_s11, 32 }
 0x86d   :  { %p9337_p13 = scmp.ne.s32.totalorder %s12920_s11, %s9336_s30  ;;  %p9340_p0 = scmp.lt.u32.totalorder %s9336_s30, %s12920_s11 }
 0x86f   :  { %p9342_p1 = pnand %p9340_p0, %p9337_p13 }
 0x871   :  { %9345 = shalt.err (!%p9342_p1)
}
 0x872   :  { %7545 = dma.vmem_to_hbm [thread:$0]  %s7543_s28, 32, %s12920_s11, [#allocation10]  }
 0x873   :  { %9346 = dma.done.wait [#allocation10], 32  }
 0x874   :  { %9347 = vsyncadd [#allocation10], 4294967264 }
 0x875   :  { %9348 = dma.done.wait [#allocation12], 64  }
 0x876   :  { %9349 = vsyncadd [#allocation12], 4294967232 }
 0x877   :  { %7562 = vsyncpa [#allocation10], 1 }
 0x878   :  { %7563 = vsyncpa [#allocation12], 1 }

</bundles_post_ra>
